<compile_context>
chip_gen: v7x
topology: tpu7x:2x2x1
jax: 0.10.0
libtpu: 0.0.40
codegen_flags: <defaults>
</compile_context>

<pallas_src>
import numpy as np

import jax
import jax.numpy as jnp
from jax.experimental import pallas as pl
from jax.experimental.pallas import tpu as pltpu


# ---------------------------------------------------------------------------
# Kernel 1: conv1 + relu + conv2 + relu + 2x2 max-pool   (one image per step)
# ---------------------------------------------------------------------------
def _conv_pool_kernel(x_ref, r1_ref, b1_ref, w2_ref, b2_ref, o_ref):
    x = x_ref[0, 0]                                              # (28, 28) f32

    # conv1 + relu as ONE MXU matmul: 9-tap im2col from contiguous slices;
    # result lanes are packed as w*32 + c1.
    slabs = [x[di:di + 26, dj:dj + 26] for di in range(3) for dj in range(3)]
    lhs1 = jnp.concatenate(slabs, axis=1).astype(jnp.bfloat16)   # (26, 234)
    a1 = jnp.dot(lhs1, r1_ref[...], preferred_element_type=jnp.float32)
    a1 = jnp.maximum(a1 + b1_ref[...], 0.0).astype(jnp.bfloat16)  # (26, 832)

    # conv2 + relu as ONE banded MXU matmul: K folds (di, w', c1); the lhs is
    # three sublane-shifted copies of a1 concatenated along lanes.  Output
    # lanes are packed as parity*768 + wp*64 + c2 (w = 2*wp + parity) so the
    # pool's w-reduction is a contiguous, 128-aligned half-slab max.
    lhs2 = jnp.concatenate([a1[0:24, :], a1[1:25, :], a1[2:26, :]], axis=1)   # (24, 2496)
    y2 = jnp.dot(lhs2, w2_ref[...], preferred_element_type=jnp.float32)
    y2 = jnp.maximum(y2 + b2_ref[...], 0.0).astype(jnp.bfloat16)  # (24, 1536)

    # 2x2 max-pool: h-pairs (sublanes) via two 0/1 selection matmuls,
    # w-pairs via the parity-split halves of the lane axis.
    rows_i = jax.lax.broadcasted_iota(jnp.int32, (12, 24), 0)
    cols_i = jax.lax.broadcasted_iota(jnp.int32, (12, 24), 1)
    pe = (cols_i == 2 * rows_i).astype(jnp.bfloat16)              # (12, 24)
    po = (cols_i == 2 * rows_i + 1).astype(jnp.bfloat16)          # (12, 24)
    yh = jnp.maximum(jnp.dot(pe, y2, preferred_element_type=jnp.float32),
                     jnp.dot(po, y2, preferred_element_type=jnp.float32))    # (12, 1536)
    pooled = jnp.maximum(yh[:, 0:768], yh[:, 768:1536])           # (12, 768)
    o_ref[0] = pooled.astype(o_ref.dtype)


def _conv_pool_call(x_nchw, p):
    n = x_nchw.shape[0]
    return pl.pallas_call(
        _conv_pool_kernel,
        grid=(n,),
        in_specs=[
            pl.BlockSpec((1, 1, 28, 28), lambda i: (i, 0, 0, 0)),
            pl.BlockSpec((234, 832), lambda i: (0, 0)),
            pl.BlockSpec((1, 832), lambda i: (0, 0)),
            pl.BlockSpec((2496, 1536), lambda i: (0, 0)),
            pl.BlockSpec((1, 1536), lambda i: (0, 0)),
        ],
        out_specs=pl.BlockSpec((1, 12, 768), lambda i: (i, 0, 0)),
        out_shape=jax.ShapeDtypeStruct((n, 12, 768), jnp.bfloat16),
        compiler_params=pltpu.CompilerParams(
            dimension_semantics=("parallel",),
            vmem_limit_bytes=32 * 1024 * 1024),
    )(x_nchw, p["conv1_w"], p["conv1_b"], p["conv2_w"], p["conv2_b"])


# ---------------------------------------------------------------------------
# Kernel 2: fc1 + relu + fc2 + log_softmax   (row tiles, full-K matmul)
# ---------------------------------------------------------------------------
def _fc_kernel(x_ref, w1_ref, b1_ref, w2_ref, b2_ref, o_ref):
    h = jnp.dot(x_ref[...], w1_ref[...], preferred_element_type=jnp.float32)
    h = jnp.maximum(h + b1_ref[...], 0.0)                          # (tm, 128)
    logits = jnp.dot(h.astype(jnp.bfloat16), w2_ref[...],
                     preferred_element_type=jnp.float32) + b2_ref[...]
    m = jnp.max(logits, axis=-1, keepdims=True)
    z = logits - m
    lse = jnp.log(jnp.sum(jnp.exp(z), axis=-1, keepdims=True))
    o_ref[...] = z - lse


def _round_up(v, m):
    return ((v + m - 1) // m) * m


def _fc_call(x_flat, p):
    n = x_flat.shape[0]
    tm = min(256, _round_up(max(n, 1), 8))         # row tile (multiple of 8)
    n_pad = _round_up(n, tm)
    if n_pad != n:                                 # pad ragged last row-tile (sliced off below)
        x_flat = jnp.pad(x_flat, ((0, n_pad - n), (0, 0)))
    out = pl.pallas_call(
        _fc_kernel,
        grid=(n_pad // tm,),
        in_specs=[
            pl.BlockSpec((tm, 9216), lambda i: (i, 0)),
            pl.BlockSpec((9216, 128), lambda i: (0, 0)),
            pl.BlockSpec((1, 128), lambda i: (0, 0)),
            pl.BlockSpec((128, 10), lambda i: (0, 0)),
            pl.BlockSpec((1, 10), lambda i: (0, 0)),
        ],
        out_specs=pl.BlockSpec((tm, 10), lambda i: (i, 0)),
        out_shape=jax.ShapeDtypeStruct((n_pad, 10), jnp.float32),
        compiler_params=pltpu.CompilerParams(
            dimension_semantics=("parallel",),
            vmem_limit_bytes=32 * 1024 * 1024),
    )(x_flat, p["fc1_w"], p["fc1_b"], p["fc2_w"], p["fc2_b"])
    return out[:n]


# ---------------------------------------------------------------------------
# Parameters (PyTorch layout) + one-time re-layout for the kernels
# ---------------------------------------------------------------------------
def init_params(key):
    ks = jax.random.split(key, 8)
    return {
        "conv1_w": 0.10 * jax.random.normal(ks[0], (32, 1, 3, 3), jnp.float32),
        "conv1_b": 0.10 * jax.random.normal(ks[1], (32,), jnp.float32),
        "conv2_w": 0.05 * jax.random.normal(ks[2], (64, 32, 3, 3), jnp.float32),
        "conv2_b": 0.05 * jax.random.normal(ks[3], (64,), jnp.float32),
        "fc1_w": 0.01 * jax.random.normal(ks[4], (128, 9216), jnp.float32),
        "fc1_b": 0.01 * jax.random.normal(ks[5], (128,), jnp.float32),
        "fc2_w": 0.05 * jax.random.normal(ks[6], (10, 128), jnp.float32),
        "fc2_b": 0.05 * jax.random.normal(ks[7], (10,), jnp.float32),
    }


def prepare_params(p):
    """One-time re-layout of PyTorch-style weights (hoisted out of the forward)."""
    # conv1 -> R1 (234, 832):  R1[m*26 + w'', w*32 + c1] = (w'' == w) * w1[c1, 0, di, dj]
    w1r = np.asarray(p["conv1_w"], np.float32).reshape(32, 9)        # [c1, m]
    R1 = np.zeros((9, 26, 26, 32), np.float32)                       # [m, w'', w, c1]
    ar = np.arange(26)
    R1[:, ar, ar, :] = w1r.T[:, None, :]                             # (9,1,32) -> (9,26,32)
    R1 = R1.reshape(234, 832)

    # conv2 -> banded W2 (2496, 1536):
    #   W2[di*832 + w'*32 + c1, parity*768 + wp*64 + c2] = w2[c2, c1, di, w' - (2*wp+parity)]
    #   for 0 <= w' - w <= 2 (w = 2*wp + parity), else 0.
    w2 = np.asarray(p["conv2_w"], np.float32)                        # [c2, c1, di, dj]
    W2 = np.zeros((3, 26, 32, 2, 12, 64), np.float32)                # [di, w', c1, par, wp, c2]
    for di in range(3):
        for dj in range(3):
            blk = w2[:, :, di, dj].T                                 # (32, 64) [c1, c2]
            for w in range(24):
                W2[di, w + dj, :, w % 2, w // 2, :] = blk
    W2 = W2.reshape(2496, 1536)

    # Biases tiled to the packed lane layouts.
    b1w = np.tile(np.asarray(p["conv1_b"], np.float32), 26).reshape(1, 832)
    b2w = np.tile(np.asarray(p["conv2_b"], np.float32), 24).reshape(1, 1536)

    # fc1: permute the 9216 input columns from PyTorch's (c2, hp, wp) flatten order to
    # the kernel's packed (hp, wp, c2) feature order, then transpose to (9216, 128).
    idx = np.arange(9216)
    hp, wp, c2 = idx // 768, (idx % 768) // 64, idx % 64
    perm = (c2 * 144 + hp * 12 + wp).astype(np.int32)
    fc1 = np.asarray(p["fc1_w"], np.float32)[:, perm].T              # (9216, 128)

    return {
        "conv1_w": jnp.asarray(R1, jnp.bfloat16),
        "conv1_b": jnp.asarray(b1w, jnp.float32),
        "conv2_w": jnp.asarray(W2, jnp.bfloat16),
        "conv2_b": jnp.asarray(b2w, jnp.float32),
        "fc1_w": jnp.asarray(fc1, jnp.bfloat16),
        "fc1_b": jnp.asarray(np.asarray(p["fc1_b"], np.float32).reshape(1, 128)),
        "fc2_w": jnp.asarray(np.asarray(p["fc2_w"], np.float32).T, jnp.bfloat16),
        "fc2_b": jnp.asarray(np.asarray(p["fc2_b"], np.float32).reshape(1, 10)),
    }


# ---------------------------------------------------------------------------
# Forward pass
# ---------------------------------------------------------------------------
def net_forward(params, x_nchw):
    n = x_nchw.shape[0]
    feats = _conv_pool_call(x_nchw, params)          # (N, 12, 768) bf16, lane-dense
    # dropout1 / dropout2 are identity at inference.
    # TODO(synk): training-mode dropout would need pltpu.prng_seed / prng_random_bits
    # masks inside the kernels.
    flat = feats.reshape(n, 9216)                    # cheap layout hop between kernels
    return _fc_call(flat, params)                    # (N, 10) f32 log-probabilities


if __name__ == "__main__":
    key = jax.random.PRNGKey(0)
    pkey, xkey = jax.random.split(key)
    params = prepare_params(init_params(pkey))       # re-layout done once, outside jit
    # MNIST-style input; fc1 expects 9216 = 64 * 12 * 12, which implies 28x28.
    x = jax.random.normal(xkey, (2, 1, 28, 28), jnp.float32)

    out = jax.jit(net_forward)(params, x)
    out = jax.block_until_ready(out)

    assert out.shape == (2, 10) and out.dtype == jnp.float32
    # log_softmax rows must exponentiate-and-sum to 1
    assert bool(jnp.all(jnp.abs(jnp.sum(jnp.exp(out), axis=1) - 1.0) < 1e-3))
    print("KERNEL_OK")
</pallas_src>

<mosaic_0001>
module attributes {stable_mosaic.version = 11 : i64} {
  func.func @_conv_pool_kernel(%arg0: i32, %arg1: memref<1x1x28x28xf32, #tpu.memory_space<vmem>>, %arg2: memref<234x832xbf16, #tpu.memory_space<vmem>>, %arg3: memref<1x832xf32, #tpu.memory_space<vmem>>, %arg4: memref<2496x1536xbf16, #tpu.memory_space<vmem>>, %arg5: memref<1x1536xf32, #tpu.memory_space<vmem>>, %arg6: memref<1x12x768xbf16, #tpu.memory_space<vmem>>) attributes {dimension_semantics = [#tpu.dimension_semantics<parallel>], iteration_bounds = array<i64: 2>, scalar_prefetch = 0 : i64, scratch_operands = 0 : i64, tpu.core_type = #tpu.core_type<tc>, window_params = [{transform_indices = @transform_0, window_bounds = array<i64: 1, 1, 28, 28>}, {pipeline_mode = #tpu.pipeline_mode<synchronous>, transform_indices = @transform_1, window_bounds = array<i64: 234, 832>}, {pipeline_mode = #tpu.pipeline_mode<synchronous>, transform_indices = @transform_2, window_bounds = array<i64: 1, 832>}, {pipeline_mode = #tpu.pipeline_mode<synchronous>, transform_indices = @transform_3, window_bounds = array<i64: 2496, 1536>}, {pipeline_mode = #tpu.pipeline_mode<synchronous>, transform_indices = @transform_4, window_bounds = array<i64: 1, 1536>}, {transform_indices = @transform_5, window_bounds = array<i64: 1, 12, 768>}]} {
    %c0 = arith.constant 0 : index
    %c0_0 = arith.constant 0 : index
    %c0_1 = arith.constant 0 : index
    %c0_2 = arith.constant 0 : index
    %0 = vector.load %arg1[%c0, %c0_0, %c0_1, %c0_2] : memref<1x1x28x28xf32, #tpu.memory_space<vmem>>, vector<1x1x28x28xf32>
    %1 = vector.shape_cast %0 : vector<1x1x28x28xf32> to vector<28x28xf32>
    %2 = vector.extract_strided_slice %1 {offsets = [0, 0], sizes = [26, 26], strides = [1, 1]} : vector<28x28xf32> to vector<26x26xf32>
    %3 = vector.extract_strided_slice %1 {offsets = [0, 1], sizes = [26, 26], strides = [1, 1]} : vector<28x28xf32> to vector<26x26xf32>
    %4 = vector.extract_strided_slice %1 {offsets = [0, 2], sizes = [26, 26], strides = [1, 1]} : vector<28x28xf32> to vector<26x26xf32>
    %5 = vector.extract_strided_slice %1 {offsets = [1, 0], sizes = [26, 26], strides = [1, 1]} : vector<28x28xf32> to vector<26x26xf32>
    %6 = vector.extract_strided_slice %1 {offsets = [1, 1], sizes = [26, 26], strides = [1, 1]} : vector<28x28xf32> to vector<26x26xf32>
    %7 = vector.extract_strided_slice %1 {offsets = [1, 2], sizes = [26, 26], strides = [1, 1]} : vector<28x28xf32> to vector<26x26xf32>
    %8 = vector.extract_strided_slice %1 {offsets = [2, 0], sizes = [26, 26], strides = [1, 1]} : vector<28x28xf32> to vector<26x26xf32>
    %9 = vector.extract_strided_slice %1 {offsets = [2, 1], sizes = [26, 26], strides = [1, 1]} : vector<28x28xf32> to vector<26x26xf32>
    %10 = vector.extract_strided_slice %1 {offsets = [2, 2], sizes = [26, 26], strides = [1, 1]} : vector<28x28xf32> to vector<26x26xf32>
    %11 = tpu.concatenate %2, %3, %4, %5, %6, %7, %8, %9, %10 in 1 : vector<26x26xf32>, vector<26x26xf32>, vector<26x26xf32>, vector<26x26xf32>, vector<26x26xf32>, vector<26x26xf32>, vector<26x26xf32>, vector<26x26xf32>, vector<26x26xf32> -> vector<26x234xf32>
    %12 = arith.truncf %11 : vector<26x234xf32> to vector<26x234xbf16>
    %c0_3 = arith.constant 0 : index
    %c0_4 = arith.constant 0 : index
    %13 = vector.load %arg2[%c0_3, %c0_4] : memref<234x832xbf16, #tpu.memory_space<vmem>>, vector<234x832xbf16>
    %cst = arith.constant dense<0.000000e+00> : vector<26x832xf32>
    %14 = tpu.matmul %12, %13, %cst {dimension_numbers = #tpu.dot_dimension_numbers<[1], [0], [0], [1], [0, 0, 1, 1], [], []>} : vector<26x234xbf16>, vector<234x832xbf16>, vector<26x832xf32> -> vector<26x832xf32>
    %c0_5 = arith.constant 0 : index
    %c0_6 = arith.constant 0 : index
    %15 = vector.load %arg3[%c0_5, %c0_6] : memref<1x832xf32, #tpu.memory_space<vmem>>, vector<1x832xf32>
    %16 = vector.broadcast %15 : vector<1x832xf32> to vector<26x832xf32>
    %17 = arith.addf %14, %16 : vector<26x832xf32>
    %cst_7 = arith.constant 0.000000e+00 : f32
    %18 = vector.broadcast %cst_7 : f32 to vector<26x832xf32>
    %19 = arith.maximumf %17, %18 : vector<26x832xf32>
    %20 = arith.truncf %19 : vector<26x832xf32> to vector<26x832xbf16>
    %21 = vector.extract_strided_slice %20 {offsets = [0, 0], sizes = [24, 832], strides = [1, 1]} : vector<26x832xbf16> to vector<24x832xbf16>
    %22 = vector.extract_strided_slice %20 {offsets = [1, 0], sizes = [24, 832], strides = [1, 1]} : vector<26x832xbf16> to vector<24x832xbf16>
    %23 = vector.extract_strided_slice %20 {offsets = [2, 0], sizes = [24, 832], strides = [1, 1]} : vector<26x832xbf16> to vector<24x832xbf16>
    %24 = tpu.concatenate %21, %22, %23 in 1 : vector<24x832xbf16>, vector<24x832xbf16>, vector<24x832xbf16> -> vector<24x2496xbf16>
    %c0_8 = arith.constant 0 : index
    %c0_9 = arith.constant 0 : index
    %25 = vector.load %arg4[%c0_8, %c0_9] : memref<2496x1536xbf16, #tpu.memory_space<vmem>>, vector<2496x1536xbf16>
    %cst_10 = arith.constant dense<0.000000e+00> : vector<24x1536xf32>
    %26 = tpu.matmul %24, %25, %cst_10 {dimension_numbers = #tpu.dot_dimension_numbers<[1], [0], [0], [1], [0, 0, 1, 1], [], []>} : vector<24x2496xbf16>, vector<2496x1536xbf16>, vector<24x1536xf32> -> vector<24x1536xf32>
    %c0_11 = arith.constant 0 : index
    %c0_12 = arith.constant 0 : index
    %27 = vector.load %arg5[%c0_11, %c0_12] : memref<1x1536xf32, #tpu.memory_space<vmem>>, vector<1x1536xf32>
    %28 = vector.broadcast %27 : vector<1x1536xf32> to vector<24x1536xf32>
    %29 = arith.addf %26, %28 : vector<24x1536xf32>
    %cst_13 = arith.constant 0.000000e+00 : f32
    %30 = vector.broadcast %cst_13 : f32 to vector<24x1536xf32>
    %31 = arith.maximumf %29, %30 : vector<24x1536xf32>
    %32 = arith.truncf %31 : vector<24x1536xf32> to vector<24x1536xbf16>
    %33 = tpu.iota {dimensions = array<i32: 0>} : vector<12x24xi32>
    %34 = tpu.iota {dimensions = array<i32: 1>} : vector<12x24xi32>
    %c2_i32 = arith.constant 2 : i32
    %35 = vector.broadcast %c2_i32 : i32 to vector<12x24xi32>
    %36 = arith.muli %35, %33 : vector<12x24xi32>
    %37 = arith.cmpi eq, %34, %36 : vector<12x24xi32>
    %38 = arith.extui %37 : vector<12x24xi1> to vector<12x24xi32>
    %39 = arith.sitofp %38 : vector<12x24xi32> to vector<12x24xf32>
    %40 = arith.truncf %39 : vector<12x24xf32> to vector<12x24xbf16>
    %c2_i32_14 = arith.constant 2 : i32
    %41 = vector.broadcast %c2_i32_14 : i32 to vector<12x24xi32>
    %42 = arith.muli %41, %33 : vector<12x24xi32>
    %c1_i32 = arith.constant 1 : i32
    %43 = vector.broadcast %c1_i32 : i32 to vector<12x24xi32>
    %44 = arith.addi %42, %43 : vector<12x24xi32>
    %45 = arith.cmpi eq, %34, %44 : vector<12x24xi32>
    %46 = arith.extui %45 : vector<12x24xi1> to vector<12x24xi32>
    %47 = arith.sitofp %46 : vector<12x24xi32> to vector<12x24xf32>
    %48 = arith.truncf %47 : vector<12x24xf32> to vector<12x24xbf16>
    %cst_15 = arith.constant dense<0.000000e+00> : vector<12x1536xf32>
    %49 = tpu.matmul %40, %32, %cst_15 {dimension_numbers = #tpu.dot_dimension_numbers<[1], [0], [0], [1], [0, 0, 1, 1], [], []>} : vector<12x24xbf16>, vector<24x1536xbf16>, vector<12x1536xf32> -> vector<12x1536xf32>
    %cst_16 = arith.constant dense<0.000000e+00> : vector<12x1536xf32>
    %50 = tpu.matmul %48, %32, %cst_16 {dimension_numbers = #tpu.dot_dimension_numbers<[1], [0], [0], [1], [0, 0, 1, 1], [], []>} : vector<12x24xbf16>, vector<24x1536xbf16>, vector<12x1536xf32> -> vector<12x1536xf32>
    %51 = arith.maximumf %49, %50 : vector<12x1536xf32>
    %52 = vector.extract_strided_slice %51 {offsets = [0, 0], sizes = [12, 768], strides = [1, 1]} : vector<12x1536xf32> to vector<12x768xf32>
    %53 = vector.extract_strided_slice %51 {offsets = [0, 768], sizes = [12, 768], strides = [1, 1]} : vector<12x1536xf32> to vector<12x768xf32>
    %54 = arith.maximumf %52, %53 : vector<12x768xf32>
    %55 = arith.truncf %54 : vector<12x768xf32> to vector<12x768xbf16>
    %c0_17 = arith.constant 0 : index
    %c0_18 = arith.constant 0 : index
    %c0_19 = arith.constant 0 : index
    %56 = vector.load %arg6[%c0_17, %c0_18, %c0_19] : memref<1x12x768xbf16, #tpu.memory_space<vmem>>, vector<1x12x768xbf16>
    %57 = vector.shape_cast %56 : vector<1x12x768xbf16> to vector<12x768xbf16>
    %58 = vector.shape_cast %55 : vector<12x768xbf16> to vector<1x12x768xbf16>
    tpu.vector_store %arg6[%c0_17, %c0_18, %c0_19], %58 {strides = array<i32>} : memref<1x12x768xbf16, #tpu.memory_space<vmem>>, vector<1x12x768xbf16>,
    return
  }
  func.func @transform_0(%arg0: i32) -> (i32, i32, i32, i32) {
    %c0_i32 = arith.constant 0 : i32
    %c0_i32_0 = arith.constant 0 : i32
    %c0_i32_1 = arith.constant 0 : i32
    %c0_i32_2 = arith.constant 0 : i32
    return %arg0, %c0_i32, %c0_i32_0, %c0_i32_1 : i32, i32, i32, i32
  }
  func.func @transform_1(%arg0: i32) -> (i32, i32) {
    %c0_i32 = arith.constant 0 : i32
    %c0_i32_0 = arith.constant 0 : i32
    %c0_i32_1 = arith.constant 0 : i32
    return %c0_i32, %c0_i32_0 : i32, i32
  }
  func.func @transform_2(%arg0: i32) -> (i32, i32) {
    %c0_i32 = arith.constant 0 : i32
    %c0_i32_0 = arith.constant 0 : i32
    %c0_i32_1 = arith.constant 0 : i32
    return %c0_i32, %c0_i32_0 : i32, i32
  }
  func.func @transform_3(%arg0: i32) -> (i32, i32) {
    %c0_i32 = arith.constant 0 : i32
    %c0_i32_0 = arith.constant 0 : i32
    %c0_i32_1 = arith.constant 0 : i32
    return %c0_i32, %c0_i32_0 : i32, i32
  }
  func.func @transform_4(%arg0: i32) -> (i32, i32) {
    %c0_i32 = arith.constant 0 : i32
    %c0_i32_0 = arith.constant 0 : i32
    %c0_i32_1 = arith.constant 0 : i32
    return %c0_i32, %c0_i32_0 : i32, i32
  }
  func.func @transform_5(%arg0: i32) -> (i32, i32, i32) {
    %c0_i32 = arith.constant 0 : i32
    %c0_i32_0 = arith.constant 0 : i32
    %c0_i32_1 = arith.constant 0 : i32
    return %arg0, %c0_i32, %c0_i32_0 : i32, i32, i32
  }
}

module attributes {stable_mosaic.version = 11 : i64} {
  func.func @_fc_kernel(%arg0: i32, %arg1: memref<8x9216xbf16, #tpu.memory_space<vmem>>, %arg2: memref<9216x128xbf16, #tpu.memory_space<vmem>>, %arg3: memref<1x128xf32, #tpu.memory_space<vmem>>, %arg4: memref<128x10xbf16, #tpu.memory_space<vmem>>, %arg5: memref<1x10xf32, #tpu.memory_space<vmem>>, %arg6: memref<8x10xf32, #tpu.memory_space<vmem>>) attributes {dimension_semantics = [#tpu.dimension_semantics<parallel>], iteration_bounds = array<i64: 1>, scalar_prefetch = 0 : i64, scratch_operands = 0 : i64, tpu.core_type = #tpu.core_type<tc>, window_params = [{transform_indices = @transform_0, window_bounds = array<i64: 8, 9216>}, {pipeline_mode = #tpu.pipeline_mode<synchronous>, transform_indices = @transform_1, window_bounds = array<i64: 9216, 128>}, {pipeline_mode = #tpu.pipeline_mode<synchronous>, transform_indices = @transform_2, window_bounds = array<i64: 1, 128>}, {pipeline_mode = #tpu.pipeline_mode<synchronous>, transform_indices = @transform_3, window_bounds = array<i64: 128, 10>}, {pipeline_mode = #tpu.pipeline_mode<synchronous>, transform_indices = @transform_4, window_bounds = array<i64: 1, 10>}, {transform_indices = @transform_5, window_bounds = array<i64: 8, 10>}]} {
    %c0 = arith.constant 0 : index
    %c0_0 = arith.constant 0 : index
    %0 = vector.load %arg1[%c0, %c0_0] : memref<8x9216xbf16, #tpu.memory_space<vmem>>, vector<8x9216xbf16>
    %c0_1 = arith.constant 0 : index
    %c0_2 = arith.constant 0 : index
    %1 = vector.load %arg2[%c0_1, %c0_2] : memref<9216x128xbf16, #tpu.memory_space<vmem>>, vector<9216x128xbf16>
    %cst = arith.constant dense<0.000000e+00> : vector<8x128xf32>
    %2 = tpu.matmul %0, %1, %cst {dimension_numbers = #tpu.dot_dimension_numbers<[1], [0], [0], [1], [0, 0, 1, 1], [], []>} : vector<8x9216xbf16>, vector<9216x128xbf16>, vector<8x128xf32> -> vector<8x128xf32>
    %c0_3 = arith.constant 0 : index
    %c0_4 = arith.constant 0 : index
    %3 = vector.load %arg3[%c0_3, %c0_4] : memref<1x128xf32, #tpu.memory_space<vmem>>, vector<1x128xf32>
    %4 = vector.broadcast %3 : vector<1x128xf32> to vector<8x128xf32>
    %5 = arith.addf %2, %4 : vector<8x128xf32>
    %cst_5 = arith.constant 0.000000e+00 : f32
    %6 = vector.broadcast %cst_5 : f32 to vector<8x128xf32>
    %7 = arith.maximumf %5, %6 : vector<8x128xf32>
    %8 = arith.truncf %7 : vector<8x128xf32> to vector<8x128xbf16>
    %c0_6 = arith.constant 0 : index
    %c0_7 = arith.constant 0 : index
    %9 = vector.load %arg4[%c0_6, %c0_7] : memref<128x10xbf16, #tpu.memory_space<vmem>>, vector<128x10xbf16>
    %cst_8 = arith.constant dense<0.000000e+00> : vector<8x10xf32>
    %10 = tpu.matmul %8, %9, %cst_8 {dimension_numbers = #tpu.dot_dimension_numbers<[1], [0], [0], [1], [0, 0, 1, 1], [], []>} : vector<8x128xbf16>, vector<128x10xbf16>, vector<8x10xf32> -> vector<8x10xf32>
    %c0_9 = arith.constant 0 : index
    %c0_10 = arith.constant 0 : index
    %11 = vector.load %arg5[%c0_9, %c0_10] : memref<1x10xf32, #tpu.memory_space<vmem>>, vector<1x10xf32>
    %12 = vector.broadcast %11 : vector<1x10xf32> to vector<8x10xf32>
    %13 = arith.addf %10, %12 : vector<8x10xf32>
    %cst_11 = arith.constant dense<0xFF800000> : vector<8xf32>
    %14 = vector.multi_reduction <maximumf>, %13, %cst_11 [1] : vector<8x10xf32> to vector<8xf32>
    %15 = vector.shape_cast %14 : vector<8xf32> to vector<8x1xf32>
    %16 = vector.broadcast %15 : vector<8x1xf32> to vector<8x10xf32>
    %17 = arith.subf %13, %16 : vector<8x10xf32>
    %18 = math.exp %17 : vector<8x10xf32>
    %cst_12 = arith.constant dense<0.000000e+00> : vector<8xf32>
    %19 = vector.multi_reduction <add>, %18, %cst_12 [1] : vector<8x10xf32> to vector<8xf32>
    %20 = vector.shape_cast %19 : vector<8xf32> to vector<8x1xf32>
    %21 = math.log %20 : vector<8x1xf32>
    %22 = vector.broadcast %21 : vector<8x1xf32> to vector<8x10xf32>
    %23 = arith.subf %17, %22 : vector<8x10xf32>
    %c0_13 = arith.constant 0 : index
    %c0_14 = arith.constant 0 : index
    %24 = vector.load %arg6[%c0_13, %c0_14] : memref<8x10xf32, #tpu.memory_space<vmem>>, vector<8x10xf32>
    tpu.vector_store %arg6[%c0_13, %c0_14], %23 {strides = array<i32>} : memref<8x10xf32, #tpu.memory_space<vmem>>, vector<8x10xf32>,
    return
  }
  func.func @transform_0(%arg0: i32) -> (i32, i32) {
    %c0_i32 = arith.constant 0 : i32
    %c0_i32_0 = arith.constant 0 : i32
    return %arg0, %c0_i32 : i32, i32
  }
  func.func @transform_1(%arg0: i32) -> (i32, i32) {
    %c0_i32 = arith.constant 0 : i32
    %c0_i32_0 = arith.constant 0 : i32
    %c0_i32_1 = arith.constant 0 : i32
    return %c0_i32, %c0_i32_0 : i32, i32
  }
  func.func @transform_2(%arg0: i32) -> (i32, i32) {
    %c0_i32 = arith.constant 0 : i32
    %c0_i32_0 = arith.constant 0 : i32
    %c0_i32_1 = arith.constant 0 : i32
    return %c0_i32, %c0_i32_0 : i32, i32
  }
  func.func @transform_3(%arg0: i32) -> (i32, i32) {
    %c0_i32 = arith.constant 0 : i32
    %c0_i32_0 = arith.constant 0 : i32
    %c0_i32_1 = arith.constant 0 : i32
    return %c0_i32, %c0_i32_0 : i32, i32
  }
  func.func @transform_4(%arg0: i32) -> (i32, i32) {
    %c0_i32 = arith.constant 0 : i32
    %c0_i32_0 = arith.constant 0 : i32
    %c0_i32_1 = arith.constant 0 : i32
    return %c0_i32, %c0_i32_0 : i32, i32
  }
  func.func @transform_5(%arg0: i32) -> (i32, i32) {
    %c0_i32 = arith.constant 0 : i32
    %c0_i32_0 = arith.constant 0 : i32
    return %arg0, %c0_i32 : i32, i32
  }
}

</mosaic_0001>

<bundles_post_ra>
// kernel: net_forward.3
= control target key start
LH: loop header
LB: loop body
LE: loop exit
PB: predicated region body
PF: predicated region fallthrough
CT: control target
= control target key end

     0   :  { %vm8637_vm0 = vmmov 0   ;;  %vm6477_vm1 = vcmask 80896   ;;  %s10570_s1 = inlined_call_operand.vmem [shape: bf16[9216,128], index: 1, kind: input, shape index: {}]   ;;  %s10571_s0 = inlined_call_operand.vmem [shape: bf16[8,9216], index: 0, kind: input, shape index: {}]   ;;  %s10572_s2 = inlined_call_operand.vmem [shape: f32[1,128], index: 2, kind: input, shape index: {}]   ;;  %s10573_s3 = inlined_call_operand.vmem [shape: bf16[128,10], index: 3, kind: input, shape index: {}]   ;;  %s10574_s4 = inlined_call_operand.vmem [shape: f32[1,10], index: 4, kind: input, shape index: {}]   ;;  %s10575_s5 = inlined_call_operand.vmem [shape: f32[8,10], index: 5, kind: output, shape index: {}]  }
   0x1   :  { %v7976_v0 = vld [vmem:[%s10570_s1 + $0x40] sm:$0xff]   ;;  %v7980_v4 = vld [vmem:[%s10570_s1 + $0x48] sm:$0xff]   ;;  %v7984_v8 = vld [vmem:[%s10570_s1 + $0x50] sm:$0xff]  }
   0x2   :  { %v7977_v1 = vld [vmem:[%s10570_s1 + $0xc0] sm:$0xff]   ;;  %7153 = vmatprep.subr.bf16.mxu0 %v7976_v0  ;;  %v7981_v5 = vld [vmem:[%s10570_s1 + $0xc8] sm:$0xff]   ;;  %v7985_v9 = vld [vmem:[%s10570_s1 + $0xd0] sm:$0xff]  }
   0x3   :  { %v7978_v2 = vld [vmem:[%s10570_s1] sm:$0xff]   ;;  %7175 = vmatprep.subr.bf16.mxu1 %v7977_v1  ;;  %v7982_v6 = vld [vmem:[%s10570_s1 + $0x8] sm:$0xff]   ;;  %v7986_v10 = vld [vmem:[%s10570_s1 + $0x10] sm:$0xff]  }
   0x4   :  { %v7979_v3 = vld [vmem:[%s10570_s1 + $0x80] sm:$0xff]   ;;  %7154 = vmatpush3.bf16.msra.mxu0 %v7978_v2  ;;  %v7983_v7 = vld [vmem:[%s10570_s1 + $0x88] sm:$0xff]   ;;  %v7987_v11 = vld [vmem:[%s10570_s1 + $0x90] sm:$0xff]  }
   0x5   :  { %7176 = vmatpush3.bf16.msra.mxu1 %v7979_v3  ;;  %7155 = vmatprep.subr.bf16.mxu0 %v7980_v4  ;;  %v7988_v12 = vld [vmem:[%s10570_s1 + $0x58] sm:$0xff]   ;;  %v7992_v16 = vld [vmem:[%s10570_s1 + $0x60] sm:$0xff]   ;;  %v7996_v20 = vld [vmem:[%s10570_s1 + $0x68] sm:$0xff]  }
   0x6   :  { %7177 = vmatprep.subr.bf16.mxu1 %v7981_v5  ;;  %v7989_v13 = vld [vmem:[%s10570_s1 + $0xd8] sm:$0xff]   ;;  %v7993_v17 = vld [vmem:[%s10570_s1 + $0xe0] sm:$0xff]   ;;  %v7997_v21 = vld [vmem:[%s10570_s1 + $0xe8] sm:$0xff]  }
   0x7   :  { %v7990_v14 = vld [vmem:[%s10570_s1 + $0x18] sm:$0xff]   ;;  %v7994_v18 = vld [vmem:[%s10570_s1 + $0x20] sm:$0xff]   ;;  %v7998_v22 = vld [vmem:[%s10570_s1 + $0x28] sm:$0xff]  }
   0x8   :  { %7156 = vmatpush3.bf16.msra.mxu0 %v7982_v6  ;;  %v7991_v15 = vld [vmem:[%s10570_s1 + $0x98] sm:$0xff]   ;;  %v7995_v19 = vld [vmem:[%s10570_s1 + $0xa0] sm:$0xff]   ;;  %v7999_v23 = vld [vmem:[%s10570_s1 + $0xa8] sm:$0xff]  }
   0x9   :  { %7178 = vmatpush3.bf16.msra.mxu1 %v7983_v7  ;;  %7157 = vmatprep.subr.bf16.mxu0 %v7984_v8  ;;  %v8000_v24 = vld [vmem:[%s10570_s1 + $0x70] sm:$0xff]   ;;  %v8004_v28 = vld [vmem:[%s10570_s1 + $0x78] sm:$0xff]   ;;  %v21_v32 = vld [vmem:[%s10571_s0] sm:$0xff] }
   0xa   :  { %7179 = vmatprep.subr.bf16.mxu1 %v7985_v9  ;;  %v8001_v25 = vld [vmem:[%s10570_s1 + $0xf0] sm:$0xff]   ;;  %v8005_v29 = vld [vmem:[%s10570_s1 + $0xf8] sm:$0xff]   ;;  %v22_v33 = vld [vmem:[%s10571_s0 + $0x8] sm:$0xff]  ;;  %v6496_v34 = vcombine.low %v21_v32, %v21_v32  ;;  %v6497_v35 = vcombine.high %v21_v32, %v21_v32 }
   0xb   :  { %v8002_v26 = vld [vmem:[%s10570_s1 + $0x30] sm:$0xff]   ;;  %v8006_v30 = vld [vmem:[%s10570_s1 + $0x38] sm:$0xff]   ;;  %v6498_v36 = vcombine.low %v22_v33, %v22_v33  ;;  %v6499_v37 = vcombine.high %v22_v33, %v22_v33  ;;  %v8012_v38 = vld [vmem:[%s10570_s1 + $0x140] sm:$0xff]  }
   0xc   :  { %7158 = vmatpush3.bf16.msra.mxu0 %v7986_v10  ;;  %v8003_v27 = vld [vmem:[%s10570_s1 + $0xb0] sm:$0xff]   ;;  %v8007_v31 = vld [vmem:[%s10570_s1 + $0xb8] sm:$0xff]   ;;  %v8013_v39 = vld [vmem:[%s10570_s1 + $0x1c0] sm:$0xff]   ;;  %4956 = vmatprep.mubr.bf16.mxu0 %v6497_v35 }
   0xd   :  { %7180 = vmatpush3.bf16.msra.mxu1 %v7987_v11  ;;  %7159 = vmatprep.subr.bf16.mxu0 %v7988_v12  ;;  %v8014_v40 = vld [vmem:[%s10570_s1 + $0x100] sm:$0xff]   ;;  %v8016_v42 = vld [vmem:[%s10570_s1 + $0x148] sm:$0xff]   ;;  %v8020_v46 = vld [vmem:[%s10570_s1 + $0x150] sm:$0xff]  }
   0xe   :  { %7181 = vmatprep.subr.bf16.mxu1 %v7989_v13  ;;  %4996 = vmatprep.mubr.bf16.mxu1 %v6499_v37  ;;  %v8015_v41 = vld [vmem:[%s10570_s1 + $0x180] sm:$0xff]   ;;  %v8017_v43 = vld [vmem:[%s10570_s1 + $0x1c8] sm:$0xff]   ;;  %v8021_v47 = vld [vmem:[%s10570_s1 + $0x1d0] sm:$0xff]  }
   0xf   :  { %v8018_v44 = vld [vmem:[%s10570_s1 + $0x108] sm:$0xff]   ;;  %v8022_v48 = vld [vmem:[%s10570_s1 + $0x110] sm:$0xff]   ;;  %v8024_v50 = vld [vmem:[%s10570_s1 + $0x158] sm:$0xff]  }
  0x10   :  { %7160 = vmatpush3.bf16.msra.mxu0 %v7990_v14  ;;  %v8019_v45 = vld [vmem:[%s10570_s1 + $0x188] sm:$0xff]   ;;  %v8023_v49 = vld [vmem:[%s10570_s1 + $0x190] sm:$0xff]   ;;  %v8025_v51 = vld [vmem:[%s10570_s1 + $0x1d8] sm:$0xff]  }
  0x11   :  { %7182 = vmatpush3.bf16.msra.mxu1 %v7991_v15  ;;  %7161 = vmatprep.subr.bf16.mxu0 %v7992_v16  ;;  %v8026_v52 = vld [vmem:[%s10570_s1 + $0x118] sm:$0xff]   ;;  %v8028_v54 = vld [vmem:[%s10570_s1 + $0x160] sm:$0xff]   ;;  %v8032_v58 = vld [vmem:[%s10570_s1 + $0x168] sm:$0xff]  }
  0x12   :  { %7183 = vmatprep.subr.bf16.mxu1 %v7993_v17  ;;  %v8027_v53 = vld [vmem:[%s10570_s1 + $0x198] sm:$0xff]   ;;  %v8029_v55 = vld [vmem:[%s10570_s1 + $0x1e0] sm:$0xff]   ;;  %v8033_v59 = vld [vmem:[%s10570_s1 + $0x1e8] sm:$0xff]  }
  0x13   :  { %v8030_v56 = vld [vmem:[%s10570_s1 + $0x120] sm:$0xff]   ;;  %v8034_v60 = vld [vmem:[%s10570_s1 + $0x128] sm:$0xff]   ;;  %v8036_v62 = vld [vmem:[%s10570_s1 + $0x170] sm:$0xff]  }
  0x14   :  { %7162 = vmatpush3.bf16.msra.mxu0 %v7994_v18  ;;  %v8031_v57 = vld [vmem:[%s10570_s1 + $0x1a0] sm:$0xff]   ;;  %v8035_v61 = vld [vmem:[%s10570_s1 + $0x1a8] sm:$0xff]   ;;  %v8037_v63 = vld [vmem:[%s10570_s1 + $0x1f0] sm:$0xff]  }
  0x15   :  { %7184 = vmatpush3.bf16.msra.mxu1 %v7995_v19  ;;  %7163 = vmatprep.subr.bf16.mxu0 %v7996_v20  ;;  %v8038_v0 = vld [vmem:[%s10570_s1 + $0x130] sm:$0xff]   ;;  %v8040_v2 = vld [vmem:[%s10570_s1 + $0x178] sm:$0xff]   ;;  %v8048_v12 = vld [vmem:[%s10570_s1 + $0x240] sm:$0xff]  }
  0x16   :  { %7185 = vmatprep.subr.bf16.mxu1 %v7997_v21  ;;  %v8039_v1 = vld [vmem:[%s10570_s1 + $0x1b0] sm:$0xff]   ;;  %v8041_v3 = vld [vmem:[%s10570_s1 + $0x1f8] sm:$0xff]   ;;  %v8049_v13 = vld [vmem:[%s10570_s1 + $0x2c0] sm:$0xff]  }
  0x17   :  { %v8042_v4 = vld [vmem:[%s10570_s1 + $0x138] sm:$0xff]   ;;  %v23_v6 = vld [vmem:[%s10571_s0 + $0x10] sm:$0xff]  ;;  %v8050_v14 = vld [vmem:[%s10570_s1 + $0x200] sm:$0xff]  }
  0x18   :  { %7164 = vmatpush3.bf16.msra.mxu0 %v7998_v22  ;;  %v8043_v5 = vld [vmem:[%s10570_s1 + $0x1b8] sm:$0xff]   ;;  %v6500_v7 = vcombine.low %v23_v6, %v23_v6  ;;  %v6501_v8 = vcombine.high %v23_v6, %v23_v6  ;;  %v8051_v15 = vld [vmem:[%s10570_s1 + $0x280] sm:$0xff]   ;;  %v8052_v16 = vld [vmem:[%s10570_s1 + $0x248] sm:$0xff]  }
  0x19   :  { %7186 = vmatpush3.bf16.msra.mxu1 %v7999_v23  ;;  %7165 = vmatprep.subr.bf16.mxu0 %v8000_v24  ;;  %v24_v9 = vld [vmem:[%s10571_s0 + $0x18] sm:$0xff]  ;;  %v8053_v17 = vld [vmem:[%s10570_s1 + $0x2c8] sm:$0xff]   ;;  %v8056_v20 = vld [vmem:[%s10570_s1 + $0x250] sm:$0xff]  }
  0x1a   :  { %7187 = vmatprep.subr.bf16.mxu1 %v8001_v25  ;;  %v6502_v10 = vcombine.low %v24_v9, %v24_v9  ;;  %v6503_v11 = vcombine.high %v24_v9, %v24_v9  ;;  %v8054_v18 = vld [vmem:[%s10570_s1 + $0x208] sm:$0xff]   ;;  %v8057_v21 = vld [vmem:[%s10570_s1 + $0x2d0] sm:$0xff]   ;;  %v8060_v24 = vld [vmem:[%s10570_s1 + $0x258] sm:$0xff]  }
  0x1b   :  { %v8055_v19 = vld [vmem:[%s10570_s1 + $0x288] sm:$0xff]   ;;  %v8058_v22 = vld [vmem:[%s10570_s1 + $0x210] sm:$0xff]   ;;  %v8061_v25 = vld [vmem:[%s10570_s1 + $0x2d8] sm:$0xff]  }
  0x1c   :  { %7166 = vmatpush3.bf16.msra.mxu0 %v8002_v26  ;;  %v8059_v23 = vld [vmem:[%s10570_s1 + $0x290] sm:$0xff]   ;;  %v8062_v26 = vld [vmem:[%s10570_s1 + $0x218] sm:$0xff]   ;;  %v8068_v32 = vld [vmem:[%s10570_s1 + $0x268] sm:$0xff]  }
  0x1d   :  { %7188 = vmatpush3.bf16.msra.mxu1 %v8003_v27  ;;  %7167 = vmatprep.subr.bf16.mxu0 %v8004_v28  ;;  %v8063_v27 = vld [vmem:[%s10570_s1 + $0x298] sm:$0xff]   ;;  %v8064_v28 = vld [vmem:[%s10570_s1 + $0x260] sm:$0xff]   ;;  %v8069_v33 = vld [vmem:[%s10570_s1 + $0x2e8] sm:$0xff]  }
  0x1e   :  { %7189 = vmatprep.subr.bf16.mxu1 %v8005_v29  ;;  %v8065_v29 = vld [vmem:[%s10570_s1 + $0x2e0] sm:$0xff]   ;;  %v8071_v35 = vld [vmem:[%s10570_s1 + $0x2a8] sm:$0xff]   ;;  %v8073_v37 = vld [vmem:[%s10570_s1 + $0x2f0] sm:$0xff]  }
  0x1f   :  { %v8104_v6 = vld [vmem:[%s10570_s1 + $0x368] sm:$0xff]  }
  0x20   :  { %7168 = vmatpush3.bf16.msra.mxu0 %v8006_v30  ;;  %v8066_v30 = vld [vmem:[%s10570_s1 + $0x220] sm:$0xff]   ;;  %v8107_v9 = vld [vmem:[%s10570_s1 + $0x3a8] sm:$0xff]  }
  0x21   :  { %7190 = vmatpush3.bf16.msra.mxu1 %v8007_v31  ;;  %7197 = vmatprep.subr.bf16.mxu0 %v8012_v38  ;;  %v8067_v31 = vld [vmem:[%s10570_s1 + $0x2a0] sm:$0xff]   ;;  %v8074_v38 = vld [vmem:[%s10570_s1 + $0x230] sm:$0xff]  }
  0x22   :  { %7219 = vmatprep.subr.bf16.mxu1 %v8013_v39  ;;  %v8075_v39 = vld [vmem:[%s10570_s1 + $0x2b0] sm:$0xff]  }
  0x23   :  { %4957 = vmatmul.mubr.bf16.vlgmr.msra.gmra.mrb[0].mxu0 %v6496_v34  ;;  %v8070_v34 = vld [vmem:[%s10570_s1 + $0x228] sm:$0xff]  }
  0x24   :  { %4997 = vmatmul.mubr.bf16.vlgmr.msra.gmra.mrb[0].mxu1 %v6498_v36  ;;  %7198 = vmatpush3.bf16.msra.mxu0 %v8014_v40  ;;  %v8072_v36 = vld [vmem:[%s10570_s1 + $0x270] sm:$0xff]   ;;  %v8076_v40 = vld [vmem:[%s10570_s1 + $0x278] sm:$0xff]  }
  0x25   :  { %7220 = vmatpush3.bf16.msra.mxu1 %v8015_v41  ;;  %7199 = vmatprep.subr.bf16.mxu0 %v8016_v42  ;;  %v8077_v41 = vld [vmem:[%s10570_s1 + $0x2f8] sm:$0xff]  }
  0x26   :  { %7221 = vmatprep.subr.bf16.mxu1 %v8017_v43  ;;  %5036 = vmatprep.mubr.bf16.mxu0 %v6501_v8  ;;  %v8078_v42 = vld [vmem:[%s10570_s1 + $0x238] sm:$0xff]   ;;  %v8106_v8 = vld [vmem:[%s10570_s1 + $0x328] sm:$0xff]  }
  0x27   :  { %5076 = vmatprep.mubr.bf16.mxu1 %v6503_v11  ;;  %v8079_v43 = vld [vmem:[%s10570_s1 + $0x2b8] sm:$0xff]   ;;  %v8109_v11 = vld [vmem:[%s10570_s1 + $0x3f0] sm:$0xff]  }
  0x28   :  { %7200 = vmatpush3.bf16.msra.mxu0 %v8018_v44  ;;  %v25_v44 = vld [vmem:[%s10571_s0 + $0x20] sm:$0xff] }
  0x29   :  { %7222 = vmatpush3.bf16.msra.mxu1 %v8019_v45  ;;  %7201 = vmatprep.subr.bf16.mxu0 %v8020_v46  ;;  %v26_v45 = vld [vmem:[%s10571_s0 + $0x28] sm:$0xff]  ;;  %v6504_v46 = vcombine.low %v25_v44, %v25_v44 }
  0x2a   :  { %7223 = vmatprep.subr.bf16.mxu1 %v8021_v47  ;;  %v6505_v47 = vcombine.high %v25_v44, %v25_v44  ;;  %v8140_v44 = vld [vmem:[%s10570_s1 + $0x468] sm:$0xff]  }
  0x2c   :  { %7202 = vmatpush3.bf16.msra.mxu0 %v8022_v48  ;;  %v6506_v48 = vcombine.low %v26_v45, %v26_v45 }
  0x2d   :  { %7224 = vmatpush3.bf16.msra.mxu1 %v8023_v49  ;;  %7203 = vmatprep.subr.bf16.mxu0 %v8024_v50  ;;  %v6507_v49 = vcombine.high %v26_v45, %v26_v45  ;;  %v8084_v50 = vld [vmem:[%s10570_s1 + $0x340] sm:$0xff]   ;;  %v8141_v45 = vld [vmem:[%s10570_s1 + $0x4e8] sm:$0xff]  }
  0x2e   :  { %7225 = vmatprep.subr.bf16.mxu1 %v8025_v51  ;;  %v8085_v51 = vld [vmem:[%s10570_s1 + $0x3c0] sm:$0xff]  }
  0x30   :  { %7204 = vmatpush3.bf16.msra.mxu0 %v8026_v52  ;;  %v8086_v52 = vld [vmem:[%s10570_s1 + $0x300] sm:$0xff]  }
  0x31   :  { %7226 = vmatpush3.bf16.msra.mxu1 %v8027_v53  ;;  %7205 = vmatprep.subr.bf16.mxu0 %v8028_v54  ;;  %v8087_v53 = vld [vmem:[%s10570_s1 + $0x380] sm:$0xff]   ;;  %v8088_v54 = vld [vmem:[%s10570_s1 + $0x348] sm:$0xff]  }
  0x32   :  { %7227 = vmatprep.subr.bf16.mxu1 %v8029_v55  ;;  %v8089_v55 = vld [vmem:[%s10570_s1 + $0x3c8] sm:$0xff]  }
  0x34   :  { %7206 = vmatpush3.bf16.msra.mxu0 %v8030_v56  ;;  %v8090_v56 = vld [vmem:[%s10570_s1 + $0x308] sm:$0xff]  }
  0x35   :  { %7228 = vmatpush3.bf16.msra.mxu1 %v8031_v57  ;;  %7207 = vmatprep.subr.bf16.mxu0 %v8032_v58  ;;  %v8091_v57 = vld [vmem:[%s10570_s1 + $0x388] sm:$0xff]   ;;  %v8092_v58 = vld [vmem:[%s10570_s1 + $0x350] sm:$0xff]  }
  0x36   :  { %7229 = vmatprep.subr.bf16.mxu1 %v8033_v59  ;;  %v8093_v59 = vld [vmem:[%s10570_s1 + $0x3d0] sm:$0xff]  }
  0x38   :  { %7208 = vmatpush3.bf16.msra.mxu0 %v8034_v60  ;;  %v8094_v60 = vld [vmem:[%s10570_s1 + $0x310] sm:$0xff]  }
  0x39   :  { %7230 = vmatpush3.bf16.msra.mxu1 %v8035_v61  ;;  %7209 = vmatprep.subr.bf16.mxu0 %v8036_v62  ;;  %v8095_v61 = vld [vmem:[%s10570_s1 + $0x390] sm:$0xff]   ;;  %v8096_v62 = vld [vmem:[%s10570_s1 + $0x358] sm:$0xff]  }
  0x3a   :  { %7231 = vmatprep.subr.bf16.mxu1 %v8037_v63  ;;  %v8097_v63 = vld [vmem:[%s10570_s1 + $0x3d8] sm:$0xff]  }
  0x3c   :  { %7210 = vmatpush3.bf16.msra.mxu0 %v8038_v0  ;;  %v8098_v0 = vld [vmem:[%s10570_s1 + $0x318] sm:$0xff]  }
  0x3d   :  { %7232 = vmatpush3.bf16.msra.mxu1 %v8039_v1  ;;  %7211 = vmatprep.subr.bf16.mxu0 %v8040_v2  ;;  %v8099_v1 = vld [vmem:[%s10570_s1 + $0x398] sm:$0xff]   ;;  %v8100_v2 = vld [vmem:[%s10570_s1 + $0x360] sm:$0xff]  }
  0x3e   :  { %7233 = vmatprep.subr.bf16.mxu1 %v8041_v3  ;;  %v8101_v3 = vld [vmem:[%s10570_s1 + $0x3e0] sm:$0xff]  }
  0x40   :  { %7212 = vmatpush3.bf16.msra.mxu0 %v8042_v4  ;;  %v8102_v4 = vld [vmem:[%s10570_s1 + $0x320] sm:$0xff]  }
  0x41   :  { %7234 = vmatpush3.bf16.msra.mxu1 %v8043_v5  ;;  %7241 = vmatprep.subr.bf16.mxu0 %v8048_v12  ;;  %v8103_v5 = vld [vmem:[%s10570_s1 + $0x3a0] sm:$0xff]   ;;  %v8110_v12 = vld [vmem:[%s10570_s1 + $0x330] sm:$0xff]  }
  0x42   :  { %7263 = vmatprep.subr.bf16.mxu1 %v8049_v13  ;;  %v8111_v13 = vld [vmem:[%s10570_s1 + $0x3b0] sm:$0xff]  }
  0x43   :  { %5037 = vmatmul.mubr.bf16.vlgmr.msra.gmra.mrb[4].mxu0 %v6500_v7  ;;  %v8105_v7 = vld [vmem:[%s10570_s1 + $0x3e8] sm:$0xff]  }
  0x44   :  { %5077 = vmatmul.mubr.bf16.vlgmr.msra.gmra.mrb[4].mxu1 %v6502_v10  ;;  %7242 = vmatpush3.bf16.msra.mxu0 %v8050_v14  ;;  %v8108_v10 = vld [vmem:[%s10570_s1 + $0x370] sm:$0xff]   ;;  %v8112_v14 = vld [vmem:[%s10570_s1 + $0x378] sm:$0xff]  }
  0x45   :  { %7264 = vmatpush3.bf16.msra.mxu1 %v8051_v15  ;;  %7243 = vmatprep.subr.bf16.mxu0 %v8052_v16  ;;  %v8113_v15 = vld [vmem:[%s10570_s1 + $0x3f8] sm:$0xff]  }
  0x46   :  { %7265 = vmatprep.subr.bf16.mxu1 %v8053_v17  ;;  %5116 = vmatprep.mubr.bf16.mxu0 %v6505_v47  ;;  %v8114_v16 = vld [vmem:[%s10570_s1 + $0x338] sm:$0xff]   ;;  %v8143_v47 = vld [vmem:[%s10570_s1 + $0x4a8] sm:$0xff]  }
  0x47   :  { %5156 = vmatprep.mubr.bf16.mxu1 %v6507_v49  ;;  %v8115_v17 = vld [vmem:[%s10570_s1 + $0x3b8] sm:$0xff]   ;;  %v8145_v49 = vld [vmem:[%s10570_s1 + $0x4f0] sm:$0xff]  }
  0x48   :  { %7244 = vmatpush3.bf16.msra.mxu0 %v8054_v18  ;;  %v27_v18 = vld [vmem:[%s10571_s0 + $0x30] sm:$0xff] }
  0x49   :  { %7266 = vmatpush3.bf16.msra.mxu1 %v8055_v19  ;;  %7245 = vmatprep.subr.bf16.mxu0 %v8056_v20  ;;  %v28_v19 = vld [vmem:[%s10571_s0 + $0x38] sm:$0xff]  ;;  %v6508_v20 = vcombine.low %v27_v18, %v27_v18 }
  0x4a   :  { %7267 = vmatprep.subr.bf16.mxu1 %v8057_v21  ;;  %v6509_v21 = vcombine.high %v27_v18, %v27_v18  ;;  %v8176_v18 = vld [vmem:[%s10570_s1 + $0x568] sm:$0xff]  }
  0x4c   :  { %7246 = vmatpush3.bf16.msra.mxu0 %v8058_v22  ;;  %v6510_v22 = vcombine.low %v28_v19, %v28_v19 }
  0x4d   :  { %7268 = vmatpush3.bf16.msra.mxu1 %v8059_v23  ;;  %7247 = vmatprep.subr.bf16.mxu0 %v8060_v24  ;;  %v8120_v23 = vld [vmem:[%s10570_s1 + $0x440] sm:$0xff]   ;;  %v6511_v24 = vcombine.high %v28_v19, %v28_v19  ;;  %v8177_v19 = vld [vmem:[%s10570_s1 + $0x5e8] sm:$0xff]  }
  0x4e   :  { %7269 = vmatprep.subr.bf16.mxu1 %v8061_v25  ;;  %v8121_v25 = vld [vmem:[%s10570_s1 + $0x4c0] sm:$0xff]  }
  0x50   :  { %7248 = vmatpush3.bf16.msra.mxu0 %v8062_v26  ;;  %v8122_v26 = vld [vmem:[%s10570_s1 + $0x400] sm:$0xff]  }
  0x51   :  { %7270 = vmatpush3.bf16.msra.mxu1 %v8063_v27  ;;  %7249 = vmatprep.subr.bf16.mxu0 %v8064_v28  ;;  %v8123_v27 = vld [vmem:[%s10570_s1 + $0x480] sm:$0xff]   ;;  %v8124_v28 = vld [vmem:[%s10570_s1 + $0x448] sm:$0xff]  }
  0x52   :  { %7271 = vmatprep.subr.bf16.mxu1 %v8065_v29  ;;  %v8125_v29 = vld [vmem:[%s10570_s1 + $0x4c8] sm:$0xff]  }
  0x54   :  { %7250 = vmatpush3.bf16.msra.mxu0 %v8066_v30  ;;  %v8126_v30 = vld [vmem:[%s10570_s1 + $0x408] sm:$0xff]  }
  0x55   :  { %7272 = vmatpush3.bf16.msra.mxu1 %v8067_v31  ;;  %7251 = vmatprep.subr.bf16.mxu0 %v8068_v32  ;;  %v8127_v31 = vld [vmem:[%s10570_s1 + $0x488] sm:$0xff]   ;;  %v8128_v32 = vld [vmem:[%s10570_s1 + $0x450] sm:$0xff]  }
  0x56   :  { %7273 = vmatprep.subr.bf16.mxu1 %v8069_v33  ;;  %v8129_v33 = vld [vmem:[%s10570_s1 + $0x4d0] sm:$0xff]  }
  0x58   :  { %7252 = vmatpush3.bf16.msra.mxu0 %v8070_v34  ;;  %v8130_v34 = vld [vmem:[%s10570_s1 + $0x410] sm:$0xff]  }
  0x59   :  { %7274 = vmatpush3.bf16.msra.mxu1 %v8071_v35  ;;  %7253 = vmatprep.subr.bf16.mxu0 %v8072_v36  ;;  %v8131_v35 = vld [vmem:[%s10570_s1 + $0x490] sm:$0xff]   ;;  %v8132_v36 = vld [vmem:[%s10570_s1 + $0x458] sm:$0xff]  }
  0x5a   :  { %7275 = vmatprep.subr.bf16.mxu1 %v8073_v37  ;;  %v8133_v37 = vld [vmem:[%s10570_s1 + $0x4d8] sm:$0xff]  }
  0x5c   :  { %7254 = vmatpush3.bf16.msra.mxu0 %v8074_v38  ;;  %v8134_v38 = vld [vmem:[%s10570_s1 + $0x418] sm:$0xff]  }
  0x5d   :  { %7276 = vmatpush3.bf16.msra.mxu1 %v8075_v39  ;;  %7255 = vmatprep.subr.bf16.mxu0 %v8076_v40  ;;  %v8135_v39 = vld [vmem:[%s10570_s1 + $0x498] sm:$0xff]   ;;  %v8136_v40 = vld [vmem:[%s10570_s1 + $0x460] sm:$0xff]  }
  0x5e   :  { %7277 = vmatprep.subr.bf16.mxu1 %v8077_v41  ;;  %v8137_v41 = vld [vmem:[%s10570_s1 + $0x4e0] sm:$0xff]  }
  0x60   :  { %7256 = vmatpush3.bf16.msra.mxu0 %v8078_v42  ;;  %v8138_v42 = vld [vmem:[%s10570_s1 + $0x420] sm:$0xff]  }
  0x61   :  { %7278 = vmatpush3.bf16.msra.mxu1 %v8079_v43  ;;  %7285 = vmatprep.subr.bf16.mxu0 %v8084_v50  ;;  %v8139_v43 = vld [vmem:[%s10570_s1 + $0x4a0] sm:$0xff]   ;;  %v8146_v50 = vld [vmem:[%s10570_s1 + $0x430] sm:$0xff]  }
  0x62   :  { %7307 = vmatprep.subr.bf16.mxu1 %v8085_v51  ;;  %v8147_v51 = vld [vmem:[%s10570_s1 + $0x4b0] sm:$0xff]  }
  0x63   :  { %5117 = vmatmul.mubr.bf16.vlgmr.msra.gmra.mrb[8].mxu0 %v6504_v46  ;;  %v8142_v46 = vld [vmem:[%s10570_s1 + $0x428] sm:$0xff]  }
  0x64   :  { %5157 = vmatmul.mubr.bf16.vlgmr.msra.gmra.mrb[8].mxu1 %v6506_v48  ;;  %7286 = vmatpush3.bf16.msra.mxu0 %v8086_v52  ;;  %v8144_v48 = vld [vmem:[%s10570_s1 + $0x470] sm:$0xff]   ;;  %v8148_v52 = vld [vmem:[%s10570_s1 + $0x478] sm:$0xff]  }
  0x65   :  { %7308 = vmatpush3.bf16.msra.mxu1 %v8087_v53  ;;  %7287 = vmatprep.subr.bf16.mxu0 %v8088_v54  ;;  %v8149_v53 = vld [vmem:[%s10570_s1 + $0x4f8] sm:$0xff]  }
  0x66   :  { %7309 = vmatprep.subr.bf16.mxu1 %v8089_v55  ;;  %5196 = vmatprep.mubr.bf16.mxu0 %v6509_v21  ;;  %v8150_v54 = vld [vmem:[%s10570_s1 + $0x438] sm:$0xff]   ;;  %v8179_v21 = vld [vmem:[%s10570_s1 + $0x5a8] sm:$0xff]  }
  0x67   :  { %5236 = vmatprep.mubr.bf16.mxu1 %v6511_v24  ;;  %v8151_v55 = vld [vmem:[%s10570_s1 + $0x4b8] sm:$0xff]   ;;  %v8182_v24 = vld [vmem:[%s10570_s1 + $0x530] sm:$0xff]  }
  0x68   :  { %7288 = vmatpush3.bf16.msra.mxu0 %v8090_v56  ;;  %v29_v56 = vld [vmem:[%s10571_s0 + $0x40] sm:$0xff] }
  0x69   :  { %7310 = vmatpush3.bf16.msra.mxu1 %v8091_v57  ;;  %7289 = vmatprep.subr.bf16.mxu0 %v8092_v58  ;;  %v6512_v57 = vcombine.low %v29_v56, %v29_v56  ;;  %v6513_v58 = vcombine.high %v29_v56, %v29_v56  ;;  %v8212_v56 = vld [vmem:[%s10570_s1 + $0x668] sm:$0xff]  }
  0x6a   :  { %7311 = vmatprep.subr.bf16.mxu1 %v8093_v59  ;;  %v30_v59 = vld [vmem:[%s10571_s0 + $0x48] sm:$0xff] }
  0x6c   :  { %7290 = vmatpush3.bf16.msra.mxu0 %v8094_v60  ;;  %v6514_v60 = vcombine.low %v30_v59, %v30_v59 }
  0x6d   :  { %7312 = vmatpush3.bf16.msra.mxu1 %v8095_v61  ;;  %7291 = vmatprep.subr.bf16.mxu0 %v8096_v62  ;;  %v6515_v61 = vcombine.high %v30_v59, %v30_v59  ;;  %v8156_v62 = vld [vmem:[%s10570_s1 + $0x540] sm:$0xff]   ;;  %v8215_v59 = vld [vmem:[%s10570_s1 + $0x6a8] sm:$0xff]  }
  0x6e   :  { %7313 = vmatprep.subr.bf16.mxu1 %v8097_v63  ;;  %v8157_v63 = vld [vmem:[%s10570_s1 + $0x5c0] sm:$0xff]  }
  0x70   :  { %7292 = vmatpush3.bf16.msra.mxu0 %v8098_v0  ;;  %v8158_v0 = vld [vmem:[%s10570_s1 + $0x500] sm:$0xff]  }
  0x71   :  { %7314 = vmatpush3.bf16.msra.mxu1 %v8099_v1  ;;  %7293 = vmatprep.subr.bf16.mxu0 %v8100_v2  ;;  %v8159_v1 = vld [vmem:[%s10570_s1 + $0x580] sm:$0xff]   ;;  %v8160_v2 = vld [vmem:[%s10570_s1 + $0x548] sm:$0xff]  }
  0x72   :  { %7315 = vmatprep.subr.bf16.mxu1 %v8101_v3  ;;  %v8161_v3 = vld [vmem:[%s10570_s1 + $0x5c8] sm:$0xff]  }
  0x74   :  { %7294 = vmatpush3.bf16.msra.mxu0 %v8102_v4  ;;  %v8162_v4 = vld [vmem:[%s10570_s1 + $0x508] sm:$0xff]  }
  0x75   :  { %7316 = vmatpush3.bf16.msra.mxu1 %v8103_v5  ;;  %7295 = vmatprep.subr.bf16.mxu0 %v8104_v6  ;;  %v8163_v5 = vld [vmem:[%s10570_s1 + $0x588] sm:$0xff]   ;;  %v8164_v6 = vld [vmem:[%s10570_s1 + $0x550] sm:$0xff]  }
  0x76   :  { %7317 = vmatprep.subr.bf16.mxu1 %v8105_v7  ;;  %v8165_v7 = vld [vmem:[%s10570_s1 + $0x5d0] sm:$0xff]  }
  0x78   :  { %7296 = vmatpush3.bf16.msra.mxu0 %v8106_v8  ;;  %v8166_v8 = vld [vmem:[%s10570_s1 + $0x510] sm:$0xff]  }
  0x79   :  { %7318 = vmatpush3.bf16.msra.mxu1 %v8107_v9  ;;  %7297 = vmatprep.subr.bf16.mxu0 %v8108_v10  ;;  %v8167_v9 = vld [vmem:[%s10570_s1 + $0x590] sm:$0xff]   ;;  %v8168_v10 = vld [vmem:[%s10570_s1 + $0x558] sm:$0xff]  }
  0x7a   :  { %7319 = vmatprep.subr.bf16.mxu1 %v8109_v11  ;;  %v8169_v11 = vld [vmem:[%s10570_s1 + $0x5d8] sm:$0xff]  }
  0x7c   :  { %7298 = vmatpush3.bf16.msra.mxu0 %v8110_v12  ;;  %v8170_v12 = vld [vmem:[%s10570_s1 + $0x518] sm:$0xff]  }
  0x7d   :  { %7320 = vmatpush3.bf16.msra.mxu1 %v8111_v13  ;;  %7299 = vmatprep.subr.bf16.mxu0 %v8112_v14  ;;  %v8171_v13 = vld [vmem:[%s10570_s1 + $0x598] sm:$0xff]   ;;  %v8172_v14 = vld [vmem:[%s10570_s1 + $0x560] sm:$0xff]  }
  0x7e   :  { %7321 = vmatprep.subr.bf16.mxu1 %v8113_v15  ;;  %v8173_v15 = vld [vmem:[%s10570_s1 + $0x5e0] sm:$0xff]  }
  0x80   :  { %7300 = vmatpush3.bf16.msra.mxu0 %v8114_v16  ;;  %v8174_v16 = vld [vmem:[%s10570_s1 + $0x520] sm:$0xff]  }
  0x81   :  { %7322 = vmatpush3.bf16.msra.mxu1 %v8115_v17  ;;  %7329 = vmatprep.subr.bf16.mxu0 %v8120_v23  ;;  %v8175_v17 = vld [vmem:[%s10570_s1 + $0x5a0] sm:$0xff]   ;;  %v8181_v23 = vld [vmem:[%s10570_s1 + $0x5f0] sm:$0xff]  }
  0x82   :  { %7351 = vmatprep.subr.bf16.mxu1 %v8121_v25  ;;  %v8183_v25 = vld [vmem:[%s10570_s1 + $0x5b0] sm:$0xff]  }
  0x83   :  { %5197 = vmatmul.mubr.bf16.vlgmr.msra.gmra.mrb[12].mxu0 %v6508_v20  ;;  %v8178_v20 = vld [vmem:[%s10570_s1 + $0x528] sm:$0xff]  }
  0x84   :  { %5237 = vmatmul.mubr.bf16.vlgmr.msra.gmra.mrb[12].mxu1 %v6510_v22  ;;  %7330 = vmatpush3.bf16.msra.mxu0 %v8122_v26  ;;  %v8180_v22 = vld [vmem:[%s10570_s1 + $0x570] sm:$0xff]   ;;  %v8184_v26 = vld [vmem:[%s10570_s1 + $0x578] sm:$0xff]  }
  0x85   :  { %7352 = vmatpush3.bf16.msra.mxu1 %v8123_v27  ;;  %7331 = vmatprep.subr.bf16.mxu0 %v8124_v28  ;;  %v8185_v27 = vld [vmem:[%s10570_s1 + $0x5f8] sm:$0xff]  }
  0x86   :  { %7353 = vmatprep.subr.bf16.mxu1 %v8125_v29  ;;  %5276 = vmatprep.mubr.bf16.mxu0 %v6513_v58  ;;  %v8186_v28 = vld [vmem:[%s10570_s1 + $0x538] sm:$0xff]   ;;  %v8214_v58 = vld [vmem:[%s10570_s1 + $0x628] sm:$0xff]  }
  0x87   :  { %5316 = vmatprep.mubr.bf16.mxu1 %v6515_v61  ;;  %v8187_v29 = vld [vmem:[%s10570_s1 + $0x5b8] sm:$0xff]   ;;  %v8217_v61 = vld [vmem:[%s10570_s1 + $0x6f0] sm:$0xff]  }
  0x88   :  { %7332 = vmatpush3.bf16.msra.mxu0 %v8126_v30  ;;  %v31_v30 = vld [vmem:[%s10571_s0 + $0x50] sm:$0xff] }
  0x89   :  { %7354 = vmatpush3.bf16.msra.mxu1 %v8127_v31  ;;  %7333 = vmatprep.subr.bf16.mxu0 %v8128_v32  ;;  %v32_v31 = vld [vmem:[%s10571_s0 + $0x58] sm:$0xff]  ;;  %v6516_v32 = vcombine.low %v31_v30, %v31_v30 }
  0x8a   :  { %7355 = vmatprep.subr.bf16.mxu1 %v8129_v33  ;;  %v6517_v33 = vcombine.high %v31_v30, %v31_v30  ;;  %v8247_v30 = vld [vmem:[%s10570_s1 + $0x7a0] sm:$0xff]  }
  0x8c   :  { %7334 = vmatpush3.bf16.msra.mxu0 %v8130_v34  ;;  %v6518_v34 = vcombine.low %v32_v31, %v32_v31 }
  0x8d   :  { %7356 = vmatpush3.bf16.msra.mxu1 %v8131_v35  ;;  %7335 = vmatprep.subr.bf16.mxu0 %v8132_v36  ;;  %v6519_v35 = vcombine.high %v32_v31, %v32_v31  ;;  %v8192_v36 = vld [vmem:[%s10570_s1 + $0x640] sm:$0xff]  }
  0x8e   :  { %7357 = vmatprep.subr.bf16.mxu1 %v8133_v37  ;;  %v8193_v37 = vld [vmem:[%s10570_s1 + $0x6c0] sm:$0xff]  }
  0x90   :  { %7336 = vmatpush3.bf16.msra.mxu0 %v8134_v38  ;;  %v8194_v38 = vld [vmem:[%s10570_s1 + $0x600] sm:$0xff]  }
  0x91   :  { %7358 = vmatpush3.bf16.msra.mxu1 %v8135_v39  ;;  %7337 = vmatprep.subr.bf16.mxu0 %v8136_v40  ;;  %v8195_v39 = vld [vmem:[%s10570_s1 + $0x680] sm:$0xff]   ;;  %v8196_v40 = vld [vmem:[%s10570_s1 + $0x648] sm:$0xff]  }
  0x92   :  { %7359 = vmatprep.subr.bf16.mxu1 %v8137_v41  ;;  %v8197_v41 = vld [vmem:[%s10570_s1 + $0x6c8] sm:$0xff]  }
  0x94   :  { %7338 = vmatpush3.bf16.msra.mxu0 %v8138_v42  ;;  %v8198_v42 = vld [vmem:[%s10570_s1 + $0x608] sm:$0xff]  }
  0x95   :  { %7360 = vmatpush3.bf16.msra.mxu1 %v8139_v43  ;;  %7339 = vmatprep.subr.bf16.mxu0 %v8140_v44  ;;  %v8199_v43 = vld [vmem:[%s10570_s1 + $0x688] sm:$0xff]   ;;  %v8200_v44 = vld [vmem:[%s10570_s1 + $0x650] sm:$0xff]  }
  0x96   :  { %7361 = vmatprep.subr.bf16.mxu1 %v8141_v45  ;;  %v8201_v45 = vld [vmem:[%s10570_s1 + $0x6d0] sm:$0xff]  }
  0x98   :  { %7340 = vmatpush3.bf16.msra.mxu0 %v8142_v46  ;;  %v8202_v46 = vld [vmem:[%s10570_s1 + $0x610] sm:$0xff]  }
  0x99   :  { %7362 = vmatpush3.bf16.msra.mxu1 %v8143_v47  ;;  %7341 = vmatprep.subr.bf16.mxu0 %v8144_v48  ;;  %v8203_v47 = vld [vmem:[%s10570_s1 + $0x690] sm:$0xff]   ;;  %v8204_v48 = vld [vmem:[%s10570_s1 + $0x658] sm:$0xff]  }
  0x9a   :  { %7363 = vmatprep.subr.bf16.mxu1 %v8145_v49  ;;  %v8205_v49 = vld [vmem:[%s10570_s1 + $0x6d8] sm:$0xff]  }
  0x9c   :  { %7342 = vmatpush3.bf16.msra.mxu0 %v8146_v50  ;;  %v8206_v50 = vld [vmem:[%s10570_s1 + $0x618] sm:$0xff]  }
  0x9d   :  { %7364 = vmatpush3.bf16.msra.mxu1 %v8147_v51  ;;  %7343 = vmatprep.subr.bf16.mxu0 %v8148_v52  ;;  %v8207_v51 = vld [vmem:[%s10570_s1 + $0x698] sm:$0xff]   ;;  %v8208_v52 = vld [vmem:[%s10570_s1 + $0x660] sm:$0xff]  }
  0x9e   :  { %7365 = vmatprep.subr.bf16.mxu1 %v8149_v53  ;;  %v8209_v53 = vld [vmem:[%s10570_s1 + $0x6e0] sm:$0xff]  }
  0xa0   :  { %7344 = vmatpush3.bf16.msra.mxu0 %v8150_v54  ;;  %v8210_v54 = vld [vmem:[%s10570_s1 + $0x620] sm:$0xff]  }
  0xa1   :  { %7366 = vmatpush3.bf16.msra.mxu1 %v8151_v55  ;;  %7373 = vmatprep.subr.bf16.mxu0 %v8156_v62  ;;  %v8211_v55 = vld [vmem:[%s10570_s1 + $0x6a0] sm:$0xff]   ;;  %v8218_v62 = vld [vmem:[%s10570_s1 + $0x630] sm:$0xff]  }
  0xa2   :  { %7395 = vmatprep.subr.bf16.mxu1 %v8157_v63  ;;  %v8219_v63 = vld [vmem:[%s10570_s1 + $0x6b0] sm:$0xff]  }
  0xa3   :  { %5277 = vmatmul.mubr.bf16.vlgmr.msra.gmra.mrb[16].mxu0 %v6512_v57  ;;  %v8213_v57 = vld [vmem:[%s10570_s1 + $0x6e8] sm:$0xff]  }
  0xa4   :  { %5317 = vmatmul.mubr.bf16.vlgmr.msra.gmra.mrb[16].mxu1 %v6514_v60  ;;  %7374 = vmatpush3.bf16.msra.mxu0 %v8158_v0  ;;  %v8216_v60 = vld [vmem:[%s10570_s1 + $0x670] sm:$0xff]   ;;  %v8220_v0 = vld [vmem:[%s10570_s1 + $0x678] sm:$0xff]  }
  0xa5   :  { %7396 = vmatpush3.bf16.msra.mxu1 %v8159_v1  ;;  %7375 = vmatprep.subr.bf16.mxu0 %v8160_v2  ;;  %v8221_v1 = vld [vmem:[%s10570_s1 + $0x6f8] sm:$0xff]  }
  0xa6   :  { %7397 = vmatprep.subr.bf16.mxu1 %v8161_v3  ;;  %5356 = vmatprep.mubr.bf16.mxu0 %v6517_v33  ;;  %v8222_v2 = vld [vmem:[%s10570_s1 + $0x638] sm:$0xff]  }
  0xa7   :  { %5396 = vmatprep.mubr.bf16.mxu1 %v6519_v35  ;;  %v8223_v3 = vld [vmem:[%s10570_s1 + $0x6b8] sm:$0xff]  }
  0xa8   :  { %7376 = vmatpush3.bf16.msra.mxu0 %v8162_v4  ;;  %v33_v4 = vld [vmem:[%s10571_s0 + $0x60] sm:$0xff] }
  0xa9   :  { %7398 = vmatpush3.bf16.msra.mxu1 %v8163_v5  ;;  %7377 = vmatprep.subr.bf16.mxu0 %v8164_v6  ;;  %v34_v5 = vld [vmem:[%s10571_s0 + $0x68] sm:$0xff]  ;;  %v6520_v6 = vcombine.low %v33_v4, %v33_v4 }
  0xaa   :  { %7399 = vmatprep.subr.bf16.mxu1 %v8165_v7  ;;  %v6521_v7 = vcombine.high %v33_v4, %v33_v4  ;;  %v8271_v4 = vld [vmem:[%s10570_s1 + $0x888] sm:$0xff]  }
  0xac   :  { %7378 = vmatpush3.bf16.msra.mxu0 %v8166_v8  ;;  %v6522_v8 = vcombine.low %v34_v5, %v34_v5 }
  0xad   :  { %7400 = vmatpush3.bf16.msra.mxu1 %v8167_v9  ;;  %7379 = vmatprep.subr.bf16.mxu0 %v8168_v10  ;;  %v8228_v9 = vld [vmem:[%s10570_s1 + $0x740] sm:$0xff]   ;;  %v6523_v10 = vcombine.high %v34_v5, %v34_v5  ;;  %v8272_v5 = vld [vmem:[%s10570_s1 + $0x850] sm:$0xff]  }
  0xae   :  { %7401 = vmatprep.subr.bf16.mxu1 %v8169_v11  ;;  %v8229_v11 = vld [vmem:[%s10570_s1 + $0x7c0] sm:$0xff]  }
  0xb0   :  { %7380 = vmatpush3.bf16.msra.mxu0 %v8170_v12  ;;  %v8230_v12 = vld [vmem:[%s10570_s1 + $0x700] sm:$0xff]  }
  0xb1   :  { %7402 = vmatpush3.bf16.msra.mxu1 %v8171_v13  ;;  %7381 = vmatprep.subr.bf16.mxu0 %v8172_v14  ;;  %v8231_v13 = vld [vmem:[%s10570_s1 + $0x780] sm:$0xff]   ;;  %v8232_v14 = vld [vmem:[%s10570_s1 + $0x748] sm:$0xff]  }
  0xb2   :  { %7403 = vmatprep.subr.bf16.mxu1 %v8173_v15  ;;  %v8233_v15 = vld [vmem:[%s10570_s1 + $0x7c8] sm:$0xff]  }
  0xb4   :  { %7382 = vmatpush3.bf16.msra.mxu0 %v8174_v16  ;;  %v8234_v16 = vld [vmem:[%s10570_s1 + $0x708] sm:$0xff]  }
  0xb5   :  { %7404 = vmatpush3.bf16.msra.mxu1 %v8175_v17  ;;  %7383 = vmatprep.subr.bf16.mxu0 %v8176_v18  ;;  %v8235_v17 = vld [vmem:[%s10570_s1 + $0x788] sm:$0xff]   ;;  %v8236_v18 = vld [vmem:[%s10570_s1 + $0x750] sm:$0xff]  }
  0xb6   :  { %7405 = vmatprep.subr.bf16.mxu1 %v8177_v19  ;;  %v8237_v19 = vld [vmem:[%s10570_s1 + $0x7d0] sm:$0xff]  }
  0xb8   :  { %7384 = vmatpush3.bf16.msra.mxu0 %v8178_v20  ;;  %v8238_v20 = vld [vmem:[%s10570_s1 + $0x710] sm:$0xff]  }
  0xb9   :  { %7406 = vmatpush3.bf16.msra.mxu1 %v8179_v21  ;;  %7385 = vmatprep.subr.bf16.mxu0 %v8180_v22  ;;  %v8239_v21 = vld [vmem:[%s10570_s1 + $0x790] sm:$0xff]   ;;  %v8240_v22 = vld [vmem:[%s10570_s1 + $0x758] sm:$0xff]  }
  0xba   :  { %7407 = vmatprep.subr.bf16.mxu1 %v8181_v23  ;;  %v8241_v23 = vld [vmem:[%s10570_s1 + $0x7d8] sm:$0xff]  }
  0xbc   :  { %7386 = vmatpush3.bf16.msra.mxu0 %v8182_v24  ;;  %v8242_v24 = vld [vmem:[%s10570_s1 + $0x718] sm:$0xff]  }
  0xbd   :  { %7408 = vmatpush3.bf16.msra.mxu1 %v8183_v25  ;;  %7387 = vmatprep.subr.bf16.mxu0 %v8184_v26  ;;  %v8243_v25 = vld [vmem:[%s10570_s1 + $0x798] sm:$0xff]   ;;  %v8244_v26 = vld [vmem:[%s10570_s1 + $0x760] sm:$0xff]  }
  0xbe   :  { %7409 = vmatprep.subr.bf16.mxu1 %v8185_v27  ;;  %v8245_v27 = vld [vmem:[%s10570_s1 + $0x7e0] sm:$0xff]  }
  0xc0   :  { %7388 = vmatpush3.bf16.msra.mxu0 %v8186_v28  ;;  %v8246_v28 = vld [vmem:[%s10570_s1 + $0x720] sm:$0xff]  }
  0xc1   :  { %7410 = vmatpush3.bf16.msra.mxu1 %v8187_v29  ;;  %7417 = vmatprep.subr.bf16.mxu0 %v8192_v36 }
  0xc2   :  { %7439 = vmatprep.subr.bf16.mxu1 %v8193_v37  ;;  %v8248_v37 = vld [vmem:[%s10570_s1 + $0x768] sm:$0xff]  }
  0xc3   :  { %5357 = vmatmul.mubr.bf16.vlgmr.msra.gmra.mrb[20].mxu0 %v6516_v32  ;;  %v6495_v32 = vld [vmem:[%s10572_s2] ss:$0 sm:$0xff] }
  0xc4   :  { %5397 = vmatmul.mubr.bf16.vlgmr.msra.gmra.mrb[20].mxu1 %v6518_v34  ;;  %7418 = vmatpush3.bf16.msra.mxu0 %v8194_v38 }
  0xc5   :  { %7440 = vmatpush3.bf16.msra.mxu1 %v8195_v39  ;;  %7419 = vmatprep.subr.bf16.mxu0 %v8196_v40  ;;  %v8249_v39 = vld [vmem:[%s10570_s1 + $0x7e8] sm:$0xff]  }
  0xc6   :  { %7441 = vmatprep.subr.bf16.mxu1 %v8197_v41  ;;  %5436 = vmatprep.mubr.bf16.mxu0 %v6521_v7  ;;  %v8274_v7 = vld [vmem:[%s10570_s1 + $0x810] sm:$0xff]  }
  0xc7   :  { %5476 = vmatprep.mubr.bf16.mxu1 %v6523_v10  ;;  %v8277_v10 = vld [vmem:[%s10570_s1 + $0x8d8] sm:$0xff]  }
  0xc8   :  { %7420 = vmatpush3.bf16.msra.mxu0 %v8198_v42  ;;  %v8250_v42 = vld [vmem:[%s10570_s1 + $0x728] sm:$0xff]  }
  0xc9   :  { %7442 = vmatpush3.bf16.msra.mxu1 %v8199_v43  ;;  %7421 = vmatprep.subr.bf16.mxu0 %v8200_v44  ;;  %v8251_v44 = vld [vmem:[%s10570_s1 + $0x7a8] sm:$0xff]  }
  0xca   :  { %7443 = vmatprep.subr.bf16.mxu1 %v8201_v45 }
  0xcc   :  { %7422 = vmatpush3.bf16.msra.mxu0 %v8202_v46 }
  0xcd   :  { %7444 = vmatpush3.bf16.msra.mxu1 %v8203_v47  ;;  %7423 = vmatprep.subr.bf16.mxu0 %v8204_v48  ;;  %v8252_v47 = vld [vmem:[%s10570_s1 + $0x770] sm:$0xff]  }
  0xce   :  { %7445 = vmatprep.subr.bf16.mxu1 %v8205_v49  ;;  %v8253_v48 = vld [vmem:[%s10570_s1 + $0x7f0] sm:$0xff]  }
  0xcf   :  { %v8254_v49 = vld [vmem:[%s10570_s1 + $0x730] sm:$0xff]  }
  0xd0   :  { %7424 = vmatpush3.bf16.msra.mxu0 %v8206_v50  ;;  %v8255_v50 = vld [vmem:[%s10570_s1 + $0x7b0] sm:$0xff]  }
  0xd1   :  { %7446 = vmatpush3.bf16.msra.mxu1 %v8207_v51  ;;  %7425 = vmatprep.subr.bf16.mxu0 %v8208_v52  ;;  %v8256_v51 = vld [vmem:[%s10570_s1 + $0x778] sm:$0xff]  }
  0xd2   :  { %7447 = vmatprep.subr.bf16.mxu1 %v8209_v53  ;;  %v8257_v52 = vld [vmem:[%s10570_s1 + $0x7f8] sm:$0xff]  }
  0xd3   :  { %v8258_v53 = vld [vmem:[%s10570_s1 + $0x738] sm:$0xff]  }
  0xd4   :  { %7426 = vmatpush3.bf16.msra.mxu0 %v8210_v54  ;;  %v8259_v54 = vld [vmem:[%s10570_s1 + $0x7b8] sm:$0xff]  }
  0xd5   :  { %7448 = vmatpush3.bf16.msra.mxu1 %v8211_v55  ;;  %7427 = vmatprep.subr.bf16.mxu0 %v8212_v56  ;;  %v35_v55 = vld [vmem:[%s10571_s0 + $0x70] sm:$0xff]  ;;  %v36_v56 = vld [vmem:[%s10571_s0 + $0x78] sm:$0xff] }
  0xd6   :  { %7449 = vmatprep.subr.bf16.mxu1 %v8213_v57  ;;  %v6524_v57 = vcombine.low %v35_v55, %v35_v55 }
  0xd8   :  { %7428 = vmatpush3.bf16.msra.mxu0 %v8214_v58  ;;  %v6525_v58 = vcombine.high %v35_v55, %v35_v55  ;;  %v8308_v55 = vld [vmem:[%s10570_s1 + $0x950] sm:$0xff]  }
  0xd9   :  { %7450 = vmatpush3.bf16.msra.mxu1 %v8215_v59  ;;  %7429 = vmatprep.subr.bf16.mxu0 %v8216_v60  ;;  %v6526_v59 = vcombine.low %v36_v56, %v36_v56  ;;  %v6527_v60 = vcombine.high %v36_v56, %v36_v56  ;;  %v8309_v56 = vld [vmem:[%s10570_s1 + $0x9d0] sm:$0xff]  }
  0xda   :  { %7451 = vmatprep.subr.bf16.mxu1 %v8217_v61  ;;  %v8264_v61 = vld [vmem:[%s10570_s1 + $0x840] sm:$0xff]  }
  0xdc   :  { %7430 = vmatpush3.bf16.msra.mxu0 %v8218_v62  ;;  %v8265_v62 = vld [vmem:[%s10570_s1 + $0x8c0] sm:$0xff]  }
  0xdd   :  { %7452 = vmatpush3.bf16.msra.mxu1 %v8219_v63  ;;  %7431 = vmatprep.subr.bf16.mxu0 %v8220_v0  ;;  %v8266_v63 = vld [vmem:[%s10570_s1 + $0x800] sm:$0xff]  }
  0xde   :  { %7453 = vmatprep.subr.bf16.mxu1 %v8221_v1  ;;  %v8267_v0 = vld [vmem:[%s10570_s1 + $0x880] sm:$0xff]   ;;  %v8268_v1 = vld [vmem:[%s10570_s1 + $0x848] sm:$0xff]  }
  0xe0   :  { %7432 = vmatpush3.bf16.msra.mxu0 %v8222_v2  ;;  %v8269_v2 = vld [vmem:[%s10570_s1 + $0x8c8] sm:$0xff]  }
  0xe1   :  { %7454 = vmatpush3.bf16.msra.mxu1 %v8223_v3  ;;  %7461 = vmatprep.subr.bf16.mxu0 %v8228_v9  ;;  %v8270_v3 = vld [vmem:[%s10570_s1 + $0x808] sm:$0xff]   ;;  %v8276_v9 = vld [vmem:[%s10570_s1 + $0x858] sm:$0xff]  }
  0xe2   :  { %7483 = vmatprep.subr.bf16.mxu1 %v8229_v11  ;;  %v8278_v11 = vld [vmem:[%s10570_s1 + $0x818] sm:$0xff]  }
  0xe3   :  { %5437 = vmatmul.mubr.bf16.vlgmr.msra.gmra.mrb[24].mxu0 %v6520_v6  ;;  %v8273_v6 = vld [vmem:[%s10570_s1 + $0x8d0] sm:$0xff]  }
  0xe4   :  { %5477 = vmatmul.mubr.bf16.vlgmr.msra.gmra.mrb[24].mxu1 %v6522_v8  ;;  %7462 = vmatpush3.bf16.msra.mxu0 %v8230_v12  ;;  %v8275_v8 = vld [vmem:[%s10570_s1 + $0x890] sm:$0xff]   ;;  %v8279_v12 = vld [vmem:[%s10570_s1 + $0x898] sm:$0xff]  }
  0xe5   :  { %7484 = vmatpush3.bf16.msra.mxu1 %v8231_v13  ;;  %7463 = vmatprep.subr.bf16.mxu0 %v8232_v14  ;;  %v8280_v13 = vld [vmem:[%s10570_s1 + $0x860] sm:$0xff]  }
  0xe6   :  { %7485 = vmatprep.subr.bf16.mxu1 %v8233_v15  ;;  %5516 = vmatprep.mubr.bf16.mxu0 %v6525_v58  ;;  %v8281_v14 = vld [vmem:[%s10570_s1 + $0x8e0] sm:$0xff]   ;;  %v8311_v58 = vld [vmem:[%s10570_s1 + $0x990] sm:$0xff]  }
  0xe7   :  { %5556 = vmatprep.mubr.bf16.mxu1 %v6527_v60  ;;  %v8282_v15 = vld [vmem:[%s10570_s1 + $0x820] sm:$0xff]   ;;  %v8313_v60 = vld [vmem:[%s10570_s1 + $0x9d8] sm:$0xff]  }
  0xe8   :  { %7464 = vmatpush3.bf16.msra.mxu0 %v8234_v16 }
  0xe9   :  { %7486 = vmatpush3.bf16.msra.mxu1 %v8235_v17  ;;  %7465 = vmatprep.subr.bf16.mxu0 %v8236_v18  ;;  %v8283_v17 = vld [vmem:[%s10570_s1 + $0x8a0] sm:$0xff]  }
  0xea   :  { %7487 = vmatprep.subr.bf16.mxu1 %v8237_v19 }
  0xec   :  { %7466 = vmatpush3.bf16.msra.mxu0 %v8238_v20 }
  0xed   :  { %7488 = vmatpush3.bf16.msra.mxu1 %v8239_v21  ;;  %7467 = vmatprep.subr.bf16.mxu0 %v8240_v22 }
  0xee   :  { %7489 = vmatprep.subr.bf16.mxu1 %v8241_v23  ;;  %v8284_v23 = vld [vmem:[%s10570_s1 + $0x868] sm:$0xff]  }
  0xf0   :  { %7468 = vmatpush3.bf16.msra.mxu0 %v8242_v24 }
  0xf1   :  { %7490 = vmatpush3.bf16.msra.mxu1 %v8243_v25  ;;  %7469 = vmatprep.subr.bf16.mxu0 %v8244_v26  ;;  %v8285_v25 = vld [vmem:[%s10570_s1 + $0x8e8] sm:$0xff]  }
  0xf2   :  { %7491 = vmatprep.subr.bf16.mxu1 %v8245_v27 }
  0xf4   :  { %7470 = vmatpush3.bf16.msra.mxu0 %v8246_v28  ;;  %v8286_v28 = vld [vmem:[%s10570_s1 + $0x828] sm:$0xff]  }
  0xf5   :  { %7492 = vmatpush3.bf16.msra.mxu1 %v8247_v30  ;;  %7471 = vmatprep.subr.bf16.mxu0 %v8248_v37  ;;  %v8287_v30 = vld [vmem:[%s10570_s1 + $0x8a8] sm:$0xff]   ;;  %v8292_v37 = vld [vmem:[%s10570_s1 + $0x878] sm:$0xff]  }
  0xf6   :  { %v7169_v29 = vpop.f32.mrb[0].mxu0  ;;  %7493 = vmatprep.subr.bf16.mxu1 %v8249_v39  ;;  %v8294_v39 = vld [vmem:[%s10570_s1 + $0x838] sm:$0xff]  }
  0xf7   :  { %v7191_v31 = vpop.f32.mrb[0].mxu1  ;;  %v7170_v33 = vpop.f32.mrb[1].mxu0 }
  0xf8   :  { %v7192_v34 = vpop.f32.mrb[1].mxu1  ;;  %v7171_v35 = vadd.f32 %v7170_v33, %v7169_v29  ;;  %v7172_v38 = vpop.f32.mrb[2].mxu0  ;;  %7472 = vmatpush3.bf16.msra.mxu0 %v8250_v42  ;;  %v8288_v33 = vld [vmem:[%s10570_s1 + $0x870] sm:$0xff]   ;;  %v38_v42 = vld [vmem:[%s10571_s0 + $0x88] sm:$0xff] }
  0xf9   :  { %v7193_v36 = vadd.f32 %v7192_v34, %v7191_v31  ;;  %v7194_v40 = vpop.f32.mrb[2].mxu1  ;;  %v7173_v43 = vpop.f32.mrb[3].mxu0  ;;  %7494 = vmatpush3.bf16.msra.mxu1 %v8251_v44  ;;  %7473 = vmatprep.subr.bf16.mxu0 %v8252_v47  ;;  %v8289_v34 = vld [vmem:[%s10570_s1 + $0x8f0] sm:$0xff]   ;;  %v8293_v38 = vld [vmem:[%s10570_s1 + $0x8f8] sm:$0xff]   ;;  %v8300_v47 = vld [vmem:[%s10570_s1 + $0x940] sm:$0xff]  }
  0xfa   :  { %v4959_v41 = vadd.f32 %v7171_v35, %v6495_v32  ;;  %v7195_v45 = vpop.f32.mrb[3].mxu1  ;;  %7495 = vmatprep.subr.bf16.mxu1 %v8253_v48  ;;  %v8290_v35 = vld [vmem:[%s10570_s1 + $0x830] sm:$0xff]   ;;  %v8295_v40 = vld [vmem:[%s10570_s1 + $0x8b8] sm:$0xff]   ;;  %v8301_v48 = vld [vmem:[%s10570_s1 + $0x9c0] sm:$0xff]  }
  0xfb   :  { %v6530_v45 = vcombine.low %v38_v42, %v38_v42 }
  0xfc   :  { %v9457_v46 = vadd.f32 %v7193_v36, %v4959_v41  ;;  %7474 = vmatpush3.bf16.msra.mxu0 %v8254_v49  ;;  %v8291_v36 = vld [vmem:[%s10570_s1 + $0x8b0] sm:$0xff]   ;;  %v37_v41 = vld [vmem:[%s10571_s0 + $0x80] sm:$0xff] }
  0xfd   :  { %7496 = vmatpush3.bf16.msra.mxu1 %v8255_v50  ;;  %7475 = vmatprep.subr.bf16.mxu0 %v8256_v51  ;;  %v6528_v43 = vcombine.low %v37_v41, %v37_v41  ;;  %v6529_v44 = vcombine.high %v37_v41, %v37_v41  ;;  %v8302_v49 = vld [vmem:[%s10570_s1 + $0x900] sm:$0xff]   ;;  %v8304_v51 = vld [vmem:[%s10570_s1 + $0x948] sm:$0xff]   ;;  %v8344_v41 = vld [vmem:[%s10570_s1 + $0xa50] sm:$0xff]  }
  0xfe   :  { %7497 = vmatprep.subr.bf16.mxu1 %v8257_v52  ;;  %v8303_v50 = vld [vmem:[%s10570_s1 + $0x980] sm:$0xff]   ;;  %v8305_v52 = vld [vmem:[%s10570_s1 + $0x9c8] sm:$0xff]  }
 0x100   :  { %7476 = vmatpush3.bf16.msra.mxu0 %v8258_v53  ;;  %v8306_v53 = vld [vmem:[%s10570_s1 + $0x908] sm:$0xff]  }
 0x101   :  { %7498 = vmatpush3.bf16.msra.mxu1 %v8259_v54  ;;  %7505 = vmatprep.subr.bf16.mxu0 %v8264_v61  ;;  %v8307_v54 = vld [vmem:[%s10570_s1 + $0x988] sm:$0xff]   ;;  %v8314_v61 = vld [vmem:[%s10570_s1 + $0x918] sm:$0xff]  }
 0x102   :  { %7527 = vmatprep.subr.bf16.mxu1 %v8265_v62  ;;  %v8315_v62 = vld [vmem:[%s10570_s1 + $0x998] sm:$0xff]  }
 0x103   :  { %5517 = vmatmul.mubr.bf16.vlgmr.msra.gmra.mrb[28].mxu0 %v6524_v57  ;;  %v8310_v57 = vld [vmem:[%s10570_s1 + $0x910] sm:$0xff]  }
 0x104   :  { %5557 = vmatmul.mubr.bf16.vlgmr.msra.gmra.mrb[28].mxu1 %v6526_v59  ;;  %7506 = vmatpush3.bf16.msra.mxu0 %v8266_v63  ;;  %v8312_v59 = vld [vmem:[%s10570_s1 + $0x958] sm:$0xff]   ;;  %v8316_v63 = vld [vmem:[%s10570_s1 + $0x960] sm:$0xff]  }
 0x105   :  { %7528 = vmatpush3.bf16.msra.mxu1 %v8267_v0  ;;  %7507 = vmatprep.subr.bf16.mxu0 %v8268_v1  ;;  %v8317_v0 = vld [vmem:[%s10570_s1 + $0x9e0] sm:$0xff]  }
 0x106   :  { %7529 = vmatprep.subr.bf16.mxu1 %v8269_v2  ;;  %5596 = vmatprep.mubr.bf16.mxu0 %v6529_v44  ;;  %v8318_v2 = vld [vmem:[%s10570_s1 + $0x920] sm:$0xff]   ;;  %v8347_v44 = vld [vmem:[%s10570_s1 + $0xa90] sm:$0xff]  }
 0x108   :  { %7508 = vmatpush3.bf16.msra.mxu0 %v8270_v3 }
 0x109   :  { %7530 = vmatpush3.bf16.msra.mxu1 %v8271_v4  ;;  %7509 = vmatprep.subr.bf16.mxu0 %v8272_v5  ;;  %v8319_v4 = vld [vmem:[%s10570_s1 + $0x9a0] sm:$0xff]  }
 0x10a   :  { %7531 = vmatprep.subr.bf16.mxu1 %v8273_v6 }
 0x10c   :  { %7510 = vmatpush3.bf16.msra.mxu0 %v8274_v7 }
 0x10d   :  { %7532 = vmatpush3.bf16.msra.mxu1 %v8275_v8  ;;  %7511 = vmatprep.subr.bf16.mxu0 %v8276_v9  ;;  %v8320_v8 = vld [vmem:[%s10570_s1 + $0x968] sm:$0xff]  }
 0x10e   :  { %7533 = vmatprep.subr.bf16.mxu1 %v8277_v10  ;;  %v8321_v10 = vld [vmem:[%s10570_s1 + $0x9e8] sm:$0xff]  }
 0x110   :  { %7512 = vmatpush3.bf16.msra.mxu0 %v8278_v11 }
 0x111   :  { %7534 = vmatpush3.bf16.msra.mxu1 %v8279_v12  ;;  %7513 = vmatprep.subr.bf16.mxu0 %v8280_v13 }
 0x112   :  { %7535 = vmatprep.subr.bf16.mxu1 %v8281_v14  ;;  %v8322_v14 = vld [vmem:[%s10570_s1 + $0x928] sm:$0xff]  }
 0x114   :  { %7514 = vmatpush3.bf16.msra.mxu0 %v8282_v15  ;;  %v8323_v15 = vld [vmem:[%s10570_s1 + $0x9a8] sm:$0xff]  }
 0x115   :  { %7536 = vmatpush3.bf16.msra.mxu1 %v8283_v17  ;;  %7515 = vmatprep.subr.bf16.mxu0 %v8284_v23  ;;  %v8328_v23 = vld [vmem:[%s10570_s1 + $0x978] sm:$0xff]  }
 0x116   :  { %v7213_v16 = vpop.f32.mrb[4].mxu0  ;;  %7537 = vmatprep.subr.bf16.mxu1 %v8285_v25  ;;  %v8330_v25 = vld [vmem:[%s10570_s1 + $0x938] sm:$0xff]  }
 0x117   :  { %v7235_v18 = vpop.f32.mrb[4].mxu1  ;;  %v7214_v19 = vpop.f32.mrb[5].mxu0 }
 0x118   :  { %v7236_v20 = vpop.f32.mrb[5].mxu1  ;;  %v7215_v21 = vadd.f32 %v7214_v19, %v7213_v16  ;;  %v7216_v24 = vpop.f32.mrb[6].mxu0  ;;  %7516 = vmatpush3.bf16.msra.mxu0 %v8286_v28  ;;  %v8324_v19 = vld [vmem:[%s10570_s1 + $0x970] sm:$0xff]   ;;  %v40_v28 = vld [vmem:[%s10571_s0 + $0x98] sm:$0xff] }
 0x119   :  { %v7237_v22 = vadd.f32 %v7236_v20, %v7235_v18  ;;  %v7238_v26 = vpop.f32.mrb[6].mxu1  ;;  %v7217_v29 = vpop.f32.mrb[7].mxu0  ;;  %7538 = vmatpush3.bf16.msra.mxu1 %v8287_v30  ;;  %7517 = vmatprep.subr.bf16.mxu0 %v8288_v33  ;;  %v8325_v20 = vld [vmem:[%s10570_s1 + $0x9f0] sm:$0xff]   ;;  %v8329_v24 = vld [vmem:[%s10570_s1 + $0x9f8] sm:$0xff]   ;;  %v6535_v33 = vcombine.high %v40_v28, %v40_v28 }
 0x11a   :  { %v5039_v27 = vadd.f32 %v7215_v21, %v9457_v46  ;;  %v7239_v31 = vpop.f32.mrb[7].mxu1  ;;  %7539 = vmatprep.subr.bf16.mxu1 %v8289_v34  ;;  %v6531_v46 = vcombine.high %v38_v42, %v38_v42  ;;  %v8326_v21 = vld [vmem:[%s10570_s1 + $0x930] sm:$0xff]   ;;  %v8331_v26 = vld [vmem:[%s10570_s1 + $0x9b8] sm:$0xff]   ;;  %v8337_v34 = vld [vmem:[%s10570_s1 + $0xac0] sm:$0xff]  }
 0x11b   :  { %v6534_v31 = vcombine.low %v40_v28, %v40_v28  ;;  %v8345_v42 = vld [vmem:[%s10570_s1 + $0xad0] sm:$0xff]  }
 0x11c   :  { %v9562_v32 = vadd.f32 %v7237_v22, %v5039_v27  ;;  %7518 = vmatpush3.bf16.msra.mxu0 %v8290_v35  ;;  %5636 = vmatprep.mubr.bf16.mxu1 %v6531_v46  ;;  %v8327_v22 = vld [vmem:[%s10570_s1 + $0x9b0] sm:$0xff]   ;;  %v8338_v35 = vld [vmem:[%s10570_s1 + $0xa00] sm:$0xff]   ;;  %v8349_v46 = vld [vmem:[%s10570_s1 + $0xad8] sm:$0xff]  }
 0x11d   :  { %7540 = vmatpush3.bf16.msra.mxu1 %v8291_v36  ;;  %7519 = vmatprep.subr.bf16.mxu0 %v8292_v37  ;;  %v39_v27 = vld [vmem:[%s10571_s0 + $0x90] sm:$0xff]  ;;  %v8339_v36 = vld [vmem:[%s10570_s1 + $0xa80] sm:$0xff]   ;;  %v8340_v37 = vld [vmem:[%s10570_s1 + $0xa48] sm:$0xff]  }
 0x11e   :  { %7541 = vmatprep.subr.bf16.mxu1 %v8293_v38  ;;  %v6532_v29 = vcombine.low %v39_v27, %v39_v27  ;;  %v6533_v30 = vcombine.high %v39_v27, %v39_v27  ;;  %v8341_v38 = vld [vmem:[%s10570_s1 + $0xac8] sm:$0xff]   ;;  %v8380_v27 = vld [vmem:[%s10570_s1 + $0xb50] sm:$0xff]  }
 0x11f   :  { %v8381_v28 = vld [vmem:[%s10570_s1 + $0xbd0] sm:$0xff]  }
 0x120   :  { %7520 = vmatpush3.bf16.msra.mxu0 %v8294_v39  ;;  %v8342_v39 = vld [vmem:[%s10570_s1 + $0xa08] sm:$0xff]  }
 0x121   :  { %7542 = vmatpush3.bf16.msra.mxu1 %v8295_v40  ;;  %7549 = vmatprep.subr.bf16.mxu0 %v8300_v47  ;;  %v8343_v40 = vld [vmem:[%s10570_s1 + $0xa88] sm:$0xff]   ;;  %v8350_v47 = vld [vmem:[%s10570_s1 + $0xa18] sm:$0xff]  }
 0x122   :  { %7571 = vmatprep.subr.bf16.mxu1 %v8301_v48  ;;  %v8351_v48 = vld [vmem:[%s10570_s1 + $0xa98] sm:$0xff]  }
 0x123   :  { %5597 = vmatmul.mubr.bf16.vlgmr.msra.gmra.mrb[32].mxu0 %v6528_v43  ;;  %v8346_v43 = vld [vmem:[%s10570_s1 + $0xa10] sm:$0xff]  }
 0x124   :  { %5637 = vmatmul.mubr.bf16.vlgmr.msra.gmra.mrb[32].mxu1 %v6530_v45  ;;  %7550 = vmatpush3.bf16.msra.mxu0 %v8302_v49  ;;  %v8348_v45 = vld [vmem:[%s10570_s1 + $0xa58] sm:$0xff]   ;;  %v8352_v49 = vld [vmem:[%s10570_s1 + $0xa60] sm:$0xff]  }
 0x125   :  { %7572 = vmatpush3.bf16.msra.mxu1 %v8303_v50  ;;  %7551 = vmatprep.subr.bf16.mxu0 %v8304_v51  ;;  %v8353_v50 = vld [vmem:[%s10570_s1 + $0xae0] sm:$0xff]  }
 0x126   :  { %7573 = vmatprep.subr.bf16.mxu1 %v8305_v52  ;;  %5676 = vmatprep.mubr.bf16.mxu0 %v6533_v30  ;;  %v8354_v52 = vld [vmem:[%s10570_s1 + $0xa20] sm:$0xff]   ;;  %v8383_v30 = vld [vmem:[%s10570_s1 + $0xb90] sm:$0xff]  }
 0x127   :  { %5716 = vmatprep.mubr.bf16.mxu1 %v6535_v33  ;;  %v8386_v33 = vld [vmem:[%s10570_s1 + $0xb18] sm:$0xff]  }
 0x128   :  { %7552 = vmatpush3.bf16.msra.mxu0 %v8306_v53 }
 0x129   :  { %7574 = vmatpush3.bf16.msra.mxu1 %v8307_v54  ;;  %7553 = vmatprep.subr.bf16.mxu0 %v8308_v55  ;;  %v8355_v54 = vld [vmem:[%s10570_s1 + $0xaa0] sm:$0xff]  }
 0x12a   :  { %7575 = vmatprep.subr.bf16.mxu1 %v8309_v56 }
 0x12c   :  { %7554 = vmatpush3.bf16.msra.mxu0 %v8310_v57  ;;  %v8356_v57 = vld [vmem:[%s10570_s1 + $0xa68] sm:$0xff]  }
 0x12d   :  { %7576 = vmatpush3.bf16.msra.mxu1 %v8311_v58  ;;  %7555 = vmatprep.subr.bf16.mxu0 %v8312_v59 }
 0x12e   :  { %7577 = vmatprep.subr.bf16.mxu1 %v8313_v60  ;;  %v8357_v60 = vld [vmem:[%s10570_s1 + $0xae8] sm:$0xff]  }
 0x130   :  { %7556 = vmatpush3.bf16.msra.mxu0 %v8314_v61 }
 0x131   :  { %7578 = vmatpush3.bf16.msra.mxu1 %v8315_v62  ;;  %7557 = vmatprep.subr.bf16.mxu0 %v8316_v63  ;;  %v8358_v63 = vld [vmem:[%s10570_s1 + $0xa28] sm:$0xff]  }
 0x132   :  { %7579 = vmatprep.subr.bf16.mxu1 %v8317_v0 }
 0x134   :  { %7558 = vmatpush3.bf16.msra.mxu0 %v8318_v2 }
 0x135   :  { %7580 = vmatpush3.bf16.msra.mxu1 %v8319_v4  ;;  %7559 = vmatprep.subr.bf16.mxu0 %v8320_v8  ;;  %v8360_v4 = vld [vmem:[%s10570_s1 + $0xa70] sm:$0xff]  }
 0x136   :  { %v7257_v1 = vpop.f32.mrb[8].mxu0  ;;  %7581 = vmatprep.subr.bf16.mxu1 %v8321_v10  ;;  %v8363_v8 = vld [vmem:[%s10570_s1 + $0xab0] sm:$0xff]   ;;  %v8365_v10 = vld [vmem:[%s10570_s1 + $0xaf8] sm:$0xff]  }
 0x137   :  { %v7279_v3 = vpop.f32.mrb[8].mxu1  ;;  %v7258_v5 = vpop.f32.mrb[9].mxu0 }
 0x138   :  { %v7259_v6 = vadd.f32 %v7258_v5, %v7257_v1  ;;  %v7280_v7 = vpop.f32.mrb[9].mxu1  ;;  %v7260_v11 = vpop.f32.mrb[10].mxu0  ;;  %7560 = vmatpush3.bf16.msra.mxu0 %v8322_v14  ;;  %v8359_v1 = vld [vmem:[%s10570_s1 + $0xaa8] sm:$0xff]  }
 0x139   :  { %v7281_v9 = vadd.f32 %v7280_v7, %v7279_v3  ;;  %v7282_v13 = vpop.f32.mrb[10].mxu1  ;;  %v7261_v16 = vpop.f32.mrb[11].mxu0  ;;  %7582 = vmatpush3.bf16.msra.mxu1 %v8323_v15  ;;  %7561 = vmatprep.subr.bf16.mxu0 %v8324_v19  ;;  %v8362_v7 = vld [vmem:[%s10570_s1 + $0xa30] sm:$0xff]   ;;  %v8366_v11 = vld [vmem:[%s10570_s1 + $0xa38] sm:$0xff]   ;;  %v8372_v19 = vld [vmem:[%s10570_s1 + $0xb40] sm:$0xff]  }
 0x13a   :  { %v5119_v12 = vadd.f32 %v7259_v6, %v9562_v32  ;;  %v7283_v18 = vpop.f32.mrb[11].mxu1  ;;  %7583 = vmatprep.subr.bf16.mxu1 %v8325_v20  ;;  %v8336_v32 = vld [vmem:[%s10570_s1 + $0xa40] sm:$0xff]   ;;  %v8361_v6 = vld [vmem:[%s10570_s1 + $0xaf0] sm:$0xff]   ;;  %v42_v16 = vld [vmem:[%s10571_s0 + $0xa8] sm:$0xff] }
 0x13b   :  { %v41_v13 = vld [vmem:[%s10571_s0 + $0xa0] sm:$0xff]  ;;  %v6539_v18 = vcombine.high %v42_v16, %v42_v16 }
 0x13c   :  { %v9667_v17 = vadd.f32 %v7281_v9, %v5119_v12  ;;  %7562 = vmatpush3.bf16.msra.mxu0 %v8326_v21  ;;  %v8364_v9 = vld [vmem:[%s10570_s1 + $0xa78] sm:$0xff]   ;;  %v6536_v14 = vcombine.low %v41_v13, %v41_v13  ;;  %v6537_v15 = vcombine.high %v41_v13, %v41_v13  ;;  %v8373_v20 = vld [vmem:[%s10570_s1 + $0xbc0] sm:$0xff]   ;;  %v8416_v13 = vld [vmem:[%s10570_s1 + $0xc50] sm:$0xff]  }
 0x13d   :  { %7584 = vmatpush3.bf16.msra.mxu1 %v8327_v22  ;;  %7563 = vmatprep.subr.bf16.mxu0 %v8328_v23  ;;  %v8367_v12 = vld [vmem:[%s10570_s1 + $0xab8] sm:$0xff]   ;;  %v8374_v21 = vld [vmem:[%s10570_s1 + $0xb00] sm:$0xff]   ;;  %v8376_v23 = vld [vmem:[%s10570_s1 + $0xb48] sm:$0xff]  }
 0x13e   :  { %7585 = vmatprep.subr.bf16.mxu1 %v8329_v24  ;;  %v8375_v22 = vld [vmem:[%s10570_s1 + $0xb80] sm:$0xff]   ;;  %v8377_v24 = vld [vmem:[%s10570_s1 + $0xbc8] sm:$0xff]  }
 0x140   :  { %7564 = vmatpush3.bf16.msra.mxu0 %v8330_v25  ;;  %v8378_v25 = vld [vmem:[%s10570_s1 + $0xb08] sm:$0xff]  }
 0x141   :  { %7586 = vmatpush3.bf16.msra.mxu1 %v8331_v26  ;;  %7593 = vmatprep.subr.bf16.mxu0 %v8336_v32  ;;  %v8379_v26 = vld [vmem:[%s10570_s1 + $0xb88] sm:$0xff]   ;;  %v8385_v32 = vld [vmem:[%s10570_s1 + $0xbd8] sm:$0xff]  }
 0x142   :  { %7615 = vmatprep.subr.bf16.mxu1 %v8337_v34  ;;  %v8387_v34 = vld [vmem:[%s10570_s1 + $0xb98] sm:$0xff]  }
 0x143   :  { %5677 = vmatmul.mubr.bf16.vlgmr.msra.gmra.mrb[36].mxu0 %v6532_v29  ;;  %v8382_v29 = vld [vmem:[%s10570_s1 + $0xb10] sm:$0xff]  }
 0x144   :  { %5717 = vmatmul.mubr.bf16.vlgmr.msra.gmra.mrb[36].mxu1 %v6534_v31  ;;  %7594 = vmatpush3.bf16.msra.mxu0 %v8338_v35  ;;  %v8384_v31 = vld [vmem:[%s10570_s1 + $0xb58] sm:$0xff]   ;;  %v8388_v35 = vld [vmem:[%s10570_s1 + $0xb60] sm:$0xff]  }
 0x145   :  { %7616 = vmatpush3.bf16.msra.mxu1 %v8339_v36  ;;  %7595 = vmatprep.subr.bf16.mxu0 %v8340_v37  ;;  %v8389_v36 = vld [vmem:[%s10570_s1 + $0xbe0] sm:$0xff]  }
 0x146   :  { %7617 = vmatprep.subr.bf16.mxu1 %v8341_v38  ;;  %5756 = vmatprep.mubr.bf16.mxu0 %v6537_v15  ;;  %v8390_v38 = vld [vmem:[%s10570_s1 + $0xb20] sm:$0xff]   ;;  %v8418_v15 = vld [vmem:[%s10570_s1 + $0xc10] sm:$0xff]  }
 0x147   :  { %5796 = vmatprep.mubr.bf16.mxu1 %v6539_v18  ;;  %v8421_v18 = vld [vmem:[%s10570_s1 + $0xcd8] sm:$0xff]  }
 0x148   :  { %7596 = vmatpush3.bf16.msra.mxu0 %v8342_v39 }
 0x149   :  { %7618 = vmatpush3.bf16.msra.mxu1 %v8343_v40  ;;  %7597 = vmatprep.subr.bf16.mxu0 %v8344_v41  ;;  %v8391_v40 = vld [vmem:[%s10570_s1 + $0xba0] sm:$0xff]  }
 0x14a   :  { %7619 = vmatprep.subr.bf16.mxu1 %v8345_v42 }
 0x14c   :  { %7598 = vmatpush3.bf16.msra.mxu0 %v8346_v43  ;;  %v8392_v43 = vld [vmem:[%s10570_s1 + $0xb68] sm:$0xff]  }
 0x14d   :  { %7620 = vmatpush3.bf16.msra.mxu1 %v8347_v44  ;;  %7599 = vmatprep.subr.bf16.mxu0 %v8348_v45 }
 0x14e   :  { %7621 = vmatprep.subr.bf16.mxu1 %v8349_v46  ;;  %v8393_v46 = vld [vmem:[%s10570_s1 + $0xbe8] sm:$0xff]  }
 0x150   :  { %7600 = vmatpush3.bf16.msra.mxu0 %v8350_v47 }
 0x151   :  { %7622 = vmatpush3.bf16.msra.mxu1 %v8351_v48  ;;  %7601 = vmatprep.subr.bf16.mxu0 %v8352_v49  ;;  %v8394_v49 = vld [vmem:[%s10570_s1 + $0xb28] sm:$0xff]  }
 0x152   :  { %7623 = vmatprep.subr.bf16.mxu1 %v8353_v50 }
 0x154   :  { %7602 = vmatpush3.bf16.msra.mxu0 %v8354_v52 }
 0x155   :  { %7624 = vmatpush3.bf16.msra.mxu1 %v8355_v54  ;;  %7603 = vmatprep.subr.bf16.mxu0 %v8356_v57  ;;  %v8396_v54 = vld [vmem:[%s10570_s1 + $0xb70] sm:$0xff]  }
 0x156   :  { %v7301_v51 = vpop.f32.mrb[12].mxu0  ;;  %7625 = vmatprep.subr.bf16.mxu1 %v8357_v60  ;;  %v8398_v57 = vld [vmem:[%s10570_s1 + $0xb30] sm:$0xff]   ;;  %v8401_v60 = vld [vmem:[%s10570_s1 + $0xbf8] sm:$0xff]  }
 0x157   :  { %v7323_v53 = vpop.f32.mrb[12].mxu1  ;;  %v7302_v55 = vpop.f32.mrb[13].mxu0 }
 0x158   :  { %v7324_v56 = vpop.f32.mrb[13].mxu1  ;;  %v7303_v58 = vadd.f32 %v7302_v55, %v7301_v51  ;;  %v7304_v61 = vpop.f32.mrb[14].mxu0  ;;  %7604 = vmatpush3.bf16.msra.mxu0 %v8358_v63  ;;  %v8395_v51 = vld [vmem:[%s10570_s1 + $0xba8] sm:$0xff]   ;;  %v43_v63 = vld [vmem:[%s10571_s0 + $0xb0] sm:$0xff] }
 0x159   :  { %v7325_v59 = vadd.f32 %v7324_v56, %v7323_v53  ;;  %v7326_v62 = vpop.f32.mrb[14].mxu1  ;;  %v7305_v2 = vpop.f32.mrb[15].mxu0  ;;  %7626 = vmatpush3.bf16.msra.mxu1 %v8359_v1  ;;  %7605 = vmatprep.subr.bf16.mxu0 %v8360_v4  ;;  %v8397_v56 = vld [vmem:[%s10570_s1 + $0xbf0] sm:$0xff]   ;;  %v8402_v61 = vld [vmem:[%s10570_s1 + $0xb38] sm:$0xff]   ;;  %v6540_v1 = vcombine.low %v43_v63, %v43_v63 }
 0x15a   :  { %v5199_v0 = vadd.f32 %v7303_v58, %v9667_v17  ;;  %v7327_v3 = vpop.f32.mrb[15].mxu1  ;;  %7627 = vmatprep.subr.bf16.mxu1 %v8361_v6  ;;  %v6538_v17 = vcombine.low %v42_v16, %v42_v16  ;;  %v8399_v58 = vld [vmem:[%s10570_s1 + $0xbb0] sm:$0xff]   ;;  %v8403_v62 = vld [vmem:[%s10570_s1 + $0xbb8] sm:$0xff]   ;;  %v6541_v2 = vcombine.high %v43_v63, %v43_v63  ;;  %v8409_v6 = vld [vmem:[%s10570_s1 + $0xcc0] sm:$0xff]  }
 0x15b   :  { %v8419_v16 = vld [vmem:[%s10570_s1 + $0xc90] sm:$0xff]  }
 0x15c   :  { %v9775_v5 = vadd.f32 %v7325_v59, %v5199_v0  ;;  %7606 = vmatpush3.bf16.msra.mxu0 %v8362_v7  ;;  %v8400_v59 = vld [vmem:[%s10570_s1 + $0xb78] sm:$0xff]   ;;  %v8410_v7 = vld [vmem:[%s10570_s1 + $0xc00] sm:$0xff]   ;;  %v8452_v63 = vld [vmem:[%s10570_s1 + $0xd50] sm:$0xff]  }
 0x15d   :  { %7628 = vmatpush3.bf16.msra.mxu1 %v8363_v8  ;;  %7607 = vmatprep.subr.bf16.mxu0 %v8364_v9  ;;  %v44_v0 = vld [vmem:[%s10571_s0 + $0xb8] sm:$0xff]  ;;  %v8411_v8 = vld [vmem:[%s10570_s1 + $0xc80] sm:$0xff]   ;;  %v8412_v9 = vld [vmem:[%s10570_s1 + $0xc48] sm:$0xff]  }
 0x15e   :  { %7629 = vmatprep.subr.bf16.mxu1 %v8365_v10  ;;  %v6542_v3 = vcombine.low %v44_v0, %v44_v0  ;;  %v6543_v4 = vcombine.high %v44_v0, %v44_v0  ;;  %v8413_v10 = vld [vmem:[%s10570_s1 + $0xcc8] sm:$0xff]   ;;  %v8453_v0 = vld [vmem:[%s10570_s1 + $0xdd0] sm:$0xff]  }
 0x160   :  { %7608 = vmatpush3.bf16.msra.mxu0 %v8366_v11  ;;  %v8414_v11 = vld [vmem:[%s10570_s1 + $0xc08] sm:$0xff]  }
 0x161   :  { %7630 = vmatpush3.bf16.msra.mxu1 %v8367_v12  ;;  %7637 = vmatprep.subr.bf16.mxu0 %v8372_v19  ;;  %v8415_v12 = vld [vmem:[%s10570_s1 + $0xc88] sm:$0xff]   ;;  %v8422_v19 = vld [vmem:[%s10570_s1 + $0xc18] sm:$0xff]  }
 0x162   :  { %7659 = vmatprep.subr.bf16.mxu1 %v8373_v20  ;;  %v8423_v20 = vld [vmem:[%s10570_s1 + $0xc98] sm:$0xff]  }
 0x163   :  { %5757 = vmatmul.mubr.bf16.vlgmr.msra.gmra.mrb[40].mxu0 %v6536_v14  ;;  %v8417_v14 = vld [vmem:[%s10570_s1 + $0xcd0] sm:$0xff]  }
 0x164   :  { %5797 = vmatmul.mubr.bf16.vlgmr.msra.gmra.mrb[40].mxu1 %v6538_v17  ;;  %7638 = vmatpush3.bf16.msra.mxu0 %v8374_v21  ;;  %v8420_v17 = vld [vmem:[%s10570_s1 + $0xc58] sm:$0xff]   ;;  %v8424_v21 = vld [vmem:[%s10570_s1 + $0xc60] sm:$0xff]  }
 0x165   :  { %7660 = vmatpush3.bf16.msra.mxu1 %v8375_v22  ;;  %7639 = vmatprep.subr.bf16.mxu0 %v8376_v23  ;;  %v8425_v22 = vld [vmem:[%s10570_s1 + $0xce0] sm:$0xff]  }
 0x166   :  { %7661 = vmatprep.subr.bf16.mxu1 %v8377_v24  ;;  %5836 = vmatprep.mubr.bf16.mxu0 %v6541_v2  ;;  %v8426_v24 = vld [vmem:[%s10570_s1 + $0xc20] sm:$0xff]   ;;  %v8455_v2 = vld [vmem:[%s10570_s1 + $0xd90] sm:$0xff]  }
 0x167   :  { %5876 = vmatprep.mubr.bf16.mxu1 %v6543_v4  ;;  %v8457_v4 = vld [vmem:[%s10570_s1 + $0xdd8] sm:$0xff]  }
 0x168   :  { %7640 = vmatpush3.bf16.msra.mxu0 %v8378_v25 }
 0x169   :  { %7662 = vmatpush3.bf16.msra.mxu1 %v8379_v26  ;;  %7641 = vmatprep.subr.bf16.mxu0 %v8380_v27  ;;  %v8427_v26 = vld [vmem:[%s10570_s1 + $0xca0] sm:$0xff]  }
 0x16a   :  { %7663 = vmatprep.subr.bf16.mxu1 %v8381_v28 }
 0x16c   :  { %7642 = vmatpush3.bf16.msra.mxu0 %v8382_v29 }
 0x16d   :  { %7664 = vmatpush3.bf16.msra.mxu1 %v8383_v30  ;;  %7643 = vmatprep.subr.bf16.mxu0 %v8384_v31  ;;  %v8428_v30 = vld [vmem:[%s10570_s1 + $0xc68] sm:$0xff]  }
 0x16e   :  { %7665 = vmatprep.subr.bf16.mxu1 %v8385_v32  ;;  %v8429_v32 = vld [vmem:[%s10570_s1 + $0xce8] sm:$0xff]  }
 0x170   :  { %7644 = vmatpush3.bf16.msra.mxu0 %v8386_v33 }
 0x171   :  { %7666 = vmatpush3.bf16.msra.mxu1 %v8387_v34  ;;  %7645 = vmatprep.subr.bf16.mxu0 %v8388_v35 }
 0x172   :  { %7667 = vmatprep.subr.bf16.mxu1 %v8389_v36  ;;  %v8430_v36 = vld [vmem:[%s10570_s1 + $0xc28] sm:$0xff]  }
 0x174   :  { %7646 = vmatpush3.bf16.msra.mxu0 %v8390_v38 }
 0x175   :  { %7668 = vmatpush3.bf16.msra.mxu1 %v8391_v40  ;;  %7647 = vmatprep.subr.bf16.mxu0 %v8392_v43  ;;  %v8434_v43 = vld [vmem:[%s10570_s1 + $0xc30] sm:$0xff]  }
 0x176   :  { %v7345_v37 = vpop.f32.mrb[16].mxu0  ;;  %7669 = vmatprep.subr.bf16.mxu1 %v8393_v46  ;;  %v8437_v46 = vld [vmem:[%s10570_s1 + $0xcf8] sm:$0xff]  }
 0x177   :  { %v7367_v39 = vpop.f32.mrb[16].mxu1  ;;  %v7346_v41 = vpop.f32.mrb[17].mxu0 }
 0x178   :  { %v7368_v42 = vpop.f32.mrb[17].mxu1  ;;  %v7347_v44 = vadd.f32 %v7346_v41, %v7345_v37  ;;  %v7348_v47 = vpop.f32.mrb[18].mxu0  ;;  %7648 = vmatpush3.bf16.msra.mxu0 %v8394_v49  ;;  %v8431_v37 = vld [vmem:[%s10570_s1 + $0xca8] sm:$0xff]   ;;  %v8432_v41 = vld [vmem:[%s10570_s1 + $0xc70] sm:$0xff]   ;;  %v45_v49 = vld [vmem:[%s10571_s0 + $0xc0] sm:$0xff] }
 0x179   :  { %v7369_v45 = vadd.f32 %v7368_v42, %v7367_v39  ;;  %v7370_v48 = vpop.f32.mrb[18].mxu1  ;;  %v7349_v52 = vpop.f32.mrb[19].mxu0  ;;  %7670 = vmatpush3.bf16.msra.mxu1 %v8395_v51  ;;  %7649 = vmatprep.subr.bf16.mxu0 %v8396_v54  ;;  %v8433_v42 = vld [vmem:[%s10570_s1 + $0xcf0] sm:$0xff]   ;;  %v8438_v47 = vld [vmem:[%s10570_s1 + $0xc38] sm:$0xff]   ;;  %v6544_v51 = vcombine.low %v45_v49, %v45_v49  ;;  %v8444_v54 = vld [vmem:[%s10570_s1 + $0xd40] sm:$0xff]  }
 0x17a   :  { %v5279_v50 = vadd.f32 %v7347_v44, %v9775_v5  ;;  %v7371_v53 = vpop.f32.mrb[19].mxu1  ;;  %7671 = vmatprep.subr.bf16.mxu1 %v8397_v56  ;;  %v8408_v5 = vld [vmem:[%s10570_s1 + $0xc40] sm:$0xff]   ;;  %v8435_v44 = vld [vmem:[%s10570_s1 + $0xcb0] sm:$0xff]   ;;  %v8439_v48 = vld [vmem:[%s10570_s1 + $0xcb8] sm:$0xff]   ;;  %v6545_v52 = vcombine.high %v45_v49, %v45_v49 }
 0x17b   :  { %v8445_v56 = vld [vmem:[%s10570_s1 + $0xdc0] sm:$0xff]   ;;  %v8488_v49 = vld [vmem:[%s10570_s1 + $0xe50] sm:$0xff]  }
 0x17c   :  { %v9880_v55 = vadd.f32 %v7369_v45, %v5279_v50  ;;  %7650 = vmatpush3.bf16.msra.mxu0 %v8398_v57  ;;  %v8436_v45 = vld [vmem:[%s10570_s1 + $0xc78] sm:$0xff]   ;;  %v46_v50 = vld [vmem:[%s10571_s0 + $0xc8] sm:$0xff]  ;;  %v8446_v57 = vld [vmem:[%s10570_s1 + $0xd00] sm:$0xff]  }
 0x17d   :  { %7672 = vmatpush3.bf16.msra.mxu1 %v8399_v58  ;;  %7651 = vmatprep.subr.bf16.mxu0 %v8400_v59  ;;  %v6546_v53 = vcombine.low %v46_v50, %v46_v50  ;;  %v8447_v58 = vld [vmem:[%s10570_s1 + $0xd80] sm:$0xff]   ;;  %v8448_v59 = vld [vmem:[%s10570_s1 + $0xd48] sm:$0xff]  }
 0x17e   :  { %7673 = vmatprep.subr.bf16.mxu1 %v8401_v60  ;;  %v8449_v60 = vld [vmem:[%s10570_s1 + $0xdc8] sm:$0xff]  }
 0x180   :  { %7652 = vmatpush3.bf16.msra.mxu0 %v8402_v61  ;;  %v8450_v61 = vld [vmem:[%s10570_s1 + $0xd08] sm:$0xff]  }
 0x181   :  { %7674 = vmatpush3.bf16.msra.mxu1 %v8403_v62  ;;  %7681 = vmatprep.subr.bf16.mxu0 %v8408_v5  ;;  %v8451_v62 = vld [vmem:[%s10570_s1 + $0xd88] sm:$0xff]   ;;  %v8458_v5 = vld [vmem:[%s10570_s1 + $0xd18] sm:$0xff]  }
 0x182   :  { %7703 = vmatprep.subr.bf16.mxu1 %v8409_v6  ;;  %v8459_v6 = vld [vmem:[%s10570_s1 + $0xd98] sm:$0xff]  }
 0x183   :  { %5837 = vmatmul.mubr.bf16.vlgmr.msra.gmra.mrb[44].mxu0 %v6540_v1  ;;  %v8454_v1 = vld [vmem:[%s10570_s1 + $0xd10] sm:$0xff]  }
 0x184   :  { %5877 = vmatmul.mubr.bf16.vlgmr.msra.gmra.mrb[44].mxu1 %v6542_v3  ;;  %7682 = vmatpush3.bf16.msra.mxu0 %v8410_v7  ;;  %v8456_v3 = vld [vmem:[%s10570_s1 + $0xd58] sm:$0xff]   ;;  %v8460_v7 = vld [vmem:[%s10570_s1 + $0xd60] sm:$0xff]  }
 0x185   :  { %7704 = vmatpush3.bf16.msra.mxu1 %v8411_v8  ;;  %7683 = vmatprep.subr.bf16.mxu0 %v8412_v9  ;;  %v8461_v8 = vld [vmem:[%s10570_s1 + $0xde0] sm:$0xff]  }
 0x186   :  { %7705 = vmatprep.subr.bf16.mxu1 %v8413_v10  ;;  %5916 = vmatprep.mubr.bf16.mxu0 %v6545_v52  ;;  %v8462_v10 = vld [vmem:[%s10570_s1 + $0xd20] sm:$0xff]   ;;  %v8491_v52 = vld [vmem:[%s10570_s1 + $0xe90] sm:$0xff]  }
 0x188   :  { %7684 = vmatpush3.bf16.msra.mxu0 %v8414_v11 }
 0x189   :  { %7706 = vmatpush3.bf16.msra.mxu1 %v8415_v12  ;;  %7685 = vmatprep.subr.bf16.mxu0 %v8416_v13  ;;  %v8463_v12 = vld [vmem:[%s10570_s1 + $0xda0] sm:$0xff]  }
 0x18a   :  { %7707 = vmatprep.subr.bf16.mxu1 %v8417_v14 }
 0x18c   :  { %7686 = vmatpush3.bf16.msra.mxu0 %v8418_v15  ;;  %v8464_v15 = vld [vmem:[%s10570_s1 + $0xd68] sm:$0xff]  }
 0x18d   :  { %7708 = vmatpush3.bf16.msra.mxu1 %v8419_v16  ;;  %7687 = vmatprep.subr.bf16.mxu0 %v8420_v17 }
 0x18e   :  { %7709 = vmatprep.subr.bf16.mxu1 %v8421_v18  ;;  %v8465_v18 = vld [vmem:[%s10570_s1 + $0xde8] sm:$0xff]  }
 0x190   :  { %7688 = vmatpush3.bf16.msra.mxu0 %v8422_v19 }
 0x191   :  { %7710 = vmatpush3.bf16.msra.mxu1 %v8423_v20  ;;  %7689 = vmatprep.subr.bf16.mxu0 %v8424_v21  ;;  %v8466_v21 = vld [vmem:[%s10570_s1 + $0xd28] sm:$0xff]  }
 0x192   :  { %7711 = vmatprep.subr.bf16.mxu1 %v8425_v22 }
 0x194   :  { %7690 = vmatpush3.bf16.msra.mxu0 %v8426_v24 }
 0x195   :  { %7712 = vmatpush3.bf16.msra.mxu1 %v8427_v26  ;;  %7691 = vmatprep.subr.bf16.mxu0 %v8428_v30  ;;  %v8468_v26 = vld [vmem:[%s10570_s1 + $0xd70] sm:$0xff]  }
 0x196   :  { %v7389_v23 = vpop.f32.mrb[20].mxu0  ;;  %7713 = vmatprep.subr.bf16.mxu1 %v8429_v32  ;;  %v8471_v30 = vld [vmem:[%s10570_s1 + $0xdb0] sm:$0xff]   ;;  %v8473_v32 = vld [vmem:[%s10570_s1 + $0xdf8] sm:$0xff]  }
 0x197   :  { %v7411_v25 = vpop.f32.mrb[20].mxu1  ;;  %v7390_v27 = vpop.f32.mrb[21].mxu0 }
 0x198   :  { %v7391_v28 = vadd.f32 %v7390_v27, %v7389_v23  ;;  %v7412_v29 = vpop.f32.mrb[21].mxu1  ;;  %v7392_v33 = vpop.f32.mrb[22].mxu0  ;;  %7692 = vmatpush3.bf16.msra.mxu0 %v8430_v36  ;;  %v8467_v23 = vld [vmem:[%s10570_s1 + $0xda8] sm:$0xff]  }
 0x199   :  { %v7413_v31 = vadd.f32 %v7412_v29, %v7411_v25  ;;  %v7414_v35 = vpop.f32.mrb[22].mxu1  ;;  %v7393_v38 = vpop.f32.mrb[23].mxu0  ;;  %7714 = vmatpush3.bf16.msra.mxu1 %v8431_v37  ;;  %7693 = vmatprep.subr.bf16.mxu0 %v8432_v41  ;;  %v8470_v29 = vld [vmem:[%s10570_s1 + $0xd30] sm:$0xff]   ;;  %v8474_v33 = vld [vmem:[%s10570_s1 + $0xd38] sm:$0xff]   ;;  %v8480_v41 = vld [vmem:[%s10570_s1 + $0xe40] sm:$0xff]  }
 0x19a   :  { %v5359_v34 = vadd.f32 %v7391_v28, %v9880_v55  ;;  %v7415_v40 = vpop.f32.mrb[23].mxu1  ;;  %7715 = vmatprep.subr.bf16.mxu1 %v8433_v42  ;;  %v6547_v55 = vcombine.high %v46_v50, %v46_v50  ;;  %v8469_v28 = vld [vmem:[%s10570_s1 + $0xdf0] sm:$0xff]   ;;  %v48_v38 = vld [vmem:[%s10571_s0 + $0xd8] sm:$0xff]  ;;  %v8481_v42 = vld [vmem:[%s10570_s1 + $0xec0] sm:$0xff]  }
 0x19b   :  { %v47_v35 = vld [vmem:[%s10571_s0 + $0xd0] sm:$0xff]  ;;  %v6551_v40 = vcombine.high %v48_v38, %v48_v38 }
 0x19c   :  { %v9982_v39 = vadd.f32 %v7413_v31, %v5359_v34  ;;  %7694 = vmatpush3.bf16.msra.mxu0 %v8434_v43  ;;  %5956 = vmatprep.mubr.bf16.mxu1 %v6547_v55  ;;  %v8472_v31 = vld [vmem:[%s10570_s1 + $0xd78] sm:$0xff]   ;;  %v6548_v36 = vcombine.low %v47_v35, %v47_v35  ;;  %v6549_v37 = vcombine.high %v47_v35, %v47_v35  ;;  %v8482_v43 = vld [vmem:[%s10570_s1 + $0xe00] sm:$0xff]   ;;  %v8489_v50 = vld [vmem:[%s10570_s1 + $0xed0] sm:$0xff]  }
 0x19d   :  { %7716 = vmatpush3.bf16.msra.mxu1 %v8435_v44  ;;  %7695 = vmatprep.subr.bf16.mxu0 %v8436_v45  ;;  %v8475_v34 = vld [vmem:[%s10570_s1 + $0xdb8] sm:$0xff]   ;;  %v8483_v44 = vld [vmem:[%s10570_s1 + $0xe80] sm:$0xff]   ;;  %v8484_v45 = vld [vmem:[%s10570_s1 + $0xe48] sm:$0xff]  }
 0x19e   :  { %7717 = vmatprep.subr.bf16.mxu1 %v8437_v46  ;;  %v8485_v46 = vld [vmem:[%s10570_s1 + $0xec8] sm:$0xff]   ;;  %v8494_v55 = vld [vmem:[%s10570_s1 + $0xe18] sm:$0xff]   ;;  %v8524_v35 = vld [vmem:[%s10570_s1 + $0xf50] sm:$0xff]  }
 0x1a0   :  { %7696 = vmatpush3.bf16.msra.mxu0 %v8438_v47  ;;  %v8486_v47 = vld [vmem:[%s10570_s1 + $0xe08] sm:$0xff]  }
 0x1a1   :  { %7718 = vmatpush3.bf16.msra.mxu1 %v8439_v48  ;;  %7725 = vmatprep.subr.bf16.mxu0 %v8444_v54  ;;  %v8487_v48 = vld [vmem:[%s10570_s1 + $0xe88] sm:$0xff]   ;;  %v8493_v54 = vld [vmem:[%s10570_s1 + $0xed8] sm:$0xff]  }
 0x1a2   :  { %7747 = vmatprep.subr.bf16.mxu1 %v8445_v56  ;;  %v8495_v56 = vld [vmem:[%s10570_s1 + $0xe98] sm:$0xff]  }
 0x1a3   :  { %5917 = vmatmul.mubr.bf16.vlgmr.msra.gmra.mrb[48].mxu0 %v6544_v51  ;;  %v8490_v51 = vld [vmem:[%s10570_s1 + $0xe10] sm:$0xff]  }
 0x1a4   :  { %5957 = vmatmul.mubr.bf16.vlgmr.msra.gmra.mrb[48].mxu1 %v6546_v53  ;;  %7726 = vmatpush3.bf16.msra.mxu0 %v8446_v57  ;;  %v8492_v53 = vld [vmem:[%s10570_s1 + $0xe58] sm:$0xff]   ;;  %v8496_v57 = vld [vmem:[%s10570_s1 + $0xe60] sm:$0xff]  }
 0x1a5   :  { %7748 = vmatpush3.bf16.msra.mxu1 %v8447_v58  ;;  %7727 = vmatprep.subr.bf16.mxu0 %v8448_v59  ;;  %v8497_v58 = vld [vmem:[%s10570_s1 + $0xee0] sm:$0xff]  }
 0x1a6   :  { %7749 = vmatprep.subr.bf16.mxu1 %v8449_v60  ;;  %5996 = vmatprep.mubr.bf16.mxu0 %v6549_v37  ;;  %v8498_v60 = vld [vmem:[%s10570_s1 + $0xe20] sm:$0xff]   ;;  %v8526_v37 = vld [vmem:[%s10570_s1 + $0xf10] sm:$0xff]  }
 0x1a7   :  { %6036 = vmatprep.mubr.bf16.mxu1 %v6551_v40  ;;  %v8529_v40 = vld [vmem:[%s10570_s1 + $0xfd8] sm:$0xff]  }
 0x1a8   :  { %7728 = vmatpush3.bf16.msra.mxu0 %v8450_v61 }
 0x1a9   :  { %7750 = vmatpush3.bf16.msra.mxu1 %v8451_v62  ;;  %7729 = vmatprep.subr.bf16.mxu0 %v8452_v63  ;;  %v8499_v62 = vld [vmem:[%s10570_s1 + $0xea0] sm:$0xff]  }
 0x1aa   :  { %7751 = vmatprep.subr.bf16.mxu1 %v8453_v0 }
 0x1ac   :  { %7730 = vmatpush3.bf16.msra.mxu0 %v8454_v1  ;;  %v8500_v1 = vld [vmem:[%s10570_s1 + $0xe68] sm:$0xff]  }
 0x1ad   :  { %7752 = vmatpush3.bf16.msra.mxu1 %v8455_v2  ;;  %7731 = vmatprep.subr.bf16.mxu0 %v8456_v3 }
 0x1ae   :  { %7753 = vmatprep.subr.bf16.mxu1 %v8457_v4  ;;  %v8501_v4 = vld [vmem:[%s10570_s1 + $0xee8] sm:$0xff]  }
 0x1b0   :  { %7732 = vmatpush3.bf16.msra.mxu0 %v8458_v5 }
 0x1b1   :  { %7754 = vmatpush3.bf16.msra.mxu1 %v8459_v6  ;;  %7733 = vmatprep.subr.bf16.mxu0 %v8460_v7  ;;  %v8502_v7 = vld [vmem:[%s10570_s1 + $0xe28] sm:$0xff]  }
 0x1b2   :  { %7755 = vmatprep.subr.bf16.mxu1 %v8461_v8 }
 0x1b4   :  { %7734 = vmatpush3.bf16.msra.mxu0 %v8462_v10 }
 0x1b5   :  { %7756 = vmatpush3.bf16.msra.mxu1 %v8463_v12  ;;  %7735 = vmatprep.subr.bf16.mxu0 %v8464_v15  ;;  %v8504_v12 = vld [vmem:[%s10570_s1 + $0xe70] sm:$0xff]  }
 0x1b6   :  { %v7433_v9 = vpop.f32.mrb[24].mxu0  ;;  %7757 = vmatprep.subr.bf16.mxu1 %v8465_v18  ;;  %v8506_v15 = vld [vmem:[%s10570_s1 + $0xe30] sm:$0xff]   ;;  %v8509_v18 = vld [vmem:[%s10570_s1 + $0xef8] sm:$0xff]  }
 0x1b7   :  { %v7455_v11 = vpop.f32.mrb[24].mxu1  ;;  %v7434_v13 = vpop.f32.mrb[25].mxu0 }
 0x1b8   :  { %v7456_v14 = vpop.f32.mrb[25].mxu1  ;;  %v7435_v16 = vadd.f32 %v7434_v13, %v7433_v9  ;;  %v7436_v19 = vpop.f32.mrb[26].mxu0  ;;  %7736 = vmatpush3.bf16.msra.mxu0 %v8466_v21  ;;  %v8503_v9 = vld [vmem:[%s10570_s1 + $0xea8] sm:$0xff]   ;;  %v49_v21 = vld [vmem:[%s10571_s0 + $0xe0] sm:$0xff] }
 0x1b9   :  { %v7457_v17 = vadd.f32 %v7456_v14, %v7455_v11  ;;  %v7458_v20 = vpop.f32.mrb[26].mxu1  ;;  %v7437_v24 = vpop.f32.mrb[27].mxu0  ;;  %7758 = vmatpush3.bf16.msra.mxu1 %v8467_v23  ;;  %7737 = vmatprep.subr.bf16.mxu0 %v8468_v26  ;;  %v8505_v14 = vld [vmem:[%s10570_s1 + $0xef0] sm:$0xff]   ;;  %v8510_v19 = vld [vmem:[%s10570_s1 + $0xe38] sm:$0xff]   ;;  %v6552_v23 = vcombine.low %v49_v21, %v49_v21 }
 0x1ba   :  { %v5439_v22 = vadd.f32 %v7435_v16, %v9982_v39  ;;  %v7459_v25 = vpop.f32.mrb[27].mxu1  ;;  %7759 = vmatprep.subr.bf16.mxu1 %v8469_v28  ;;  %v6550_v39 = vcombine.low %v48_v38, %v48_v38  ;;  %v8507_v16 = vld [vmem:[%s10570_s1 + $0xeb0] sm:$0xff]   ;;  %v8511_v20 = vld [vmem:[%s10570_s1 + $0xeb8] sm:$0xff]   ;;  %v6553_v24 = vcombine.high %v49_v21, %v49_v21  ;;  %v8517_v28 = vld [vmem:[%s10570_s1 + $0xfc0] sm:$0xff]  }
 0x1bb   :  { %v8527_v38 = vld [vmem:[%s10570_s1 + $0xf90] sm:$0xff]  }
 0x1bc   :  { %v10090_v27 = vadd.f32 %v7457_v17, %v5439_v22  ;;  %7738 = vmatpush3.bf16.msra.mxu0 %v8470_v29  ;;  %v8508_v17 = vld [vmem:[%s10570_s1 + $0xe78] sm:$0xff]   ;;  %v50_v22 = vld [vmem:[%s10571_s0 + $0xe8] sm:$0xff]  ;;  %v8518_v29 = vld [vmem:[%s10570_s1 + $0xf00] sm:$0xff]  }
 0x1bd   :  { %7760 = vmatpush3.bf16.msra.mxu1 %v8471_v30  ;;  %7739 = vmatprep.subr.bf16.mxu0 %v8472_v31  ;;  %v6554_v25 = vcombine.low %v50_v22, %v50_v22  ;;  %v6555_v26 = vcombine.high %v50_v22, %v50_v22  ;;  %v8519_v30 = vld [vmem:[%s10570_s1 + $0xf80] sm:$0xff]   ;;  %v8520_v31 = vld [vmem:[%s10570_s1 + $0xf48] sm:$0xff]   ;;  %v8560_v21 = vld [vmem:[%s10570_s1 + $0x1050] sm:$0xff]  }
 0x1be   :  { %7761 = vmatprep.subr.bf16.mxu1 %v8473_v32  ;;  %v8521_v32 = vld [vmem:[%s10570_s1 + $0xfc8] sm:$0xff]   ;;  %v8561_v22 = vld [vmem:[%s10570_s1 + $0x10d0] sm:$0xff]  }
 0x1c0   :  { %7740 = vmatpush3.bf16.msra.mxu0 %v8474_v33  ;;  %v8522_v33 = vld [vmem:[%s10570_s1 + $0xf08] sm:$0xff]  }
 0x1c1   :  { %7762 = vmatpush3.bf16.msra.mxu1 %v8475_v34  ;;  %7769 = vmatprep.subr.bf16.mxu0 %v8480_v41  ;;  %v8523_v34 = vld [vmem:[%s10570_s1 + $0xf88] sm:$0xff]   ;;  %v8530_v41 = vld [vmem:[%s10570_s1 + $0xf18] sm:$0xff]  }
 0x1c2   :  { %7791 = vmatprep.subr.bf16.mxu1 %v8481_v42  ;;  %v8531_v42 = vld [vmem:[%s10570_s1 + $0xf98] sm:$0xff]  }
 0x1c3   :  { %5997 = vmatmul.mubr.bf16.vlgmr.msra.gmra.mrb[52].mxu0 %v6548_v36  ;;  %v8525_v36 = vld [vmem:[%s10570_s1 + $0xfd0] sm:$0xff]  }
 0x1c4   :  { %6037 = vmatmul.mubr.bf16.vlgmr.msra.gmra.mrb[52].mxu1 %v6550_v39  ;;  %7770 = vmatpush3.bf16.msra.mxu0 %v8482_v43  ;;  %v8528_v39 = vld [vmem:[%s10570_s1 + $0xf58] sm:$0xff]   ;;  %v8532_v43 = vld [vmem:[%s10570_s1 + $0xf60] sm:$0xff]  }
 0x1c5   :  { %7792 = vmatpush3.bf16.msra.mxu1 %v8483_v44  ;;  %7771 = vmatprep.subr.bf16.mxu0 %v8484_v45  ;;  %v8533_v44 = vld [vmem:[%s10570_s1 + $0xfe0] sm:$0xff]  }
 0x1c6   :  { %7793 = vmatprep.subr.bf16.mxu1 %v8485_v46  ;;  %6076 = vmatprep.mubr.bf16.mxu0 %v6553_v24  ;;  %v8534_v45 = vld [vmem:[%s10570_s1 + $0xf20] sm:$0xff]   ;;  %v8563_v24 = vld [vmem:[%s10570_s1 + $0x1090] sm:$0xff]  }
 0x1c7   :  { %6116 = vmatprep.mubr.bf16.mxu1 %v6555_v26  ;;  %v8565_v26 = vld [vmem:[%s10570_s1 + $0x10d8] sm:$0xff]  }
 0x1c8   :  { %7772 = vmatpush3.bf16.msra.mxu0 %v8486_v47  ;;  %v8535_v47 = vld [vmem:[%s10570_s1 + $0xfa0] sm:$0xff]  }
 0x1c9   :  { %7794 = vmatpush3.bf16.msra.mxu1 %v8487_v48  ;;  %7773 = vmatprep.subr.bf16.mxu0 %v8488_v49 }
 0x1ca   :  { %7795 = vmatprep.subr.bf16.mxu1 %v8489_v50 }
 0x1cc   :  { %7774 = vmatpush3.bf16.msra.mxu0 %v8490_v51 }
 0x1cd   :  { %7796 = vmatpush3.bf16.msra.mxu1 %v8491_v52  ;;  %7775 = vmatprep.subr.bf16.mxu0 %v8492_v53  ;;  %v8536_v53 = vld [vmem:[%s10570_s1 + $0xf68] sm:$0xff]  }
 0x1ce   :  { %7797 = vmatprep.subr.bf16.mxu1 %v8493_v54 }
 0x1d0   :  { %7776 = vmatpush3.bf16.msra.mxu0 %v8494_v55  ;;  %v8537_v55 = vld [vmem:[%s10570_s1 + $0xfe8] sm:$0xff]  }
 0x1d1   :  { %7798 = vmatpush3.bf16.msra.mxu1 %v8495_v56  ;;  %7777 = vmatprep.subr.bf16.mxu0 %v8496_v57 }
 0x1d2   :  { %7799 = vmatprep.subr.bf16.mxu1 %v8497_v58  ;;  %v8538_v58 = vld [vmem:[%s10570_s1 + $0xf28] sm:$0xff]  }
 0x1d4   :  { %7778 = vmatpush3.bf16.msra.mxu0 %v8498_v60  ;;  %v8539_v60 = vld [vmem:[%s10570_s1 + $0xfa8] sm:$0xff]  }
 0x1d5   :  { %7800 = vmatpush3.bf16.msra.mxu1 %v8499_v62  ;;  %7779 = vmatprep.subr.bf16.mxu0 %v8500_v1  ;;  %v8542_v1 = vld [vmem:[%s10570_s1 + $0xf30] sm:$0xff]  }
 0x1d6   :  { %v7477_v59 = vpop.f32.mrb[28].mxu0  ;;  %7801 = vmatprep.subr.bf16.mxu1 %v8501_v4  ;;  %v8545_v4 = vld [vmem:[%s10570_s1 + $0xff8] sm:$0xff]  }
 0x1d7   :  { %v7499_v61 = vpop.f32.mrb[28].mxu1  ;;  %v7478_v63 = vpop.f32.mrb[29].mxu0 }
 0x1d8   :  { %v7500_v0 = vpop.f32.mrb[29].mxu1  ;;  %v7479_v2 = vadd.f32 %v7478_v63, %v7477_v59  ;;  %v7480_v5 = vpop.f32.mrb[30].mxu0  ;;  %7780 = vmatpush3.bf16.msra.mxu0 %v8502_v7  ;;  %v8540_v63 = vld [vmem:[%s10570_s1 + $0xf70] sm:$0xff]  }
 0x1d9   :  { %v7501_v3 = vadd.f32 %v7500_v0, %v7499_v61  ;;  %v7502_v6 = vpop.f32.mrb[30].mxu1  ;;  %v7481_v10 = vpop.f32.mrb[31].mxu0  ;;  %7802 = vmatpush3.bf16.msra.mxu1 %v8503_v9  ;;  %7781 = vmatprep.subr.bf16.mxu0 %v8504_v12  ;;  %v8541_v0 = vld [vmem:[%s10570_s1 + $0xff0] sm:$0xff]   ;;  %v8546_v5 = vld [vmem:[%s10570_s1 + $0xf38] sm:$0xff]  }
 0x1da   :  { %v5519_v8 = vadd.f32 %v7479_v2, %v10090_v27  ;;  %v7503_v11 = vpop.f32.mrb[31].mxu1  ;;  %7803 = vmatprep.subr.bf16.mxu1 %v8505_v14  ;;  %v8516_v27 = vld [vmem:[%s10570_s1 + $0xf40] sm:$0xff]   ;;  %v8543_v2 = vld [vmem:[%s10570_s1 + $0xfb0] sm:$0xff]   ;;  %v8547_v6 = vld [vmem:[%s10570_s1 + $0xfb8] sm:$0xff]  }
 0x1db   :  { %v51_v7 = vld [vmem:[%s10571_s0 + $0xf0] sm:$0xff]  ;;  %v8553_v14 = vld [vmem:[%s10570_s1 + $0x10c0] sm:$0xff]  }
 0x1dc   :  { %v10195_v13 = vadd.f32 %v7501_v3, %v5519_v8  ;;  %7782 = vmatpush3.bf16.msra.mxu0 %v8506_v15  ;;  %v8544_v3 = vld [vmem:[%s10570_s1 + $0xf78] sm:$0xff]   ;;  %v6556_v9 = vcombine.low %v51_v7, %v51_v7  ;;  %v6557_v10 = vcombine.high %v51_v7, %v51_v7  ;;  %v8554_v15 = vld [vmem:[%s10570_s1 + $0x1000] sm:$0xff]   ;;  %v8596_v7 = vld [vmem:[%s10570_s1 + $0x1150] sm:$0xff]  }
 0x1dd   :  { %7804 = vmatpush3.bf16.msra.mxu1 %v8507_v16  ;;  %7783 = vmatprep.subr.bf16.mxu0 %v8508_v17  ;;  %v52_v8 = vld [vmem:[%s10571_s0 + $0xf8] sm:$0xff]  ;;  %v8555_v16 = vld [vmem:[%s10570_s1 + $0x1080] sm:$0xff]   ;;  %v8556_v17 = vld [vmem:[%s10570_s1 + $0x1048] sm:$0xff]  }
 0x1de   :  { %7805 = vmatprep.subr.bf16.mxu1 %v8509_v18  ;;  %v6558_v11 = vcombine.low %v52_v8, %v52_v8  ;;  %v6559_v12 = vcombine.high %v52_v8, %v52_v8  ;;  %v8557_v18 = vld [vmem:[%s10570_s1 + $0x10c8] sm:$0xff]   ;;  %v8597_v8 = vld [vmem:[%s10570_s1 + $0x11d0] sm:$0xff]  }
 0x1e0   :  { %7784 = vmatpush3.bf16.msra.mxu0 %v8510_v19  ;;  %v8558_v19 = vld [vmem:[%s10570_s1 + $0x1008] sm:$0xff]  }
 0x1e1   :  { %7806 = vmatpush3.bf16.msra.mxu1 %v8511_v20  ;;  %7813 = vmatprep.subr.bf16.mxu0 %v8516_v27  ;;  %v8559_v20 = vld [vmem:[%s10570_s1 + $0x1088] sm:$0xff]   ;;  %v8566_v27 = vld [vmem:[%s10570_s1 + $0x1018] sm:$0xff]  }
 0x1e2   :  { %7835 = vmatprep.subr.bf16.mxu1 %v8517_v28  ;;  %v8567_v28 = vld [vmem:[%s10570_s1 + $0x1098] sm:$0xff]  }
 0x1e3   :  { %6077 = vmatmul.mubr.bf16.vlgmr.msra.gmra.mrb[56].mxu0 %v6552_v23  ;;  %v8562_v23 = vld [vmem:[%s10570_s1 + $0x1010] sm:$0xff]  }
 0x1e4   :  { %6117 = vmatmul.mubr.bf16.vlgmr.msra.gmra.mrb[56].mxu1 %v6554_v25  ;;  %7814 = vmatpush3.bf16.msra.mxu0 %v8518_v29  ;;  %v8564_v25 = vld [vmem:[%s10570_s1 + $0x1058] sm:$0xff]   ;;  %v8568_v29 = vld [vmem:[%s10570_s1 + $0x1060] sm:$0xff]  }
 0x1e5   :  { %7836 = vmatpush3.bf16.msra.mxu1 %v8519_v30  ;;  %7815 = vmatprep.subr.bf16.mxu0 %v8520_v31  ;;  %v8569_v30 = vld [vmem:[%s10570_s1 + $0x10e0] sm:$0xff]  }
 0x1e6   :  { %7837 = vmatprep.subr.bf16.mxu1 %v8521_v32  ;;  %6156 = vmatprep.mubr.bf16.mxu0 %v6557_v10  ;;  %v8570_v31 = vld [vmem:[%s10570_s1 + $0x1020] sm:$0xff]   ;;  %v8599_v10 = vld [vmem:[%s10570_s1 + $0x1190] sm:$0xff]  }
 0x1e7   :  { %6196 = vmatprep.mubr.bf16.mxu1 %v6559_v12  ;;  %v8601_v12 = vld [vmem:[%s10570_s1 + $0x11d8] sm:$0xff]  }
 0x1e8   :  { %7816 = vmatpush3.bf16.msra.mxu0 %v8522_v33  ;;  %v8571_v33 = vld [vmem:[%s10570_s1 + $0x10a0] sm:$0xff]  }
 0x1e9   :  { %7838 = vmatpush3.bf16.msra.mxu1 %v8523_v34  ;;  %7817 = vmatprep.subr.bf16.mxu0 %v8524_v35 }
 0x1ea   :  { %7839 = vmatprep.subr.bf16.mxu1 %v8525_v36 }
 0x1ec   :  { %7818 = vmatpush3.bf16.msra.mxu0 %v8526_v37 }
 0x1ed   :  { %7840 = vmatpush3.bf16.msra.mxu1 %v8527_v38  ;;  %7819 = vmatprep.subr.bf16.mxu0 %v8528_v39  ;;  %v8572_v39 = vld [vmem:[%s10570_s1 + $0x1068] sm:$0xff]  }
 0x1ee   :  { %7841 = vmatprep.subr.bf16.mxu1 %v8529_v40 }
 0x1f0   :  { %7820 = vmatpush3.bf16.msra.mxu0 %v8530_v41  ;;  %v8573_v41 = vld [vmem:[%s10570_s1 + $0x10e8] sm:$0xff]  }
 0x1f1   :  { %7842 = vmatpush3.bf16.msra.mxu1 %v8531_v42  ;;  %7821 = vmatprep.subr.bf16.mxu0 %v8532_v43 }
 0x1f2   :  { %7843 = vmatprep.subr.bf16.mxu1 %v8533_v44  ;;  %v8574_v44 = vld [vmem:[%s10570_s1 + $0x1028] sm:$0xff]  }
 0x1f4   :  { %7822 = vmatpush3.bf16.msra.mxu0 %v8534_v45 }
 0x1f5   :  { %7844 = vmatpush3.bf16.msra.mxu1 %v8535_v47  ;;  %7823 = vmatprep.subr.bf16.mxu0 %v8536_v53  ;;  %v8580_v53 = vld [vmem:[%s10570_s1 + $0x1078] sm:$0xff]  }
 0x1f6   :  { %v7521_v46 = vpop.f32.mrb[32].mxu0  ;;  %7845 = vmatprep.subr.bf16.mxu1 %v8537_v55  ;;  %v8582_v55 = vld [vmem:[%s10570_s1 + $0x1038] sm:$0xff]  }
 0x1f7   :  { %v7543_v48 = vpop.f32.mrb[32].mxu1  ;;  %v7522_v49 = vpop.f32.mrb[33].mxu0 }
 0x1f8   :  { %v7544_v50 = vpop.f32.mrb[33].mxu1  ;;  %v7523_v51 = vadd.f32 %v7522_v49, %v7521_v46  ;;  %v7524_v54 = vpop.f32.mrb[34].mxu0  ;;  %7824 = vmatpush3.bf16.msra.mxu0 %v8538_v58  ;;  %v8575_v46 = vld [vmem:[%s10570_s1 + $0x10a8] sm:$0xff]   ;;  %v8576_v49 = vld [vmem:[%s10570_s1 + $0x1070] sm:$0xff]  }
 0x1f9   :  { %v7545_v52 = vadd.f32 %v7544_v50, %v7543_v48  ;;  %v7546_v56 = vpop.f32.mrb[34].mxu1  ;;  %v7525_v59 = vpop.f32.mrb[35].mxu0  ;;  %7846 = vmatpush3.bf16.msra.mxu1 %v8539_v60  ;;  %7825 = vmatprep.subr.bf16.mxu0 %v8540_v63  ;;  %v8577_v50 = vld [vmem:[%s10570_s1 + $0x10f0] sm:$0xff]   ;;  %v8581_v54 = vld [vmem:[%s10570_s1 + $0x10f8] sm:$0xff]   ;;  %v54_v58 = vld [vmem:[%s10571_s0 + $0x108] sm:$0xff] }
 0x1fa   :  { %v5599_v57 = vadd.f32 %v7523_v51, %v10195_v13  ;;  %v7547_v61 = vpop.f32.mrb[35].mxu1  ;;  %7847 = vmatprep.subr.bf16.mxu1 %v8541_v0  ;;  %v8552_v13 = vld [vmem:[%s10570_s1 + $0x1040] sm:$0xff]   ;;  %v8578_v51 = vld [vmem:[%s10570_s1 + $0x1030] sm:$0xff]   ;;  %v8583_v56 = vld [vmem:[%s10570_s1 + $0x10b8] sm:$0xff]  }
 0x1fb   :  { %v6562_v61 = vcombine.low %v54_v58, %v54_v58  ;;  %v8588_v63 = vld [vmem:[%s10570_s1 + $0x1140] sm:$0xff]  }
 0x1fc   :  { %v10297_v62 = vadd.f32 %v7545_v52, %v5599_v57  ;;  %7826 = vmatpush3.bf16.msra.mxu0 %v8542_v1  ;;  %v8579_v52 = vld [vmem:[%s10570_s1 + $0x10b0] sm:$0xff]   ;;  %v53_v57 = vld [vmem:[%s10571_s0 + $0x100] sm:$0xff] }
 0x1fd   :  { %7848 = vmatpush3.bf16.msra.mxu1 %v8543_v2  ;;  %7827 = vmatprep.subr.bf16.mxu0 %v8544_v3  ;;  %v6560_v59 = vcombine.low %v53_v57, %v53_v57  ;;  %v6561_v60 = vcombine.high %v53_v57, %v53_v57  ;;  %v8589_v0 = vld [vmem:[%s10570_s1 + $0x11c0] sm:$0xff]   ;;  %v8592_v3 = vld [vmem:[%s10570_s1 + $0x1148] sm:$0xff]  }
 0x1fe   :  { %7849 = vmatprep.subr.bf16.mxu1 %v8545_v4  ;;  %v8590_v1 = vld [vmem:[%s10570_s1 + $0x1100] sm:$0xff]   ;;  %v8593_v4 = vld [vmem:[%s10570_s1 + $0x11c8] sm:$0xff]  }
 0x1ff   :  { %v8591_v2 = vld [vmem:[%s10570_s1 + $0x1180] sm:$0xff]  }
 0x200   :  { %7828 = vmatpush3.bf16.msra.mxu0 %v8546_v5  ;;  %v8594_v5 = vld [vmem:[%s10570_s1 + $0x1108] sm:$0xff]  }
 0x201   :  { %7850 = vmatpush3.bf16.msra.mxu1 %v8547_v6  ;;  %7857 = vmatprep.subr.bf16.mxu0 %v8552_v13  ;;  %v8595_v6 = vld [vmem:[%s10570_s1 + $0x1188] sm:$0xff]   ;;  %v8602_v13 = vld [vmem:[%s10570_s1 + $0x1118] sm:$0xff]  }
 0x202   :  { %7879 = vmatprep.subr.bf16.mxu1 %v8553_v14  ;;  %v8603_v14 = vld [vmem:[%s10570_s1 + $0x1198] sm:$0xff]  }
 0x203   :  { %6157 = vmatmul.mubr.bf16.vlgmr.msra.gmra.mrb[60].mxu0 %v6556_v9  ;;  %v8598_v9 = vld [vmem:[%s10570_s1 + $0x1110] sm:$0xff]  }
 0x204   :  { %6197 = vmatmul.mubr.bf16.vlgmr.msra.gmra.mrb[60].mxu1 %v6558_v11  ;;  %7858 = vmatpush3.bf16.msra.mxu0 %v8554_v15  ;;  %v8600_v11 = vld [vmem:[%s10570_s1 + $0x1158] sm:$0xff]   ;;  %v8604_v15 = vld [vmem:[%s10570_s1 + $0x1160] sm:$0xff]  }
 0x205   :  { %7880 = vmatpush3.bf16.msra.mxu1 %v8555_v16  ;;  %7859 = vmatprep.subr.bf16.mxu0 %v8556_v17  ;;  %v8605_v16 = vld [vmem:[%s10570_s1 + $0x11e0] sm:$0xff]  }
 0x206   :  { %7881 = vmatprep.subr.bf16.mxu1 %v8557_v18  ;;  %6236 = vmatprep.mubr.bf16.mxu0 %v6561_v60  ;;  %v8606_v17 = vld [vmem:[%s10570_s1 + $0x1120] sm:$0xff]  }
 0x208   :  { %7860 = vmatpush3.bf16.msra.mxu0 %v8558_v19  ;;  %v8607_v19 = vld [vmem:[%s10570_s1 + $0x11a0] sm:$0xff]  }
 0x209   :  { %7882 = vmatpush3.bf16.msra.mxu1 %v8559_v20  ;;  %7861 = vmatprep.subr.bf16.mxu0 %v8560_v21 }
 0x20a   :  { %7883 = vmatprep.subr.bf16.mxu1 %v8561_v22 }
 0x20c   :  { %7862 = vmatpush3.bf16.msra.mxu0 %v8562_v23 }
 0x20d   :  { %7884 = vmatpush3.bf16.msra.mxu1 %v8563_v24  ;;  %7863 = vmatprep.subr.bf16.mxu0 %v8564_v25  ;;  %v8608_v25 = vld [vmem:[%s10570_s1 + $0x1168] sm:$0xff]  }
 0x20e   :  { %7885 = vmatprep.subr.bf16.mxu1 %v8565_v26 }
 0x210   :  { %7864 = vmatpush3.bf16.msra.mxu0 %v8566_v27  ;;  %v8609_v27 = vld [vmem:[%s10570_s1 + $0x11e8] sm:$0xff]  }
 0x211   :  { %7886 = vmatpush3.bf16.msra.mxu1 %v8567_v28  ;;  %7865 = vmatprep.subr.bf16.mxu0 %v8568_v29 }
 0x212   :  { %7887 = vmatprep.subr.bf16.mxu1 %v8569_v30  ;;  %v8610_v30 = vld [vmem:[%s10570_s1 + $0x1128] sm:$0xff]  }
 0x214   :  { %7866 = vmatpush3.bf16.msra.mxu0 %v8570_v31 }
 0x215   :  { %7888 = vmatpush3.bf16.msra.mxu1 %v8571_v33  ;;  %7867 = vmatprep.subr.bf16.mxu0 %v8572_v39  ;;  %v8616_v39 = vld [vmem:[%s10570_s1 + $0x1178] sm:$0xff]  }
 0x216   :  { %v7565_v32 = vpop.f32.mrb[36].mxu0  ;;  %7889 = vmatprep.subr.bf16.mxu1 %v8573_v41  ;;  %v8618_v41 = vld [vmem:[%s10570_s1 + $0x1138] sm:$0xff]  }
 0x217   :  { %v7587_v34 = vpop.f32.mrb[36].mxu1  ;;  %v7566_v35 = vpop.f32.mrb[37].mxu0 }
 0x218   :  { %v7588_v36 = vpop.f32.mrb[37].mxu1  ;;  %v7567_v37 = vadd.f32 %v7566_v35, %v7565_v32  ;;  %v7568_v40 = vpop.f32.mrb[38].mxu0  ;;  %7868 = vmatpush3.bf16.msra.mxu0 %v8574_v44  ;;  %v8611_v32 = vld [vmem:[%s10570_s1 + $0x11a8] sm:$0xff]   ;;  %v8612_v35 = vld [vmem:[%s10570_s1 + $0x1170] sm:$0xff]   ;;  %v56_v44 = vld [vmem:[%s10571_s0 + $0x118] sm:$0xff] }
 0x219   :  { %v7589_v38 = vadd.f32 %v7588_v36, %v7587_v34  ;;  %v7590_v42 = vpop.f32.mrb[38].mxu1  ;;  %v7569_v45 = vpop.f32.mrb[39].mxu0  ;;  %7890 = vmatpush3.bf16.msra.mxu1 %v8575_v46  ;;  %7869 = vmatprep.subr.bf16.mxu0 %v8576_v49  ;;  %v8613_v36 = vld [vmem:[%s10570_s1 + $0x11f0] sm:$0xff]   ;;  %v8617_v40 = vld [vmem:[%s10570_s1 + $0x11f8] sm:$0xff]  }
 0x21a   :  { %v5679_v43 = vadd.f32 %v7567_v37, %v10297_v62  ;;  %v7591_v47 = vpop.f32.mrb[39].mxu1  ;;  %7891 = vmatprep.subr.bf16.mxu1 %v8577_v50  ;;  %v6563_v62 = vcombine.high %v54_v58, %v54_v58  ;;  %v8614_v37 = vld [vmem:[%s10570_s1 + $0x1130] sm:$0xff]   ;;  %v8619_v42 = vld [vmem:[%s10570_s1 + $0x11b8] sm:$0xff]  }
 0x21b   :  { %v6566_v47 = vcombine.low %v56_v44, %v56_v44 }
 0x21c   :  { %v10402_v48 = vadd.f32 %v7589_v38, %v5679_v43  ;;  %7870 = vmatpush3.bf16.msra.mxu0 %v8578_v51  ;;  %6276 = vmatprep.mubr.bf16.mxu1 %v6563_v62  ;;  %v8615_v38 = vld [vmem:[%s10570_s1 + $0x11b0] sm:$0xff]  }
 0x21d   :  { %7892 = vmatpush3.bf16.msra.mxu1 %v8579_v52  ;;  %7871 = vmatprep.subr.bf16.mxu0 %v8580_v53  ;;  %v55_v43 = vld [vmem:[%s10571_s0 + $0x110] sm:$0xff] }
 0x21e   :  { %7893 = vmatprep.subr.bf16.mxu1 %v8581_v54  ;;  %v6564_v45 = vcombine.low %v55_v43, %v55_v43  ;;  %v6565_v46 = vcombine.high %v55_v43, %v55_v43 }
 0x220   :  { %7872 = vmatpush3.bf16.msra.mxu0 %v8582_v55 }
 0x221   :  { %7894 = vmatpush3.bf16.msra.mxu1 %v8583_v56  ;;  %7901 = vmatprep.subr.bf16.mxu0 %v8588_v63 }
 0x222   :  { %7923 = vmatprep.subr.bf16.mxu1 %v8589_v0 }
 0x223   :  { %6237 = vmatmul.mubr.bf16.vlgmr.msra.gmra.mrb[64].mxu0 %v6560_v59 }
 0x224   :  { %6277 = vmatmul.mubr.bf16.vlgmr.msra.gmra.mrb[64].mxu1 %v6562_v61  ;;  %7902 = vmatpush3.bf16.msra.mxu0 %v8590_v1 }
 0x225   :  { %7924 = vmatpush3.bf16.msra.mxu1 %v8591_v2  ;;  %7903 = vmatprep.subr.bf16.mxu0 %v8592_v3 }
 0x226   :  { %7925 = vmatprep.subr.bf16.mxu1 %v8593_v4  ;;  %6316 = vmatprep.mubr.bf16.mxu0 %v6565_v46 }
 0x228   :  { %7904 = vmatpush3.bf16.msra.mxu0 %v8594_v5 }
 0x229   :  { %7926 = vmatpush3.bf16.msra.mxu1 %v8595_v6  ;;  %7905 = vmatprep.subr.bf16.mxu0 %v8596_v7 }
 0x22a   :  { %7927 = vmatprep.subr.bf16.mxu1 %v8597_v8 }
 0x22c   :  { %7906 = vmatpush3.bf16.msra.mxu0 %v8598_v9  ;;  %v8636_v9 = vmov 0.0  }
 0x22d   :  { %7928 = vmatpush3.bf16.msra.mxu1 %v8599_v10  ;;  %7907 = vmatprep.subr.bf16.mxu0 %v8600_v11  ;;  %v8624_v10 = vld [vmem:[%s10573_s3] sm:$0xff]   ;;  %v8625_v11 = vld [vmem:[%s10573_s3 + $0x8] sm:$0xff]  }
 0x22e   :  { %7929 = vmatprep.subr.bf16.mxu1 %v8601_v12  ;;  %v8626_v12 = vld [vmem:[%s10573_s3 + $0x10] sm:$0xff]  }
 0x230   :  { %7908 = vmatpush3.bf16.msra.mxu0 %v8602_v13  ;;  %v8627_v13 = vld [vmem:[%s10573_s3 + $0x18] sm:$0xff]  }
 0x231   :  { %7930 = vmatpush3.bf16.msra.mxu1 %v8603_v14  ;;  %7909 = vmatprep.subr.bf16.mxu0 %v8604_v15  ;;  %v8628_v14 = vld [vmem:[%s10573_s3 + $0x20] sm:$0xff]  }
 0x232   :  { %7931 = vmatprep.subr.bf16.mxu1 %v8605_v16 }
 0x234   :  { %7910 = vmatpush3.bf16.msra.mxu0 %v8606_v17 }
 0x235   :  { %7932 = vmatpush3.bf16.msra.mxu1 %v8607_v19  ;;  %7911 = vmatprep.subr.bf16.mxu0 %v8608_v25  ;;  %v8629_v25 = vld [vmem:[%s10573_s3 + $0x28] sm:$0xff]  }
 0x236   :  { %v7609_v18 = vpop.f32.mrb[40].mxu0  ;;  %7933 = vmatprep.subr.bf16.mxu1 %v8609_v27 }
 0x237   :  { %v7631_v20 = vpop.f32.mrb[40].mxu1  ;;  %v7610_v21 = vpop.f32.mrb[41].mxu0 }
 0x238   :  { %v7632_v22 = vpop.f32.mrb[41].mxu1  ;;  %v7611_v23 = vadd.f32 %v7610_v21, %v7609_v18  ;;  %v7612_v26 = vpop.f32.mrb[42].mxu0  ;;  %7912 = vmatpush3.bf16.msra.mxu0 %v8610_v30 }
 0x239   :  { %v7633_v24 = vadd.f32 %v7632_v22, %v7631_v20  ;;  %v7634_v28 = vpop.f32.mrb[42].mxu1  ;;  %v7613_v31 = vpop.f32.mrb[43].mxu0  ;;  %7934 = vmatpush3.bf16.msra.mxu1 %v8611_v32  ;;  %7913 = vmatprep.subr.bf16.mxu0 %v8612_v35 }
 0x23a   :  { %v5759_v29 = vadd.f32 %v7611_v23, %v10402_v48  ;;  %v7635_v33 = vpop.f32.mrb[43].mxu1  ;;  %7935 = vmatprep.subr.bf16.mxu1 %v8613_v36  ;;  %v6567_v48 = vcombine.high %v56_v44, %v56_v44  ;;  %v8630_v28 = vld [vmem:[%s10573_s3 + $0x30] sm:$0xff]  }
 0x23c   :  { %v5799_v34 = vadd.f32 %v7633_v24, %v5759_v29  ;;  %7914 = vmatpush3.bf16.msra.mxu0 %v8614_v37  ;;  %6356 = vmatprep.mubr.bf16.mxu1 %v6567_v48  ;;  %v8631_v29 = vld [vmem:[%s10573_s3 + $0x38] sm:$0xff]  }
 0x23d   :  { %7936 = vmatpush3.bf16.msra.mxu1 %v8615_v38  ;;  %7915 = vmatprep.subr.bf16.mxu0 %v8616_v39 }
 0x23e   :  { %7937 = vmatprep.subr.bf16.mxu1 %v8617_v40 }
 0x240   :  { %7916 = vmatpush3.bf16.msra.mxu0 %v8618_v41 }
 0x241   :  { %7938 = vmatpush3.bf16.msra.mxu1 %v8619_v42  ;;  %7954 = vmatprep.subr.bf16.mxu0 %v8636_v9 }
 0x243   :  { %6317 = vmatmul.mubr.bf16.vlgmr.msra.gmra.mrb[68].mxu0 %v6564_v45 }
 0x244   :  { %6357 = vmatmul.mubr.bf16.vlgmr.msra.gmra.mrb[68].mxu1 %v6566_v47  ;;  %7955 = vmatpush3.bf16.msra.mxu0 %v8624_v10 }
 0x245   :  { %7956 = vmatprep.subr.bf16.mxu0 %v8636_v9  ;;  %7970 = vmatprep.mubr.msk.bf16.mxu0 %vm8637_vm0, %v8636_v9 }
 0x248   :  { %7957 = vmatpush3.bf16.msra.mxu0 %v8625_v11 }
 0x249   :  { %7958 = vmatprep.subr.bf16.mxu0 %v8636_v9 }
 0x24c   :  { %7959 = vmatpush3.bf16.msra.mxu0 %v8626_v12 }
 0x24d   :  { %7960 = vmatprep.subr.bf16.mxu0 %v8636_v9 }
 0x250   :  { %7961 = vmatpush3.bf16.msra.mxu0 %v8627_v13 }
 0x251   :  { %7962 = vmatprep.subr.bf16.mxu0 %v8636_v9 }
 0x254   :  { %7963 = vmatpush3.bf16.msra.mxu0 %v8628_v14 }
 0x255   :  { %7964 = vmatprep.subr.bf16.mxu0 %v8636_v9 }
 0x256   :  { %v7653_v49 = vpop.f32.mrb[44].mxu0 }
 0x257   :  { %v7675_v50 = vpop.f32.mrb[44].mxu1  ;;  %v7654_v51 = vpop.f32.mrb[45].mxu0 }
 0x258   :  { %v7655_v52 = vadd.f32 %v7654_v51, %v7653_v49  ;;  %v7676_v53 = vpop.f32.mrb[45].mxu1  ;;  %v7656_v54 = vpop.f32.mrb[46].mxu0  ;;  %7965 = vmatpush3.bf16.msra.mxu0 %v8629_v25 }
 0x259   :  { %v7677_v55 = vadd.f32 %v7676_v53, %v7675_v50  ;;  %v7678_v56 = vpop.f32.mrb[46].mxu1  ;;  %v7657_v57 = vpop.f32.mrb[47].mxu0  ;;  %7966 = vmatprep.subr.bf16.mxu0 %v8636_v9 }
 0x25a   :  { %v5839_v58 = vadd.f32 %v7655_v52, %v5799_v34  ;;  %v7679_v59 = vpop.f32.mrb[47].mxu1 }
 0x25c   :  { %v5879_v60 = vadd.f32 %v7677_v55, %v5839_v58  ;;  %7967 = vmatpush3.bf16.msra.mxu0 %v8630_v28 }
 0x25d   :  { %7968 = vmatprep.subr.bf16.mxu0 %v8636_v9 }
 0x260   :  { %7969 = vmatpush3.bf16.msra.mxu0 %v8631_v29 }
 0x276   :  { %v7697_v61 = vpop.f32.mrb[48].mxu0 }
 0x277   :  { %v7719_v62 = vpop.f32.mrb[48].mxu1  ;;  %v7698_v63 = vpop.f32.mrb[49].mxu0 }
 0x278   :  { %v7699_v0 = vadd.f32 %v7698_v63, %v7697_v61  ;;  %v7720_v1 = vpop.f32.mrb[49].mxu1  ;;  %v7700_v2 = vpop.f32.mrb[50].mxu0 }
 0x279   :  { %v7721_v3 = vadd.f32 %v7720_v1, %v7719_v62  ;;  %v7722_v4 = vpop.f32.mrb[50].mxu1  ;;  %v7701_v5 = vpop.f32.mrb[51].mxu0 }
 0x27a   :  { %v5919_v6 = vadd.f32 %v7699_v0, %v5879_v60  ;;  %v7723_v7 = vpop.f32.mrb[51].mxu1 }
 0x27c   :  { %v5959_v8 = vadd.f32 %v7721_v3, %v5919_v6 }
 0x296   :  { %v7741_v15 = vpop.f32.mrb[52].mxu0 }
 0x297   :  { %v7763_v16 = vpop.f32.mrb[52].mxu1  ;;  %v7742_v17 = vpop.f32.mrb[53].mxu0 }
 0x298   :  { %v7764_v18 = vpop.f32.mrb[53].mxu1  ;;  %v7743_v19 = vadd.f32 %v7742_v17, %v7741_v15  ;;  %v7744_v21 = vpop.f32.mrb[54].mxu0 }
 0x299   :  { %v7765_v20 = vadd.f32 %v7764_v18, %v7763_v16  ;;  %v7766_v22 = vpop.f32.mrb[54].mxu1  ;;  %v7745_v23 = vpop.f32.mrb[55].mxu0  ;;  %v7144_v16 = vld [vmem:[%s10574_s4] ss:$0 sm:$0xff] }
 0x29a   :  { %v7767_v24 = vpop.f32.mrb[55].mxu1  ;;  %v5999_v26 = vadd.f32 %v7743_v19, %v5959_v8 }
 0x29c   :  { %v6039_v27 = vadd.f32 %v7765_v20, %v5999_v26 }
 0x2b6   :  { %v7785_v30 = vpop.f32.mrb[56].mxu0 }
 0x2b7   :  { %v7807_v31 = vpop.f32.mrb[56].mxu1  ;;  %v7786_v32 = vpop.f32.mrb[57].mxu0 }
 0x2b8   :  { %v7787_v33 = vadd.f32 %v7786_v32, %v7785_v30  ;;  %v7808_v34 = vpop.f32.mrb[57].mxu1  ;;  %v7788_v35 = vpop.f32.mrb[58].mxu0 }
 0x2b9   :  { %v7809_v36 = vadd.f32 %v7808_v34, %v7807_v31  ;;  %v7810_v37 = vpop.f32.mrb[58].mxu1  ;;  %v7789_v38 = vpop.f32.mrb[59].mxu0 }
 0x2ba   :  { %v6079_v39 = vadd.f32 %v7787_v33, %v6039_v27  ;;  %v7811_v40 = vpop.f32.mrb[59].mxu1 }
 0x2bc   :  { %v6119_v41 = vadd.f32 %v7809_v36, %v6079_v39 }
 0x2d6   :  { %v7829_v42 = vpop.f32.mrb[60].mxu0 }
 0x2d7   :  { %v7851_v43 = vpop.f32.mrb[60].mxu1  ;;  %v7830_v44 = vpop.f32.mrb[61].mxu0 }
 0x2d8   :  { %v7831_v45 = vadd.f32 %v7830_v44, %v7829_v42  ;;  %v7852_v46 = vpop.f32.mrb[61].mxu1  ;;  %v7832_v47 = vpop.f32.mrb[62].mxu0 }
 0x2d9   :  { %v7853_v48 = vadd.f32 %v7852_v46, %v7851_v43  ;;  %v7854_v49 = vpop.f32.mrb[62].mxu1  ;;  %v7833_v50 = vpop.f32.mrb[63].mxu0 }
 0x2da   :  { %v6159_v51 = vadd.f32 %v7831_v45, %v6119_v41  ;;  %v7855_v52 = vpop.f32.mrb[63].mxu1 }
 0x2dc   :  { %v6199_v53 = vadd.f32 %v7853_v48, %v6159_v51 }
 0x2f6   :  { %v7873_v54 = vpop.f32.mrb[64].mxu0 }
 0x2f7   :  { %v7895_v55 = vpop.f32.mrb[64].mxu1  ;;  %v7874_v56 = vpop.f32.mrb[65].mxu0 }
 0x2f8   :  { %v7875_v57 = vadd.f32 %v7874_v56, %v7873_v54  ;;  %v7896_v58 = vpop.f32.mrb[65].mxu1  ;;  %v7876_v59 = vpop.f32.mrb[66].mxu0 }
 0x2f9   :  { %v7897_v60 = vadd.f32 %v7896_v58, %v7895_v55  ;;  %v7898_v61 = vpop.f32.mrb[66].mxu1  ;;  %v7877_v62 = vpop.f32.mrb[67].mxu0 }
 0x2fa   :  { %v6239_v63 = vadd.f32 %v7875_v57, %v6199_v53  ;;  %v7899_v0 = vpop.f32.mrb[67].mxu1 }
 0x2fc   :  { %v6279_v1 = vadd.f32 %v7897_v60, %v6239_v63 }
 0x316   :  { %v7917_v2 = vpop.f32.mrb[68].mxu0 }
 0x317   :  { %v7939_v3 = vpop.f32.mrb[68].mxu1  ;;  %v7918_v4 = vpop.f32.mrb[69].mxu0 }
 0x318   :  { %v7919_v5 = vadd.f32 %v7918_v4, %v7917_v2  ;;  %v7940_v6 = vpop.f32.mrb[69].mxu1  ;;  %v7920_v7 = vpop.f32.mrb[70].mxu0 }
 0x319   :  { %v7941_v8 = vadd.f32 %v7940_v6, %v7939_v3  ;;  %v7942_v9 = vpop.f32.mrb[70].mxu1  ;;  %v7921_v10 = vpop.f32.mrb[71].mxu0 }
 0x31a   :  { %v6319_v11 = vadd.f32 %v7919_v5, %v6279_v1  ;;  %v7943_v12 = vpop.f32.mrb[71].mxu1 }
 0x31c   :  { %v6359_v13 = vadd.f32 %v7941_v8, %v6319_v11 }
 0x31e   :  { %v6364_v14 = vmax.f32 %v6359_v13, 0.0 }
 0x320   :  { %v6365_v15 = vpack.c.bf16 %v6364_v14, %v6364_v14 }
 0x322   :  { %7971 = vmatmul.mubr.bf16.vlgmr.msra.gmra.mrb[72].mxu0 %v6365_v15 }
 0x3f5   :  { %v6471_v17 = vpop.f32.mrb[72].mxu0 }
 0x3f6   :  { %v6472_v18 = vadd.f32 %v7144_v16, %v6471_v17  ;;  %v7972_v19 = vpop.f32.mrb[73].mxu0 }
 0x3f7   :  { %v6474_v20 = vpop.f32.mrb[74].mxu0 }
 0x3f8   :  { %v7973_v21 = vpop.f32.mrb[75].mxu0  ;;  %v6478_v22 = vsel %vm6477_vm1, %v6472_v18, -inf }
 0x3f9   :  { %6479 = vmax.xlane.f32.xlu0 %v6478_v22 }
 0x486   :  { %v6480_v23 = vpop.xlane.xlu0 %6479 }
 0x487   :  { %v6481_v24 = vsub.f32 %v6472_v18, %v6480_v23 }
 0x489   :  { %v6482_v25 = vmul.f32 1.442695, %v6481_v24 }
 0x48b   :  { %8632 = vpow2.f32 %v6482_v25 }
 0x495   :  { %v8633_v26 = vpop.eup %8632 }
 0x496   :  { %v6484_v27 = vsel %vm6477_vm1, %v8633_v26, 0.0 }
 0x497   :  { %6485 = vadd.xlane.f32.xlu0 %v6484_v27 }
 0x524   :  { %v6486_v28 = vpop.xlane.xlu0 %6485 }
 0x525   :  { %8634 = vlog2.f32 %v6486_v28 }
 0x52f   :  { %v8635_v29 = vpop.eup %8634 }
 0x530   :  { %v6488_v30 = vmul.f32 0.6931472, %v8635_v29 }
 0x532   :  { %v6489_v31 = vsub.f32 %v6481_v24, %v6488_v30 }
 0x534   :  { %6490 = vst.msk [vmem:[%s10575_s5] sm:$0xff] %vm6477_vm1, %v6489_v31 }

// kernel: net_forward.2
= control target key start
LH: loop header
LB: loop body
LE: loop exit
PB: predicated region body
PF: predicated region fallthrough
CT: control target
= control target key end

     0   :  { %10 = vsyncpa [#allocation3], 0  ;;  %s23955_s0 = inlined_call_operand.vmem [shape: f32[2,1,28,28], index: 0, kind: input, shape index: {}]   ;;  %s23956_s1 = inlined_call_operand.vmem [shape: bf16[234,832], index: 1, kind: input, shape index: {}]   ;;  %s23957_s2 = inlined_call_operand.hbm [shape: f32[1,832], index: 2, kind: input, shape index: {}]   ;;  %s23958_s3 = inlined_call_operand.hbm [shape: bf16[2496,1536], index: 3, kind: input, shape index: {}]   ;;  %s23959_s4 = inlined_call_operand.hbm [shape: f32[1,1536], index: 4, kind: input, shape index: {}]   ;;  %s23960_s5 = inlined_call_operand.vmem [shape: bf16[2,12,768], index: 5, kind: output, shape index: {}]  }
   0x1   :  { %11 = vsyncpa [#allocation5], 0  ;;  %s22523_s18 = smov 0  }
   0x2 LB: > { %s22479_s19 = smov [#allocation4]   ;;  %s22529_s21 = sadd.s32 4294967295, %s22477_s18   ;;  %s22477_s18 = sphi %s22523_s18, %s17_s18  }
   0x3   : > { %s184_s20 = sshll.u32 %s22479_s19, 4  ;;  %p16776_p0 = scmp.ge.s32.totalorder %s22477_s18, 1  ;;  %s22538_s20 = int_to_ptr.vmem [resolvable:$true] %s184_s20 }
   0x4   : > { %p158_p1 = scmp.lt.s32.totalorder %s22477_s18, 3  ;;  %p19322_p2 = scmp.eq.s32.totalorder %s22529_s21, 0 }
   0x5   : > { %s22480_s23 = smov [#allocation2]   ;;  %s22481_s26 = smov [#allocation6]  }
   0x6   : > { %p22534_p3 = pnand %p16776_p0, %p158_p1  ;;  %s174_s24 = sshll.u32 %s22480_s23, 4  ;;  %s22548_s24 = int_to_ptr.vmem [resolvable:$true] %s174_s24 }
   0x7   : > { %s198_s27 = sshll.u32 %s22481_s26, 4  ;;  %s22379_s30 = scalar_lea.hbm %s23958_s3, 239616  ;;  %s22550_s27 = int_to_ptr.vmem [resolvable:$true] %s198_s27 }
   0x8   : > { %p19312_p4 = pneg %p22534_p3  ;;  %p22380_p6 = scmp.ne.s32.totalorder %s23958_s3, %s22379_s30 }
   0x9   : > { %p22386_p10 = scmp.lt.u32.totalorder %s22379_s30, %s23958_s3 }
   0xa   : > { %p22544_p5 = pnand %p19322_p2, %p19312_p4 }
   0xc   : > { %p22560_p7 = pneg %p22544_p5 }
   0xe   : > { %p22382_p8 = pnand %p22560_p7, %p22380_p6 }
  0x10   : > { %p22383_p9 = pneg %p22382_p8 }
  0x12   : > { %p22388_p11 = pnand %p22386_p10, %p22383_p9 }
  0x14   : > { %22391 = shalt.err (!%p22388_p11)
}
  0x15   : > { %s22392_s11 = scalar_lea.vmem %s22538_s20, 239616  ;;  %p22400_p1 = scmp.lt.s32.totalorder %s22538_s20, %s22538_s20 }
  0x16   : > { %p22393_p12 = scmp.ne.s32.totalorder %s22538_s20, %s22392_s11  ;;  %p22401_p4 = scmp.lt.s32.totalorder %s22392_s11, %s22392_s11 }
  0x18   : > { %p22395_p13 = pnand %p22393_p12, %p22560_p7  ;;  %p22402_p6 = por %p22401_p4, %p22400_p1 }
  0x1a   : > { %p22396_p0 = pneg %p22395_p13 }
  0x1c   : > { %p22403_p8 = pnand %p22402_p6, %p22396_p0 }
  0x1e   : > { %22406 = shalt.err (!%p22403_p8)
}
  0x1f   : > { %s22482_s12 = smov 768   ;;  %s22483_s13 = smov 48  }
  0x20   : > { %19318 = dma.hbm_to_vmem [thread:$0]  (!%p22544_p5), %s23958_s3, 239616, %s22538_s20, [#allocation5], %s22482_s12, %s22482_s12, %s22483_s13  }
  0x21   : > { %s22407_s19 = scalar_lea.hbm %s23957_s2, 112 }
  0x22   : > { %p22408_p9 = scmp.ne.s32.totalorder %s23957_s2, %s22407_s19  ;;  %p22414_p12 = scmp.lt.u32.totalorder %s22407_s19, %s23957_s2 }
  0x24   : > { %p22410_p10 = pnand %p22408_p9, %p22560_p7 }
  0x26   : > { %p22411_p11 = pneg %p22410_p10 }
  0x28   : > { %p22416_p13 = pnand %p22414_p12, %p22411_p11 }
  0x2a   : > { %22419 = shalt.err (!%p22416_p13)
}
  0x2b   : > { %s22420_s20 = scalar_lea.vmem %s22548_s24, 112  ;;  %s22427_s30 = scalar_lea.vmem %s22548_s24, 128 }
  0x2c   : > { %p22421_p0 = scmp.ne.s32.totalorder %s22548_s24, %s22420_s20  ;;  %p22428_p6 = scmp.lt.s32.totalorder %s22548_s24, %s22548_s24 }
  0x2d   : > { %p22429_p8 = scmp.lt.s32.totalorder %s22427_s30, %s22420_s20 }
  0x2e   : > { %p22423_p1 = pnand %p22421_p0, %p22560_p7 }
  0x2f   : > { %p22430_p9 = por %p22429_p8, %p22428_p6 }
  0x30   : > { %p22424_p4 = pneg %p22423_p1 }
  0x32   : > { %p22431_p10 = pnand %p22430_p9, %p22424_p4 }
  0x34   : > { %22434 = shalt.err (!%p22431_p10)
}
  0x35   : > { %19315 = dma.hbm_to_vmem [thread:$0]  (!%p22544_p5), %s23957_s2, 112, %s22548_s24, [#allocation3]  }
  0x36   : > { %s22435_s11 = scalar_lea.hbm %s23959_s4, 192 }
  0x37   : > { %p22436_p11 = scmp.ne.s32.totalorder %s23959_s4, %s22435_s11  ;;  %p22442_p0 = scmp.lt.u32.totalorder %s22435_s11, %s23959_s4 }
  0x39   : > { %p22438_p12 = pnand %p22436_p11, %p22560_p7 }
  0x3b   : > { %p22439_p13 = pneg %p22438_p12 }
  0x3d   : > { %p22444_p1 = pnand %p22442_p0, %p22439_p13 }
  0x3f   : > { %22447 = shalt.err (!%p22444_p1)
}
  0x40   : > { %s22448_s24 = scalar_lea.vmem %s22550_s27, 192  ;;  %p22456_p9 = scmp.lt.s32.totalorder %s22550_s27, %s22550_s27 }
  0x41   : > { %p22449_p4 = scmp.ne.s32.totalorder %s22550_s27, %s22448_s24  ;;  %p22457_p10 = scmp.lt.s32.totalorder %s22448_s24, %s22448_s24 }
  0x43   : > { %p22451_p6 = pnand %p22449_p4, %p22560_p7  ;;  %p22458_p11 = por %p22457_p10, %p22456_p9 }
  0x45   : > { %p22452_p8 = pneg %p22451_p6 }
  0x47   : > { %p22459_p12 = pnand %p22458_p11, %p22452_p8 }
  0x49   : > { %22462 = shalt.err (!%p22459_p12)
}
  0x4a   : > { %19321 = dma.hbm_to_vmem [thread:$0]  (!%p22544_p5), %s23959_s4, 192, %s22550_s27, [#allocation5]  }
  0x4b   : > { %219 = sbr.rel (%p22534_p3) target bundleno = 2761 (0xac9), region = 40 }
  0x52   : > { %22468 = dma.done.wait (%p19322_p2), [#allocation3], 112  }
  0x53   : > { %22470 = vsyncadd (%p19322_p2), [#allocation3], 4294967184 }
  0x54   : > { %22472 = dma.done.wait (%p19322_p2), [#allocation5], 239808  }
  0x55   : > { %22474 = vsyncadd (%p19322_p2), [#allocation5], 4294727488  ;;  %p255_p7 = scmp.lt.s32.totalorder %s22529_s21, 1  ;;  %vm334_vm0 = vcmask 1045504   ;;  %vm298_vm1 = vcmask 1046528   ;;  %s22484_s26 = smov 50  }
  0x56   : > { %v19420_v11 = vld [vmem:[%s23956_s1 + $0x4] ss:$28 sps:$4 sm:$0xff]   ;;  %s22485_s28 = smov 25   ;;  %v19422_v17 = vld [vmem:[%s23956_s1 + $0xc] ss:$28 sps:$4 sm:$0xff]   ;;  %s22486_s14 = smov 28  }
  0x57   : > { %s24027_s21 = smov (!%p255_p7, %s22529_s21), 1  ;;  %1141 = vmatprep.subr.bf16.mxu0 %v19420_v11  ;;  %v19424_v18 = vld [vmem:[%s23956_s1] ss:$28 sps:$4 sm:$0xff]   ;;  %v19425_v19 = vld [vmem:[%s23956_s1 + $0x8] ss:$28 sps:$4 sm:$0xff]   ;;  %1194 = vmatprep.subr.bf16.mxu1 %v19422_v17  ;;  %s22487_s15 = smov 103  }
  0x58   : > { %s18824_s22 = sshll.u32 %s24027_s21, 5  ;;  %v19426_v22 = vld [vmem:[%s23956_s1 + $0x3c] ss:$28 sps:$4 sm:$0xff]   ;;  %1142 = vmatpush1.bf16.msra.mxu0 %v19424_v18  ;;  %v19428_v23 = vld [vmem:[%s23956_s1 + $0x44] ss:$28 sps:$4 sm:$0xff]   ;;  %1195 = vmatpush1.bf16.msra.mxu1 %v19425_v19  ;;  %s22488_s20 = smov 78  }
  0x59   : > { %s259_s8 = scalar_lea.vmem %s23955_s0, %s18824_s22  ;;  %v19430_v24 = vld [vmem:[%s23956_s1 + $0x38] ss:$28 sps:$4 sm:$0xff]   ;;  %v19431_v25 = vld [vmem:[%s23956_s1 + $0x40] ss:$28 sps:$4 sm:$0xff]   ;;  %1143 = vmatprep.subr.bf16.mxu0 %v19426_v22  ;;  %1196 = vmatprep.subr.bf16.mxu1 %v19428_v23  ;;  %v19436_v30 = vld [vmem:[%s23956_s1 + $0x70] ss:$28 sps:$4 sm:$0xff]  }
  0x5a   : > { %v22646_v0 = vld [vmem:[%s259_s8] sm:$0xff]  ;;  %v22648_v1 = vld [vmem:[%s259_s8 + $0x8] sm:$0xff]  ;;  %v22650_v2 = vld [vmem:[%s259_s8 + $0x10] sm:$0xff]  ;;  %s22489_s30 = smov 53   ;;  %vm1119_vm2 = vcmask 1044480   ;;  %vm378_vm3 = vcmask 211968  }
  0x5b   : > { %v22652_v3 = vld [vmem:[%s259_s8 + $0x18] sm:$0xf]  ;;  %v19355_v4 = vpack.i.bf16 %v22648_v1, %v22646_v0  ;;  %v335_v5 = vrot.slane %v22646_v0, 2  ;;  %v336_v6 = vrot.slane %v22648_v1, 2  ;;  %v338_v7 = vrot.slane %v22650_v2, 2  ;;  %s22491_s24 = smov 64  }
  0x5c   : > { %v299_v8 = vrot.slane %v22646_v0, 1  ;;  %v300_v9 = vrot.slane %v22648_v1, 1  ;;  %v302_v10 = vrot.slane %v22650_v2, 1  ;;  %v22669_v13 = vrot.slane %v22652_v3, 1  ;;  %v19432_v28 = vld [vmem:[%s23956_s1 + $0x74] ss:$28 sps:$4 sm:$0xff]   ;;  %1144 = vmatpush1.bf16.msra.mxu0 %v19430_v24  ;;  %1197 = vmatpush1.bf16.msra.mxu1 %v19431_v25 }
  0x5d   : > { %19356 = vrot.lane.b32.xlu1 %v19355_v4, %s22484_s26  ;;  %19351 = vrot.lane.b32.xlu0 %v19355_v4, %s22485_s28  ;;  %v337_v12 = vsel %vm334_vm0, %v335_v5, %v336_v6  ;;  %v339_v14 = vsel %vm334_vm0, %v336_v6, %v338_v7  ;;  %v340_v27 = vrot.slane %v22652_v3, 2  ;;  %v19434_v29 = vld [vmem:[%s23956_s1 + $0x7c] ss:$28 sps:$4 sm:$0xff]   ;;  %v19438_v34 = vld [vmem:[%s23956_s1 + $0xac] ss:$28 sps:$4 sm:$0xff]   ;;  %v19390_v38 = vpack.i.bf16 %v22652_v3, %v22650_v2  ;;  %s19299_s16 = smul.u32 48, %s24027_s21 }
  0x5e   : > { %v22673_v15 = vsel %vm298_vm1, %v299_v8, %v300_v9  ;;  %v22676_v16 = vsel %vm298_vm1, %v300_v9, %v302_v10  ;;  %v19365_v20 = vpack.i.bf16 %v339_v14, %v337_v12  ;;  %v22704_v26 = vsel %vm298_vm1, %v302_v10, %v22669_v13  ;;  %v19437_v32 = vld [vmem:[%s23956_s1 + $0x78] ss:$28 sps:$4 sm:$0xff]   ;;  %1145 = vmatprep.subr.bf16.mxu0 %v19432_v28  ;;  %v19442_v36 = vld [vmem:[%s23956_s1 + $0xa8] ss:$28 sps:$4 sm:$0xff]   ;;  %v19443_v39 = vld [vmem:[%s23956_s1 + $0xb0] ss:$28 sps:$4 sm:$0xff]  }
  0x5f   : > { %v19360_v21 = vpack.i.bf16 %v22676_v16, %v22673_v15  ;;  %v19385_v31 = vpack.i.bf16 %v22669_v13, %v22704_v26  ;;  %v341_v33 = vsel %vm334_vm0, %v338_v7, %v340_v27  ;;  %1198 = vmatprep.subr.bf16.mxu1 %v19434_v29  ;;  %v19440_v35 = vld [vmem:[%s23956_s1 + $0xb4] ss:$28 sps:$4 sm:$0xff]   ;;  %v19444_v40 = vld [vmem:[%s23956_s1 + $0xe4] ss:$28 sps:$4 sm:$0xff]   ;;  %v19446_v41 = vld [vmem:[%s23956_s1 + $0xec] ss:$28 sps:$4 sm:$0xff]   ;;  %s23937_s22 = scalar_lea.vmem %s23960_s5, %s19299_s16 }
  0x60   : > { %1146 = vmatpush1.bf16.msra.mxu0 %v19436_v30  ;;  %v19395_v37 = vpack.i.bf16 %v340_v27, %v341_v33  ;;  %1199 = vmatpush1.bf16.msra.mxu1 %v19437_v32  ;;  %v19448_v42 = vld [vmem:[%s23956_s1 + $0xe0] ss:$28 sps:$4 sm:$0xff]   ;;  %v19449_v43 = vld [vmem:[%s23956_s1 + $0xe8] ss:$28 sps:$4 sm:$0xff]   ;;  %v19454_v46 = vld [vmem:[%s23956_s1 + $0x118] ss:$28 sps:$4 sm:$0xff]  }
  0x61   : > { %19366 = vrot.lane.b32.xlu1 %v19365_v20, %s22486_s14  ;;  %19361 = vrot.lane.b32.xlu0 %v19360_v21, %s22487_s15  ;;  %v19450_v44 = vld [vmem:[%s23956_s1 + $0x11c] ss:$28 sps:$4 sm:$0xff]   ;;  %v19452_v45 = vld [vmem:[%s23956_s1 + $0x124] ss:$28 sps:$4 sm:$0xff]   ;;  %vm398_vm4 = vcmask 15360   ;;  %vm383_vm5 = vcmask 424960  }
  0x62   : > { %1147 = vmatprep.subr.bf16.mxu0 %v19438_v34  ;;  %1200 = vmatprep.subr.bf16.mxu1 %v19440_v35  ;;  %v19455_v47 = vld [vmem:[%s23956_s1 + $0x120] ss:$28 sps:$4 sm:$0xff]   ;;  %v19456_v48 = vld [vmem:[%s23956_s1 + $0x154] ss:$28 sps:$4 sm:$0xff]   ;;  %v19462_v51 = vld [vmem:[%s23956_s1 + $0x18c] ss:$28 sps:$4 sm:$0xff]  }
  0x63   : > { %v19458_v49 = vld [vmem:[%s23956_s1 + $0x15c] ss:$28 sps:$4 sm:$0xff]   ;;  %v19460_v50 = vld [vmem:[%s23956_s1 + $0x150] ss:$28 sps:$4 sm:$0xff]   ;;  %v19466_v54 = vld [vmem:[%s23956_s1 + $0x188] ss:$28 sps:$4 sm:$0xff]  }
  0x64   : > { %1148 = vmatpush1.bf16.msra.mxu0 %v19442_v36  ;;  %1201 = vmatpush1.bf16.msra.mxu1 %v19443_v39  ;;  %v19461_v52 = vld [vmem:[%s23956_s1 + $0x158] ss:$28 sps:$4 sm:$0xff]   ;;  %v19468_v55 = vld [vmem:[%s23956_s1 + $0x1c4] ss:$28 sps:$4 sm:$0xff]   ;;  %v19467_v56 = vld [vmem:[%s23956_s1 + $0x190] ss:$28 sps:$4 sm:$0xff]  }
  0x65   : > { %19376 = vrot.lane.b32.xlu1 %v19360_v21, %s22488_s20  ;;  %19371 = vrot.lane.b32.xlu0 %v19365_v20, %s22489_s30  ;;  %v19464_v53 = vld [vmem:[%s23956_s1 + $0x194] ss:$28 sps:$4 sm:$0xff]   ;;  %v19470_v57 = vld [vmem:[%s23956_s1 + $0x1cc] ss:$28 sps:$4 sm:$0xff]   ;;  %vm388_vm6 = vcmask 637952   ;;  %vm403_vm7 = vcmask 228352  }
  0x66   : > { %1149 = vmatprep.subr.bf16.mxu0 %v19444_v40  ;;  %1202 = vmatprep.subr.bf16.mxu1 %v19446_v41  ;;  %v19472_v58 = vld [vmem:[%s23956_s1 + $0x1c0] ss:$28 sps:$4 sm:$0xff]   ;;  %v19473_v60 = vld [vmem:[%s23956_s1 + $0x1c8] ss:$28 sps:$4 sm:$0xff]   ;;  %v19478_v62 = vld [vmem:[%s23956_s1 + $0x1f8] ss:$28 sps:$4 sm:$0xff]  }
  0x67   : > { %v19474_v59 = vld [vmem:[%s23956_s1 + $0x1fc] ss:$28 sps:$4 sm:$0xff]   ;;  %v19476_v61 = vld [vmem:[%s23956_s1 + $0x204] ss:$28 sps:$4 sm:$0xff]   ;;  %v19480_v63 = vld [vmem:[%s23956_s1 + $0x234] ss:$28 sps:$4 sm:$0xff]  }
  0x68   : > { %1150 = vmatpush1.bf16.msra.mxu0 %v19448_v42  ;;  %1203 = vmatpush1.bf16.msra.mxu1 %v19449_v43  ;;  %v19479_v4 = vld [vmem:[%s23956_s1 + $0x200] ss:$28 sps:$4 sm:$0xff]   ;;  %v19484_v6 = vld [vmem:[%s23956_s1 + $0x230] ss:$28 sps:$4 sm:$0xff]   ;;  %v19485_v8 = vld [vmem:[%s23956_s1 + $0x238] ss:$28 sps:$4 sm:$0xff]  }
  0x69   : > { %19386 = vrot.lane.b32.xlu1 %v19385_v31, %s22487_s15  ;;  %19381 = vrot.lane.b32.xlu0 %v19365_v20, %s22488_s20  ;;  %v19482_v5 = vld [vmem:[%s23956_s1 + $0x23c] ss:$28 sps:$4 sm:$0xff]   ;;  %v19486_v7 = vld [vmem:[%s23956_s1 + $0x26c] ss:$28 sps:$4 sm:$0xff]   ;;  %vm393_vm8 = vcmask 850944   ;;  %vm408_vm9 = vcmask 441344  }
  0x6a   : > { %1151 = vmatprep.subr.bf16.mxu0 %v19450_v44  ;;  %1204 = vmatprep.subr.bf16.mxu1 %v19452_v45  ;;  %v19488_v9 = vld [vmem:[%s23956_s1 + $0x274] ss:$28 sps:$4 sm:$0xff]   ;;  %v19490_v10 = vld [vmem:[%s23956_s1 + $0x268] ss:$28 sps:$4 sm:$0xff]   ;;  %v19496_v17 = vld [vmem:[%s23956_s1 + $0x2a0] ss:$28 sps:$4 sm:$0xff]  }
  0x6b   : > { %v19492_v11 = vld [vmem:[%s23956_s1 + $0x2a4] ss:$28 sps:$4 sm:$0xff]   ;;  %v19491_v12 = vld [vmem:[%s23956_s1 + $0x270] ss:$28 sps:$4 sm:$0xff]   ;;  %v19498_v19 = vld [vmem:[%s23956_s1 + $0x2dc] ss:$28 sps:$4 sm:$0xff]  }
  0x6c   : > { %1152 = vmatpush1.bf16.msra.mxu0 %v19454_v46  ;;  %1205 = vmatpush1.bf16.msra.mxu1 %v19455_v47  ;;  %v19494_v14 = vld [vmem:[%s23956_s1 + $0x2ac] ss:$28 sps:$4 sm:$0xff]   ;;  %v19500_v20 = vld [vmem:[%s23956_s1 + $0x2e4] ss:$28 sps:$4 sm:$0xff]   ;;  %v19502_v21 = vld [vmem:[%s23956_s1 + $0x2d8] ss:$28 sps:$4 sm:$0xff]  }
  0x6d   : > { %19396 = vrot.lane.b32.xlu1 %v19395_v37, %s22486_s14  ;;  %19391 = vrot.lane.b32.xlu0 %v19390_v38, %s22485_s28  ;;  %v19497_v18 = vld [vmem:[%s23956_s1 + $0x2a8] ss:$28 sps:$4 sm:$0xff]   ;;  %v19503_v22 = vld [vmem:[%s23956_s1 + $0x2e0] ss:$28 sps:$4 sm:$0xff]   ;;  %vm413_vm10 = vcmask 654336   ;;  %vm1112_vm11 = vcmask 867328  }
  0x6e   : > { %1153 = vmatprep.subr.bf16.mxu0 %v19456_v48  ;;  %1206 = vmatprep.subr.bf16.mxu1 %v19458_v49  ;;  %v19504_v23 = vld [vmem:[%s23956_s1 + $0x314] ss:$28 sps:$4 sm:$0x1f]   ;;  %v19506_v25 = vld [vmem:[%s23956_s1 + $0x31c] ss:$28 sps:$4 sm:$0x1f]  }
  0x6f   : > { %v19508_v24 = vld [vmem:[%s23956_s1 + $0x310] ss:$28 sps:$4 sm:$0x1f]   ;;  %v19509_v27 = vld [vmem:[%s23956_s1 + $0x318] ss:$28 sps:$4 sm:$0x1f]  }
  0x70   : > { %1154 = vmatpush1.bf16.msra.mxu0 %v19460_v50  ;;  %1207 = vmatpush1.bf16.msra.mxu1 %v19461_v52  ;;  %v1121_v28 = vsel %vm1119_vm2, %v19508_v24, 0  ;;  %v19512_v29 = vld [vmem:[%s23956_s1 + $0x14] ss:$28 sps:$4 sm:$0xff]   ;;  %v1127_v30 = vsel %vm1119_vm2, %v19509_v27, 0  ;;  %vm1391_vm12 = vsmask.f32 7424 }
  0x71   : > { %19406 = vrot.lane.b32.xlu1 %v19395_v37, %s22489_s30  ;;  %19401 = vrot.lane.b32.xlu0 %v19390_v38, %s22484_s26  ;;  %v19517_v24 = vld [vmem:[%s23956_s1 + $0x50] ss:$28 sps:$4 sm:$0xff]   ;;  %vm1525_vm13 = vcmask 523264   ;;  %vm16054_vm14 = vcmask 1043456  }
  0x72   : > { %1155 = vmatprep.subr.bf16.mxu0 %v19462_v51  ;;  %1208 = vmatprep.subr.bf16.mxu1 %v19464_v53 }
  0x74   : > { %1156 = vmatpush1.bf16.msra.mxu0 %v19466_v54  ;;  %1209 = vmatpush1.bf16.msra.mxu1 %v19467_v56 }
  0x75   : > { %19416 = vrot.lane.b32.xlu1 %v19395_v37, %s22488_s20  ;;  %19411 = vrot.lane.b32.xlu0 %v19385_v31, %s22488_s20  ;;  %v23961_v31 = vmov 0  }
  0x76   : > { %1157 = vmatprep.subr.bf16.mxu0 %v19468_v55  ;;  %1210 = vmatprep.subr.bf16.mxu1 %v19470_v57 }
  0x78   : > { %1158 = vmatpush1.bf16.msra.mxu0 %v19472_v58  ;;  %1211 = vmatpush1.bf16.msra.mxu1 %v19473_v60 }
  0x79   : > { %1159 = vmatprep.subr.bf16.mxu0 %v19474_v59  ;;  %1212 = vmatprep.subr.bf16.mxu1 %v19476_v61 }
  0x7c   : > { %1160 = vmatpush1.bf16.msra.mxu0 %v19478_v62  ;;  %1213 = vmatpush1.bf16.msra.mxu1 %v19479_v4 }
  0x7d   : > { %1161 = vmatprep.subr.bf16.mxu0 %v19480_v63  ;;  %1214 = vmatprep.subr.bf16.mxu1 %v19482_v5 }
  0x80   : > { %1162 = vmatpush1.bf16.msra.mxu0 %v19484_v6  ;;  %1215 = vmatpush1.bf16.msra.mxu1 %v19485_v8  ;;  %v19510_v6 = vld [vmem:[%s23956_s1 + $0x10] ss:$28 sps:$4 sm:$0xff]  }
  0x81   : > { %1163 = vmatprep.subr.bf16.mxu0 %v19486_v7  ;;  %1216 = vmatprep.subr.bf16.mxu1 %v19488_v9  ;;  %v19513_v9 = vld [vmem:[%s23956_s1 + $0x18] ss:$28 sps:$4 sm:$0xff]  }
  0x84   : > { %1164 = vmatpush1.bf16.msra.mxu0 %v19490_v10  ;;  %1217 = vmatpush1.bf16.msra.mxu1 %v19491_v12  ;;  %v19516_v10 = vld [vmem:[%s23956_s1 + $0x4c] ss:$28 sps:$4 sm:$0xff]  }
  0x85   : > { %1165 = vmatprep.subr.bf16.mxu0 %v19492_v11  ;;  %1218 = vmatprep.subr.bf16.mxu1 %v19494_v14 }
  0x88   : > { %1166 = vmatpush1.bf16.msra.mxu0 %v19496_v17  ;;  %1219 = vmatpush1.bf16.msra.mxu1 %v19497_v18 }
  0x89   : > { %1167 = vmatprep.subr.bf16.mxu0 %v19498_v19  ;;  %1220 = vmatprep.subr.bf16.mxu1 %v19500_v20 }
  0x8c   : > { %1168 = vmatpush1.bf16.msra.mxu0 %v19502_v21  ;;  %1221 = vmatpush1.bf16.msra.mxu1 %v19503_v22 }
  0x8d   : > { %16893 = vmatprep.subr.msk.bf16.mxu0 %vm1119_vm2, %v19504_v23  ;;  %16896 = vmatprep.subr.msk.bf16.mxu1 %vm1119_vm2, %v19506_v25  ;;  %v19520_v25 = vld [vmem:[%s23956_s1 + $0x84] ss:$28 sps:$4 sm:$0xff]  }
  0x90   : > { %1170 = vmatpush1.bf16.msra.mxu0 %v1121_v28  ;;  %1223 = vmatpush1.bf16.msra.mxu1 %v1127_v30 }
  0x91   : > { %1247 = vmatprep.subr.bf16.mxu0 %v19512_v29  ;;  %1300 = vmatprep.subr.bf16.mxu1 %v23961_v31 }
  0xcf   : > { %v19357_v32 = vpop.permute.xlu1 %19356  ;;  %v19352_v33 = vpop.permute.xlu0 %19351 }
  0xd0   : > { %v19354_v34 = vunpack.i.h.bf16 %v19352_v33  ;;  %v19353_v35 = vunpack.i.l.bf16 %v19352_v33  ;;  %v19359_v40 = vunpack.i.h.bf16 %v19357_v32  ;;  %v19358_v41 = vunpack.i.l.bf16 %v19357_v32 }
  0xd2   : > { %v380_v42 = vsel %vm378_vm3, %v22648_v1, %v19354_v34  ;;  %v379_v43 = vsel %vm378_vm3, %v22646_v0, %v19353_v35 }
  0xd3   : > { %v19367_v36 = vpop.permute.xlu1 %19366  ;;  %v19362_v37 = vpop.permute.xlu0 %19361  ;;  %v384_v1 = vsel %vm383_vm5, %v379_v43, %v19358_v41  ;;  %v385_v0 = vsel %vm383_vm5, %v380_v42, %v19359_v40 }
  0xd4   : > { %v19364_v38 = vunpack.i.h.bf16 %v19362_v37  ;;  %v19363_v39 = vunpack.i.l.bf16 %v19362_v37  ;;  %v19369_v44 = vunpack.i.h.bf16 %v19367_v36  ;;  %v19368_v45 = vunpack.i.l.bf16 %v19367_v36  ;;  %v19524_v37 = vld [vmem:[%s23956_s1 + $0xbc] ss:$28 sps:$4 sm:$0xff]  }
  0xd6   : > { %v400_v48 = vsel %vm398_vm4, %v19364_v38, %v22676_v16  ;;  %v399_v49 = vsel %vm398_vm4, %v19363_v39, %v22673_v15 }
  0xd7   : > { %v19377_v46 = vpop.permute.xlu1 %19376  ;;  %v19372_v47 = vpop.permute.xlu0 %19371  ;;  %v404_v56 = vsel %vm403_vm7, %v399_v49, %v19368_v45  ;;  %v405_v16 = vsel %vm403_vm7, %v400_v48, %v19369_v44  ;;  %v19522_v48 = vld [vmem:[%s23956_s1 + $0xb8] ss:$28 sps:$4 sm:$0xff]  }
  0xd8   : > { %v19379_v50 = vunpack.i.h.bf16 %v19377_v46  ;;  %v19378_v51 = vunpack.i.l.bf16 %v19377_v46  ;;  %v19374_v52 = vunpack.i.h.bf16 %v19372_v47  ;;  %v19373_v53 = vunpack.i.l.bf16 %v19372_v47 }
  0xda   : > { %v390_v54 = vsel %vm388_vm6, %v385_v0, %v19379_v50  ;;  %v389_v55 = vsel %vm388_vm6, %v384_v1, %v19378_v51  ;;  %v409_v4 = vsel %vm408_vm9, %v404_v56, %v19373_v53  ;;  %v410_v5 = vsel %vm408_vm9, %v405_v16, %v19374_v52  ;;  %v19525_v0 = vld [vmem:[%s23956_s1 + $0xc0] ss:$28 sps:$4 sm:$0xff]   ;;  %v19526_v16 = vld [vmem:[%s23956_s1 + $0xf0] ss:$28 sps:$4 sm:$0xff]  }
  0xdb   : > { %v22899_v57 = vpop.permute.xlu1 %19386  ;;  %v19382_v15 = vpop.permute.xlu0 %19381  ;;  %v394_v58 = vsel %vm393_vm8, %v389_v55, %v19363_v39  ;;  %v395_v59 = vsel %vm393_vm8, %v390_v54, %v19364_v38  ;;  %v19528_v55 = vld [vmem:[%s23956_s1 + $0xf4] ss:$28 sps:$4 sm:$0xff]  }
  0xdc   : > { %v19389_v60 = vunpack.i.h.bf16 %v22899_v57  ;;  %v19388_v61 = vunpack.i.l.bf16 %v22899_v57  ;;  %v19384_v62 = vunpack.i.h.bf16 %v19382_v15  ;;  %v19383_v63 = vunpack.i.l.bf16 %v19382_v15  ;;  %v19529_v57 = vld [vmem:[%s23956_s1 + $0xf8] ss:$28 sps:$4 sm:$0xff]   ;;  %v19532_v15 = vld [vmem:[%s23956_s1 + $0x12c] ss:$28 sps:$4 sm:$0xff]  }
  0xdd   : > { %v22928_v19 = vpack.c.bf16 %v395_v59, %v394_v58  ;;  %v19530_v58 = vld [vmem:[%s23956_s1 + $0x128] ss:$28 sps:$4 sm:$0xff]   ;;  %v19533_v59 = vld [vmem:[%s23956_s1 + $0x130] ss:$28 sps:$4 sm:$0xff]  }
  0xde   : > { %v414_v7 = vsel %vm413_vm10, %v409_v4, %v19383_v63  ;;  %v415_v8 = vsel %vm413_vm10, %v410_v5, %v19384_v62  ;;  %v402_v11 = vsel %vm398_vm4, %v19389_v60, %v22669_v13  ;;  %v401_v12 = vsel %vm398_vm4, %v19388_v61, %v22704_v26  ;;  %v19514_v13 = vld [vmem:[%s23956_s1 + $0x48] ss:$28 sps:$4 sm:$0xff]   ;;  %v19540_v63 = vld [vmem:[%s23956_s1 + $0x19c] ss:$28 sps:$4 sm:$0xff]  }
  0xdf   : > { %v22926_v14 = vpack.c.bf16 %v415_v8, %v414_v7  ;;  %v19397_v17 = vpop.permute.xlu1 %19396  ;;  %v19392_v18 = vpop.permute.xlu0 %19391  ;;  %v19537_v62 = vld [vmem:[%s23956_s1 + $0x168] ss:$28 sps:$4 sm:$0xff]   ;;  %v19538_v4 = vld [vmem:[%s23956_s1 + $0x198] ss:$28 sps:$4 sm:$0xff]   ;;  %v19541_v5 = vld [vmem:[%s23956_s1 + $0x1a0] ss:$28 sps:$4 sm:$0xff]  }
  0xe0   : > { %v19399_v20 = vunpack.i.h.bf16 %v19397_v17  ;;  %v19398_v21 = vunpack.i.l.bf16 %v19397_v17  ;;  %v19394_v22 = vunpack.i.h.bf16 %v19392_v18  ;;  %v19393_v23 = vunpack.i.l.bf16 %v19392_v18  ;;  %v19542_v7 = vld [vmem:[%s23956_s1 + $0x1d0] ss:$28 sps:$4 sm:$0xff]   ;;  %v19545_v8 = vld [vmem:[%s23956_s1 + $0x1d8] ss:$28 sps:$4 sm:$0xff]   ;;  %v19553_v17 = vld [vmem:[%s23956_s1 + $0x248] ss:$28 sps:$4 sm:$0xff]  }
  0xe1   : > { %16894 = vmatprep.mubr.msk.bf16.mxu0 %vm1112_vm11, %v22926_v14  ;;  %16897 = vmatprep.mubr.msk.bf16.mxu1 %vm1112_vm11, %v22926_v14  ;;  %v19556_v18 = vld [vmem:[%s23956_s1 + $0x27c] ss:$28 sps:$4 sm:$0xff]  }
  0xe2   : > { %v406_v26 = vsel %vm403_vm7, %v401_v12, %v19398_v21  ;;  %1174 = vmatmul.mubr.bf16.vlgmr.msra.gmra.mrb[0].mxu0 %v22928_v19  ;;  %v407_v27 = vsel %vm403_vm7, %v402_v11, %v19399_v20  ;;  %v382_v28 = vsel %vm378_vm3, %v22652_v3, %v19394_v22  ;;  %v381_v29 = vsel %vm378_vm3, %v22650_v2, %v19393_v23  ;;  %v19518_v3 = vld [vmem:[%s23956_s1 + $0x80] ss:$28 sps:$4 sm:$0xff]   ;;  %v19521_v2 = vld [vmem:[%s23956_s1 + $0x88] ss:$28 sps:$4 sm:$0xff]   ;;  %v19549_v11 = vld [vmem:[%s23956_s1 + $0x210] ss:$28 sps:$4 sm:$0xff]  }
  0xe3   : > { %1227 = vmatmul.mubr.bf16.vlgmr.msra.gmra.mrb[0].mxu1 %v22928_v19  ;;  %1248 = vmatpush1.bf16.msra.mxu0 %v19510_v6  ;;  %v19407_v30 = vpop.permute.xlu1 %19406  ;;  %v19402_v32 = vpop.permute.xlu0 %19401  ;;  %v19544_v6 = vld [vmem:[%s23956_s1 + $0x1d4] ss:$28 sps:$4 sm:$0xff]   ;;  %v19552_v12 = vld [vmem:[%s23956_s1 + $0x244] ss:$28 sps:$4 sm:$0xff]  }
  0xe4   : > { %1301 = vmatpush1.bf16.msra.mxu1 %v19513_v9  ;;  %v19409_v33 = vunpack.i.h.bf16 %v19407_v30  ;;  %v19408_v34 = vunpack.i.l.bf16 %v19407_v30  ;;  %v19404_v35 = vunpack.i.h.bf16 %v19402_v32  ;;  %v19403_v36 = vunpack.i.l.bf16 %v19402_v32  ;;  %1249 = vmatprep.subr.bf16.mxu0 %v19516_v10  ;;  %v19548_v9 = vld [vmem:[%s23956_s1 + $0x20c] ss:$28 sps:$4 sm:$0xff]   ;;  %v19554_v20 = vld [vmem:[%s23956_s1 + $0x278] ss:$28 sps:$4 sm:$0xff]   ;;  %v19557_v21 = vld [vmem:[%s23956_s1 + $0x280] ss:$28 sps:$4 sm:$0xff]  }
  0xe5   : > { %1302 = vmatprep.subr.bf16.mxu1 %v23961_v31  ;;  %v19546_v10 = vld [vmem:[%s23956_s1 + $0x208] ss:$28 sps:$4 sm:$0xff]   ;;  %v19560_v22 = vld [vmem:[%s23956_s1 + $0x2b4] ss:$28 sps:$4 sm:$0xff]   ;;  %v19572_v30 = vld [vmem:[#allocation4 + $0x4] ss:$48 sps:$4 sm:$0xff]  }
  0xe6   : > { %v411_v38 = vsel %vm408_vm9, %v406_v26, %v19408_v34  ;;  %v412_v39 = vsel %vm408_vm9, %v407_v27, %v19409_v33  ;;  %v386_v40 = vsel %vm383_vm5, %v381_v29, %v19403_v36  ;;  %v387_v41 = vsel %vm383_vm5, %v382_v28, %v19404_v35  ;;  %v19558_v23 = vld [vmem:[%s23956_s1 + $0x2b0] ss:$28 sps:$4 sm:$0xff]   ;;  %v19566_v27 = vld [vmem:[%s23956_s1 + $0x324] ss:$28 sps:$4 sm:$0x1f]  }
  0xe7   : > { %1250 = vmatpush1.bf16.msra.mxu0 %v19514_v13  ;;  %v19417_v42 = vpop.permute.xlu1 %19416  ;;  %v19412_v43 = vpop.permute.xlu0 %19411  ;;  %v19561_v13 = vld [vmem:[%s23956_s1 + $0x2b8] ss:$28 sps:$4 sm:$0xff]   ;;  %v19564_v26 = vld [vmem:[%s23956_s1 + $0x2ec] ss:$28 sps:$4 sm:$0xff]   ;;  %v19573_v36 = vld [vmem:[#allocation4 + $0x8] ss:$48 sps:$4 sm:$0xff]  }
  0xe8   : > { %1303 = vmatpush1.bf16.msra.mxu1 %v19517_v24  ;;  %v19419_v44 = vunpack.i.h.bf16 %v19417_v42  ;;  %v19418_v45 = vunpack.i.l.bf16 %v19417_v42  ;;  %v19414_v46 = vunpack.i.h.bf16 %v19412_v43  ;;  %v19413_v47 = vunpack.i.l.bf16 %v19412_v43  ;;  %1251 = vmatprep.subr.bf16.mxu0 %v19520_v25  ;;  %v19562_v24 = vld [vmem:[%s23956_s1 + $0x2e8] ss:$28 sps:$4 sm:$0xff]   ;;  %v19565_v25 = vld [vmem:[%s23956_s1 + $0x2f0] ss:$28 sps:$4 sm:$0xff]  }
  0xe9   : > { %1304 = vmatprep.subr.bf16.mxu1 %v23961_v31  ;;  %v19568_v28 = vld [vmem:[%s23956_s1 + $0x320] ss:$28 sps:$4 sm:$0x1f]   ;;  %v19569_v29 = vld [vmem:[%s23956_s1 + $0x328] ss:$28 sps:$4 sm:$0x1f]  }
  0xea   : > { %v416_v49 = vsel %vm413_vm10, %v411_v38, %v19418_v45  ;;  %v417_v50 = vsel %vm413_vm10, %v412_v39, %v19419_v44  ;;  %v391_v51 = vsel %vm388_vm6, %v386_v40, %v19413_v47  ;;  %v392_v1 = vsel %vm388_vm6, %v387_v41, %v19414_v46  ;;  %v19575_v32 = vld [vmem:[#allocation4 + $0xc] ss:$48 sps:$4 sm:$0xff]   ;;  %v19570_v35 = vld [vmem:[#allocation4] ss:$48 sps:$4 sm:$0xff]   ;;  %v19579_v38 = vld [vmem:[#allocation4 + $0x68] ss:$48 sps:$4 sm:$0xff]  }
  0xeb   : > { %v22976_v52 = vpack.c.bf16 %v417_v50, %v416_v49  ;;  %1252 = vmatpush1.bf16.msra.mxu0 %v19518_v3  ;;  %v396_v53 = vsel %vm393_vm8, %v391_v51, %v19388_v61  ;;  %v397_v54 = vsel %vm393_vm8, %v392_v1, %v19389_v60  ;;  %v19536_v60 = vld [vmem:[%s23956_s1 + $0x164] ss:$28 sps:$4 sm:$0xff]   ;;  %v1133_v33 = vsel %vm1119_vm2, %v19568_v28, 0  ;;  %v19578_v3 = vld [vmem:[#allocation4 + $0x64] ss:$48 sps:$4 sm:$0xff]  }
  0xec   : > { %1305 = vmatpush1.bf16.msra.mxu1 %v19521_v2  ;;  %1253 = vmatprep.subr.bf16.mxu0 %v19524_v37  ;;  %v22987_v56 = vpack.c.bf16 %v397_v54, %v396_v53  ;;  %v19534_v61 = vld [vmem:[%s23956_s1 + $0x160] ss:$28 sps:$4 sm:$0xff]   ;;  %v1139_v34 = vsel %vm1119_vm2, %v19569_v29, 0  ;;  %v19581_v2 = vld [vmem:[#allocation4 + $0x6c] ss:$48 sps:$4 sm:$0xff]  }
  0xed   : > { %16895 = vmatprep.mubr.msk.bf16.mxu0 %vm1112_vm11, %v22976_v52  ;;  %16898 = vmatprep.mubr.msk.bf16.mxu1 %vm1112_vm11, %v22976_v52  ;;  %v19576_v37 = vld [vmem:[#allocation4 + $0x60] ss:$48 sps:$4 sm:$0xff]   ;;  %v19584_v39 = vld [vmem:[#allocation4 + $0xc4] ss:$48 sps:$4 sm:$0xff]   ;;  %v19587_v40 = vld [vmem:[#allocation4 + $0xcc] ss:$48 sps:$4 sm:$0xff]  }
  0xee   : > { %1306 = vmatprep.subr.bf16.mxu1 %v23961_v31  ;;  %1184 = vmatmul.mubr.bf16.gmra.mrb[4].mxu0 %v22987_v56  ;;  %v19582_v41 = vld [vmem:[#allocation4 + $0xc0] ss:$48 sps:$4 sm:$0xff]   ;;  %v19585_v42 = vld [vmem:[#allocation4 + $0xc8] ss:$48 sps:$4 sm:$0xff]   ;;  %v19590_v43 = vld [vmem:[#allocation4 + $0x124] ss:$48 sps:$4 sm:$0xff]  }
  0xef   : > { %1237 = vmatmul.mubr.bf16.gmra.mrb[4].mxu1 %v22987_v56  ;;  %1254 = vmatpush1.bf16.msra.mxu0 %v19522_v48  ;;  %v19593_v44 = vld [vmem:[#allocation4 + $0x12c] ss:$48 sps:$4 sm:$0xff]   ;;  %v19591_v45 = vld [vmem:[#allocation4 + $0x128] ss:$48 sps:$4 sm:$0xff]   ;;  %v19596_v46 = vld [vmem:[#allocation4 + $0x184] ss:$48 sps:$4 sm:$0xff]  }
  0xf0   : > { %1307 = vmatpush1.bf16.msra.mxu1 %v19525_v0  ;;  %16900 = vmatprep.mubr.msk.bf16.mxu0 %vm1112_vm11, %v22926_v14  ;;  %v19599_v47 = vld [vmem:[#allocation4 + $0x18c] ss:$48 sps:$4 sm:$0xff]   ;;  %v19594_v48 = vld [vmem:[#allocation4 + $0x180] ss:$48 sps:$4 sm:$0xff]   ;;  %v19597_v49 = vld [vmem:[#allocation4 + $0x188] ss:$48 sps:$4 sm:$0xff]  }
  0xf1   : > { %16902 = vmatprep.mubr.msk.bf16.mxu1 %vm1112_vm11, %v22926_v14  ;;  %1255 = vmatprep.subr.bf16.mxu0 %v19528_v55  ;;  %v19550_v14 = vld [vmem:[%s23956_s1 + $0x240] ss:$28 sps:$4 sm:$0xff]   ;;  %v19605_v51 = vld [vmem:[#allocation4 + $0x1ec] ss:$48 sps:$4 sm:$0xff]   ;;  %v19600_v1 = vld [vmem:[#allocation4 + $0x1e0] ss:$48 sps:$4 sm:$0xff]  }
  0xf2   : > { %1308 = vmatprep.subr.bf16.mxu1 %v23961_v31  ;;  %v19602_v50 = vld [vmem:[#allocation4 + $0x1e4] ss:$48 sps:$4 sm:$0xff]   ;;  %v19603_v0 = vld [vmem:[#allocation4 + $0x1e8] ss:$48 sps:$4 sm:$0xff]   ;;  %v19611_v53 = vld [vmem:[#allocation4 + $0x24c] ss:$48 sps:$4 sm:$0xff]  }
  0xf3   : > { %1256 = vmatpush1.bf16.msra.mxu0 %v19526_v16  ;;  %v19606_v54 = vld [vmem:[#allocation4 + $0x240] ss:$48 sps:$4 sm:$0xff]   ;;  %v19609_v55 = vld [vmem:[#allocation4 + $0x248] ss:$48 sps:$4 sm:$0xff]   ;;  %v19617_v16 = vld [vmem:[#allocation4 + $0x2ac] ss:$48 sps:$4 sm:$0xff]  }
  0xf4   : > { %1309 = vmatpush1.bf16.msra.mxu1 %v19529_v57  ;;  %1257 = vmatprep.subr.bf16.mxu0 %v19532_v15  ;;  %v19612_v57 = vld [vmem:[#allocation4 + $0x2a0] ss:$48 sps:$4 sm:$0xff]   ;;  %v19615_v15 = vld [vmem:[#allocation4 + $0x2a8] ss:$48 sps:$4 sm:$0xff]   ;;  %v19662_v29 = vld [vmem:[#allocation4 + $0x5a4] ss:$48 sps:$4 sm:$0xff]  }
  0xf5   : > { %1310 = vmatprep.subr.bf16.mxu1 %v23961_v31  ;;  %v19657_v28 = vld [vmem:[#allocation4 + $0x548] ss:$48 sps:$4 sm:$0xff]  }
  0xf7   : > { %1258 = vmatpush1.bf16.msra.mxu0 %v19530_v58  ;;  %v19620_v58 = vld [vmem:[#allocation4 + $0x304] ss:$48 sps:$4 sm:$0xff]  }
  0xf8   : > { %1311 = vmatpush1.bf16.msra.mxu1 %v19533_v59  ;;  %1259 = vmatprep.subr.bf16.mxu0 %v19536_v60  ;;  %v19623_v59 = vld [vmem:[#allocation4 + $0x30c] ss:$48 sps:$4 sm:$0xff]   ;;  %v19618_v60 = vld [vmem:[#allocation4 + $0x300] ss:$48 sps:$4 sm:$0xff]  }
  0xf9   : > { %1312 = vmatprep.subr.bf16.mxu1 %v23961_v31 }
  0xfb   : > { %1260 = vmatpush1.bf16.msra.mxu0 %v19534_v61  ;;  %v19621_v61 = vld [vmem:[#allocation4 + $0x308] ss:$48 sps:$4 sm:$0xff]  }
  0xfc   : > { %1313 = vmatpush1.bf16.msra.mxu1 %v19537_v62  ;;  %1261 = vmatprep.subr.bf16.mxu0 %v19540_v63  ;;  %v19626_v62 = vld [vmem:[#allocation4 + $0x364] ss:$48 sps:$4 sm:$0xff]   ;;  %v19629_v63 = vld [vmem:[#allocation4 + $0x36c] ss:$48 sps:$4 sm:$0xff]  }
  0xfd   : > { %1314 = vmatprep.subr.bf16.mxu1 %v23961_v31 }
  0xff   : > { %1262 = vmatpush1.bf16.msra.mxu0 %v19538_v4  ;;  %v19624_v4 = vld [vmem:[#allocation4 + $0x360] ss:$48 sps:$4 sm:$0xff]  }
 0x100   : > { %1315 = vmatpush1.bf16.msra.mxu1 %v19541_v5  ;;  %1263 = vmatprep.subr.bf16.mxu0 %v19544_v6  ;;  %v19627_v5 = vld [vmem:[#allocation4 + $0x368] ss:$48 sps:$4 sm:$0xff]   ;;  %v19632_v6 = vld [vmem:[#allocation4 + $0x3c4] ss:$48 sps:$4 sm:$0xff]  }
 0x101   : > { %1316 = vmatprep.subr.bf16.mxu1 %v23961_v31 }
 0x103   : > { %1264 = vmatpush1.bf16.msra.mxu0 %v19542_v7  ;;  %v19635_v7 = vld [vmem:[#allocation4 + $0x3cc] ss:$48 sps:$4 sm:$0xff]  }
 0x104   : > { %1317 = vmatpush1.bf16.msra.mxu1 %v19545_v8  ;;  %1265 = vmatprep.subr.bf16.mxu0 %v19548_v9  ;;  %v19630_v8 = vld [vmem:[#allocation4 + $0x3c0] ss:$48 sps:$4 sm:$0xff]   ;;  %v19633_v9 = vld [vmem:[#allocation4 + $0x3c8] ss:$48 sps:$4 sm:$0xff]  }
 0x105   : > { %1318 = vmatprep.subr.bf16.mxu1 %v23961_v31 }
 0x107   : > { %1266 = vmatpush1.bf16.msra.mxu0 %v19546_v10  ;;  %v19638_v10 = vld [vmem:[#allocation4 + $0x424] ss:$48 sps:$4 sm:$0xff]  }
 0x108   : > { %1319 = vmatpush1.bf16.msra.mxu1 %v19549_v11  ;;  %1267 = vmatprep.subr.bf16.mxu0 %v19552_v12  ;;  %v19641_v11 = vld [vmem:[#allocation4 + $0x42c] ss:$48 sps:$4 sm:$0xff]   ;;  %v19636_v12 = vld [vmem:[#allocation4 + $0x420] ss:$48 sps:$4 sm:$0xff]  }
 0x109   : > { %1320 = vmatprep.subr.bf16.mxu1 %v23961_v31 }
 0x10b   : > { %1268 = vmatpush1.bf16.msra.mxu0 %v19550_v14  ;;  %v19639_v14 = vld [vmem:[#allocation4 + $0x428] ss:$48 sps:$4 sm:$0xff]  }
 0x10c   : > { %1321 = vmatpush1.bf16.msra.mxu1 %v19553_v17  ;;  %1269 = vmatprep.subr.bf16.mxu0 %v19556_v18  ;;  %v19644_v17 = vld [vmem:[#allocation4 + $0x484] ss:$48 sps:$4 sm:$0xff]   ;;  %v19647_v18 = vld [vmem:[#allocation4 + $0x48c] ss:$48 sps:$4 sm:$0xff]  }
 0x10d   : > { %1322 = vmatprep.subr.bf16.mxu1 %v23961_v31 }
 0x10f   : > { %1270 = vmatpush1.bf16.msra.mxu0 %v19554_v20  ;;  %v19642_v20 = vld [vmem:[#allocation4 + $0x480] ss:$48 sps:$4 sm:$0xff]  }
 0x110   : > { %1323 = vmatpush1.bf16.msra.mxu1 %v19557_v21  ;;  %1271 = vmatprep.subr.bf16.mxu0 %v19560_v22  ;;  %v19645_v21 = vld [vmem:[#allocation4 + $0x488] ss:$48 sps:$4 sm:$0xff]   ;;  %v19650_v22 = vld [vmem:[#allocation4 + $0x4e4] ss:$48 sps:$4 sm:$0xff]  }
 0x111   : > { %1324 = vmatprep.subr.bf16.mxu1 %v23961_v31 }
 0x113   : > { %1272 = vmatpush1.bf16.msra.mxu0 %v19558_v23  ;;  %v19653_v23 = vld [vmem:[#allocation4 + $0x4ec] ss:$48 sps:$4 sm:$0xff]  }
 0x114   : > { %1325 = vmatpush1.bf16.msra.mxu1 %v19561_v13  ;;  %1273 = vmatprep.subr.bf16.mxu0 %v19564_v26  ;;  %v19648_v13 = vld [vmem:[#allocation4 + $0x4e0] ss:$48 sps:$4 sm:$0xff]   ;;  %v19651_v26 = vld [vmem:[#allocation4 + $0x4e8] ss:$48 sps:$4 sm:$0xff]  }
 0x115   : > { %1326 = vmatprep.subr.bf16.mxu1 %v23961_v31 }
 0x117   : > { %1274 = vmatpush1.bf16.msra.mxu0 %v19562_v24  ;;  %v19656_v24 = vld [vmem:[#allocation4 + $0x544] ss:$48 sps:$4 sm:$0xff]  }
 0x118   : > { %1327 = vmatpush1.bf16.msra.mxu1 %v19565_v25  ;;  %16899 = vmatprep.subr.msk.bf16.mxu0 %vm1119_vm2, %v19566_v27  ;;  %v19654_v25 = vld [vmem:[#allocation4 + $0x540] ss:$48 sps:$4 sm:$0xff]   ;;  %v19659_v27 = vld [vmem:[#allocation4 + $0x54c] ss:$48 sps:$4 sm:$0xff]  }
 0x119   : > { %1328 = vmatprep.subr.bf16.mxu1 %v23961_v31  ;;  %v20547_v31 = vld [vmem:[#allocation4 + $0x25c] ss:$48 sps:$4 sm:$0xff]  }
 0x11b   : > { %1276 = vmatpush1.bf16.msra.mxu0 %v1133_v33  ;;  %v19663_v33 = vld [vmem:[#allocation4 + $0x5a8] ss:$48 sps:$4 sm:$0xff]  }
 0x11c   : > { %1329 = vmatpush1.bf16.msra.mxu1 %v1139_v34  ;;  %12907 = vmatprep.subr.bf16.mxu0 %v19572_v30  ;;  %v19660_v30 = vld [vmem:[#allocation4 + $0x5a0] ss:$48 sps:$4 sm:$0xff]   ;;  %v19668_v34 = vld [vmem:[#allocation4 + $0x604] ss:$48 sps:$4 sm:$0xff]  }
 0x11d   : > { %13417 = vmatprep.subr.bf16.mxu1 %v19575_v32  ;;  %v19665_v32 = vld [vmem:[#allocation4 + $0x5ac] ss:$48 sps:$4 sm:$0xff]  }
 0x11e   : > { %1280 = vmatmul.mubr.bf16.vlgmr.msra.gmra.mrb[8].mxu0 %v22928_v19 }
 0x11f   : > { %1333 = vmatmul.mubr.bf16.vlgmr.msra.gmra.mrb[8].mxu1 %v22928_v19  ;;  %16901 = vmatprep.mubr.msk.bf16.mxu0 %vm1112_vm11, %v22976_v52  ;;  %v19588_v19 = vld [vmem:[#allocation4 + $0x120] ss:$48 sps:$4 sm:$0xff]  }
 0x120   : > { %16903 = vmatprep.mubr.msk.bf16.mxu1 %vm1112_vm11, %v22976_v52  ;;  %12908 = vmatpush1.bf16.msra.mxu0 %v19570_v35  ;;  %v19608_v52 = vld [vmem:[#allocation4 + $0x244] ss:$48 sps:$4 sm:$0xff]   ;;  %v19671_v35 = vld [vmem:[#allocation4 + $0x60c] ss:$48 sps:$4 sm:$0xff]  }
 0x121   : > { %13418 = vmatpush1.bf16.msra.mxu1 %v19573_v36  ;;  %12909 = vmatprep.subr.bf16.mxu0 %v19578_v3  ;;  %v23963_v36 = vlaneseq }
 0x122   : > { %13419 = vmatprep.subr.bf16.mxu1 %v19581_v2 }
 0x123   : > { %v23119_v3 = vshrl.u32 %v23963_v36, 7  ;;  %v20550_v36 = vld [vmem:[#allocation4 + $0x2b4] ss:$48 sps:$4 sm:$0xff]  }
 0x124   : > { %12910 = vmatpush1.bf16.msra.mxu0 %v19576_v37  ;;  %v23124_v37 = vld [vmem:[#allocation2] sm:$0x7f] }
 0x125   : > { %13420 = vmatpush1.bf16.msra.mxu1 %v19579_v38  ;;  %12911 = vmatprep.subr.bf16.mxu0 %v19584_v39  ;;  %23991 = vst [vmem:[#allocation9_spill] sm:$0xff] %v23119_v3  ;;  %v23122_v2 = vsub.s32 0, %v23119_v3  ;;  %v23127_v38 = vsub.s32 2, %v23119_v3  ;;  %v23130_v39 = vsub.s32 1, %v23119_v3 }
 0x126   : > { %1290 = vmatmul.mubr.bf16.gmra.mrb[12].mxu0 %v22987_v56  ;;  %13421 = vmatprep.subr.bf16.mxu1 %v19587_v40  ;;  %v23133_v40 = vsub.s32 3, %v23119_v3 }
 0x127   : > { %1341 = vmatmul.mubr.bf16.gmra.mrb[12].mxu1 %v22987_v56  ;;  %v19614_v56 = vld [vmem:[#allocation4 + $0x2a4] ss:$48 sps:$4 sm:$0xff]   ;;  %23992 = vst [vmem:[#allocation10_spill] sm:$0xff] %v23122_v2  ;;  %23993 = vst [vmem:[#allocation11_spill] sm:$0xff] %v23127_v38 }
 0x128   : > { %12912 = vmatpush1.bf16.msra.mxu0 %v19582_v41  ;;  %23994 = vst [vmem:[#allocation12_spill] sm:$0xff] %v23130_v39  ;;  %23995 = vst [vmem:[#allocation13_spill] sm:$0xff] %v23133_v40  ;;  %v547_v41 = vrot.slane %v23124_v37, %v23122_v2 }
 0x129   : > { %13422 = vmatpush1.bf16.msra.mxu1 %v19585_v42  ;;  %12913 = vmatprep.subr.bf16.mxu0 %v19590_v43  ;;  %v23139_v42 = vrot.slane %v23124_v37, %v23127_v38  ;;  %v23143_v43 = vrot.slane %v23124_v37, %v23130_v39 }
 0x12a   : > { %13423 = vmatprep.subr.bf16.mxu1 %v19593_v44  ;;  %v23147_v44 = vrot.slane %v23124_v37, %v23133_v40 }
 0x12c   : > { %12914 = vmatpush1.bf16.msra.mxu0 %v19588_v19 }
 0x12d   : > { %13424 = vmatpush1.bf16.msra.mxu1 %v19591_v45  ;;  %12915 = vmatprep.subr.bf16.mxu0 %v19596_v46 }
 0x12e   : > { %13425 = vmatprep.subr.bf16.mxu1 %v19599_v47 }
 0x130   : > { %12916 = vmatpush1.bf16.msra.mxu0 %v19594_v48 }
 0x131   : > { %13426 = vmatpush1.bf16.msra.mxu1 %v19597_v49  ;;  %12917 = vmatprep.subr.bf16.mxu0 %v19602_v50 }
 0x132   : > { %13427 = vmatprep.subr.bf16.mxu1 %v19605_v51 }
 0x134   : > { %12918 = vmatpush1.bf16.msra.mxu0 %v19600_v1 }
 0x135   : > { %13428 = vmatpush1.bf16.msra.mxu1 %v19603_v0  ;;  %12919 = vmatprep.subr.bf16.mxu0 %v19608_v52 }
 0x136   : > { %13429 = vmatprep.subr.bf16.mxu1 %v19611_v53 }
 0x138   : > { %12920 = vmatpush1.bf16.msra.mxu0 %v19606_v54 }
 0x139   : > { %13430 = vmatpush1.bf16.msra.mxu1 %v19609_v55  ;;  %12921 = vmatprep.subr.bf16.mxu0 %v19614_v56 }
 0x13a   : > { %13431 = vmatprep.subr.bf16.mxu1 %v19617_v16 }
 0x13c   : > { %12922 = vmatpush1.bf16.msra.mxu0 %v19612_v57 }
 0x13d   : > { %13432 = vmatpush1.bf16.msra.mxu1 %v19615_v15  ;;  %12923 = vmatprep.subr.bf16.mxu0 %v19620_v58 }
 0x13e   : > { %13433 = vmatprep.subr.bf16.mxu1 %v19623_v59 }
 0x140   : > { %12924 = vmatpush1.bf16.msra.mxu0 %v19618_v60 }
 0x141   : > { %13434 = vmatpush1.bf16.msra.mxu1 %v19621_v61  ;;  %12925 = vmatprep.subr.bf16.mxu0 %v19626_v62  ;;  %v19666_v62 = vld [vmem:[#allocation4 + $0x600] ss:$48 sps:$4 sm:$0xff]  }
 0x142   : > { %13435 = vmatprep.subr.bf16.mxu1 %v19629_v63  ;;  %v19669_v63 = vld [vmem:[#allocation4 + $0x608] ss:$48 sps:$4 sm:$0xff]  }
 0x144   : > { %12926 = vmatpush1.bf16.msra.mxu0 %v19624_v4 }
 0x145   : > { %13436 = vmatpush1.bf16.msra.mxu1 %v19627_v5  ;;  %12927 = vmatprep.subr.bf16.mxu0 %v19632_v6 }
 0x146   : > { %13437 = vmatprep.subr.bf16.mxu1 %v19635_v7  ;;  %v19674_v7 = vld [vmem:[#allocation4 + $0x664] ss:$48 sps:$4 sm:$0xff]  }
 0x148   : > { %12928 = vmatpush1.bf16.msra.mxu0 %v19630_v8  ;;  %v19677_v8 = vld [vmem:[#allocation4 + $0x66c] ss:$48 sps:$4 sm:$0xff]  }
 0x149   : > { %13438 = vmatpush1.bf16.msra.mxu1 %v19633_v9  ;;  %12929 = vmatprep.subr.bf16.mxu0 %v19638_v10 }
 0x14a   : > { %13439 = vmatprep.subr.bf16.mxu1 %v19641_v11 }
 0x14c   : > { %12930 = vmatpush1.bf16.msra.mxu0 %v19636_v12 }
 0x14d   : > { %13440 = vmatpush1.bf16.msra.mxu1 %v19639_v14  ;;  %12931 = vmatprep.subr.bf16.mxu0 %v19644_v17  ;;  %v19672_v14 = vld [vmem:[#allocation4 + $0x660] ss:$48 sps:$4 sm:$0xff]   ;;  %v19675_v17 = vld [vmem:[#allocation4 + $0x668] ss:$48 sps:$4 sm:$0xff]  }
 0x14e   : > { %13441 = vmatprep.subr.bf16.mxu1 %v19647_v18 }
 0x150   : > { %12932 = vmatpush1.bf16.msra.mxu0 %v19642_v20 }
 0x151   : > { %13442 = vmatpush1.bf16.msra.mxu1 %v19645_v21  ;;  %12933 = vmatprep.subr.bf16.mxu0 %v19650_v22  ;;  %v19680_v22 = vld [vmem:[#allocation4 + $0x6c4] ss:$48 sps:$4 sm:$0xff]  }
 0x152   : > { %13443 = vmatprep.subr.bf16.mxu1 %v19653_v23  ;;  %v19683_v23 = vld [vmem:[#allocation4 + $0x6cc] ss:$48 sps:$4 sm:$0xff]  }
 0x154   : > { %12934 = vmatpush1.bf16.msra.mxu0 %v19648_v13 }
 0x155   : > { %13444 = vmatpush1.bf16.msra.mxu1 %v19651_v26  ;;  %12935 = vmatprep.subr.bf16.mxu0 %v19656_v24 }
 0x156   : > { %13445 = vmatprep.subr.bf16.mxu1 %v19659_v27  ;;  %v19678_v27 = vld [vmem:[#allocation4 + $0x6c0] ss:$48 sps:$4 sm:$0xff]  }
 0x158   : > { %12936 = vmatpush1.bf16.msra.mxu0 %v19654_v25 }
 0x159   : > { %13446 = vmatpush1.bf16.msra.mxu1 %v19657_v28  ;;  %12937 = vmatprep.subr.bf16.mxu0 %v19662_v29  ;;  %v19681_v28 = vld [vmem:[#allocation4 + $0x6c8] ss:$48 sps:$4 sm:$0xff]  }
 0x15a   : > { %13447 = vmatprep.subr.bf16.mxu1 %v19665_v32 }
 0x15c   : > { %12938 = vmatpush1.bf16.msra.mxu0 %v19660_v30 }
 0x15d   : > { %13448 = vmatpush1.bf16.msra.mxu1 %v19663_v33  ;;  %12958 = vmatprep.subr.bf16.mxu0 %v19668_v34 }
 0x15e   : > { %13468 = vmatprep.subr.bf16.mxu1 %v19671_v35 }
 0x1b5   : > { %v1175_v19 = vpop.f32.mrb[0].mxu0 }
 0x1b6   : > { %v1176_v45 = vadd.f32 %v1175_v19, %v547_v41  ;;  %v1228_v46 = vpop.f32.mrb[0].mxu1  ;;  %v1177_v47 = vpop.f32.mrb[1].mxu0 }
 0x1b7   : > { %v1229_v48 = vadd.f32 %v1228_v46, %v23139_v42  ;;  %v1178_v49 = vadd.f32 %v1177_v47, %v23143_v43  ;;  %v1230_v50 = vpop.f32.mrb[1].mxu1  ;;  %v1179_v51 = vpop.f32.mrb[2].mxu0 }
 0x1b8   : > { %v1231_v1 = vadd.f32 %v1230_v50, %v23147_v44  ;;  %v1180_v0 = vadd.f32 %v1179_v51, %v547_v41  ;;  %v1232_v52 = vpop.f32.mrb[2].mxu1  ;;  %v1181_v53 = vpop.f32.mrb[3].mxu0  ;;  %v1349_v16 = vmax.f32 %v1176_v45, 0.0  ;;  %v19686_v50 = vld [vmem:[#allocation4 + $0x724] ss:$48 sps:$4 sm:$0xff]  }
 0x1b9   : > { %v1233_v54 = vadd.f32 %v1232_v52, %v23139_v42  ;;  %v1182_v55 = vadd.f32 %v1181_v53, %v23143_v43  ;;  %v1234_v56 = vpop.f32.mrb[3].mxu1  ;;  %v1351_v58 = vmax.f32 %v1229_v48, 0.0  ;;  %v1350_v59 = vmax.f32 %v1178_v49, 0.0 }
 0x1ba   : > { %v1356_v57 = vmax.f32 %v1180_v0, 0.0  ;;  %v1235_v15 = vadd.f32 %v1234_v56, %v23147_v44  ;;  %v1352_v4 = vmax.f32 %v1231_v1, 0.0  ;;  %v19684_v56 = vld [vmem:[#allocation4 + $0x720] ss:$48 sps:$4 sm:$0xff]  }
 0x1bb   : > { %v1358_v60 = vmax.f32 %v1233_v54, 0.0  ;;  %v1357_v61 = vmax.f32 %v1182_v55, 0.0 }
 0x1bc   : > { %v23155_v5 = vpack.c.bf16 %v1356_v57, %v1349_v16  ;;  %v1359_v6 = vmax.f32 %v1235_v15, 0.0  ;;  %v19687_v57 = vld [vmem:[#allocation4 + $0x728] ss:$48 sps:$4 sm:$0xff]   ;;  %v19692_v15 = vld [vmem:[#allocation4 + $0x784] ss:$48 sps:$4 sm:$0xff]  }
 0x1bd   : > { %v23157_v9 = vpack.c.bf16 %v1358_v60, %v1351_v58  ;;  %v23159_v10 = vpack.c.bf16 %v1357_v61, %v1350_v59  ;;  %v19690_v61 = vld [vmem:[#allocation4 + $0x780] ss:$48 sps:$4 sm:$0xff]  }
 0x1be   : > { %v23161_v11 = vpack.c.bf16 %v1359_v6, %v1352_v4  ;;  %v1395_v29 = vshll.u32 %v23155_v5, 16  ;;  %v1393_v59 = vshrl.u32 %v23155_v5, 16 }
 0x1bf   : > { %12939 = vmatprep.mubr.bf16.mxu0 %v23159_v10  ;;  %13449 = vmatprep.mubr.bf16.mxu1 %v23159_v10  ;;  %v1407_v19 = vshll.u32 %v23159_v10, 16  ;;  %v1405_v4 = vshrl.u32 %v23159_v10, 16 }
 0x1c0   : > { %12940 = vmatmul.mubr.bf16.vlgmr.msra.gmra.mrb[16].mxu0 %v23155_v5  ;;  %13450 = vmatmul.mubr.bf16.vlgmr.msra.gmra.mrb[16].mxu1 %v23155_v5 }
 0x1c1   : > { %12959 = vmatpush1.bf16.msra.mxu0 %v19666_v62  ;;  %13469 = vmatpush1.bf16.msra.mxu1 %v19669_v63  ;;  %v1185_v12 = vpop.f32.mrb[4].mxu0  ;;  %v1409_v58 = vrot.slane %v1407_v19, 1  ;;  %v19693_v62 = vld [vmem:[#allocation4 + $0x788] ss:$48 sps:$4 sm:$0xff]   ;;  %v19695_v63 = vld [vmem:[#allocation4 + $0x78c] ss:$48 sps:$4 sm:$0xff]  }
 0x1c2   : > { %v1186_v18 = vadd.f32 %v1185_v12, %v547_v41  ;;  %v1238_v20 = vpop.f32.mrb[4].mxu1  ;;  %v1187_v21 = vpop.f32.mrb[5].mxu0  ;;  %12960 = vmatprep.subr.bf16.mxu0 %v19674_v7  ;;  %13470 = vmatprep.subr.bf16.mxu1 %v19677_v8  ;;  %v19698_v12 = vld [vmem:[#allocation4 + $0x7e4] ss:$48 sps:$4 sm:$0xff]   ;;  %v19702_v19 = vld [vmem:[#allocation4 + $0x840] ss:$48 sps:$4 sm:$0xff]  }
 0x1c3   : > { %v1239_v13 = vadd.f32 %v1238_v20, %v23139_v42  ;;  %v1188_v26 = vadd.f32 %v1187_v21, %v23143_v43  ;;  %v1240_v24 = vpop.f32.mrb[5].mxu1  ;;  %v1189_v25 = vpop.f32.mrb[6].mxu0  ;;  %v19701_v21 = vld [vmem:[#allocation4 + $0x7ec] ss:$48 sps:$4 sm:$0xff]  }
 0x1c4   : > { %v1363_v30 = vmax.f32 %v1186_v18, 0.0  ;;  %v1241_v32 = vadd.f32 %v1240_v24, %v23147_v44  ;;  %v1190_v33 = vadd.f32 %v1189_v25, %v547_v41  ;;  %v1242_v34 = vpop.f32.mrb[6].mxu1  ;;  %v1191_v35 = vpop.f32.mrb[7].mxu0  ;;  %v19689_v41 = vld [vmem:[#allocation4 + $0x72c] ss:$48 sps:$4 sm:$0xff]   ;;  %v1410_v18 = vor.u32 %v1409_v58, %v1405_v4 }
 0x1c5   : > { %v1365_v45 = vmax.f32 %v1239_v13, 0.0  ;;  %v1364_v46 = vmax.f32 %v1188_v26, 0.0  ;;  %v1243_v47 = vadd.f32 %v1242_v34, %v23139_v42  ;;  %v1192_v48 = vadd.f32 %v1191_v35, %v23143_v43  ;;  %v1244_v49 = vpop.f32.mrb[7].mxu1  ;;  %12961 = vmatpush1.bf16.msra.mxu0 %v19672_v14  ;;  %13471 = vmatpush1.bf16.msra.mxu1 %v19675_v17  ;;  %v19696_v24 = vld [vmem:[#allocation4 + $0x7e0] ss:$48 sps:$4 sm:$0xff]  }
 0x1c6   : > { %v1366_v51 = vmax.f32 %v1241_v32, 0.0  ;;  %v1370_v1 = vmax.f32 %v1190_v33, 0.0  ;;  %v1245_v0 = vadd.f32 %v1244_v49, %v23147_v44  ;;  %12962 = vmatprep.subr.bf16.mxu0 %v19680_v22  ;;  %13472 = vmatprep.subr.bf16.mxu1 %v19683_v23  ;;  %v1397_v42 = vrot.slane %v1395_v29, 1  ;;  %v19699_v25 = vld [vmem:[#allocation4 + $0x7e8] ss:$48 sps:$4 sm:$0xff]  }
 0x1c7   : > { %v1372_v52 = vmax.f32 %v1243_v47, 0.0  ;;  %v1371_v53 = vmax.f32 %v1192_v48, 0.0  ;;  %v1419_v22 = vshll.u32 %v23157_v9, 16  ;;  %v1431_v23 = vshll.u32 %v23161_v11, 16  ;;  %v19704_v32 = vld [vmem:[#allocation4 + $0x844] ss:$48 sps:$4 sm:$0xff]  }
 0x1c8   : > { %v23175_v54 = vpack.c.bf16 %v1370_v1, %v1363_v30  ;;  %v1373_v55 = vmax.f32 %v1245_v0, 0.0  ;;  %v1398_v7 = vor.u32 %v1397_v42, %v1393_v59  ;;  %v19707_v33 = vld [vmem:[#allocation4 + $0x84c] ss:$48 sps:$4 sm:$0xff]   ;;  %v1429_v48 = vshrl.u32 %v23161_v11, 16  ;;  %v19711_v42 = vld [vmem:[#allocation4 + $0x8a8] ss:$48 sps:$4 sm:$0xff]  }
 0x1c9   : > { %v23177_v16 = vpack.c.bf16 %v1372_v52, %v1365_v45  ;;  %v23179_v43 = vpack.c.bf16 %v1371_v53, %v1364_v46  ;;  %12963 = vmatpush1.bf16.msra.mxu0 %v19678_v27  ;;  %13473 = vmatpush1.bf16.msra.mxu1 %v19681_v28  ;;  %v1421_v34 = vrot.slane %v1419_v22, 1  ;;  %v1433_v35 = vrot.slane %v1431_v23, 1  ;;  %v19705_v45 = vld [vmem:[#allocation4 + $0x848] ss:$48 sps:$4 sm:$0xff]   ;;  %v19720_v4 = vld [vmem:[#allocation4 + $0x960] ss:$48 sps:$4 sm:$0xff]  }
 0x1ca   : > { %v23181_v44 = vpack.c.bf16 %v1373_v55, %v1366_v51  ;;  %12964 = vmatprep.subr.bf16.mxu0 %v19686_v50  ;;  %13474 = vmatprep.subr.bf16.mxu1 %v19689_v41  ;;  %v1400_v60 = vshll.u32 %v23175_v54, 16  ;;  %v1476_v14 = vshrl.u32 %v23175_v54, 16  ;;  %v1417_v46 = vshrl.u32 %v23157_v9, 16  ;;  %v19710_v50 = vld [vmem:[#allocation4 + $0x8a4] ss:$48 sps:$4 sm:$0xff]  }
 0x1cb   : > { %12949 = vmatprep.mubr.bf16.mxu0 %v23179_v43  ;;  %13459 = vmatprep.mubr.bf16.mxu1 %v23179_v43  ;;  %v1412_v6 = vshll.u32 %v23179_v43, 16  ;;  %v1479_v17 = vshrl.u32 %v23179_v43, 16  ;;  %v1424_v27 = vshll.u32 %v23177_v16, 16  ;;  %v19713_v51 = vld [vmem:[#allocation4 + $0x8ac] ss:$48 sps:$4 sm:$0xff]   ;;  %v1482_v0 = vshrl.u32 %v23177_v16, 16 }
 0x1cc   : > { %12950 = vmatmul.mubr.bf16.gmra.mrb[20].mxu0 %v23175_v54  ;;  %13460 = vmatmul.mubr.bf16.gmra.mrb[20].mxu1 %v23175_v54  ;;  %v1402_v8 = vrot.slane %v1400_v60, 1  ;;  %v1436_v28 = vshll.u32 %v23181_v44, 16  ;;  %v1485_v1 = vshrl.u32 %v23181_v44, 16  ;;  %v1422_v41 = vor.u32 %v1421_v34, %v1417_v46  ;;  %v19714_v60 = vld [vmem:[#allocation4 + $0x900] ss:$48 sps:$4 sm:$0xff]  }
 0x1cd   : > { %12965 = vmatpush1.bf16.msra.mxu0 %v19684_v56  ;;  %13475 = vmatpush1.bf16.msra.mxu1 %v19687_v57  ;;  %v1414_v20 = vrot.slane %v1412_v6, 1  ;;  %v1426_v47 = vrot.slane %v1424_v27, 1  ;;  %v1434_v52 = vor.u32 %v1433_v35, %v1429_v48  ;;  %v19708_v56 = vld [vmem:[#allocation4 + $0x8a0] ss:$48 sps:$4 sm:$0xff]   ;;  %v19716_v57 = vld [vmem:[#allocation4 + $0x904] ss:$48 sps:$4 sm:$0xff]  }
 0x1ce   : > { %12990 = vmatprep.mubr.bf16.mxu0 %v23161_v11  ;;  %13500 = vmatprep.mubr.bf16.mxu1 %v23161_v11  ;;  %v1403_v13 = vsel %vm1391_vm12, %v1398_v7, %v1402_v8  ;;  %v1478_v29 = vor.u32 %v1476_v14, %v1402_v8  ;;  %v1438_v49 = vrot.slane %v1436_v28, 1  ;;  %v19723_v6 = vld [vmem:[#allocation4 + $0x968] ss:$48 sps:$4 sm:$0xff]   ;;  %v19728_v7 = vld [vmem:[#allocation4 + $0x9c4] ss:$48 sps:$4 sm:$0xff]   ;;  %v23964_v27 = vsub.s32 5, %v23119_v3 }
 0x1cf   : > { %12966 = vmatprep.subr.bf16.mxu0 %v19692_v15  ;;  %13476 = vmatprep.subr.bf16.mxu1 %v19695_v63  ;;  %v1415_v26 = vsel %vm1391_vm12, %v1410_v18, %v1414_v20  ;;  %v1481_v30 = vor.u32 %v1479_v17, %v1414_v20  ;;  %v1427_v53 = vsel %vm1391_vm12, %v1422_v41, %v1426_v47  ;;  %v19719_v15 = vld [vmem:[#allocation4 + $0x90c] ss:$48 sps:$4 sm:$0xff]   ;;  %v19729_v14 = vld [vmem:[#allocation4 + $0x9c8] ss:$48 sps:$4 sm:$0xff]   ;;  %v19734_v17 = vld [vmem:[#allocation4 + $0xa24] ss:$48 sps:$4 sm:$0xff]  }
 0x1d0   : > { %1497 = vrot.lane.b32.xlu0 %v1403_v13, %s22491_s24  ;;  %1499 = vrot.lane.b32.xlu1 %v1415_v26, %s22491_s24  ;;  %v1439_v55 = vsel %vm1391_vm12, %v1434_v52, %v1438_v49  ;;  %v1487_v58 = vor.u32 %v1485_v1, %v1438_v49  ;;  %v1484_v59 = vor.u32 %v1482_v0, %v1426_v47  ;;  %v19725_v63 = vld [vmem:[#allocation4 + $0x96c] ss:$48 sps:$4 sm:$0xff]   ;;  %v19732_v20 = vld [vmem:[#allocation4 + $0xa20] ss:$48 sps:$4 sm:$0xff]   ;;  %v19740_v22 = vld [vmem:[#allocation4 + $0xa84] ss:$48 sps:$4 sm:$0xff]  }
 0x1d1   : > { %12967 = vmatpush1.bf16.msra.mxu0 %v19690_v61  ;;  %13477 = vmatpush1.bf16.msra.mxu1 %v19693_v62  ;;  %v19717_v61 = vld [vmem:[#allocation4 + $0x908] ss:$48 sps:$4 sm:$0xff]   ;;  %v19722_v62 = vld [vmem:[#allocation4 + $0x964] ss:$48 sps:$4 sm:$0xff]   ;;  %v19731_v8 = vld [vmem:[#allocation4 + $0x9cc] ss:$48 sps:$4 sm:$0xff]  }
 0x1d2   : > { %12968 = vmatprep.subr.bf16.mxu0 %v19698_v12  ;;  %13478 = vmatprep.subr.bf16.mxu1 %v19701_v21  ;;  %v19726_v12 = vld [vmem:[#allocation4 + $0x9c0] ss:$48 sps:$4 sm:$0xff]   ;;  %v19737_v18 = vld [vmem:[#allocation4 + $0xa2c] ss:$48 sps:$4 sm:$0xff]   ;;  %v19735_v21 = vld [vmem:[#allocation4 + $0xa28] ss:$48 sps:$4 sm:$0xff]  }
 0x1d3   : > { %v19743_v23 = vld [vmem:[#allocation4 + $0xa8c] ss:$48 sps:$4 sm:$0xff]   ;;  %v23966_v13 = vsub.s32 4, %v23119_v3  ;;  %v19738_v26 = vld [vmem:[#allocation4 + $0xa80] ss:$48 sps:$4 sm:$0xff]  }
 0x1d4   : > { %1511 = vrot.lane.b32.xlu0 %v1478_v29, %s22491_s24  ;;  %1513 = vrot.lane.b32.xlu1 %v1481_v30, %s22491_s24  ;;  %v19746_v28 = vld [vmem:[#allocation4 + $0xae4] ss:$48 sps:$4 sm:$0xff]   ;;  %v19749_v29 = vld [vmem:[#allocation4 + $0xaec] ss:$48 sps:$4 sm:$0xff]   ;;  %v19744_v34 = vld [vmem:[#allocation4 + $0xae0] ss:$48 sps:$4 sm:$0xff]  }
 0x1d5   : > { %12969 = vmatpush1.bf16.msra.mxu0 %v19696_v24  ;;  %13479 = vmatpush1.bf16.msra.mxu1 %v19699_v25  ;;  %v19741_v24 = vld [vmem:[#allocation4 + $0xa88] ss:$48 sps:$4 sm:$0xff]   ;;  %v23965_v25 = vsub.s32 6, %v23119_v3  ;;  %v563_v30 = vrot.slane %v23124_v37, %v23966_v13  ;;  %v19750_v41 = vld [vmem:[#allocation4 + $0xb40] ss:$48 sps:$4 sm:$0xff]  }
 0x1d6   : > { %12970 = vmatprep.subr.bf16.mxu0 %v19704_v32  ;;  %13480 = vmatprep.subr.bf16.mxu1 %v19707_v33  ;;  %v567_v33 = vrot.slane %v23124_v37, %v23964_v27  ;;  %v19747_v35 = vld [vmem:[#allocation4 + $0xae8] ss:$48 sps:$4 sm:$0xff]  }
 0x1d7   : > { %v571_v32 = vrot.slane %v23124_v37, %v23965_v25 }
 0x1d8   : > { %1501 = vrot.lane.b32.xlu0 %v1427_v53, %s22491_s24  ;;  %1503 = vrot.lane.b32.xlu1 %v1439_v55, %s22491_s24  ;;  %v19753_v55 = vld [vmem:[#allocation4 + $0xb48] ss:$48 sps:$4 sm:$0xff]  }
 0x1d9   : > { %12971 = vmatpush1.bf16.msra.mxu0 %v19702_v19  ;;  %13481 = vmatpush1.bf16.msra.mxu1 %v19705_v45  ;;  %v19752_v19 = vld [vmem:[#allocation4 + $0xb44] ss:$48 sps:$4 sm:$0xff]   ;;  %v19755_v45 = vld [vmem:[#allocation4 + $0xb4c] ss:$48 sps:$4 sm:$0xff]  }
 0x1da   : > { %12972 = vmatprep.subr.bf16.mxu0 %v19710_v50  ;;  %13482 = vmatprep.subr.bf16.mxu1 %v19713_v51 }
 0x1dc   : > { %1517 = vrot.lane.b32.xlu1 %v1487_v58, %s22491_s24  ;;  %1515 = vrot.lane.b32.xlu0 %v1484_v59, %s22491_s24  ;;  %v19761_v58 = vld [vmem:[#allocation4 + $0xbac] ss:$48 sps:$4 sm:$0xff]  }
 0x1dd   : > { %12973 = vmatpush1.bf16.msra.mxu0 %v19708_v56  ;;  %13483 = vmatpush1.bf16.msra.mxu1 %v19711_v42 }
 0x1de   : > { %12974 = vmatprep.subr.bf16.mxu0 %v19716_v57  ;;  %13484 = vmatprep.subr.bf16.mxu1 %v19719_v15  ;;  %v19758_v15 = vld [vmem:[#allocation4 + $0xba4] ss:$48 sps:$4 sm:$0xff]  }
 0x1e1   : > { %12975 = vmatpush1.bf16.msra.mxu0 %v19714_v60  ;;  %13485 = vmatpush1.bf16.msra.mxu1 %v19717_v61 }
 0x1e2   : > { %12976 = vmatprep.subr.bf16.mxu0 %v19722_v62  ;;  %13486 = vmatprep.subr.bf16.mxu1 %v19725_v63 }
 0x1e5   : > { %12977 = vmatpush1.bf16.msra.mxu0 %v19720_v4  ;;  %13487 = vmatpush1.bf16.msra.mxu1 %v19723_v6  ;;  %v19756_v6 = vld [vmem:[#allocation4 + $0xba0] ss:$48 sps:$4 sm:$0xff]  }
 0x1e6   : > { %12978 = vmatprep.subr.bf16.mxu0 %v19728_v7  ;;  %13488 = vmatprep.subr.bf16.mxu1 %v19731_v8  ;;  %v19759_v8 = vld [vmem:[#allocation4 + $0xba8] ss:$48 sps:$4 sm:$0xff]  }
 0x1e9   : > { %12979 = vmatpush1.bf16.msra.mxu0 %v19726_v12  ;;  %13489 = vmatpush1.bf16.msra.mxu1 %v19729_v14  ;;  %v19764_v12 = vld [vmem:[#allocation4 + $0xc04] ss:$48 sps:$4 sm:$0xff]  }
 0x1ea   : > { %12980 = vmatprep.subr.bf16.mxu0 %v19734_v17  ;;  %13490 = vmatprep.subr.bf16.mxu1 %v19737_v18 }
 0x1ed   : > { %12981 = vmatpush1.bf16.msra.mxu0 %v19732_v20  ;;  %13491 = vmatpush1.bf16.msra.mxu1 %v19735_v21 }
 0x1ee   : > { %12982 = vmatprep.subr.bf16.mxu0 %v19740_v22  ;;  %13492 = vmatprep.subr.bf16.mxu1 %v19743_v23  ;;  %v19767_v23 = vld [vmem:[#allocation4 + $0xc0c] ss:$48 sps:$4 sm:$0xff]  }
 0x1f1   : > { %v1281_v46 = vpop.f32.mrb[8].mxu0  ;;  %12983 = vmatpush1.bf16.msra.mxu0 %v19738_v26  ;;  %13493 = vmatpush1.bf16.msra.mxu1 %v19741_v24 }
 0x1f2   : > { %v1282_v47 = vadd.f32 %v1281_v46, %v563_v30  ;;  %v1334_v48 = vpop.f32.mrb[8].mxu1  ;;  %v1283_v49 = vpop.f32.mrb[9].mxu0  ;;  %12984 = vmatprep.subr.bf16.mxu0 %v19746_v28  ;;  %13494 = vmatprep.subr.bf16.mxu1 %v19749_v29 }
 0x1f3   : > { %v1335_v50 = vadd.f32 %v1334_v48, %v571_v32  ;;  %v1284_v51 = vadd.f32 %v1283_v49, %v567_v33  ;;  %v1336_v1 = vpop.f32.mrb[9].mxu1  ;;  %v1285_v0 = vpop.f32.mrb[10].mxu0 }
 0x1f4   : > { %v1286_v52 = vadd.f32 %v1285_v0, %v563_v30  ;;  %v1337_v53 = vpop.f32.mrb[10].mxu1  ;;  %v1287_v37 = vpop.f32.mrb[11].mxu0  ;;  %v1353_v59 = vmax.f32 %v1282_v47, 0.0 }
 0x1f5   : > { %v1338_v56 = vadd.f32 %v1337_v53, %v571_v32  ;;  %v1288_v42 = vadd.f32 %v1287_v37, %v567_v33  ;;  %v1339_v57 = vpop.f32.mrb[11].mxu1  ;;  %12985 = vmatpush1.bf16.msra.mxu0 %v19744_v34  ;;  %13495 = vmatpush1.bf16.msra.mxu1 %v19747_v35  ;;  %v1355_v61 = vmax.f32 %v1335_v50, 0.0  ;;  %v1354_v62 = vmax.f32 %v1284_v51, 0.0  ;;  %v19765_v50 = vld [vmem:[#allocation4 + $0xc08] ss:$48 sps:$4 sm:$0xff]  }
 0x1f6   : > { %v1360_v60 = vmax.f32 %v1286_v52, 0.0  ;;  %12986 = vmatprep.subr.bf16.mxu0 %v19752_v19  ;;  %13496 = vmatprep.subr.bf16.mxu1 %v19755_v45  ;;  %v19762_v45 = vld [vmem:[#allocation4 + $0xc00] ss:$48 sps:$4 sm:$0xff]  }
 0x1f7   : > { %v1362_v63 = vmax.f32 %v1338_v56, 0.0  ;;  %v1361_v4 = vmax.f32 %v1288_v42, 0.0  ;;  %v19768_v57 = vld [vmem:[#allocation4 + $0xc60] ss:$48 sps:$4 sm:$0xff]  }
 0x1f8   : > { %v23227_v7 = vpack.c.bf16 %v1360_v60, %v1353_v59 }
 0x1f9   : > { %v23229_v14 = vpack.c.bf16 %v1362_v63, %v1355_v61  ;;  %v23231_v17 = vpack.c.bf16 %v1361_v4, %v1354_v62  ;;  %v1291_v18 = vpop.f32.mrb[12].mxu0  ;;  %12987 = vmatpush1.bf16.msra.mxu0 %v19750_v41  ;;  %13497 = vmatpush1.bf16.msra.mxu1 %v19753_v55  ;;  %v19770_v41 = vld [vmem:[#allocation4 + $0xc64] ss:$48 sps:$4 sm:$0xff]   ;;  %v19773_v55 = vld [vmem:[#allocation4 + $0xc6c] ss:$48 sps:$4 sm:$0xff]  }
 0x1fa   : > { %23996 = vst [vmem:[#allocation14_spill] sm:$0xff] %v23227_v7  ;;  %v1292_v20 = vadd.f32 %v1291_v18, %v563_v30  ;;  %v1342_v21 = vpop.f32.mrb[12].mxu1  ;;  %v1293_v22 = vpop.f32.mrb[13].mxu0  ;;  %12988 = vmatprep.subr.bf16.mxu0 %v19758_v15  ;;  %13498 = vmatprep.subr.bf16.mxu1 %v19761_v58  ;;  %v1443_v46 = vshll.u32 %v23227_v7, 16  ;;  %v19771_v15 = vld [vmem:[#allocation4 + $0xc68] ss:$48 sps:$4 sm:$0xff]  }
 0x1fb   : > { %v1343_v26 = vadd.f32 %v1342_v21, %v571_v32  ;;  %v1294_v24 = vadd.f32 %v1293_v22, %v567_v33  ;;  %v1344_v28 = vpop.f32.mrb[13].mxu1  ;;  %v1295_v29 = vpop.f32.mrb[14].mxu0  ;;  %v1455_v51 = vshll.u32 %v23231_v17, 16  ;;  %v1441_v59 = vshrl.u32 %v23227_v7, 16  ;;  %v19776_v61 = vld [vmem:[#allocation4 + $0xcc4] ss:$48 sps:$4 sm:$0xff]  }
 0x1fc   : > { %v1296_v34 = vadd.f32 %v1295_v29, %v563_v30  ;;  %v1345_v35 = vpop.f32.mrb[14].mxu1  ;;  %v1297_v19 = vpop.f32.mrb[15].mxu0  ;;  %v1367_v1 = vmax.f32 %v1292_v20, 0.0  ;;  %v19779_v62 = vld [vmem:[#allocation4 + $0xccc] ss:$48 sps:$4 sm:$0xff]   ;;  %v1453_v63 = vshrl.u32 %v23231_v17, 16 }
 0x1fd   : > { %v1346_v47 = vadd.f32 %v1345_v35, %v571_v32  ;;  %v1298_v48 = vadd.f32 %v1297_v19, %v567_v33  ;;  %v1347_v49 = vpop.f32.mrb[15].mxu1  ;;  %12989 = vmatpush1.bf16.msra.mxu0 %v19756_v6  ;;  %13499 = vmatpush1.bf16.msra.mxu1 %v19759_v8  ;;  %v1369_v52 = vmax.f32 %v1343_v26, 0.0  ;;  %v1368_v30 = vmax.f32 %v1294_v24, 0.0  ;;  %v19774_v21 = vld [vmem:[#allocation4 + $0xcc0] ss:$48 sps:$4 sm:$0xff]  }
 0x1fe   : > { %v1374_v0 = vmax.f32 %v1296_v34, 0.0  ;;  %13009 = vmatprep.subr.bf16.mxu0 %v19764_v12  ;;  %13519 = vmatprep.subr.bf16.mxu1 %v19767_v23  ;;  %v1445_v32 = vrot.slane %v1443_v46, 1  ;;  %v1457_v58 = vrot.slane %v1455_v51, 1  ;;  %v1467_v12 = vshll.u32 %v23229_v14, 16  ;;  %v19777_v22 = vld [vmem:[#allocation4 + $0xcc8] ss:$48 sps:$4 sm:$0xff]  }
 0x1ff   : > { %v1376_v53 = vmax.f32 %v1346_v47, 0.0  ;;  %v1375_v37 = vmax.f32 %v1298_v48, 0.0  ;;  %v19782_v26 = vld [vmem:[#allocation4 + $0xd24] ss:$48 sps:$4 sm:$0xff]   ;;  %v19780_v34 = vld [vmem:[#allocation4 + $0xd20] ss:$48 sps:$4 sm:$0xff]  }
 0x200   : > { %v23235_v56 = vpack.c.bf16 %v1374_v0, %v1367_v1  ;;  %12991 = vmatmul.mubr.bf16.vlgmr.msra.gmra.mrb[16].mxu0 %v23157_v9  ;;  %13501 = vmatmul.mubr.bf16.vlgmr.msra.gmra.mrb[16].mxu1 %v23157_v9  ;;  %v1446_v6 = vor.u32 %v1445_v32, %v1441_v59  ;;  %v1458_v18 = vor.u32 %v1457_v58, %v1453_v63  ;;  %v19783_v19 = vld [vmem:[#allocation4 + $0xd28] ss:$48 sps:$4 sm:$0xff]   ;;  %v19785_v47 = vld [vmem:[#allocation4 + $0xd2c] ss:$48 sps:$4 sm:$0xff]   ;;  %v19788_v48 = vld [vmem:[#allocation4 + $0xd84] ss:$48 sps:$4 sm:$0xff]  }
 0x201   : > { %v23239_v33 = vpack.c.bf16 %v1376_v53, %v1369_v52  ;;  %v23241_v42 = vpack.c.bf16 %v1375_v37, %v1368_v30  ;;  %13000 = vmatprep.mubr.bf16.mxu0 %v23181_v44  ;;  %13010 = vmatpush1.bf16.msra.mxu0 %v19762_v45  ;;  %v1469_v45 = vrot.slane %v1467_v12, 1  ;;  %v19791_v1 = vld [vmem:[#allocation4 + $0xd8c] ss:$48 sps:$4 sm:$0xff]   ;;  %v19786_v0 = vld [vmem:[#allocation4 + $0xd80] ss:$48 sps:$4 sm:$0xff]  }
 0x202   : > { %23997 = vst [vmem:[#allocation15_spill] sm:$0xff] %v23235_v56  ;;  %13510 = vmatprep.mubr.bf16.mxu1 %v23181_v44  ;;  %13520 = vmatpush1.bf16.msra.mxu1 %v19765_v50  ;;  %v1448_v60 = vshll.u32 %v23235_v56, 16  ;;  %v1488_v29 = vshrl.u32 %v23235_v56, 16  ;;  %v1465_v50 = vshrl.u32 %v23229_v14, 16  ;;  %v19789_v30 = vld [vmem:[#allocation4 + $0xd88] ss:$48 sps:$4 sm:$0xff]  }
 0x203   : > { %23998 = vst [vmem:[#allocation16_spill] sm:$0xff] %v23241_v42  ;;  %13011 = vmatprep.subr.bf16.mxu0 %v19770_v41  ;;  %13521 = vmatprep.subr.bf16.mxu1 %v19773_v55  ;;  %v1460_v4 = vshll.u32 %v23241_v42, 16  ;;  %v1472_v24 = vshll.u32 %v23239_v33, 16  ;;  %v1491_v35 = vshrl.u32 %v23241_v42, 16  ;;  %v1494_v52 = vshrl.u32 %v23239_v33, 16 }
 0x204   : > { %v1450_v8 = vrot.slane %v1448_v60, 1  ;;  %v1470_v41 = vor.u32 %v1469_v45, %v1465_v50  ;;  %v19794_v53 = vld [vmem:[#allocation4 + $0xde4] ss:$48 sps:$4 sm:$0xff]   ;;  %v19797_v37 = vld [vmem:[#allocation4 + $0xdec] ss:$48 sps:$4 sm:$0xff]  }
 0x205   : > { %13012 = vmatpush1.bf16.msra.mxu0 %v19768_v57  ;;  %v1462_v20 = vrot.slane %v1460_v4, 1  ;;  %v1474_v51 = vrot.slane %v1472_v24, 1  ;;  %v19792_v57 = vld [vmem:[#allocation4 + $0xde0] ss:$48 sps:$4 sm:$0xff]   ;;  %v19800_v58 = vld [vmem:[#allocation4 + $0xe44] ss:$48 sps:$4 sm:$0xff]  }
 0x206   : > { %13522 = vmatpush1.bf16.msra.mxu1 %v19771_v15  ;;  %v1451_v23 = vsel %vm1391_vm12, %v1446_v6, %v1450_v8  ;;  %13013 = vmatprep.subr.bf16.mxu0 %v19776_v61  ;;  %v1490_v46 = vor.u32 %v1488_v29, %v1450_v8  ;;  %v19795_v15 = vld [vmem:[#allocation4 + $0xde8] ss:$48 sps:$4 sm:$0xff]   ;;  %v19803_v59 = vld [vmem:[#allocation4 + $0xe4c] ss:$48 sps:$4 sm:$0xff]   ;;  %v19798_v60 = vld [vmem:[#allocation4 + $0xe40] ss:$48 sps:$4 sm:$0xff]  }
 0x207   : > { %1505 = vrot.lane.b32.xlu0 %v1451_v23, %s22491_s24  ;;  %v1463_v28 = vsel %vm1391_vm12, %v1458_v18, %v1462_v20  ;;  %13523 = vmatprep.subr.bf16.mxu1 %v19779_v62  ;;  %v1493_v49 = vor.u32 %v1491_v35, %v1462_v20  ;;  %v1475_v55 = vsel %vm1391_vm12, %v1470_v41, %v1474_v51  ;;  %v19801_v61 = vld [vmem:[#allocation4 + $0xe48] ss:$48 sps:$4 sm:$0xff]   ;;  %v19806_v62 = vld [vmem:[#allocation4 + $0xea4] ss:$48 sps:$4 sm:$0xff]   ;;  %v19809_v63 = vld [vmem:[#allocation4 + $0xeac] ss:$48 sps:$4 sm:$0xff]  }
 0x208   : > { %1507 = vrot.lane.b32.xlu1 %v1463_v28, %s22491_s24  ;;  %13001 = vmatmul.mubr.bf16.gmra.mrb[20].mxu0 %v23177_v16  ;;  %v1496_v32 = vor.u32 %v1494_v52, %v1474_v51  ;;  %v19804_v4 = vld [vmem:[#allocation4 + $0xea0] ss:$48 sps:$4 sm:$0xff]   ;;  %v19807_v6 = vld [vmem:[#allocation4 + $0xea8] ss:$48 sps:$4 sm:$0xff]   ;;  %v19812_v8 = vld [vmem:[#allocation4 + $0xf04] ss:$48 sps:$4 sm:$0xff]  }
 0x209   : > { %13511 = vmatmul.mubr.bf16.gmra.mrb[20].mxu1 %v23177_v16  ;;  %13014 = vmatpush1.bf16.msra.mxu0 %v19774_v21  ;;  %v19815_v12 = vld [vmem:[#allocation4 + $0xf0c] ss:$48 sps:$4 sm:$0xff]   ;;  %v19810_v18 = vld [vmem:[#allocation4 + $0xf00] ss:$48 sps:$4 sm:$0xff]   ;;  %v19813_v20 = vld [vmem:[#allocation4 + $0xf08] ss:$48 sps:$4 sm:$0xff]  }
 0x20a   : > { %13041 = vmatprep.mubr.bf16.mxu0 %v23231_v17  ;;  %13524 = vmatpush1.bf16.msra.mxu1 %v19777_v22  ;;  %v19818_v21 = vld [vmem:[#allocation4 + $0xf64] ss:$48 sps:$4 sm:$0xff]   ;;  %v19821_v22 = vld [vmem:[#allocation4 + $0xf6c] ss:$48 sps:$4 sm:$0xff]   ;;  %v19816_v23 = vld [vmem:[#allocation4 + $0xf60] ss:$48 sps:$4 sm:$0xff]  }
 0x20b   : > { %13551 = vmatprep.mubr.bf16.mxu1 %v23231_v17  ;;  %1519 = vrot.lane.b32.xlu0 %v1490_v46, %s22491_s24  ;;  %v19824_v24 = vld [vmem:[#allocation4 + $0xfc4] ss:$48 sps:$4 sm:$0xff]   ;;  %v19827_v28 = vld [vmem:[#allocation4 + $0xfcc] ss:$48 sps:$4 sm:$0xff]   ;;  %v19822_v29 = vld [vmem:[#allocation4 + $0xfc0] ss:$48 sps:$4 sm:$0xff]  }
 0x20c   : > { %1521 = vrot.lane.b32.xlu1 %v1493_v49, %s22491_s24  ;;  %13015 = vmatprep.subr.bf16.mxu0 %v19782_v26  ;;  %v19819_v26 = vld [vmem:[#allocation4 + $0xf68] ss:$48 sps:$4 sm:$0xff]   ;;  %v19830_v35 = vld [vmem:[#allocation4 + $0x1024] ss:$48 sps:$4 sm:$0xff]   ;;  %v19828_v45 = vld [vmem:[#allocation4 + $0x1020] ss:$48 sps:$4 sm:$0xff]  }
 0x20d   : > { %13525 = vmatprep.subr.bf16.mxu1 %v19785_v47  ;;  %13016 = vmatpush1.bf16.msra.mxu0 %v19780_v34  ;;  %v19825_v34 = vld [vmem:[#allocation4 + $0xfc8] ss:$48 sps:$4 sm:$0xff]   ;;  %v19836_v47 = vld [vmem:[#allocation4 + $0x1084] ss:$48 sps:$4 sm:$0xff]   ;;  %v19834_v49 = vld [vmem:[#allocation4 + $0x1080] ss:$48 sps:$4 sm:$0xff]  }
 0x20e   : > { %13526 = vmatpush1.bf16.msra.mxu1 %v19783_v19  ;;  %13017 = vmatprep.subr.bf16.mxu0 %v19788_v48  ;;  %v19833_v19 = vld [vmem:[#allocation4 + $0x102c] ss:$48 sps:$4 sm:$0xff]   ;;  %v19831_v46 = vld [vmem:[#allocation4 + $0x1028] ss:$48 sps:$4 sm:$0xff]   ;;  %v19842_v51 = vld [vmem:[#allocation4 + $0x10e4] ss:$48 sps:$4 sm:$0xff]  }
 0x20f   : > { %1509 = vrot.lane.b32.xlu0 %v1475_v55, %s22491_s24  ;;  %13527 = vmatprep.subr.bf16.mxu1 %v19791_v1  ;;  %v19839_v48 = vld [vmem:[#allocation4 + $0x108c] ss:$48 sps:$4 sm:$0xff]   ;;  %v19837_v50 = vld [vmem:[#allocation4 + $0x1088] ss:$48 sps:$4 sm:$0xff]   ;;  %v19848_v52 = vld [vmem:[#allocation4 + $0x1144] ss:$48 sps:$4 sm:$0xff]  }
 0x210   : > { %1523 = vrot.lane.b32.xlu1 %v1496_v32, %s22491_s24  ;;  %v19845_v1 = vld [vmem:[#allocation4 + $0x10ec] ss:$48 sps:$4 sm:$0xff]   ;;  %v19843_v41 = vld [vmem:[#allocation4 + $0x10e8] ss:$48 sps:$4 sm:$0xff]   ;;  %v19854_v55 = vld [vmem:[#allocation4 + $0x11a4] ss:$48 sps:$4 sm:$0xff]  }
 0x211   : > { %13018 = vmatpush1.bf16.msra.mxu0 %v19786_v0  ;;  %v19840_v0 = vld [vmem:[#allocation4 + $0x10e0] ss:$48 sps:$4 sm:$0xff]   ;;  %v19857_v32 = vld [vmem:[#allocation4 + $0x11ac] ss:$48 sps:$4 sm:$0xff]  }
 0x212   : > { %13528 = vmatpush1.bf16.msra.mxu1 %v19789_v30  ;;  %13019 = vmatprep.subr.bf16.mxu0 %v19794_v53  ;;  %v19851_v30 = vld [vmem:[#allocation4 + $0x114c] ss:$48 sps:$4 sm:$0xff]   ;;  %v19846_v53 = vld [vmem:[#allocation4 + $0x1140] ss:$48 sps:$4 sm:$0xff]  }
 0x213   : > { %13529 = vmatprep.subr.bf16.mxu1 %v19797_v37  ;;  %v19849_v37 = vld [vmem:[#allocation4 + $0x1148] ss:$48 sps:$4 sm:$0xff]  }
 0x215   : > { %13020 = vmatpush1.bf16.msra.mxu0 %v19792_v57  ;;  %v19852_v57 = vld [vmem:[#allocation4 + $0x11a0] ss:$48 sps:$4 sm:$0xff]  }
 0x216   : > { %13530 = vmatpush1.bf16.msra.mxu1 %v19795_v15  ;;  %13021 = vmatprep.subr.bf16.mxu0 %v19800_v58  ;;  %v19855_v15 = vld [vmem:[#allocation4 + $0x11a8] ss:$48 sps:$4 sm:$0xff]   ;;  %v19860_v58 = vld [vmem:[#allocation4 + $0x1204] ss:$48 sps:$4 sm:$0xff]  }
 0x217   : > { %13531 = vmatprep.subr.bf16.mxu1 %v19803_v59  ;;  %v19863_v59 = vld [vmem:[#allocation4 + $0x120c] ss:$48 sps:$4 sm:$0xff]  }
 0x219   : > { %13022 = vmatpush1.bf16.msra.mxu0 %v19798_v60  ;;  %v19858_v60 = vld [vmem:[#allocation4 + $0x1200] ss:$48 sps:$4 sm:$0xff]  }
 0x21a   : > { %13532 = vmatpush1.bf16.msra.mxu1 %v19801_v61  ;;  %13023 = vmatprep.subr.bf16.mxu0 %v19806_v62  ;;  %v19861_v61 = vld [vmem:[#allocation4 + $0x1208] ss:$48 sps:$4 sm:$0xff]   ;;  %v19866_v62 = vld [vmem:[#allocation4 + $0x1264] ss:$48 sps:$4 sm:$0xff]  }
 0x21b   : > { %13533 = vmatprep.subr.bf16.mxu1 %v19809_v63  ;;  %v19869_v63 = vld [vmem:[#allocation4 + $0x126c] ss:$48 sps:$4 sm:$0xff]  }
 0x21d   : > { %13024 = vmatpush1.bf16.msra.mxu0 %v19804_v4  ;;  %v19864_v4 = vld [vmem:[#allocation4 + $0x1260] ss:$48 sps:$4 sm:$0xff]  }
 0x21e   : > { %13534 = vmatpush1.bf16.msra.mxu1 %v19807_v6  ;;  %13025 = vmatprep.subr.bf16.mxu0 %v19812_v8  ;;  %v19867_v6 = vld [vmem:[#allocation4 + $0x1268] ss:$48 sps:$4 sm:$0xff]   ;;  %v19872_v8 = vld [vmem:[#allocation4 + $0x12c4] ss:$48 sps:$4 sm:$0xff]  }
 0x21f   : > { %13535 = vmatprep.subr.bf16.mxu1 %v19815_v12  ;;  %v19875_v12 = vld [vmem:[#allocation4 + $0x12cc] ss:$48 sps:$4 sm:$0xff]  }
 0x221   : > { %13026 = vmatpush1.bf16.msra.mxu0 %v19810_v18 }
 0x222   : > { %13536 = vmatpush1.bf16.msra.mxu1 %v19813_v20  ;;  %13027 = vmatprep.subr.bf16.mxu0 %v19818_v21  ;;  %v19870_v21 = vld [vmem:[#allocation4 + $0x12c0] ss:$48 sps:$4 sm:$0xff]  }
 0x223   : > { %13537 = vmatprep.subr.bf16.mxu1 %v19821_v22  ;;  %v19873_v22 = vld [vmem:[#allocation4 + $0x12c8] ss:$48 sps:$4 sm:$0xff]  }
 0x225   : > { %13028 = vmatpush1.bf16.msra.mxu0 %v19816_v23  ;;  %v19878_v23 = vld [vmem:[#allocation4 + $0x1324] ss:$48 sps:$4 sm:$0xff]  }
 0x226   : > { %13538 = vmatpush1.bf16.msra.mxu1 %v19819_v26  ;;  %13029 = vmatprep.subr.bf16.mxu0 %v19824_v24  ;;  %v19881_v26 = vld [vmem:[#allocation4 + $0x132c] ss:$48 sps:$4 sm:$0xff]  }
 0x227   : > { %13539 = vmatprep.subr.bf16.mxu1 %v19827_v28  ;;  %v19876_v28 = vld [vmem:[#allocation4 + $0x1320] ss:$48 sps:$4 sm:$0xff]  }
 0x229   : > { %13030 = vmatpush1.bf16.msra.mxu0 %v19822_v29  ;;  %v19879_v29 = vld [vmem:[#allocation4 + $0x1328] ss:$48 sps:$4 sm:$0xff]  }
 0x22a   : > { %13540 = vmatpush1.bf16.msra.mxu1 %v19825_v34  ;;  %13031 = vmatprep.subr.bf16.mxu0 %v19830_v35  ;;  %v19884_v34 = vld [vmem:[#allocation4 + $0x1384] ss:$48 sps:$4 sm:$0xff]   ;;  %v19887_v35 = vld [vmem:[#allocation4 + $0x138c] ss:$48 sps:$4 sm:$0xff]  }
 0x22b   : > { %13541 = vmatprep.subr.bf16.mxu1 %v19833_v19  ;;  %v19882_v19 = vld [vmem:[#allocation4 + $0x1380] ss:$48 sps:$4 sm:$0xff]  }
 0x22d   : > { %13032 = vmatpush1.bf16.msra.mxu0 %v19828_v45  ;;  %v19885_v45 = vld [vmem:[#allocation4 + $0x1388] ss:$48 sps:$4 sm:$0xff]  }
 0x22e   : > { %13542 = vmatpush1.bf16.msra.mxu1 %v19831_v46  ;;  %13033 = vmatprep.subr.bf16.mxu0 %v19836_v47  ;;  %v19890_v46 = vld [vmem:[#allocation4 + $0x13e4] ss:$48 sps:$4 sm:$0xff]   ;;  %v19893_v47 = vld [vmem:[#allocation4 + $0x13ec] ss:$48 sps:$4 sm:$0xff]  }
 0x22f   : > { %13543 = vmatprep.subr.bf16.mxu1 %v19839_v48  ;;  %v19888_v48 = vld [vmem:[#allocation4 + $0x13e0] ss:$48 sps:$4 sm:$0xff]  }
 0x231   : > { %13034 = vmatpush1.bf16.msra.mxu0 %v19834_v49  ;;  %v19891_v49 = vld [vmem:[#allocation4 + $0x13e8] ss:$48 sps:$4 sm:$0xff]  }
 0x232   : > { %13544 = vmatpush1.bf16.msra.mxu1 %v19837_v50  ;;  %13035 = vmatprep.subr.bf16.mxu0 %v19842_v51  ;;  %v19896_v50 = vld [vmem:[#allocation4 + $0x1444] ss:$48 sps:$4 sm:$0xff]   ;;  %v19899_v51 = vld [vmem:[#allocation4 + $0x144c] ss:$48 sps:$4 sm:$0xff]  }
 0x233   : > { %13545 = vmatprep.subr.bf16.mxu1 %v19845_v1  ;;  %v19894_v1 = vld [vmem:[#allocation4 + $0x1440] ss:$48 sps:$4 sm:$0xff]  }
 0x235   : > { %13036 = vmatpush1.bf16.msra.mxu0 %v19840_v0  ;;  %v19897_v0 = vld [vmem:[#allocation4 + $0x1448] ss:$48 sps:$4 sm:$0xff]  }
 0x236   : > { %13546 = vmatpush1.bf16.msra.mxu1 %v19843_v41  ;;  %13037 = vmatprep.subr.bf16.mxu0 %v19848_v52  ;;  %v19902_v41 = vld [vmem:[#allocation4 + $0x14a4] ss:$48 sps:$4 sm:$0xff]   ;;  %v19905_v52 = vld [vmem:[#allocation4 + $0x14ac] ss:$48 sps:$4 sm:$0xff]  }
 0x237   : > { %13547 = vmatprep.subr.bf16.mxu1 %v19851_v30  ;;  %v19900_v30 = vld [vmem:[#allocation4 + $0x14a0] ss:$48 sps:$4 sm:$0xff]  }
 0x239   : > { %13038 = vmatpush1.bf16.msra.mxu0 %v19846_v53  ;;  %v19903_v53 = vld [vmem:[#allocation4 + $0x14a8] ss:$48 sps:$4 sm:$0xff]  }
 0x23a   : > { %13548 = vmatpush1.bf16.msra.mxu1 %v19849_v37  ;;  %13039 = vmatprep.subr.bf16.mxu0 %v19854_v55  ;;  %v19908_v37 = vld [vmem:[#allocation4 + $0x1504] ss:$48 sps:$4 sm:$0xff]   ;;  %v19911_v55 = vld [vmem:[#allocation4 + $0x150c] ss:$48 sps:$4 sm:$0xff]  }
 0x23b   : > { %13549 = vmatprep.subr.bf16.mxu1 %v19857_v32  ;;  %v19906_v32 = vld [vmem:[#allocation4 + $0x1500] ss:$48 sps:$4 sm:$0xff]  }
 0x23d   : > { %13040 = vmatpush1.bf16.msra.mxu0 %v19852_v57  ;;  %v19909_v57 = vld [vmem:[#allocation4 + $0x1508] ss:$48 sps:$4 sm:$0xff]  }
 0x23e   : > { %13550 = vmatpush1.bf16.msra.mxu1 %v19855_v15  ;;  %13060 = vmatprep.subr.bf16.mxu0 %v19860_v58  ;;  %v19914_v15 = vld [vmem:[#allocation4 + $0x1564] ss:$48 sps:$4 sm:$0xff]   ;;  %v19917_v58 = vld [vmem:[#allocation4 + $0x156c] ss:$48 sps:$4 sm:$0xff]  }
 0x23f   : > { %13570 = vmatprep.subr.bf16.mxu1 %v19863_v59  ;;  %v19912_v59 = vld [vmem:[#allocation4 + $0x1560] ss:$48 sps:$4 sm:$0xff]  }
 0x240   : > { %13042 = vmatmul.mubr.bf16.vlgmr.msra.gmra.mrb[16].mxu0 %v23227_v7 }
 0x241   : > { %13552 = vmatmul.mubr.bf16.vlgmr.msra.gmra.mrb[16].mxu1 %v23227_v7  ;;  %13051 = vmatprep.mubr.bf16.mxu0 %v23241_v42 }
 0x242   : > { %13061 = vmatpush1.bf16.msra.mxu0 %v19858_v60  ;;  %13561 = vmatprep.mubr.bf16.mxu1 %v23241_v42  ;;  %v23272_v18 = vpop.permute.xlu0 %1497  ;;  %v23274_v20 = vpop.permute.xlu1 %1499  ;;  %v19915_v60 = vld [vmem:[#allocation4 + $0x1568] ss:$48 sps:$4 sm:$0xff]  }
 0x243   : > { %13571 = vmatpush1.bf16.msra.mxu1 %v19861_v61  ;;  %13062 = vmatprep.subr.bf16.mxu0 %v19866_v62  ;;  %v23279_v24 = vsel %vm1525_vm13, %v23272_v18, %v23274_v20  ;;  %v19920_v61 = vld [vmem:[#allocation4 + $0x15c4] ss:$48 sps:$4 sm:$0xff]   ;;  %v19923_v62 = vld [vmem:[#allocation4 + $0x15cc] ss:$48 sps:$4 sm:$0xff]  }
 0x244   : > { %13572 = vmatprep.subr.bf16.mxu1 %v19869_v63  ;;  %23999 = vst [vmem:[#allocation17_spill] sm:$0xff] %v23279_v24  ;;  %v19918_v63 = vld [vmem:[#allocation4 + $0x15c0] ss:$48 sps:$4 sm:$0xff]  }
 0x246   : > { %13063 = vmatpush1.bf16.msra.mxu0 %v19864_v4  ;;  %v19921_v4 = vld [vmem:[#allocation4 + $0x15c8] ss:$48 sps:$4 sm:$0xff]  }
 0x247   : > { %13573 = vmatpush1.bf16.msra.mxu1 %v19867_v6  ;;  %13064 = vmatprep.subr.bf16.mxu0 %v19872_v8  ;;  %v19926_v6 = vld [vmem:[#allocation4 + $0x1624] ss:$48 sps:$4 sm:$0xff]   ;;  %v19929_v8 = vld [vmem:[#allocation4 + $0x162c] ss:$48 sps:$4 sm:$0xff]  }
 0x248   : > { %13052 = vmatmul.mubr.bf16.gmra.mrb[20].mxu0 %v23235_v56  ;;  %13574 = vmatprep.subr.bf16.mxu1 %v19875_v12  ;;  %v19924_v12 = vld [vmem:[#allocation4 + $0x1620] ss:$48 sps:$4 sm:$0xff]  }
 0x249   : > { %13562 = vmatmul.mubr.bf16.gmra.mrb[20].mxu1 %v23235_v56  ;;  %13092 = vmatprep.mubr.bf16.mxu0 %v23279_v24 }
 0x24a   : > { %13065 = vmatpush1.bf16.msra.mxu0 %v19870_v21  ;;  %13602 = vmatprep.mubr.bf16.mxu1 %v23279_v24  ;;  %v19927_v21 = vld [vmem:[#allocation4 + $0x1628] ss:$48 sps:$4 sm:$0xff]  }
 0x24b   : > { %13575 = vmatpush1.bf16.msra.mxu1 %v19873_v22  ;;  %13066 = vmatprep.subr.bf16.mxu0 %v19878_v23  ;;  %v19932_v22 = vld [vmem:[#allocation4 + $0x1684] ss:$48 sps:$4 sm:$0xff]   ;;  %v19935_v23 = vld [vmem:[#allocation4 + $0x168c] ss:$48 sps:$4 sm:$0xff]  }
 0x24c   : > { %13576 = vmatprep.subr.bf16.mxu1 %v19881_v26  ;;  %v19930_v26 = vld [vmem:[#allocation4 + $0x1680] ss:$48 sps:$4 sm:$0xff]  }
 0x24e   : > { %13067 = vmatpush1.bf16.msra.mxu0 %v19876_v28  ;;  %v19933_v28 = vld [vmem:[#allocation4 + $0x1688] ss:$48 sps:$4 sm:$0xff]  }
 0x24f   : > { %13577 = vmatpush1.bf16.msra.mxu1 %v19879_v29  ;;  %13068 = vmatprep.subr.bf16.mxu0 %v19884_v34  ;;  %v19938_v29 = vld [vmem:[#allocation4 + $0x16e4] ss:$48 sps:$4 sm:$0xff]   ;;  %v19941_v34 = vld [vmem:[#allocation4 + $0x16ec] ss:$48 sps:$4 sm:$0xff]  }
 0x250   : > { %13578 = vmatprep.subr.bf16.mxu1 %v19887_v35  ;;  %v19936_v35 = vld [vmem:[#allocation4 + $0x16e0] ss:$48 sps:$4 sm:$0xff]  }
 0x252   : > { %13069 = vmatpush1.bf16.msra.mxu0 %v19882_v19  ;;  %v19939_v19 = vld [vmem:[#allocation4 + $0x16e8] ss:$48 sps:$4 sm:$0xff]  }
 0x253   : > { %13579 = vmatpush1.bf16.msra.mxu1 %v19885_v45  ;;  %13070 = vmatprep.subr.bf16.mxu0 %v19890_v46  ;;  %v19944_v45 = vld [vmem:[#allocation4 + $0x1744] ss:$48 sps:$4 sm:$0xff]   ;;  %v19947_v46 = vld [vmem:[#allocation4 + $0x174c] ss:$48 sps:$4 sm:$0xff]  }
 0x254   : > { %13580 = vmatprep.subr.bf16.mxu1 %v19893_v47  ;;  %v19942_v47 = vld [vmem:[#allocation4 + $0x1740] ss:$48 sps:$4 sm:$0xff]  }
 0x256   : > { %13071 = vmatpush1.bf16.msra.mxu0 %v19888_v48  ;;  %v19945_v48 = vld [vmem:[#allocation4 + $0x1748] ss:$48 sps:$4 sm:$0xff]  }
 0x257   : > { %13581 = vmatpush1.bf16.msra.mxu1 %v19891_v49  ;;  %13072 = vmatprep.subr.bf16.mxu0 %v19896_v50  ;;  %v19950_v49 = vld [vmem:[#allocation4 + $0x17a4] ss:$48 sps:$4 sm:$0xff]   ;;  %v19953_v50 = vld [vmem:[#allocation4 + $0x17ac] ss:$48 sps:$4 sm:$0xff]  }
 0x258   : > { %13582 = vmatprep.subr.bf16.mxu1 %v19899_v51  ;;  %v19948_v51 = vld [vmem:[#allocation4 + $0x17a0] ss:$48 sps:$4 sm:$0xff]  }
 0x25a   : > { %13073 = vmatpush1.bf16.msra.mxu0 %v19894_v1  ;;  %v19951_v1 = vld [vmem:[#allocation4 + $0x17a8] ss:$48 sps:$4 sm:$0xff]  }
 0x25b   : > { %13583 = vmatpush1.bf16.msra.mxu1 %v19897_v0  ;;  %13074 = vmatprep.subr.bf16.mxu0 %v19902_v41  ;;  %v19956_v0 = vld [vmem:[#allocation4 + $0x1804] ss:$48 sps:$4 sm:$0xff]   ;;  %v19959_v41 = vld [vmem:[#allocation4 + $0x180c] ss:$48 sps:$4 sm:$0xff]  }
 0x25c   : > { %13584 = vmatprep.subr.bf16.mxu1 %v19905_v52  ;;  %v19954_v52 = vld [vmem:[#allocation4 + $0x1800] ss:$48 sps:$4 sm:$0xff]  }
 0x25e   : > { %13075 = vmatpush1.bf16.msra.mxu0 %v19900_v30  ;;  %v19957_v30 = vld [vmem:[#allocation4 + $0x1808] ss:$48 sps:$4 sm:$0xff]  }
 0x25f   : > { %13585 = vmatpush1.bf16.msra.mxu1 %v19903_v53  ;;  %13076 = vmatprep.subr.bf16.mxu0 %v19908_v37  ;;  %v19962_v53 = vld [vmem:[#allocation4 + $0x1864] ss:$48 sps:$4 sm:$0xff]   ;;  %v19965_v37 = vld [vmem:[#allocation4 + $0x186c] ss:$48 sps:$4 sm:$0xff]  }
 0x260   : > { %13586 = vmatprep.subr.bf16.mxu1 %v19911_v55  ;;  %v23288_v55 = vsel %vm1525_vm13, %v23229_v14, %v23272_v18  ;;  %v19963_v18 = vld [vmem:[#allocation4 + $0x1868] ss:$48 sps:$4 sm:$0xff]  }
 0x262   : > { %13077 = vmatpush1.bf16.msra.mxu0 %v19906_v32  ;;  %v1512_v32 = vpop.permute.xlu0 %1511 }
 0x263   : > { %13587 = vmatpush1.bf16.msra.mxu1 %v19909_v57  ;;  %13078 = vmatprep.subr.bf16.mxu0 %v19914_v15  ;;  %v23290_v57 = vpop.permute.xlu1 %1513 }
 0x264   : > { %13588 = vmatprep.subr.bf16.mxu1 %v19917_v58  ;;  %v23294_v15 = vsel %vm1525_vm13, %v1512_v32, %v23290_v57  ;;  %v19960_v58 = vld [vmem:[#allocation4 + $0x1860] ss:$48 sps:$4 sm:$0xff]  }
 0x266   : > { %13079 = vmatpush1.bf16.msra.mxu0 %v19912_v59  ;;  %v19968_v59 = vld [vmem:[#allocation4 + $0x18c4] ss:$48 sps:$4 sm:$0xff]  }
 0x267   : > { %13589 = vmatpush1.bf16.msra.mxu1 %v19915_v60  ;;  %13080 = vmatprep.subr.bf16.mxu0 %v19920_v61  ;;  %v19971_v60 = vld [vmem:[#allocation4 + $0x18cc] ss:$48 sps:$4 sm:$0xff]   ;;  %v23300_v61 = vpop.permute.xlu0 %1501 }
 0x268   : > { %13590 = vmatprep.subr.bf16.mxu1 %v19923_v62  ;;  %v23302_v62 = vpop.permute.xlu1 %1503 }
 0x26a   : > { %13081 = vmatpush1.bf16.msra.mxu0 %v19918_v63  ;;  %v19966_v63 = vld [vmem:[#allocation4 + $0x18c0] ss:$48 sps:$4 sm:$0xff]  }
 0x26b   : > { %13591 = vmatpush1.bf16.msra.mxu1 %v19921_v4  ;;  %13082 = vmatprep.subr.bf16.mxu0 %v19926_v6  ;;  %v19969_v4 = vld [vmem:[#allocation4 + $0x18c8] ss:$48 sps:$4 sm:$0xff]   ;;  %v19974_v6 = vld [vmem:[#allocation4 + $0x1924] ss:$48 sps:$4 sm:$0xff]  }
 0x26c   : > { %13592 = vmatprep.subr.bf16.mxu1 %v19929_v8  ;;  %v19977_v8 = vld [vmem:[#allocation4 + $0x192c] ss:$48 sps:$4 sm:$0xff]  }
 0x26e   : > { %13083 = vmatpush1.bf16.msra.mxu0 %v19924_v12  ;;  %v23306_v12 = vsel %vm1525_vm13, %v23239_v33, %v1512_v32  ;;  %v20010_v32 = vld [vmem:[#allocation4 + $0x1b64] ss:$48 sps:$4 sm:$0xff]  }
 0x26f   : > { %13593 = vmatpush1.bf16.msra.mxu1 %v19927_v21  ;;  %13084 = vmatprep.subr.bf16.mxu0 %v19932_v22  ;;  %v23311_v21 = vsel %vm1525_vm13, %v23300_v61, %v23302_v62  ;;  %v19972_v22 = vld [vmem:[#allocation4 + $0x1920] ss:$48 sps:$4 sm:$0xff]  }
 0x270   : > { %13594 = vmatprep.subr.bf16.mxu1 %v19935_v23  ;;  %v19975_v23 = vld [vmem:[#allocation4 + $0x1928] ss:$48 sps:$4 sm:$0xff]  }
 0x272   : > { %13085 = vmatpush1.bf16.msra.mxu0 %v19930_v26  ;;  %v19980_v26 = vld [vmem:[#allocation4 + $0x1984] ss:$48 sps:$4 sm:$0xff]  }
 0x273   : > { %13595 = vmatpush1.bf16.msra.mxu1 %v19933_v28  ;;  %13086 = vmatprep.subr.bf16.mxu0 %v19938_v29  ;;  %v19983_v28 = vld [vmem:[#allocation4 + $0x198c] ss:$48 sps:$4 sm:$0xff]   ;;  %v19978_v29 = vld [vmem:[#allocation4 + $0x1980] ss:$48 sps:$4 sm:$0xff]  }
 0x274   : > { %13596 = vmatprep.subr.bf16.mxu1 %v19941_v34  ;;  %v19981_v34 = vld [vmem:[#allocation4 + $0x1988] ss:$48 sps:$4 sm:$0xff]  }
 0x276   : > { %13087 = vmatpush1.bf16.msra.mxu0 %v19936_v35  ;;  %v19986_v35 = vld [vmem:[#allocation4 + $0x19e4] ss:$48 sps:$4 sm:$0xff]  }
 0x277   : > { %13597 = vmatpush1.bf16.msra.mxu1 %v19939_v19  ;;  %13088 = vmatprep.subr.bf16.mxu0 %v19944_v45  ;;  %v19989_v19 = vld [vmem:[#allocation4 + $0x19ec] ss:$48 sps:$4 sm:$0xff]   ;;  %v19984_v45 = vld [vmem:[#allocation4 + $0x19e0] ss:$48 sps:$4 sm:$0xff]  }
 0x278   : > { %13598 = vmatprep.subr.bf16.mxu1 %v19947_v46  ;;  %v19987_v46 = vld [vmem:[#allocation4 + $0x19e8] ss:$48 sps:$4 sm:$0xff]  }
 0x27a   : > { %13089 = vmatpush1.bf16.msra.mxu0 %v19942_v47  ;;  %v19992_v47 = vld [vmem:[#allocation4 + $0x1a44] ss:$48 sps:$4 sm:$0xff]  }
 0x27b   : > { %13599 = vmatpush1.bf16.msra.mxu1 %v19945_v48  ;;  %13090 = vmatprep.subr.bf16.mxu0 %v19950_v49  ;;  %v19995_v48 = vld [vmem:[#allocation4 + $0x1a4c] ss:$48 sps:$4 sm:$0xff]   ;;  %v19990_v49 = vld [vmem:[#allocation4 + $0x1a40] ss:$48 sps:$4 sm:$0xff]  }
 0x27c   : > { %13600 = vmatprep.subr.bf16.mxu1 %v19953_v50  ;;  %v19993_v50 = vld [vmem:[#allocation4 + $0x1a48] ss:$48 sps:$4 sm:$0xff]  }
 0x27e   : > { %13091 = vmatpush1.bf16.msra.mxu0 %v19948_v51  ;;  %v19998_v51 = vld [vmem:[#allocation4 + $0x1aa4] ss:$48 sps:$4 sm:$0xff]  }
 0x27f   : > { %13601 = vmatpush1.bf16.msra.mxu1 %v19951_v1  ;;  %13111 = vmatprep.subr.bf16.mxu0 %v19956_v0  ;;  %v20001_v1 = vld [vmem:[#allocation4 + $0x1aac] ss:$48 sps:$4 sm:$0xff]   ;;  %v19996_v0 = vld [vmem:[#allocation4 + $0x1aa0] ss:$48 sps:$4 sm:$0xff]  }
 0x280   : > { %13621 = vmatprep.subr.bf16.mxu1 %v19959_v41  ;;  %v19999_v41 = vld [vmem:[#allocation4 + $0x1aa8] ss:$48 sps:$4 sm:$0xff]  }
 0x281   : > { %13093 = vmatmul.mubr.bf16.vlgmr.msra.gmra.mrb[16].mxu0 %v23288_v55 }
 0x282   : > { %13603 = vmatmul.mubr.bf16.vlgmr.msra.gmra.mrb[16].mxu1 %v23288_v55  ;;  %13102 = vmatprep.mubr.bf16.mxu0 %v23294_v15 }
 0x283   : > { %13112 = vmatpush1.bf16.msra.mxu0 %v19954_v52  ;;  %13612 = vmatprep.mubr.bf16.mxu1 %v23294_v15  ;;  %v20004_v52 = vld [vmem:[#allocation4 + $0x1b04] ss:$48 sps:$4 sm:$0xff]  }
 0x284   : > { %13622 = vmatpush1.bf16.msra.mxu1 %v19957_v30  ;;  %13113 = vmatprep.subr.bf16.mxu0 %v19962_v53  ;;  %v20007_v30 = vld [vmem:[#allocation4 + $0x1b0c] ss:$48 sps:$4 sm:$0xff]   ;;  %v20002_v53 = vld [vmem:[#allocation4 + $0x1b00] ss:$48 sps:$4 sm:$0xff]  }
 0x285   : > { %13623 = vmatprep.subr.bf16.mxu1 %v19965_v37  ;;  %v20005_v37 = vld [vmem:[#allocation4 + $0x1b08] ss:$48 sps:$4 sm:$0xff]  }
 0x287   : > { %13114 = vmatpush1.bf16.msra.mxu0 %v19960_v58  ;;  %v20013_v58 = vld [vmem:[#allocation4 + $0x1b6c] ss:$48 sps:$4 sm:$0xff]  }
 0x288   : > { %13624 = vmatpush1.bf16.msra.mxu1 %v19963_v18  ;;  %13115 = vmatprep.subr.bf16.mxu0 %v19968_v59  ;;  %v20008_v18 = vld [vmem:[#allocation4 + $0x1b60] ss:$48 sps:$4 sm:$0xff]   ;;  %v20011_v59 = vld [vmem:[#allocation4 + $0x1b68] ss:$48 sps:$4 sm:$0xff]  }
 0x289   : > { %13103 = vmatmul.mubr.bf16.gmra.mrb[20].mxu0 %v23306_v12  ;;  %13625 = vmatprep.subr.bf16.mxu1 %v19971_v60  ;;  %v20016_v60 = vld [vmem:[#allocation4 + $0x1bc4] ss:$48 sps:$4 sm:$0xff]  }
 0x28a   : > { %13613 = vmatmul.mubr.bf16.gmra.mrb[20].mxu1 %v23306_v12  ;;  %13143 = vmatprep.mubr.bf16.mxu0 %v23311_v21 }
 0x28b   : > { %13116 = vmatpush1.bf16.msra.mxu0 %v19966_v63  ;;  %13653 = vmatprep.mubr.bf16.mxu1 %v23311_v21  ;;  %v20019_v63 = vld [vmem:[#allocation4 + $0x1bcc] ss:$48 sps:$4 sm:$0xff]  }
 0x28c   : > { %13626 = vmatpush1.bf16.msra.mxu1 %v19969_v4  ;;  %13117 = vmatprep.subr.bf16.mxu0 %v19974_v6  ;;  %v20014_v4 = vld [vmem:[#allocation4 + $0x1bc0] ss:$48 sps:$4 sm:$0xff]   ;;  %v20017_v6 = vld [vmem:[#allocation4 + $0x1bc8] ss:$48 sps:$4 sm:$0xff]  }
 0x28d   : > { %13627 = vmatprep.subr.bf16.mxu1 %v19977_v8  ;;  %v20022_v8 = vld [vmem:[#allocation4 + $0x1c24] ss:$48 sps:$4 sm:$0xff]  }
 0x28f   : > { %13118 = vmatpush1.bf16.msra.mxu0 %v19972_v22  ;;  %v20025_v22 = vld [vmem:[#allocation4 + $0x1c2c] ss:$48 sps:$4 sm:$0xff]  }
 0x290   : > { %13628 = vmatpush1.bf16.msra.mxu1 %v19975_v23  ;;  %13119 = vmatprep.subr.bf16.mxu0 %v19980_v26  ;;  %v20020_v23 = vld [vmem:[#allocation4 + $0x1c20] ss:$48 sps:$4 sm:$0xff]   ;;  %v20023_v26 = vld [vmem:[#allocation4 + $0x1c28] ss:$48 sps:$4 sm:$0xff]  }
 0x291   : > { %13629 = vmatprep.subr.bf16.mxu1 %v19983_v28  ;;  %v20028_v28 = vld [vmem:[#allocation4 + $0x1c84] ss:$48 sps:$4 sm:$0xff]  }
 0x293   : > { %13120 = vmatpush1.bf16.msra.mxu0 %v19978_v29  ;;  %v20031_v29 = vld [vmem:[#allocation4 + $0x1c8c] ss:$48 sps:$4 sm:$0xff]  }
 0x294   : > { %13630 = vmatpush1.bf16.msra.mxu1 %v19981_v34  ;;  %13121 = vmatprep.subr.bf16.mxu0 %v19986_v35  ;;  %v20026_v34 = vld [vmem:[#allocation4 + $0x1c80] ss:$48 sps:$4 sm:$0xff]   ;;  %v20029_v35 = vld [vmem:[#allocation4 + $0x1c88] ss:$48 sps:$4 sm:$0xff]  }
 0x295   : > { %13631 = vmatprep.subr.bf16.mxu1 %v19989_v19  ;;  %v20034_v19 = vld [vmem:[#allocation4 + $0x1ce4] ss:$48 sps:$4 sm:$0xff]  }
 0x297   : > { %13122 = vmatpush1.bf16.msra.mxu0 %v19984_v45  ;;  %v20037_v45 = vld [vmem:[#allocation4 + $0x1cec] ss:$48 sps:$4 sm:$0xff]  }
 0x298   : > { %13632 = vmatpush1.bf16.msra.mxu1 %v19987_v46  ;;  %13123 = vmatprep.subr.bf16.mxu0 %v19992_v47  ;;  %v20032_v46 = vld [vmem:[#allocation4 + $0x1ce0] ss:$48 sps:$4 sm:$0xff]   ;;  %v20035_v47 = vld [vmem:[#allocation4 + $0x1ce8] ss:$48 sps:$4 sm:$0xff]  }
 0x299   : > { %13633 = vmatprep.subr.bf16.mxu1 %v19995_v48  ;;  %v20040_v48 = vld [vmem:[#allocation4 + $0x1d44] ss:$48 sps:$4 sm:$0xff]  }
 0x29b   : > { %13124 = vmatpush1.bf16.msra.mxu0 %v19990_v49  ;;  %v20043_v49 = vld [vmem:[#allocation4 + $0x1d4c] ss:$48 sps:$4 sm:$0xff]  }
 0x29c   : > { %13634 = vmatpush1.bf16.msra.mxu1 %v19993_v50  ;;  %13125 = vmatprep.subr.bf16.mxu0 %v19998_v51  ;;  %v20038_v50 = vld [vmem:[#allocation4 + $0x1d40] ss:$48 sps:$4 sm:$0xff]   ;;  %v20041_v51 = vld [vmem:[#allocation4 + $0x1d48] ss:$48 sps:$4 sm:$0xff]  }
 0x29d   : > { %13635 = vmatprep.subr.bf16.mxu1 %v20001_v1  ;;  %v20046_v1 = vld [vmem:[#allocation4 + $0x1da4] ss:$48 sps:$4 sm:$0xff]  }
 0x29f   : > { %13126 = vmatpush1.bf16.msra.mxu0 %v19996_v0  ;;  %v20049_v0 = vld [vmem:[#allocation4 + $0x1dac] ss:$48 sps:$4 sm:$0xff]  }
 0x2a0   : > { %13636 = vmatpush1.bf16.msra.mxu1 %v19999_v41  ;;  %13127 = vmatprep.subr.bf16.mxu0 %v20004_v52  ;;  %v20044_v41 = vld [vmem:[#allocation4 + $0x1da0] ss:$48 sps:$4 sm:$0xff]   ;;  %v20047_v52 = vld [vmem:[#allocation4 + $0x1da8] ss:$48 sps:$4 sm:$0xff]  }
 0x2a1   : > { %13637 = vmatprep.subr.bf16.mxu1 %v20007_v30  ;;  %v20052_v30 = vld [vmem:[#allocation4 + $0x1e04] ss:$48 sps:$4 sm:$0xff]  }
 0x2a3   : > { %13128 = vmatpush1.bf16.msra.mxu0 %v20002_v53  ;;  %v20055_v53 = vld [vmem:[#allocation4 + $0x1e0c] ss:$48 sps:$4 sm:$0xff]  }
 0x2a4   : > { %13638 = vmatpush1.bf16.msra.mxu1 %v20005_v37  ;;  %13129 = vmatprep.subr.bf16.mxu0 %v20010_v32  ;;  %v20050_v37 = vld [vmem:[#allocation4 + $0x1e00] ss:$48 sps:$4 sm:$0xff]   ;;  %v23317_v32 = vpop.permute.xlu1 %1517 }
 0x2a5   : > { %13639 = vmatprep.subr.bf16.mxu1 %v20013_v58  ;;  %v1516_v58 = vpop.permute.xlu0 %1515 }
 0x2a7   : > { %13130 = vmatpush1.bf16.msra.mxu0 %v20008_v18  ;;  %v20053_v18 = vld [vmem:[#allocation4 + $0x1e08] ss:$48 sps:$4 sm:$0xff]  }
 0x2a8   : > { %13640 = vmatpush1.bf16.msra.mxu1 %v20011_v59  ;;  %13131 = vmatprep.subr.bf16.mxu0 %v20016_v60  ;;  %v20058_v59 = vld [vmem:[#allocation4 + $0x1e64] ss:$48 sps:$4 sm:$0xff]   ;;  %v20061_v60 = vld [vmem:[#allocation4 + $0x1e6c] ss:$48 sps:$4 sm:$0xff]  }
 0x2a9   : > { %13641 = vmatprep.subr.bf16.mxu1 %v20019_v63  ;;  %v23322_v63 = vsel %vm1525_vm13, %v23274_v20, %v23300_v61  ;;  %v23332_v20 = vpop.permute.xlu0 %1505  ;;  %v23334_v61 = vpop.permute.xlu1 %1507 }
 0x2ab   : > { %13132 = vmatpush1.bf16.msra.mxu0 %v20014_v4  ;;  %v23326_v4 = vsel %vm1525_vm13, %v1516_v58, %v23317_v32 }
 0x2ac   : > { %13642 = vmatpush1.bf16.msra.mxu1 %v20017_v6  ;;  %13133 = vmatprep.subr.bf16.mxu0 %v20022_v8  ;;  %v20056_v6 = vld [vmem:[#allocation4 + $0x1e60] ss:$48 sps:$4 sm:$0xff]   ;;  %v20059_v8 = vld [vmem:[#allocation4 + $0x1e68] ss:$48 sps:$4 sm:$0xff]  }
 0x2ad   : > { %13643 = vmatprep.subr.bf16.mxu1 %v20025_v22  ;;  %v20064_v22 = vld [vmem:[#allocation4 + $0x1ec4] ss:$48 sps:$4 sm:$0xff]  }
 0x2af   : > { %13134 = vmatpush1.bf16.msra.mxu0 %v20020_v23  ;;  %v20067_v23 = vld [vmem:[#allocation4 + $0x1ecc] ss:$48 sps:$4 sm:$0xff]  }
 0x2b0   : > { %13644 = vmatpush1.bf16.msra.mxu1 %v20023_v26  ;;  %13135 = vmatprep.subr.bf16.mxu0 %v20028_v28  ;;  %v20062_v26 = vld [vmem:[#allocation4 + $0x1ec0] ss:$48 sps:$4 sm:$0xff]   ;;  %v20065_v28 = vld [vmem:[#allocation4 + $0x1ec8] ss:$48 sps:$4 sm:$0xff]  }
 0x2b1   : > { %13645 = vmatprep.subr.bf16.mxu1 %v20031_v29  ;;  %v20070_v29 = vld [vmem:[#allocation4 + $0x1f24] ss:$48 sps:$4 sm:$0xff]  }
 0x2b3   : > { %13136 = vmatpush1.bf16.msra.mxu0 %v20026_v34  ;;  %v20073_v34 = vld [vmem:[#allocation4 + $0x1f2c] ss:$48 sps:$4 sm:$0xff]  }
 0x2b4   : > { %13646 = vmatpush1.bf16.msra.mxu1 %v20029_v35  ;;  %13137 = vmatprep.subr.bf16.mxu0 %v20034_v19  ;;  %v23338_v35 = vsel %vm1525_vm13, %v23290_v57, %v1516_v58  ;;  %v23343_v19 = vsel %vm1525_vm13, %v23332_v20, %v23334_v61  ;;  %v20071_v57 = vld [vmem:[#allocation4 + $0x1f28] ss:$48 sps:$4 sm:$0xff]   ;;  %v20097_v58 = vld [vmem:[#allocation4 + $0x20ac] ss:$48 sps:$4 sm:$0xff]  }
 0x2b5   : > { %13647 = vmatprep.subr.bf16.mxu1 %v20037_v45  ;;  %v20068_v45 = vld [vmem:[#allocation4 + $0x1f20] ss:$48 sps:$4 sm:$0xff]  }
 0x2b7   : > { %13138 = vmatpush1.bf16.msra.mxu0 %v20032_v46  ;;  %v20076_v46 = vld [vmem:[#allocation4 + $0x1f84] ss:$48 sps:$4 sm:$0xff]  }
 0x2b8   : > { %13648 = vmatpush1.bf16.msra.mxu1 %v20035_v47  ;;  %13139 = vmatprep.subr.bf16.mxu0 %v20040_v48  ;;  %v20079_v47 = vld [vmem:[#allocation4 + $0x1f8c] ss:$48 sps:$4 sm:$0xff]   ;;  %v20074_v48 = vld [vmem:[#allocation4 + $0x1f80] ss:$48 sps:$4 sm:$0xff]  }
 0x2b9   : > { %13649 = vmatprep.subr.bf16.mxu1 %v20043_v49  ;;  %v20077_v49 = vld [vmem:[#allocation4 + $0x1f88] ss:$48 sps:$4 sm:$0xff]  }
 0x2bb   : > { %13140 = vmatpush1.bf16.msra.mxu0 %v20038_v50  ;;  %v20082_v50 = vld [vmem:[#allocation4 + $0x1fe4] ss:$48 sps:$4 sm:$0xff]  }
 0x2bc   : > { %13650 = vmatpush1.bf16.msra.mxu1 %v20041_v51  ;;  %13141 = vmatprep.subr.bf16.mxu0 %v20046_v1  ;;  %v20085_v51 = vld [vmem:[#allocation4 + $0x1fec] ss:$48 sps:$4 sm:$0xff]   ;;  %v20080_v1 = vld [vmem:[#allocation4 + $0x1fe0] ss:$48 sps:$4 sm:$0xff]  }
 0x2bd   : > { %13651 = vmatprep.subr.bf16.mxu1 %v20049_v0  ;;  %v20083_v0 = vld [vmem:[#allocation4 + $0x1fe8] ss:$48 sps:$4 sm:$0xff]  }
 0x2bf   : > { %13142 = vmatpush1.bf16.msra.mxu0 %v20044_v41  ;;  %v20088_v41 = vld [vmem:[#allocation4 + $0x2044] ss:$48 sps:$4 sm:$0xff]  }
 0x2c0   : > { %13652 = vmatpush1.bf16.msra.mxu1 %v20047_v52  ;;  %13162 = vmatprep.subr.bf16.mxu0 %v20052_v30  ;;  %v20091_v52 = vld [vmem:[#allocation4 + $0x204c] ss:$48 sps:$4 sm:$0xff]   ;;  %v20086_v30 = vld [vmem:[#allocation4 + $0x2040] ss:$48 sps:$4 sm:$0xff]  }
 0x2c1   : > { %13672 = vmatprep.subr.bf16.mxu1 %v20055_v53  ;;  %v20089_v53 = vld [vmem:[#allocation4 + $0x2048] ss:$48 sps:$4 sm:$0xff]  }
 0x2c2   : > { %13144 = vmatmul.mubr.bf16.vlgmr.msra.gmra.mrb[16].mxu0 %v23322_v63 }
 0x2c3   : > { %13654 = vmatmul.mubr.bf16.vlgmr.msra.gmra.mrb[16].mxu1 %v23322_v63  ;;  %13153 = vmatprep.mubr.bf16.mxu0 %v23326_v4 }
 0x2c4   : > { %13163 = vmatpush1.bf16.msra.mxu0 %v20050_v37  ;;  %13663 = vmatprep.mubr.bf16.mxu1 %v23326_v4  ;;  %v20094_v37 = vld [vmem:[#allocation4 + $0x20a4] ss:$48 sps:$4 sm:$0xff]  }
 0x2c5   : > { %13673 = vmatpush1.bf16.msra.mxu1 %v20053_v18  ;;  %13164 = vmatprep.subr.bf16.mxu0 %v20058_v59  ;;  %v20092_v18 = vld [vmem:[#allocation4 + $0x20a0] ss:$48 sps:$4 sm:$0xff]   ;;  %v20095_v59 = vld [vmem:[#allocation4 + $0x20a8] ss:$48 sps:$4 sm:$0xff]  }
 0x2c6   : > { %13674 = vmatprep.subr.bf16.mxu1 %v20061_v60  ;;  %v20100_v60 = vld [vmem:[#allocation4 + $0x2104] ss:$48 sps:$4 sm:$0xff]  }
 0x2c8   : > { %13165 = vmatpush1.bf16.msra.mxu0 %v20056_v6  ;;  %v20103_v6 = vld [vmem:[#allocation4 + $0x210c] ss:$48 sps:$4 sm:$0xff]  }
 0x2c9   : > { %13675 = vmatpush1.bf16.msra.mxu1 %v20059_v8  ;;  %13166 = vmatprep.subr.bf16.mxu0 %v20064_v22  ;;  %v20098_v8 = vld [vmem:[#allocation4 + $0x2100] ss:$48 sps:$4 sm:$0xff]   ;;  %v20101_v22 = vld [vmem:[#allocation4 + $0x2108] ss:$48 sps:$4 sm:$0xff]  }
 0x2ca   : > { %13154 = vmatmul.mubr.bf16.gmra.mrb[20].mxu0 %v23338_v35  ;;  %13676 = vmatprep.subr.bf16.mxu1 %v20067_v23  ;;  %v20106_v23 = vld [vmem:[#allocation4 + $0x2164] ss:$48 sps:$4 sm:$0xff]  }
 0x2cb   : > { %13664 = vmatmul.mubr.bf16.gmra.mrb[20].mxu1 %v23338_v35  ;;  %13194 = vmatprep.mubr.bf16.mxu0 %v23343_v19 }
 0x2cc   : > { %13167 = vmatpush1.bf16.msra.mxu0 %v20062_v26  ;;  %13704 = vmatprep.mubr.bf16.mxu1 %v23343_v19  ;;  %v20109_v26 = vld [vmem:[#allocation4 + $0x216c] ss:$48 sps:$4 sm:$0xff]  }
 0x2cd   : > { %13677 = vmatpush1.bf16.msra.mxu1 %v20065_v28  ;;  %13168 = vmatprep.subr.bf16.mxu0 %v20070_v29  ;;  %v20104_v28 = vld [vmem:[#allocation4 + $0x2160] ss:$48 sps:$4 sm:$0xff]   ;;  %v20107_v29 = vld [vmem:[#allocation4 + $0x2168] ss:$48 sps:$4 sm:$0xff]  }
 0x2ce   : > { %13678 = vmatprep.subr.bf16.mxu1 %v20073_v34  ;;  %v20112_v34 = vld [vmem:[#allocation4 + $0x21c4] ss:$48 sps:$4 sm:$0xff]  }
 0x2d0   : > { %13169 = vmatpush1.bf16.msra.mxu0 %v20068_v45  ;;  %v20115_v45 = vld [vmem:[#allocation4 + $0x21cc] ss:$48 sps:$4 sm:$0xff]  }
 0x2d1   : > { %13679 = vmatpush1.bf16.msra.mxu1 %v20071_v57  ;;  %13170 = vmatprep.subr.bf16.mxu0 %v20076_v46  ;;  %v20110_v57 = vld [vmem:[#allocation4 + $0x21c0] ss:$48 sps:$4 sm:$0xff]   ;;  %v20113_v46 = vld [vmem:[#allocation4 + $0x21c8] ss:$48 sps:$4 sm:$0xff]  }
 0x2d2   : > { %13680 = vmatprep.subr.bf16.mxu1 %v20079_v47  ;;  %v20118_v47 = vld [vmem:[#allocation4 + $0x2224] ss:$48 sps:$4 sm:$0xff]  }
 0x2d4   : > { %13171 = vmatpush1.bf16.msra.mxu0 %v20074_v48  ;;  %v20121_v48 = vld [vmem:[#allocation4 + $0x222c] ss:$48 sps:$4 sm:$0xff]  }
 0x2d5   : > { %13681 = vmatpush1.bf16.msra.mxu1 %v20077_v49  ;;  %13172 = vmatprep.subr.bf16.mxu0 %v20082_v50  ;;  %v20116_v49 = vld [vmem:[#allocation4 + $0x2220] ss:$48 sps:$4 sm:$0xff]   ;;  %v20119_v50 = vld [vmem:[#allocation4 + $0x2228] ss:$48 sps:$4 sm:$0xff]  }
 0x2d6   : > { %13682 = vmatprep.subr.bf16.mxu1 %v20085_v51  ;;  %v20124_v51 = vld [vmem:[#allocation4 + $0x2284] ss:$48 sps:$4 sm:$0xff]  }
 0x2d8   : > { %13173 = vmatpush1.bf16.msra.mxu0 %v20080_v1  ;;  %v20127_v1 = vld [vmem:[#allocation4 + $0x228c] ss:$48 sps:$4 sm:$0xff]  }
 0x2d9   : > { %13683 = vmatpush1.bf16.msra.mxu1 %v20083_v0  ;;  %13174 = vmatprep.subr.bf16.mxu0 %v20088_v41  ;;  %v20122_v0 = vld [vmem:[#allocation4 + $0x2280] ss:$48 sps:$4 sm:$0xff]   ;;  %v20125_v41 = vld [vmem:[#allocation4 + $0x2288] ss:$48 sps:$4 sm:$0xff]  }
 0x2da   : > { %13684 = vmatprep.subr.bf16.mxu1 %v20091_v52  ;;  %v20130_v52 = vld [vmem:[#allocation4 + $0x22e4] ss:$48 sps:$4 sm:$0xff]  }
 0x2dc   : > { %13175 = vmatpush1.bf16.msra.mxu0 %v20086_v30  ;;  %v20133_v30 = vld [vmem:[#allocation4 + $0x22ec] ss:$48 sps:$4 sm:$0xff]  }
 0x2dd   : > { %13685 = vmatpush1.bf16.msra.mxu1 %v20089_v53  ;;  %13176 = vmatprep.subr.bf16.mxu0 %v20094_v37  ;;  %v20128_v53 = vld [vmem:[#allocation4 + $0x22e0] ss:$48 sps:$4 sm:$0xff]   ;;  %v20131_v37 = vld [vmem:[#allocation4 + $0x22e8] ss:$48 sps:$4 sm:$0xff]  }
 0x2de   : > { %13686 = vmatprep.subr.bf16.mxu1 %v20097_v58  ;;  %v20136_v58 = vld [vmem:[#allocation4 + $0x2344] ss:$48 sps:$4 sm:$0xff]  }
 0x2e0   : > { %13177 = vmatpush1.bf16.msra.mxu0 %v20092_v18  ;;  %v20139_v18 = vld [vmem:[#allocation4 + $0x234c] ss:$48 sps:$4 sm:$0xff]  }
 0x2e1   : > { %13687 = vmatpush1.bf16.msra.mxu1 %v20095_v59  ;;  %13178 = vmatprep.subr.bf16.mxu0 %v20100_v60  ;;  %v20134_v59 = vld [vmem:[#allocation4 + $0x2340] ss:$48 sps:$4 sm:$0xff]   ;;  %v20137_v60 = vld [vmem:[#allocation4 + $0x2348] ss:$48 sps:$4 sm:$0xff]  }
 0x2e2   : > { %13688 = vmatprep.subr.bf16.mxu1 %v20103_v6  ;;  %v20142_v6 = vld [vmem:[#allocation4 + $0x23a4] ss:$48 sps:$4 sm:$0xff]  }
 0x2e4   : > { %13179 = vmatpush1.bf16.msra.mxu0 %v20098_v8  ;;  %v20145_v8 = vld [vmem:[#allocation4 + $0x23ac] ss:$48 sps:$4 sm:$0xff]  }
 0x2e5   : > { %13689 = vmatpush1.bf16.msra.mxu1 %v20101_v22  ;;  %13180 = vmatprep.subr.bf16.mxu0 %v20106_v23  ;;  %v20140_v22 = vld [vmem:[#allocation4 + $0x23a0] ss:$48 sps:$4 sm:$0xff]   ;;  %v20143_v23 = vld [vmem:[#allocation4 + $0x23a8] ss:$48 sps:$4 sm:$0xff]  }
 0x2e6   : > { %13690 = vmatprep.subr.bf16.mxu1 %v20109_v26  ;;  %v20148_v26 = vld [vmem:[#allocation4 + $0x2404] ss:$48 sps:$4 sm:$0xff]  }
 0x2e8   : > { %13181 = vmatpush1.bf16.msra.mxu0 %v20104_v28  ;;  %v20151_v28 = vld [vmem:[#allocation4 + $0x240c] ss:$48 sps:$4 sm:$0xff]  }
 0x2e9   : > { %13691 = vmatpush1.bf16.msra.mxu1 %v20107_v29  ;;  %13182 = vmatprep.subr.bf16.mxu0 %v20112_v34  ;;  %v20146_v29 = vld [vmem:[#allocation4 + $0x2400] ss:$48 sps:$4 sm:$0xff]   ;;  %v1520_v34 = vpop.permute.xlu0 %1519 }
 0x2ea   : > { %13692 = vmatprep.subr.bf16.mxu1 %v20115_v45  ;;  %v23349_v45 = vpop.permute.xlu1 %1521 }
 0x2ec   : > { %13183 = vmatpush1.bf16.msra.mxu0 %v20110_v57  ;;  %v20149_v57 = vld [vmem:[#allocation4 + $0x2408] ss:$48 sps:$4 sm:$0xff]  }
 0x2ed   : > { %13693 = vmatpush1.bf16.msra.mxu1 %v20113_v46  ;;  %13184 = vmatprep.subr.bf16.mxu0 %v20118_v47  ;;  %v20154_v46 = vld [vmem:[#allocation4 + $0x2464] ss:$48 sps:$4 sm:$0xff]   ;;  %v20157_v47 = vld [vmem:[#allocation4 + $0x246c] ss:$48 sps:$4 sm:$0xff]  }
 0x2ee   : > { %13694 = vmatprep.subr.bf16.mxu1 %v20121_v48  ;;  %v23354_v48 = vsel %vm1525_vm13, %v23302_v62, %v23332_v20  ;;  %v23365_v62 = vrot.slane %v23175_v54, 1  ;;  %v20158_v20 = vld [vmem:[#allocation4 + $0x24c0] ss:$48 sps:$4 sm:$0xff]  }
 0x2f0   : > { %13185 = vmatpush1.bf16.msra.mxu0 %v20116_v49  ;;  %v23358_v49 = vsel %vm1525_vm13, %v1520_v34, %v23349_v45 }
 0x2f1   : > { %13695 = vmatpush1.bf16.msra.mxu1 %v20119_v50  ;;  %13186 = vmatprep.subr.bf16.mxu0 %v20124_v51  ;;  %v20152_v50 = vld [vmem:[#allocation4 + $0x2460] ss:$48 sps:$4 sm:$0xff]   ;;  %v20155_v51 = vld [vmem:[#allocation4 + $0x2468] ss:$48 sps:$4 sm:$0xff]  }
 0x2f2   : > { %13696 = vmatprep.subr.bf16.mxu1 %v20127_v1  ;;  %v20160_v1 = vld [vmem:[#allocation4 + $0x24c4] ss:$48 sps:$4 sm:$0xff]  }
 0x2f4   : > { %13187 = vmatpush1.bf16.msra.mxu0 %v20122_v0  ;;  %v20163_v0 = vld [vmem:[#allocation4 + $0x24cc] ss:$48 sps:$4 sm:$0xff]  }
 0x2f5   : > { %13697 = vmatpush1.bf16.msra.mxu1 %v20125_v41  ;;  %13188 = vmatprep.subr.bf16.mxu0 %v20130_v52  ;;  %v20161_v41 = vld [vmem:[#allocation4 + $0x24c8] ss:$48 sps:$4 sm:$0xff]   ;;  %v20166_v52 = vld [vmem:[#allocation4 + $0x2524] ss:$48 sps:$4 sm:$0xff]  }
 0x2f6   : > { %13698 = vmatprep.subr.bf16.mxu1 %v20133_v30  ;;  %v1565_v30 = vrot.slane %v23155_v5, 1 }
 0x2f8   : > { %13189 = vmatpush1.bf16.msra.mxu0 %v20128_v53  ;;  %v20169_v53 = vld [vmem:[#allocation4 + $0x252c] ss:$48 sps:$4 sm:$0xff]  }
 0x2f9   : > { %13699 = vmatpush1.bf16.msra.mxu1 %v20131_v37  ;;  %13190 = vmatprep.subr.bf16.mxu0 %v20136_v58  ;;  %v23370_v37 = vsel %vm1525_vm13, %v23317_v32, %v1520_v34  ;;  %v23375_v58 = vsel %vm298_vm1, %v1565_v30, %v23365_v62  ;;  %v20172_v32 = vld [vmem:[#allocation4 + $0x2584] ss:$48 sps:$4 sm:$0xff]   ;;  %v20187_v34 = vld [vmem:[#allocation4 + $0x264c] ss:$48 sps:$4 sm:$0xff]  }
 0x2fa   : > { %13700 = vmatprep.subr.bf16.mxu1 %v20139_v18  ;;  %v20164_v18 = vld [vmem:[#allocation4 + $0x2520] ss:$48 sps:$4 sm:$0xff]   ;;  %v20202_v30 = vld [vmem:[#allocation4 + $0x2764] ss:$48 sps:$4 sm:$0xff]  }
 0x2fc   : > { %13191 = vmatpush1.bf16.msra.mxu0 %v20134_v59  ;;  %v20167_v59 = vld [vmem:[#allocation4 + $0x2528] ss:$48 sps:$4 sm:$0xff]  }
 0x2fd   : > { %13701 = vmatpush1.bf16.msra.mxu1 %v20137_v60  ;;  %13192 = vmatprep.subr.bf16.mxu0 %v20142_v6  ;;  %v20175_v60 = vld [vmem:[#allocation4 + $0x258c] ss:$48 sps:$4 sm:$0xff]   ;;  %v20170_v6 = vld [vmem:[#allocation4 + $0x2580] ss:$48 sps:$4 sm:$0xff]  }
 0x2fe   : > { %13702 = vmatprep.subr.bf16.mxu1 %v20145_v8  ;;  %v20173_v8 = vld [vmem:[#allocation4 + $0x2588] ss:$48 sps:$4 sm:$0xff]  }
 0x300   : > { %13193 = vmatpush1.bf16.msra.mxu0 %v20140_v22  ;;  %v20178_v22 = vld [vmem:[#allocation4 + $0x25e4] ss:$48 sps:$4 sm:$0xff]  }
 0x301   : > { %13703 = vmatpush1.bf16.msra.mxu1 %v20143_v23  ;;  %13213 = vmatprep.subr.bf16.mxu0 %v20148_v26  ;;  %v20181_v23 = vld [vmem:[#allocation4 + $0x25ec] ss:$48 sps:$4 sm:$0xff]   ;;  %v20176_v26 = vld [vmem:[#allocation4 + $0x25e0] ss:$48 sps:$4 sm:$0xff]  }
 0x302   : > { %13723 = vmatprep.subr.bf16.mxu1 %v20151_v28  ;;  %v20179_v28 = vld [vmem:[#allocation4 + $0x25e8] ss:$48 sps:$4 sm:$0xff]  }
 0x303   : > { %13195 = vmatmul.mubr.bf16.vlgmr.msra.gmra.mrb[16].mxu0 %v23354_v48 }
 0x304   : > { %13705 = vmatmul.mubr.bf16.vlgmr.msra.gmra.mrb[16].mxu1 %v23354_v48  ;;  %13204 = vmatprep.mubr.bf16.mxu0 %v23358_v49 }
 0x305   : > { %13214 = vmatpush1.bf16.msra.mxu0 %v20146_v29  ;;  %13714 = vmatprep.mubr.bf16.mxu1 %v23358_v49  ;;  %v20184_v29 = vld [vmem:[#allocation4 + $0x2644] ss:$48 sps:$4 sm:$0xff]  }
 0x306   : > { %13724 = vmatpush1.bf16.msra.mxu1 %v20149_v57  ;;  %13215 = vmatprep.subr.bf16.mxu0 %v20154_v46  ;;  %v20182_v57 = vld [vmem:[#allocation4 + $0x2640] ss:$48 sps:$4 sm:$0xff]   ;;  %v20185_v46 = vld [vmem:[#allocation4 + $0x2648] ss:$48 sps:$4 sm:$0xff]  }
 0x307   : > { %13725 = vmatprep.subr.bf16.mxu1 %v20157_v47  ;;  %v20190_v47 = vld [vmem:[#allocation4 + $0x26a4] ss:$48 sps:$4 sm:$0xff]  }
 0x309   : > { %13216 = vmatpush1.bf16.msra.mxu0 %v20152_v50  ;;  %v20193_v50 = vld [vmem:[#allocation4 + $0x26ac] ss:$48 sps:$4 sm:$0xff]  }
 0x30a   : > { %13726 = vmatpush1.bf16.msra.mxu1 %v20155_v51  ;;  %13217 = vmatprep.subr.bf16.mxu0 %v20160_v1  ;;  %v20188_v51 = vld [vmem:[#allocation4 + $0x26a0] ss:$48 sps:$4 sm:$0xff]   ;;  %v20191_v1 = vld [vmem:[#allocation4 + $0x26a8] ss:$48 sps:$4 sm:$0xff]  }
 0x30b   : > { %13205 = vmatmul.mubr.bf16.gmra.mrb[20].mxu0 %v23370_v37  ;;  %13727 = vmatprep.subr.bf16.mxu1 %v20163_v0  ;;  %v20196_v0 = vld [vmem:[#allocation4 + $0x2704] ss:$48 sps:$4 sm:$0xff]  }
 0x30c   : > { %13715 = vmatmul.mubr.bf16.gmra.mrb[20].mxu1 %v23370_v37  ;;  %13245 = vmatprep.mubr.bf16.mxu0 %v23375_v58 }
 0x30d   : > { %13218 = vmatpush1.bf16.msra.mxu0 %v20158_v20  ;;  %13755 = vmatprep.mubr.bf16.mxu1 %v23375_v58  ;;  %v20199_v20 = vld [vmem:[#allocation4 + $0x270c] ss:$48 sps:$4 sm:$0xff]  }
 0x30e   : > { %13728 = vmatpush1.bf16.msra.mxu1 %v20161_v41  ;;  %13219 = vmatprep.subr.bf16.mxu0 %v20166_v52  ;;  %v20194_v41 = vld [vmem:[#allocation4 + $0x2700] ss:$48 sps:$4 sm:$0xff]   ;;  %v20197_v52 = vld [vmem:[#allocation4 + $0x2708] ss:$48 sps:$4 sm:$0xff]  }
 0x30f   : > { %13729 = vmatprep.subr.bf16.mxu1 %v20169_v53  ;;  %v20205_v53 = vld [vmem:[#allocation4 + $0x276c] ss:$48 sps:$4 sm:$0xff]  }
 0x311   : > { %13220 = vmatpush1.bf16.msra.mxu0 %v20164_v18  ;;  %v20200_v18 = vld [vmem:[#allocation4 + $0x2760] ss:$48 sps:$4 sm:$0xff]  }
 0x312   : > { %13730 = vmatpush1.bf16.msra.mxu1 %v20167_v59  ;;  %13221 = vmatprep.subr.bf16.mxu0 %v20172_v32  ;;  %v20203_v59 = vld [vmem:[#allocation4 + $0x2768] ss:$48 sps:$4 sm:$0xff]   ;;  %v20208_v32 = vld [vmem:[#allocation4 + $0x27c4] ss:$48 sps:$4 sm:$0xff]  }
 0x313   : > { %13731 = vmatprep.subr.bf16.mxu1 %v20175_v60  ;;  %v20211_v60 = vld [vmem:[#allocation4 + $0x27cc] ss:$48 sps:$4 sm:$0xff]  }
 0x315   : > { %13222 = vmatpush1.bf16.msra.mxu0 %v20170_v6  ;;  %v20206_v6 = vld [vmem:[#allocation4 + $0x27c0] ss:$48 sps:$4 sm:$0xff]  }
 0x316   : > { %13732 = vmatpush1.bf16.msra.mxu1 %v20173_v8  ;;  %13223 = vmatprep.subr.bf16.mxu0 %v20178_v22  ;;  %v20209_v8 = vld [vmem:[#allocation4 + $0x27c8] ss:$48 sps:$4 sm:$0xff]   ;;  %v20214_v22 = vld [vmem:[#allocation4 + $0x2824] ss:$48 sps:$4 sm:$0xff]  }
 0x317   : > { %13733 = vmatprep.subr.bf16.mxu1 %v20181_v23  ;;  %v20217_v23 = vld [vmem:[#allocation4 + $0x282c] ss:$48 sps:$4 sm:$0xff]  }
 0x319   : > { %13224 = vmatpush1.bf16.msra.mxu0 %v20176_v26  ;;  %v20212_v26 = vld [vmem:[#allocation4 + $0x2820] ss:$48 sps:$4 sm:$0xff]  }
 0x31a   : > { %13734 = vmatpush1.bf16.msra.mxu1 %v20179_v28  ;;  %13225 = vmatprep.subr.bf16.mxu0 %v20184_v29  ;;  %v20215_v28 = vld [vmem:[#allocation4 + $0x2828] ss:$48 sps:$4 sm:$0xff]   ;;  %v20220_v29 = vld [vmem:[#allocation4 + $0x2884] ss:$48 sps:$4 sm:$0xff]  }
 0x31b   : > { %13735 = vmatprep.subr.bf16.mxu1 %v20187_v34  ;;  %v20223_v34 = vld [vmem:[#allocation4 + $0x288c] ss:$48 sps:$4 sm:$0xff]  }
 0x31d   : > { %13226 = vmatpush1.bf16.msra.mxu0 %v20182_v57  ;;  %v20218_v57 = vld [vmem:[#allocation4 + $0x2880] ss:$48 sps:$4 sm:$0xff]  }
 0x31e   : > { %13736 = vmatpush1.bf16.msra.mxu1 %v20185_v46  ;;  %13227 = vmatprep.subr.bf16.mxu0 %v20190_v47  ;;  %v20221_v46 = vld [vmem:[#allocation4 + $0x2888] ss:$48 sps:$4 sm:$0xff]   ;;  %v20226_v47 = vld [vmem:[#allocation4 + $0x28e4] ss:$48 sps:$4 sm:$0xff]  }
 0x31f   : > { %13737 = vmatprep.subr.bf16.mxu1 %v20193_v50  ;;  %v20229_v50 = vld [vmem:[#allocation4 + $0x28ec] ss:$48 sps:$4 sm:$0xff]  }
 0x321   : > { %13228 = vmatpush1.bf16.msra.mxu0 %v20188_v51  ;;  %v20224_v51 = vld [vmem:[#allocation4 + $0x28e0] ss:$48 sps:$4 sm:$0xff]  }
 0x322   : > { %13738 = vmatpush1.bf16.msra.mxu1 %v20191_v1  ;;  %13229 = vmatprep.subr.bf16.mxu0 %v20196_v0  ;;  %v20227_v1 = vld [vmem:[#allocation4 + $0x28e8] ss:$48 sps:$4 sm:$0xff]   ;;  %v20232_v0 = vld [vmem:[#allocation4 + $0x2944] ss:$48 sps:$4 sm:$0xff]  }
 0x323   : > { %13739 = vmatprep.subr.bf16.mxu1 %v20199_v20  ;;  %v20235_v20 = vld [vmem:[#allocation4 + $0x294c] ss:$48 sps:$4 sm:$0xff]  }
 0x325   : > { %13230 = vmatpush1.bf16.msra.mxu0 %v20194_v41  ;;  %v20230_v41 = vld [vmem:[#allocation4 + $0x2940] ss:$48 sps:$4 sm:$0xff]  }
 0x326   : > { %13740 = vmatpush1.bf16.msra.mxu1 %v20197_v52  ;;  %13231 = vmatprep.subr.bf16.mxu0 %v20202_v30  ;;  %v20233_v52 = vld [vmem:[#allocation4 + $0x2948] ss:$48 sps:$4 sm:$0xff]   ;;  %v20238_v30 = vld [vmem:[#allocation4 + $0x29a4] ss:$48 sps:$4 sm:$0xff]  }
 0x327   : > { %13741 = vmatprep.subr.bf16.mxu1 %v20205_v53  ;;  %v20241_v53 = vld [vmem:[#allocation4 + $0x29ac] ss:$48 sps:$4 sm:$0xff]  }
 0x329   : > { %13232 = vmatpush1.bf16.msra.mxu0 %v20200_v18  ;;  %v20236_v18 = vld [vmem:[#allocation4 + $0x29a0] ss:$48 sps:$4 sm:$0xff]  }
 0x32a   : > { %13742 = vmatpush1.bf16.msra.mxu1 %v20203_v59  ;;  %13233 = vmatprep.subr.bf16.mxu0 %v20208_v32  ;;  %v20239_v59 = vld [vmem:[#allocation4 + $0x29a8] ss:$48 sps:$4 sm:$0xff]   ;;  %v20244_v32 = vld [vmem:[#allocation4 + $0x2a04] ss:$48 sps:$4 sm:$0xff]  }
 0x32b   : > { %13743 = vmatprep.subr.bf16.mxu1 %v20211_v60  ;;  %v20247_v60 = vld [vmem:[#allocation4 + $0x2a0c] ss:$48 sps:$4 sm:$0xff]  }
 0x32d   : > { %13234 = vmatpush1.bf16.msra.mxu0 %v20206_v6  ;;  %v1510_v6 = vpop.permute.xlu0 %1509 }
 0x32e   : > { %13744 = vmatpush1.bf16.msra.mxu1 %v20209_v8  ;;  %13235 = vmatprep.subr.bf16.mxu0 %v20214_v22  ;;  %v20242_v8 = vld [vmem:[#allocation4 + $0x2a00] ss:$48 sps:$4 sm:$0xff]   ;;  %v20245_v22 = vld [vmem:[#allocation4 + $0x2a08] ss:$48 sps:$4 sm:$0xff]  }
 0x32f   : > { %13745 = vmatprep.subr.bf16.mxu1 %v20217_v23  ;;  %v20250_v23 = vld [vmem:[#allocation4 + $0x2a64] ss:$48 sps:$4 sm:$0xff]  }
 0x331   : > { %13236 = vmatpush1.bf16.msra.mxu0 %v20212_v26  ;;  %v20253_v26 = vld [vmem:[#allocation4 + $0x2a6c] ss:$48 sps:$4 sm:$0xff]  }
 0x332   : > { %13746 = vmatpush1.bf16.msra.mxu1 %v20215_v28  ;;  %13237 = vmatprep.subr.bf16.mxu0 %v20220_v29  ;;  %v23382_v28 = vsel %vm1525_vm13, %v23334_v61, %v1510_v6  ;;  %v20248_v29 = vld [vmem:[#allocation4 + $0x2a60] ss:$48 sps:$4 sm:$0xff]   ;;  %v23389_v61 = vrot.slane %v23177_v16, 1  ;;  %v20277_v6 = vld [vmem:[#allocation4 + $0x2bec] ss:$48 sps:$4 sm:$0xff]  }
 0x333   : > { %13747 = vmatprep.subr.bf16.mxu1 %v20223_v34  ;;  %v20251_v34 = vld [vmem:[#allocation4 + $0x2a68] ss:$48 sps:$4 sm:$0xff]  }
 0x335   : > { %13238 = vmatpush1.bf16.msra.mxu0 %v20218_v57  ;;  %v20256_v57 = vld [vmem:[#allocation4 + $0x2ac4] ss:$48 sps:$4 sm:$0xff]  }
 0x336   : > { %13748 = vmatpush1.bf16.msra.mxu1 %v20221_v46  ;;  %13239 = vmatprep.subr.bf16.mxu0 %v20226_v47  ;;  %v20259_v46 = vld [vmem:[#allocation4 + $0x2acc] ss:$48 sps:$4 sm:$0xff]   ;;  %v1524_v47 = vpop.permute.xlu1 %1523 }
 0x337   : > { %13749 = vmatprep.subr.bf16.mxu1 %v20229_v50  ;;  %v20254_v50 = vld [vmem:[#allocation4 + $0x2ac0] ss:$48 sps:$4 sm:$0xff]  }
 0x339   : > { %13240 = vmatpush1.bf16.msra.mxu0 %v20224_v51  ;;  %v20257_v51 = vld [vmem:[#allocation4 + $0x2ac8] ss:$48 sps:$4 sm:$0xff]  }
 0x33a   : > { %13750 = vmatpush1.bf16.msra.mxu1 %v20227_v1  ;;  %13241 = vmatprep.subr.bf16.mxu0 %v20232_v0  ;;  %v20262_v1 = vld [vmem:[#allocation4 + $0x2b24] ss:$48 sps:$4 sm:$0xff]   ;;  %v1571_v0 = vrot.slane %v23157_v9, 1 }
 0x33b   : > { %13751 = vmatprep.subr.bf16.mxu1 %v20235_v20  ;;  %v20265_v20 = vld [vmem:[#allocation4 + $0x2b2c] ss:$48 sps:$4 sm:$0xff]  }
 0x33d   : > { %13242 = vmatpush1.bf16.msra.mxu0 %v20230_v41  ;;  %v23394_v41 = vsel %vm1525_vm13, %v23349_v45, %v1524_v47  ;;  %v20268_v45 = vld [vmem:[#allocation4 + $0x2b84] ss:$48 sps:$4 sm:$0xff]   ;;  %v20284_v47 = vld [vmem:[#allocation4 + $0x2ca0] ss:$48 sps:$4 sm:$0xff]  }
 0x33e   : > { %13752 = vmatpush1.bf16.msra.mxu1 %v20233_v52  ;;  %13243 = vmatprep.subr.bf16.mxu0 %v20238_v30  ;;  %v23399_v52 = vsel %vm298_vm1, %v1571_v0, %v23389_v61  ;;  %v20260_v30 = vld [vmem:[#allocation4 + $0x2b20] ss:$48 sps:$4 sm:$0xff]  }
 0x33f   : > { %13753 = vmatprep.subr.bf16.mxu1 %v20241_v53  ;;  %v20263_v53 = vld [vmem:[#allocation4 + $0x2b28] ss:$48 sps:$4 sm:$0xff]   ;;  %v20290_v0 = vld [vmem:[#allocation4 + $0x2d00] ss:$48 sps:$4 sm:$0xff]  }
 0x341   : > { %13244 = vmatpush1.bf16.msra.mxu0 %v20236_v18  ;;  %v20271_v18 = vld [vmem:[#allocation4 + $0x2b8c] ss:$48 sps:$4 sm:$0xff]  }
 0x342   : > { %13754 = vmatpush1.bf16.msra.mxu1 %v20239_v59  ;;  %13264 = vmatprep.subr.bf16.mxu0 %v20244_v32  ;;  %v20266_v59 = vld [vmem:[#allocation4 + $0x2b80] ss:$48 sps:$4 sm:$0xff]   ;;  %v20269_v32 = vld [vmem:[#allocation4 + $0x2b88] ss:$48 sps:$4 sm:$0xff]  }
 0x343   : > { %13774 = vmatprep.subr.bf16.mxu1 %v20247_v60  ;;  %v20274_v60 = vld [vmem:[#allocation4 + $0x2be4] ss:$48 sps:$4 sm:$0xff]  }
 0x344   : > { %13246 = vmatmul.mubr.bf16.vlgmr.msra.gmra.mrb[16].mxu0 %v23382_v28 }
 0x345   : > { %13756 = vmatmul.mubr.bf16.vlgmr.msra.gmra.mrb[16].mxu1 %v23382_v28  ;;  %13255 = vmatprep.mubr.bf16.mxu0 %v23365_v62 }
 0x346   : > { %13265 = vmatpush1.bf16.msra.mxu0 %v20242_v8  ;;  %13765 = vmatprep.mubr.bf16.mxu1 %v23365_v62  ;;  %v20272_v8 = vld [vmem:[#allocation4 + $0x2be0] ss:$48 sps:$4 sm:$0xff]  }
 0x347   : > { %13775 = vmatpush1.bf16.msra.mxu1 %v20245_v22  ;;  %13266 = vmatprep.subr.bf16.mxu0 %v20250_v23  ;;  %v20275_v22 = vld [vmem:[#allocation4 + $0x2be8] ss:$48 sps:$4 sm:$0xff]   ;;  %v20280_v23 = vld [vmem:[#allocation4 + $0x2c44] ss:$48 sps:$4 sm:$0xff]  }
 0x348   : > { %13776 = vmatprep.subr.bf16.mxu1 %v20253_v26  ;;  %v20283_v26 = vld [vmem:[#allocation4 + $0x2c4c] ss:$48 sps:$4 sm:$0xff]  }
 0x34a   : > { %13267 = vmatpush1.bf16.msra.mxu0 %v20248_v29  ;;  %v20278_v29 = vld [vmem:[#allocation4 + $0x2c40] ss:$48 sps:$4 sm:$0xff]  }
 0x34b   : > { %13777 = vmatpush1.bf16.msra.mxu1 %v20251_v34  ;;  %13268 = vmatprep.subr.bf16.mxu0 %v20256_v57  ;;  %v20281_v34 = vld [vmem:[#allocation4 + $0x2c48] ss:$48 sps:$4 sm:$0xff]   ;;  %v20286_v57 = vld [vmem:[#allocation4 + $0x2ca4] ss:$48 sps:$4 sm:$0xff]  }
 0x34c   : > { %13256 = vmatmul.mubr.bf16.gmra.mrb[20].mxu0 %v23394_v41  ;;  %13778 = vmatprep.subr.bf16.mxu1 %v20259_v46  ;;  %v20289_v46 = vld [vmem:[#allocation4 + $0x2cac] ss:$48 sps:$4 sm:$0xff]  }
 0x34d   : > { %13766 = vmatmul.mubr.bf16.gmra.mrb[20].mxu1 %v23394_v41  ;;  %13296 = vmatprep.mubr.bf16.mxu0 %v23399_v52 }
 0x34e   : > { %13269 = vmatpush1.bf16.msra.mxu0 %v20254_v50  ;;  %13806 = vmatprep.mubr.bf16.mxu1 %v23399_v52  ;;  %v20287_v50 = vld [vmem:[#allocation4 + $0x2ca8] ss:$48 sps:$4 sm:$0xff]  }
 0x34f   : > { %13779 = vmatpush1.bf16.msra.mxu1 %v20257_v51  ;;  %13270 = vmatprep.subr.bf16.mxu0 %v20262_v1  ;;  %v20292_v51 = vld [vmem:[#allocation4 + $0x2d04] ss:$48 sps:$4 sm:$0xff]   ;;  %v20295_v1 = vld [vmem:[#allocation4 + $0x2d0c] ss:$48 sps:$4 sm:$0xff]  }
 0x350   : > { %13780 = vmatprep.subr.bf16.mxu1 %v20265_v20  ;;  %v20293_v20 = vld [vmem:[#allocation4 + $0x2d08] ss:$48 sps:$4 sm:$0xff]  }
 0x352   : > { %13271 = vmatpush1.bf16.msra.mxu0 %v20260_v30  ;;  %v20298_v30 = vld [vmem:[#allocation4 + $0x2d64] ss:$48 sps:$4 sm:$0xff]  }
 0x353   : > { %13781 = vmatpush1.bf16.msra.mxu1 %v20263_v53  ;;  %13272 = vmatprep.subr.bf16.mxu0 %v20268_v45  ;;  %v20301_v53 = vld [vmem:[#allocation4 + $0x2d6c] ss:$48 sps:$4 sm:$0xff]   ;;  %v20296_v45 = vld [vmem:[#allocation4 + $0x2d60] ss:$48 sps:$4 sm:$0xff]  }
 0x354   : > { %13782 = vmatprep.subr.bf16.mxu1 %v20271_v18  ;;  %v20299_v18 = vld [vmem:[#allocation4 + $0x2d68] ss:$48 sps:$4 sm:$0xff]  }
 0x356   : > { %13273 = vmatpush1.bf16.msra.mxu0 %v20266_v59  ;;  %v20304_v59 = vld [vmem:[#allocation4 + $0x2dc4] ss:$48 sps:$4 sm:$0xff]  }
 0x357   : > { %13783 = vmatpush1.bf16.msra.mxu1 %v20269_v32  ;;  %13274 = vmatprep.subr.bf16.mxu0 %v20274_v60  ;;  %v20307_v32 = vld [vmem:[#allocation4 + $0x2dcc] ss:$48 sps:$4 sm:$0xff]   ;;  %v20302_v60 = vld [vmem:[#allocation4 + $0x2dc0] ss:$48 sps:$4 sm:$0xff]  }
 0x358   : > { %13784 = vmatprep.subr.bf16.mxu1 %v20277_v6  ;;  %v20305_v6 = vld [vmem:[#allocation4 + $0x2dc8] ss:$48 sps:$4 sm:$0xff]  }
 0x35a   : > { %13275 = vmatpush1.bf16.msra.mxu0 %v20272_v8  ;;  %v20310_v8 = vld [vmem:[#allocation4 + $0x2e24] ss:$48 sps:$4 sm:$0xff]  }
 0x35b   : > { %13785 = vmatpush1.bf16.msra.mxu1 %v20275_v22  ;;  %13276 = vmatprep.subr.bf16.mxu0 %v20280_v23  ;;  %v20313_v22 = vld [vmem:[#allocation4 + $0x2e2c] ss:$48 sps:$4 sm:$0xff]   ;;  %v20308_v23 = vld [vmem:[#allocation4 + $0x2e20] ss:$48 sps:$4 sm:$0xff]  }
 0x35c   : > { %13786 = vmatprep.subr.bf16.mxu1 %v20283_v26  ;;  %v20311_v26 = vld [vmem:[#allocation4 + $0x2e28] ss:$48 sps:$4 sm:$0xff]  }
 0x35e   : > { %13277 = vmatpush1.bf16.msra.mxu0 %v20278_v29  ;;  %v20316_v29 = vld [vmem:[#allocation4 + $0x2e84] ss:$48 sps:$4 sm:$0xff]  }
 0x35f   : > { %13787 = vmatpush1.bf16.msra.mxu1 %v20281_v34  ;;  %13278 = vmatprep.subr.bf16.mxu0 %v20286_v57  ;;  %v20319_v34 = vld [vmem:[#allocation4 + $0x2e8c] ss:$48 sps:$4 sm:$0xff]   ;;  %v20314_v57 = vld [vmem:[#allocation4 + $0x2e80] ss:$48 sps:$4 sm:$0xff]  }
 0x360   : > { %13788 = vmatprep.subr.bf16.mxu1 %v20289_v46  ;;  %v20317_v46 = vld [vmem:[#allocation4 + $0x2e88] ss:$48 sps:$4 sm:$0xff]  }
 0x362   : > { %13279 = vmatpush1.bf16.msra.mxu0 %v20284_v47  ;;  %v20322_v47 = vld [vmem:[#allocation4 + $0x2ee4] ss:$48 sps:$4 sm:$0xff]  }
 0x363   : > { %13789 = vmatpush1.bf16.msra.mxu1 %v20287_v50  ;;  %13280 = vmatprep.subr.bf16.mxu0 %v20292_v51  ;;  %v20325_v50 = vld [vmem:[#allocation4 + $0x2eec] ss:$48 sps:$4 sm:$0xff]   ;;  %v20320_v51 = vld [vmem:[#allocation4 + $0x2ee0] ss:$48 sps:$4 sm:$0xff]  }
 0x364   : > { %13790 = vmatprep.subr.bf16.mxu1 %v20295_v1  ;;  %v20323_v1 = vld [vmem:[#allocation4 + $0x2ee8] ss:$48 sps:$4 sm:$0xff]  }
 0x366   : > { %13281 = vmatpush1.bf16.msra.mxu0 %v20290_v0  ;;  %v20328_v0 = vld [vmem:[#allocation4 + $0x2f44] ss:$48 sps:$4 sm:$0xff]  }
 0x367   : > { %13791 = vmatpush1.bf16.msra.mxu1 %v20293_v20  ;;  %13282 = vmatprep.subr.bf16.mxu0 %v20298_v30  ;;  %v20331_v20 = vld [vmem:[#allocation4 + $0x2f4c] ss:$48 sps:$4 sm:$0xff]   ;;  %v20326_v30 = vld [vmem:[#allocation4 + $0x2f40] ss:$48 sps:$4 sm:$0xff]  }
 0x368   : > { %13792 = vmatprep.subr.bf16.mxu1 %v20301_v53  ;;  %v20329_v53 = vld [vmem:[#allocation4 + $0x2f48] ss:$48 sps:$4 sm:$0xff]  }
 0x36a   : > { %13283 = vmatpush1.bf16.msra.mxu0 %v20296_v45  ;;  %v20334_v45 = vld [vmem:[#allocation4 + $0x2fa4] ss:$48 sps:$4 sm:$0xff]  }
 0x36b   : > { %13793 = vmatpush1.bf16.msra.mxu1 %v20299_v18  ;;  %13284 = vmatprep.subr.bf16.mxu0 %v20304_v59  ;;  %v20337_v18 = vld [vmem:[#allocation4 + $0x2fac] ss:$48 sps:$4 sm:$0xff]   ;;  %v20332_v59 = vld [vmem:[#allocation4 + $0x2fa0] ss:$48 sps:$4 sm:$0xff]  }
 0x36c   : > { %13794 = vmatprep.subr.bf16.mxu1 %v20307_v32  ;;  %v20335_v32 = vld [vmem:[#allocation4 + $0x2fa8] ss:$48 sps:$4 sm:$0xff]  }
 0x36e   : > { %13285 = vmatpush1.bf16.msra.mxu0 %v20302_v60  ;;  %v20340_v60 = vld [vmem:[#allocation4 + $0x3004] ss:$48 sps:$4 sm:$0xff]  }
 0x36f   : > { %13795 = vmatpush1.bf16.msra.mxu1 %v20305_v6  ;;  %13286 = vmatprep.subr.bf16.mxu0 %v20310_v8  ;;  %v23405_v6 = vrot.slane %v23179_v43, 1  ;;  %v20343_v8 = vld [vmem:[#allocation4 + $0x300c] ss:$48 sps:$4 sm:$0xff]  }
 0x370   : > { %13796 = vmatprep.subr.bf16.mxu1 %v20313_v22  ;;  %v1568_v22 = vrot.slane %v23159_v10, 1 }
 0x372   : > { %13287 = vmatpush1.bf16.msra.mxu0 %v20308_v23  ;;  %v20338_v23 = vld [vmem:[#allocation4 + $0x3000] ss:$48 sps:$4 sm:$0xff]  }
 0x373   : > { %13797 = vmatpush1.bf16.msra.mxu1 %v20311_v26  ;;  %13288 = vmatprep.subr.bf16.mxu0 %v20316_v29  ;;  %v20341_v26 = vld [vmem:[#allocation4 + $0x3008] ss:$48 sps:$4 sm:$0xff]   ;;  %v20346_v29 = vld [vmem:[#allocation4 + $0x3064] ss:$48 sps:$4 sm:$0xff]  }
 0x374   : > { %13798 = vmatprep.subr.bf16.mxu1 %v20319_v34  ;;  %v20349_v34 = vld [vmem:[#allocation4 + $0x306c] ss:$48 sps:$4 sm:$0xff]  }
 0x376   : > { %13289 = vmatpush1.bf16.msra.mxu0 %v20314_v57  ;;  %v23410_v57 = vsel %vm298_vm1, %v1568_v22, %v23405_v6  ;;  %v20362_v22 = vld [vmem:[#allocation4 + $0x3180] ss:$48 sps:$4 sm:$0xff]  }
 0x377   : > { %13799 = vmatpush1.bf16.msra.mxu1 %v20317_v46  ;;  %13290 = vmatprep.subr.bf16.mxu0 %v20322_v47  ;;  %v20344_v46 = vld [vmem:[#allocation4 + $0x3060] ss:$48 sps:$4 sm:$0xff]   ;;  %v20347_v47 = vld [vmem:[#allocation4 + $0x3068] ss:$48 sps:$4 sm:$0xff]  }
 0x378   : > { %13800 = vmatprep.subr.bf16.mxu1 %v20325_v50  ;;  %v20352_v50 = vld [vmem:[#allocation4 + $0x30c4] ss:$48 sps:$4 sm:$0xff]  }
 0x37a   : > { %13291 = vmatpush1.bf16.msra.mxu0 %v20320_v51  ;;  %v20355_v51 = vld [vmem:[#allocation4 + $0x30cc] ss:$48 sps:$4 sm:$0xff]  }
 0x37b   : > { %13801 = vmatpush1.bf16.msra.mxu1 %v20323_v1  ;;  %13292 = vmatprep.subr.bf16.mxu0 %v20328_v0  ;;  %v23417_v1 = vrot.slane %v23235_v56, 1  ;;  %v20350_v0 = vld [vmem:[#allocation4 + $0x30c0] ss:$48 sps:$4 sm:$0xff]  }
 0x37c   : > { %13802 = vmatprep.subr.bf16.mxu1 %v20331_v20  ;;  %v20353_v20 = vld [vmem:[#allocation4 + $0x30c8] ss:$48 sps:$4 sm:$0xff]  }
 0x37e   : > { %13293 = vmatpush1.bf16.msra.mxu0 %v20326_v30  ;;  %v20358_v30 = vld [vmem:[#allocation4 + $0x3124] ss:$48 sps:$4 sm:$0xff]  }
 0x37f   : > { %13803 = vmatpush1.bf16.msra.mxu1 %v20329_v53  ;;  %13294 = vmatprep.subr.bf16.mxu0 %v20334_v45  ;;  %v1577_v53 = vrot.slane %v23227_v7, 1  ;;  %v20361_v45 = vld [vmem:[#allocation4 + $0x312c] ss:$48 sps:$4 sm:$0xff]  }
 0x380   : > { %13804 = vmatprep.subr.bf16.mxu1 %v20337_v18 }
 0x381   : > { %v23423_v18 = vsel %vm298_vm1, %v1577_v53, %v23417_v1  ;;  %v20380_v53 = vld [vmem:[#allocation4 + $0x32a0] ss:$48 sps:$4 sm:$0xff]  }
 0x382   : > { %13295 = vmatpush1.bf16.msra.mxu0 %v20332_v59  ;;  %v20356_v59 = vld [vmem:[#allocation4 + $0x3120] ss:$48 sps:$4 sm:$0xff]  }
 0x383   : > { %13805 = vmatpush1.bf16.msra.mxu1 %v20335_v32  ;;  %13315 = vmatprep.subr.bf16.mxu0 %v20340_v60  ;;  %v20359_v32 = vld [vmem:[#allocation4 + $0x3128] ss:$48 sps:$4 sm:$0xff]   ;;  %v20364_v60 = vld [vmem:[#allocation4 + $0x3184] ss:$48 sps:$4 sm:$0xff]  }
 0x384   : > { %13825 = vmatprep.subr.bf16.mxu1 %v20343_v8  ;;  %v20367_v8 = vld [vmem:[#allocation4 + $0x318c] ss:$48 sps:$4 sm:$0xff]  }
 0x385   : > { %13297 = vmatmul.mubr.bf16.vlgmr.msra.gmra.mrb[16].mxu0 %v23410_v57 }
 0x386   : > { %13807 = vmatmul.mubr.bf16.vlgmr.msra.gmra.mrb[16].mxu1 %v23410_v57  ;;  %13306 = vmatprep.mubr.bf16.mxu0 %v23389_v61 }
 0x387   : > { %13316 = vmatpush1.bf16.msra.mxu0 %v20338_v23  ;;  %13816 = vmatprep.mubr.bf16.mxu1 %v23389_v61  ;;  %v20365_v23 = vld [vmem:[#allocation4 + $0x3188] ss:$48 sps:$4 sm:$0xff]  }
 0x388   : > { %13826 = vmatpush1.bf16.msra.mxu1 %v20341_v26  ;;  %13317 = vmatprep.subr.bf16.mxu0 %v20346_v29  ;;  %v20370_v26 = vld [vmem:[#allocation4 + $0x31e4] ss:$48 sps:$4 sm:$0xff]   ;;  %v20373_v29 = vld [vmem:[#allocation4 + $0x31ec] ss:$48 sps:$4 sm:$0xff]  }
 0x389   : > { %13827 = vmatprep.subr.bf16.mxu1 %v20349_v34  ;;  %v20368_v34 = vld [vmem:[#allocation4 + $0x31e0] ss:$48 sps:$4 sm:$0xff]  }
 0x38b   : > { %13318 = vmatpush1.bf16.msra.mxu0 %v20344_v46  ;;  %v20371_v46 = vld [vmem:[#allocation4 + $0x31e8] ss:$48 sps:$4 sm:$0xff]  }
 0x38c   : > { %13828 = vmatpush1.bf16.msra.mxu1 %v20347_v47  ;;  %13319 = vmatprep.subr.bf16.mxu0 %v20352_v50  ;;  %v20376_v47 = vld [vmem:[#allocation4 + $0x3244] ss:$48 sps:$4 sm:$0xff]   ;;  %v20379_v50 = vld [vmem:[#allocation4 + $0x324c] ss:$48 sps:$4 sm:$0xff]  }
 0x38d   : > { %13307 = vmatmul.mubr.bf16.gmra.mrb[20].mxu0 %v23405_v6  ;;  %13829 = vmatprep.subr.bf16.mxu1 %v20355_v51  ;;  %v20374_v51 = vld [vmem:[#allocation4 + $0x3240] ss:$48 sps:$4 sm:$0xff]  }
 0x38e   : > { %13817 = vmatmul.mubr.bf16.gmra.mrb[20].mxu1 %v23405_v6  ;;  %13347 = vmatprep.mubr.bf16.mxu0 %v23423_v18 }
 0x38f   : > { %13320 = vmatpush1.bf16.msra.mxu0 %v20350_v0  ;;  %13857 = vmatprep.mubr.bf16.mxu1 %v23423_v18  ;;  %v20377_v0 = vld [vmem:[#allocation4 + $0x3248] ss:$48 sps:$4 sm:$0xff]  }
 0x390   : > { %13830 = vmatpush1.bf16.msra.mxu1 %v20353_v20  ;;  %13321 = vmatprep.subr.bf16.mxu0 %v20358_v30  ;;  %v20382_v20 = vld [vmem:[#allocation4 + $0x32a4] ss:$48 sps:$4 sm:$0xff]   ;;  %v20385_v30 = vld [vmem:[#allocation4 + $0x32ac] ss:$48 sps:$4 sm:$0xff]  }
 0x391   : > { %13831 = vmatprep.subr.bf16.mxu1 %v20361_v45  ;;  %v20383_v45 = vld [vmem:[#allocation4 + $0x32a8] ss:$48 sps:$4 sm:$0xff]  }
 0x393   : > { %13322 = vmatpush1.bf16.msra.mxu0 %v20356_v59  ;;  %v20388_v59 = vld [vmem:[#allocation4 + $0x3304] ss:$48 sps:$4 sm:$0xff]  }
 0x394   : > { %13832 = vmatpush1.bf16.msra.mxu1 %v20359_v32  ;;  %13323 = vmatprep.subr.bf16.mxu0 %v20364_v60  ;;  %v20391_v32 = vld [vmem:[#allocation4 + $0x330c] ss:$48 sps:$4 sm:$0xff]   ;;  %v20386_v60 = vld [vmem:[#allocation4 + $0x3300] ss:$48 sps:$4 sm:$0xff]  }
 0x395   : > { %13833 = vmatprep.subr.bf16.mxu1 %v20367_v8  ;;  %v20389_v8 = vld [vmem:[#allocation4 + $0x3308] ss:$48 sps:$4 sm:$0xff]  }
 0x397   : > { %13324 = vmatpush1.bf16.msra.mxu0 %v20362_v22  ;;  %v20394_v22 = vld [vmem:[#allocation4 + $0x3364] ss:$48 sps:$4 sm:$0xff]  }
 0x398   : > { %13834 = vmatpush1.bf16.msra.mxu1 %v20365_v23  ;;  %13325 = vmatprep.subr.bf16.mxu0 %v20370_v26  ;;  %v20397_v23 = vld [vmem:[#allocation4 + $0x336c] ss:$48 sps:$4 sm:$0xff]   ;;  %v20392_v26 = vld [vmem:[#allocation4 + $0x3360] ss:$48 sps:$4 sm:$0xff]  }
 0x399   : > { %13835 = vmatprep.subr.bf16.mxu1 %v20373_v29  ;;  %v20395_v29 = vld [vmem:[#allocation4 + $0x3368] ss:$48 sps:$4 sm:$0xff]  }
 0x39b   : > { %13326 = vmatpush1.bf16.msra.mxu0 %v20368_v34  ;;  %v20400_v34 = vld [vmem:[#allocation4 + $0x33c4] ss:$48 sps:$4 sm:$0xff]  }
 0x39c   : > { %13836 = vmatpush1.bf16.msra.mxu1 %v20371_v46  ;;  %13327 = vmatprep.subr.bf16.mxu0 %v20376_v47  ;;  %v20403_v46 = vld [vmem:[#allocation4 + $0x33cc] ss:$48 sps:$4 sm:$0xff]   ;;  %v20398_v47 = vld [vmem:[#allocation4 + $0x33c0] ss:$48 sps:$4 sm:$0xff]  }
 0x39d   : > { %13837 = vmatprep.subr.bf16.mxu1 %v20379_v50  ;;  %v20401_v50 = vld [vmem:[#allocation4 + $0x33c8] ss:$48 sps:$4 sm:$0xff]  }
 0x39f   : > { %13328 = vmatpush1.bf16.msra.mxu0 %v20374_v51  ;;  %v20406_v51 = vld [vmem:[#allocation4 + $0x3424] ss:$48 sps:$4 sm:$0xff]  }
 0x3a0   : > { %13838 = vmatpush1.bf16.msra.mxu1 %v20377_v0  ;;  %13329 = vmatprep.subr.bf16.mxu0 %v20382_v20  ;;  %v20409_v0 = vld [vmem:[#allocation4 + $0x342c] ss:$48 sps:$4 sm:$0xff]   ;;  %v20404_v20 = vld [vmem:[#allocation4 + $0x3420] ss:$48 sps:$4 sm:$0xff]  }
 0x3a1   : > { %13839 = vmatprep.subr.bf16.mxu1 %v20385_v30  ;;  %v20407_v30 = vld [vmem:[#allocation4 + $0x3428] ss:$48 sps:$4 sm:$0xff]  }
 0x3a3   : > { %13330 = vmatpush1.bf16.msra.mxu0 %v20380_v53  ;;  %v20412_v53 = vld [vmem:[#allocation4 + $0x3484] ss:$48 sps:$4 sm:$0xff]  }
 0x3a4   : > { %13840 = vmatpush1.bf16.msra.mxu1 %v20383_v45  ;;  %13331 = vmatprep.subr.bf16.mxu0 %v20388_v59  ;;  %v20415_v45 = vld [vmem:[#allocation4 + $0x348c] ss:$48 sps:$4 sm:$0xff]   ;;  %v20410_v59 = vld [vmem:[#allocation4 + $0x3480] ss:$48 sps:$4 sm:$0xff]  }
 0x3a5   : > { %13841 = vmatprep.subr.bf16.mxu1 %v20391_v32  ;;  %v20413_v32 = vld [vmem:[#allocation4 + $0x3488] ss:$48 sps:$4 sm:$0xff]  }
 0x3a7   : > { %13332 = vmatpush1.bf16.msra.mxu0 %v20386_v60  ;;  %v20418_v60 = vld [vmem:[#allocation4 + $0x34e4] ss:$48 sps:$4 sm:$0xff]  }
 0x3a8   : > { %13842 = vmatpush1.bf16.msra.mxu1 %v20389_v8  ;;  %13333 = vmatprep.subr.bf16.mxu0 %v20394_v22  ;;  %v20421_v8 = vld [vmem:[#allocation4 + $0x34ec] ss:$48 sps:$4 sm:$0xff]   ;;  %v20416_v22 = vld [vmem:[#allocation4 + $0x34e0] ss:$48 sps:$4 sm:$0xff]  }
 0x3a9   : > { %13843 = vmatprep.subr.bf16.mxu1 %v20397_v23  ;;  %v20419_v23 = vld [vmem:[#allocation4 + $0x34e8] ss:$48 sps:$4 sm:$0xff]  }
 0x3ab   : > { %13334 = vmatpush1.bf16.msra.mxu0 %v20392_v26  ;;  %v20424_v26 = vld [vmem:[#allocation4 + $0x3544] ss:$48 sps:$4 sm:$0xff]  }
 0x3ac   : > { %13844 = vmatpush1.bf16.msra.mxu1 %v20395_v29  ;;  %13335 = vmatprep.subr.bf16.mxu0 %v20400_v34  ;;  %v20427_v29 = vld [vmem:[#allocation4 + $0x354c] ss:$48 sps:$4 sm:$0xff]   ;;  %v20422_v34 = vld [vmem:[#allocation4 + $0x3540] ss:$48 sps:$4 sm:$0xff]  }
 0x3ad   : > { %13845 = vmatprep.subr.bf16.mxu1 %v20403_v46  ;;  %v20425_v46 = vld [vmem:[#allocation4 + $0x3548] ss:$48 sps:$4 sm:$0xff]  }
 0x3af   : > { %13336 = vmatpush1.bf16.msra.mxu0 %v20398_v47  ;;  %v20430_v47 = vld [vmem:[#allocation4 + $0x35a4] ss:$48 sps:$4 sm:$0xff]  }
 0x3b0   : > { %13846 = vmatpush1.bf16.msra.mxu1 %v20401_v50  ;;  %13337 = vmatprep.subr.bf16.mxu0 %v20406_v51  ;;  %v20433_v50 = vld [vmem:[#allocation4 + $0x35ac] ss:$48 sps:$4 sm:$0xff]   ;;  %v20428_v51 = vld [vmem:[#allocation4 + $0x35a0] ss:$48 sps:$4 sm:$0xff]  }
 0x3b1   : > { %13847 = vmatprep.subr.bf16.mxu1 %v20409_v0  ;;  %v20431_v0 = vld [vmem:[#allocation4 + $0x35a8] ss:$48 sps:$4 sm:$0xff]  }
 0x3b3   : > { %13338 = vmatpush1.bf16.msra.mxu0 %v20404_v20  ;;  %v20436_v20 = vld [vmem:[#allocation4 + $0x3604] ss:$48 sps:$4 sm:$0xff]  }
 0x3b4   : > { %13848 = vmatpush1.bf16.msra.mxu1 %v20407_v30  ;;  %13339 = vmatprep.subr.bf16.mxu0 %v20412_v53  ;;  %v23429_v30 = vrot.slane %v23181_v44, 1  ;;  %v20439_v53 = vld [vmem:[#allocation4 + $0x360c] ss:$48 sps:$4 sm:$0xff]  }
 0x3b5   : > { %13849 = vmatprep.subr.bf16.mxu1 %v20415_v45  ;;  %v1574_v45 = vrot.slane %v23161_v11, 1 }
 0x3b7   : > { %13340 = vmatpush1.bf16.msra.mxu0 %v20410_v59  ;;  %v20434_v59 = vld [vmem:[#allocation4 + $0x3600] ss:$48 sps:$4 sm:$0xff]  }
 0x3b8   : > { %13850 = vmatpush1.bf16.msra.mxu1 %v20413_v32  ;;  %13341 = vmatprep.subr.bf16.mxu0 %v20418_v60  ;;  %v20437_v32 = vld [vmem:[#allocation4 + $0x3608] ss:$48 sps:$4 sm:$0xff]   ;;  %v20442_v60 = vld [vmem:[#allocation4 + $0x3664] ss:$48 sps:$4 sm:$0xff]  }
 0x3b9   : > { %13851 = vmatprep.subr.bf16.mxu1 %v20421_v8  ;;  %v20445_v8 = vld [vmem:[#allocation4 + $0x366c] ss:$48 sps:$4 sm:$0xff]  }
 0x3bb   : > { %13342 = vmatpush1.bf16.msra.mxu0 %v20416_v22  ;;  %v23434_v22 = vsel %vm298_vm1, %v1574_v45, %v23429_v30  ;;  %v20455_v45 = vld [vmem:[#allocation4 + $0x3728] ss:$48 sps:$4 sm:$0xff]  }
 0x3bc   : > { %13852 = vmatpush1.bf16.msra.mxu1 %v20419_v23  ;;  %13343 = vmatprep.subr.bf16.mxu0 %v20424_v26  ;;  %v20440_v23 = vld [vmem:[#allocation4 + $0x3660] ss:$48 sps:$4 sm:$0xff]   ;;  %v20443_v26 = vld [vmem:[#allocation4 + $0x3668] ss:$48 sps:$4 sm:$0xff]  }
 0x3bd   : > { %13853 = vmatprep.subr.bf16.mxu1 %v20427_v29  ;;  %v20448_v29 = vld [vmem:[#allocation4 + $0x36c4] ss:$48 sps:$4 sm:$0xff]  }
 0x3bf   : > { %13344 = vmatpush1.bf16.msra.mxu0 %v20422_v34  ;;  %v20451_v34 = vld [vmem:[#allocation4 + $0x36cc] ss:$48 sps:$4 sm:$0xff]  }
 0x3c0   : > { %13854 = vmatpush1.bf16.msra.mxu1 %v20425_v46  ;;  %13345 = vmatprep.subr.bf16.mxu0 %v20430_v47  ;;  %v23441_v46 = vrot.slane %v23239_v33, 1  ;;  %v20446_v47 = vld [vmem:[#allocation4 + $0x36c0] ss:$48 sps:$4 sm:$0xff]  }
 0x3c1   : > { %13855 = vmatprep.subr.bf16.mxu1 %v20433_v50  ;;  %v20449_v50 = vld [vmem:[#allocation4 + $0x36c8] ss:$48 sps:$4 sm:$0xff]   ;;  %v20452_v33 = vld [vmem:[#allocation4 + $0x3720] ss:$48 sps:$4 sm:$0xff]  }
 0x3c3   : > { %13346 = vmatpush1.bf16.msra.mxu0 %v20428_v51  ;;  %v20454_v51 = vld [vmem:[#allocation4 + $0x3724] ss:$48 sps:$4 sm:$0xff]  }
 0x3c4   : > { %13856 = vmatpush1.bf16.msra.mxu1 %v20431_v0  ;;  %13366 = vmatprep.subr.bf16.mxu0 %v20436_v20  ;;  %v1583_v0 = vrot.slane %v23229_v14, 1  ;;  %v20457_v20 = vld [vmem:[#allocation4 + $0x372c] ss:$48 sps:$4 sm:$0xff]  }
 0x3c5   : > { %13876 = vmatprep.subr.bf16.mxu1 %v20439_v53  ;;  %v20463_v14 = vld [vmem:[#allocation4 + $0x378c] ss:$48 sps:$4 sm:$0xff]  }
 0x3c6   : > { %13348 = vmatmul.mubr.bf16.vlgmr.msra.gmra.mrb[16].mxu0 %v23434_v22  ;;  %v23447_v53 = vsel %vm298_vm1, %v1583_v0, %v23441_v46  ;;  %v20470_v0 = vld [vmem:[#allocation4 + $0x3840] ss:$48 sps:$4 sm:$0xff]  }
 0x3c7   : > { %13858 = vmatmul.mubr.bf16.vlgmr.msra.gmra.mrb[16].mxu1 %v23434_v22  ;;  %13357 = vmatprep.mubr.bf16.mxu0 %v23417_v1 }
 0x3c8   : > { %13367 = vmatpush1.bf16.msra.mxu0 %v20434_v59  ;;  %13867 = vmatprep.mubr.bf16.mxu1 %v23417_v1  ;;  %v20460_v59 = vld [vmem:[#allocation4 + $0x3784] ss:$48 sps:$4 sm:$0xff]  }
 0x3c9   : > { %13877 = vmatpush1.bf16.msra.mxu1 %v20437_v32  ;;  %13368 = vmatprep.subr.bf16.mxu0 %v20442_v60  ;;  %v20458_v32 = vld [vmem:[#allocation4 + $0x3780] ss:$48 sps:$4 sm:$0xff]   ;;  %v20461_v60 = vld [vmem:[#allocation4 + $0x3788] ss:$48 sps:$4 sm:$0xff]  }
 0x3ca   : > { %13878 = vmatprep.subr.bf16.mxu1 %v20445_v8  ;;  %v20466_v8 = vld [vmem:[#allocation4 + $0x37e4] ss:$48 sps:$4 sm:$0xff]  }
 0x3cc   : > { %13369 = vmatpush1.bf16.msra.mxu0 %v20440_v23  ;;  %v20469_v23 = vld [vmem:[#allocation4 + $0x37ec] ss:$48 sps:$4 sm:$0xff]  }
 0x3cd   : > { %13879 = vmatpush1.bf16.msra.mxu1 %v20443_v26  ;;  %13370 = vmatprep.subr.bf16.mxu0 %v20448_v29  ;;  %v20464_v26 = vld [vmem:[#allocation4 + $0x37e0] ss:$48 sps:$4 sm:$0xff]   ;;  %v20467_v29 = vld [vmem:[#allocation4 + $0x37e8] ss:$48 sps:$4 sm:$0xff]  }
 0x3ce   : > { %13358 = vmatmul.mubr.bf16.gmra.mrb[20].mxu0 %v23429_v30  ;;  %13880 = vmatprep.subr.bf16.mxu1 %v20451_v34  ;;  %v20472_v34 = vld [vmem:[#allocation4 + $0x3844] ss:$48 sps:$4 sm:$0xff]  }
 0x3cf   : > { %13868 = vmatmul.mubr.bf16.gmra.mrb[20].mxu1 %v23429_v30  ;;  %18776 = vmatprep.mubr.msk.bf16.mxu0 %vm1525_vm13, %v23447_v53 }
 0x3d0   : > { %13371 = vmatpush1.bf16.msra.mxu0 %v20446_v47  ;;  %18778 = vmatprep.mubr.msk.bf16.mxu1 %vm1525_vm13, %v23447_v53  ;;  %v20475_v47 = vld [vmem:[#allocation4 + $0x384c] ss:$48 sps:$4 sm:$0xff]  }
 0x3d1   : > { %13881 = vmatpush1.bf16.msra.mxu1 %v20449_v50  ;;  %13372 = vmatprep.subr.bf16.mxu0 %v20454_v51  ;;  %v20473_v50 = vld [vmem:[#allocation4 + $0x3848] ss:$48 sps:$4 sm:$0xff]   ;;  %v20478_v51 = vld [vmem:[#allocation4 + $0x38a4] ss:$48 sps:$4 sm:$0xff]  }
 0x3d2   : > { %13882 = vmatprep.subr.bf16.mxu1 %v20457_v20  ;;  %v20481_v20 = vld [vmem:[#allocation4 + $0x38ac] ss:$48 sps:$4 sm:$0xff]  }
 0x3d4   : > { %13373 = vmatpush1.bf16.msra.mxu0 %v20452_v33  ;;  %v20476_v33 = vld [vmem:[#allocation4 + $0x38a0] ss:$48 sps:$4 sm:$0xff]  }
 0x3d5   : > { %13883 = vmatpush1.bf16.msra.mxu1 %v20455_v45  ;;  %13374 = vmatprep.subr.bf16.mxu0 %v20460_v59  ;;  %v20479_v45 = vld [vmem:[#allocation4 + $0x38a8] ss:$48 sps:$4 sm:$0xff]   ;;  %v20484_v59 = vld [vmem:[#allocation4 + $0x3904] ss:$48 sps:$4 sm:$0xff]  }
 0x3d6   : > { %13884 = vmatprep.subr.bf16.mxu1 %v20463_v14  ;;  %v20487_v14 = vld [vmem:[#allocation4 + $0x390c] ss:$48 sps:$4 sm:$0xff]  }
 0x3d8   : > { %13375 = vmatpush1.bf16.msra.mxu0 %v20458_v32  ;;  %v20482_v32 = vld [vmem:[#allocation4 + $0x3900] ss:$48 sps:$4 sm:$0xff]  }
 0x3d9   : > { %13885 = vmatpush1.bf16.msra.mxu1 %v20461_v60  ;;  %13376 = vmatprep.subr.bf16.mxu0 %v20466_v8  ;;  %v20485_v60 = vld [vmem:[#allocation4 + $0x3908] ss:$48 sps:$4 sm:$0xff]   ;;  %v20490_v8 = vld [vmem:[#allocation4 + $0x3964] ss:$48 sps:$4 sm:$0xff]  }
 0x3da   : > { %13886 = vmatprep.subr.bf16.mxu1 %v20469_v23  ;;  %v20493_v23 = vld [vmem:[#allocation4 + $0x396c] ss:$48 sps:$4 sm:$0xff]  }
 0x3dc   : > { %13377 = vmatpush1.bf16.msra.mxu0 %v20464_v26  ;;  %v20488_v26 = vld [vmem:[#allocation4 + $0x3960] ss:$48 sps:$4 sm:$0xff]  }
 0x3dd   : > { %13887 = vmatpush1.bf16.msra.mxu1 %v20467_v29  ;;  %13378 = vmatprep.subr.bf16.mxu0 %v20472_v34  ;;  %v20491_v29 = vld [vmem:[#allocation4 + $0x3968] ss:$48 sps:$4 sm:$0xff]   ;;  %v20496_v34 = vld [vmem:[#allocation4 + $0x39c4] ss:$48 sps:$4 sm:$0xff]  }
 0x3de   : > { %13888 = vmatprep.subr.bf16.mxu1 %v20475_v47  ;;  %v20499_v47 = vld [vmem:[#allocation4 + $0x39cc] ss:$48 sps:$4 sm:$0xff]  }
 0x3e0   : > { %13379 = vmatpush1.bf16.msra.mxu0 %v20470_v0  ;;  %v20494_v0 = vld [vmem:[#allocation4 + $0x39c0] ss:$48 sps:$4 sm:$0xff]  }
 0x3e1   : > { %13889 = vmatpush1.bf16.msra.mxu1 %v20473_v50  ;;  %13380 = vmatprep.subr.bf16.mxu0 %v20478_v51  ;;  %v20497_v50 = vld [vmem:[#allocation4 + $0x39c8] ss:$48 sps:$4 sm:$0xff]   ;;  %v20502_v51 = vld [vmem:[#allocation4 + $0x3a24] ss:$48 sps:$4 sm:$0xff]  }
 0x3e2   : > { %13890 = vmatprep.subr.bf16.mxu1 %v20481_v20  ;;  %v20505_v20 = vld [vmem:[#allocation4 + $0x3a2c] ss:$48 sps:$4 sm:$0xff]  }
 0x3e4   : > { %13381 = vmatpush1.bf16.msra.mxu0 %v20476_v33  ;;  %v20500_v33 = vld [vmem:[#allocation4 + $0x3a20] ss:$48 sps:$4 sm:$0xff]  }
 0x3e5   : > { %13891 = vmatpush1.bf16.msra.mxu1 %v20479_v45  ;;  %13382 = vmatprep.subr.bf16.mxu0 %v20484_v59  ;;  %v20503_v45 = vld [vmem:[#allocation4 + $0x3a28] ss:$48 sps:$4 sm:$0xff]   ;;  %v20508_v59 = vld [vmem:[#allocation4 + $0x14] ss:$48 sps:$4 sm:$0xff]  }
 0x3e6   : > { %13892 = vmatprep.subr.bf16.mxu1 %v20487_v14  ;;  %v20511_v14 = vld [vmem:[#allocation4 + $0x1c] ss:$48 sps:$4 sm:$0xff]  }
 0x3e8   : > { %13383 = vmatpush1.bf16.msra.mxu0 %v20482_v32  ;;  %v23455_v32 = vrot.slane %v23241_v42, 1 }
 0x3e9   : > { %13893 = vmatpush1.bf16.msra.mxu1 %v20485_v60  ;;  %13384 = vmatprep.subr.bf16.mxu0 %v20490_v8  ;;  %v20506_v60 = vld [vmem:[#allocation4 + $0x10] ss:$48 sps:$4 sm:$0xff]   ;;  %v1580_v8 = vrot.slane %v23231_v17, 1 }
 0x3ea   : > { %13894 = vmatprep.subr.bf16.mxu1 %v20493_v23  ;;  %24000 = vst [vmem:[#allocation18_spill] sm:$0xff] %v23455_v32  ;;  %v20509_v23 = vld [vmem:[#allocation4 + $0x18] ss:$48 sps:$4 sm:$0xff]  }
 0x3ec   : > { %13385 = vmatpush1.bf16.msra.mxu0 %v20488_v26  ;;  %v20514_v26 = vld [vmem:[#allocation4 + $0x74] ss:$48 sps:$4 sm:$0xff]  }
 0x3ed   : > { %13895 = vmatpush1.bf16.msra.mxu1 %v20491_v29  ;;  %13386 = vmatprep.subr.bf16.mxu0 %v20496_v34  ;;  %v20517_v29 = vld [vmem:[#allocation4 + $0x7c] ss:$48 sps:$4 sm:$0xff]   ;;  %v23460_v34 = vsel %vm298_vm1, %v1580_v8, %v23455_v32  ;;  %v20532_v8 = vld [vmem:[#allocation4 + $0x194] ss:$48 sps:$4 sm:$0xff]   ;;  %vm16050_vm1 = vcmask 195584  }
 0x3ee   : > { %13896 = vmatprep.subr.bf16.mxu1 %v20499_v47  ;;  %v20512_v47 = vld [vmem:[#allocation4 + $0x70] ss:$48 sps:$4 sm:$0xff]  }
 0x3f0   : > { %13387 = vmatpush1.bf16.msra.mxu0 %v20494_v0  ;;  %v20515_v0 = vld [vmem:[#allocation4 + $0x78] ss:$48 sps:$4 sm:$0xff]  }
 0x3f1   : > { %13897 = vmatpush1.bf16.msra.mxu1 %v20497_v50  ;;  %13388 = vmatprep.subr.bf16.mxu0 %v20502_v51  ;;  %v20520_v50 = vld [vmem:[#allocation4 + $0xd4] ss:$48 sps:$4 sm:$0xff]   ;;  %v20523_v51 = vld [vmem:[#allocation4 + $0xdc] ss:$48 sps:$4 sm:$0xff]  }
 0x3f2   : > { %13898 = vmatprep.subr.bf16.mxu1 %v20505_v20  ;;  %v20518_v20 = vld [vmem:[#allocation4 + $0xd0] ss:$48 sps:$4 sm:$0xff]  }
 0x3f4   : > { %13389 = vmatpush1.bf16.msra.mxu0 %v20500_v33  ;;  %v20521_v33 = vld [vmem:[#allocation4 + $0xd8] ss:$48 sps:$4 sm:$0xff]  }
 0x3f5   : > { %13899 = vmatpush1.bf16.msra.mxu1 %v20503_v45  ;;  %13927 = vmatprep.subr.bf16.mxu0 %v20508_v59  ;;  %v20526_v45 = vld [vmem:[#allocation4 + $0x134] ss:$48 sps:$4 sm:$0xff]   ;;  %v20529_v59 = vld [vmem:[#allocation4 + $0x13c] ss:$48 sps:$4 sm:$0xff]  }
 0x3f6   : > { %14437 = vmatprep.subr.bf16.mxu1 %v20511_v14  ;;  %v20524_v14 = vld [vmem:[#allocation4 + $0x130] ss:$48 sps:$4 sm:$0xff]  }
 0x3f7   : > { %13399 = vmatmul.mubr.bf16.vlgmr.msra.gmra.mrb[16].mxu0 %v23460_v34 }
 0x3f8   : > { %13909 = vmatmul.mubr.bf16.vlgmr.msra.gmra.mrb[16].mxu1 %v23460_v34  ;;  %18777 = vmatprep.mubr.msk.bf16.mxu0 %vm1525_vm13, %v23441_v46 }
 0x3f9   : > { %18779 = vmatprep.mubr.msk.bf16.mxu1 %vm1525_vm13, %v23441_v46  ;;  %13928 = vmatpush1.bf16.msra.mxu0 %v20506_v60  ;;  %v20527_v60 = vld [vmem:[#allocation4 + $0x138] ss:$48 sps:$4 sm:$0xff]  }
 0x3fa   : > { %14438 = vmatpush1.bf16.msra.mxu1 %v20509_v23  ;;  %13929 = vmatprep.subr.bf16.mxu0 %v20514_v26  ;;  %v20535_v23 = vld [vmem:[#allocation4 + $0x19c] ss:$48 sps:$4 sm:$0xff]   ;;  %v20530_v26 = vld [vmem:[#allocation4 + $0x190] ss:$48 sps:$4 sm:$0xff]  }
 0x3fb   : > { %14439 = vmatprep.subr.bf16.mxu1 %v20517_v29  ;;  %v20533_v29 = vld [vmem:[#allocation4 + $0x198] ss:$48 sps:$4 sm:$0xff]  }
 0x3fd   : > { %13930 = vmatpush1.bf16.msra.mxu0 %v20512_v47  ;;  %v20538_v47 = vld [vmem:[#allocation4 + $0x1f4] ss:$48 sps:$4 sm:$0xff]  }
 0x3fe   : > { %14440 = vmatpush1.bf16.msra.mxu1 %v20515_v0  ;;  %13931 = vmatprep.subr.bf16.mxu0 %v20520_v50  ;;  %v20541_v0 = vld [vmem:[#allocation4 + $0x1fc] ss:$48 sps:$4 sm:$0xff]   ;;  %v20536_v50 = vld [vmem:[#allocation4 + $0x1f0] ss:$48 sps:$4 sm:$0xff]  }
 0x3ff   : > { %13409 = vmatmul.mubr.bf16.gmra.mrb[20].mxu0 %v23455_v32  ;;  %14441 = vmatprep.subr.bf16.mxu1 %v20523_v51  ;;  %v20539_v51 = vld [vmem:[#allocation4 + $0x1f8] ss:$48 sps:$4 sm:$0xff]  }
 0x400   : > { %13919 = vmatmul.mubr.bf16.gmra.mrb[20].mxu1 %v23455_v32  ;;  %13959 = vmatprep.mubr.bf16.mxu0 %v23159_v10 }
 0x401   : > { %13932 = vmatpush1.bf16.msra.mxu0 %v20518_v20  ;;  %14469 = vmatprep.mubr.bf16.mxu1 %v23159_v10  ;;  %v20544_v20 = vld [vmem:[#allocation4 + $0x254] ss:$48 sps:$4 sm:$0xff]  }
 0x402   : > { %14442 = vmatpush1.bf16.msra.mxu1 %v20521_v33  ;;  %13933 = vmatprep.subr.bf16.mxu0 %v20526_v45  ;;  %v20542_v33 = vld [vmem:[#allocation4 + $0x250] ss:$48 sps:$4 sm:$0xff]   ;;  %v20545_v45 = vld [vmem:[#allocation4 + $0x258] ss:$48 sps:$4 sm:$0xff]  }
 0x403   : > { %14443 = vmatprep.subr.bf16.mxu1 %v20529_v59  ;;  %v20553_v59 = vld [vmem:[#allocation4 + $0x2bc] ss:$48 sps:$4 sm:$0xff]  }
 0x405   : > { %13934 = vmatpush1.bf16.msra.mxu0 %v20524_v14  ;;  %v20548_v14 = vld [vmem:[#allocation4 + $0x2b0] ss:$48 sps:$4 sm:$0xff]  }
 0x406   : > { %14444 = vmatpush1.bf16.msra.mxu1 %v20527_v60  ;;  %13935 = vmatprep.subr.bf16.mxu0 %v20532_v8  ;;  %v20551_v60 = vld [vmem:[#allocation4 + $0x2b8] ss:$48 sps:$4 sm:$0xff]   ;;  %v20556_v8 = vld [vmem:[#allocation4 + $0x314] ss:$48 sps:$4 sm:$0xff]  }
 0x407   : > { %14445 = vmatprep.subr.bf16.mxu1 %v20535_v23  ;;  %v20559_v23 = vld [vmem:[#allocation4 + $0x31c] ss:$48 sps:$4 sm:$0xff]  }
 0x409   : > { %13936 = vmatpush1.bf16.msra.mxu0 %v20530_v26  ;;  %v20554_v26 = vld [vmem:[#allocation4 + $0x310] ss:$48 sps:$4 sm:$0xff]  }
 0x40a   : > { %14446 = vmatpush1.bf16.msra.mxu1 %v20533_v29  ;;  %13937 = vmatprep.subr.bf16.mxu0 %v20538_v47  ;;  %v20557_v29 = vld [vmem:[#allocation4 + $0x318] ss:$48 sps:$4 sm:$0xff]   ;;  %v20562_v47 = vld [vmem:[#allocation4 + $0x374] ss:$48 sps:$4 sm:$0xff]  }
 0x40b   : > { %14447 = vmatprep.subr.bf16.mxu1 %v20541_v0  ;;  %v20565_v0 = vld [vmem:[#allocation4 + $0x37c] ss:$48 sps:$4 sm:$0xff]  }
 0x40d   : > { %13938 = vmatpush1.bf16.msra.mxu0 %v20536_v50  ;;  %v20560_v50 = vld [vmem:[#allocation4 + $0x370] ss:$48 sps:$4 sm:$0xff]  }
 0x40e   : > { %14448 = vmatpush1.bf16.msra.mxu1 %v20539_v51  ;;  %13939 = vmatprep.subr.bf16.mxu0 %v20544_v20  ;;  %v20563_v51 = vld [vmem:[#allocation4 + $0x378] ss:$48 sps:$4 sm:$0xff]   ;;  %v20568_v20 = vld [vmem:[#allocation4 + $0x3d4] ss:$48 sps:$4 sm:$0xff]  }
 0x40f   : > { %14449 = vmatprep.subr.bf16.mxu1 %v20547_v31  ;;  %v20571_v31 = vld [vmem:[#allocation4 + $0x3dc] ss:$48 sps:$4 sm:$0xff]  }
 0x411   : > { %13940 = vmatpush1.bf16.msra.mxu0 %v20542_v33  ;;  %v20566_v33 = vld [vmem:[#allocation4 + $0x3d0] ss:$48 sps:$4 sm:$0xff]  }
 0x412   : > { %14450 = vmatpush1.bf16.msra.mxu1 %v20545_v45  ;;  %13941 = vmatprep.subr.bf16.mxu0 %v20550_v36  ;;  %v20569_v45 = vld [vmem:[#allocation4 + $0x3d8] ss:$48 sps:$4 sm:$0xff]   ;;  %v20574_v36 = vld [vmem:[#allocation4 + $0x434] ss:$48 sps:$4 sm:$0xff]  }
 0x413   : > { %14451 = vmatprep.subr.bf16.mxu1 %v20553_v59  ;;  %v20577_v59 = vld [vmem:[#allocation4 + $0x43c] ss:$48 sps:$4 sm:$0xff]  }
 0x415   : > { %13942 = vmatpush1.bf16.msra.mxu0 %v20548_v14  ;;  %v20572_v14 = vld [vmem:[#allocation4 + $0x430] ss:$48 sps:$4 sm:$0xff]  }
 0x416   : > { %14452 = vmatpush1.bf16.msra.mxu1 %v20551_v60  ;;  %13943 = vmatprep.subr.bf16.mxu0 %v20556_v8  ;;  %v20575_v60 = vld [vmem:[#allocation4 + $0x438] ss:$48 sps:$4 sm:$0xff]   ;;  %v20580_v8 = vld [vmem:[#allocation4 + $0x494] ss:$48 sps:$4 sm:$0xff]  }
 0x417   : > { %14453 = vmatprep.subr.bf16.mxu1 %v20559_v23  ;;  %v20583_v23 = vld [vmem:[#allocation4 + $0x49c] ss:$48 sps:$4 sm:$0xff]  }
 0x419   : > { %13944 = vmatpush1.bf16.msra.mxu0 %v20554_v26  ;;  %v20578_v26 = vld [vmem:[#allocation4 + $0x490] ss:$48 sps:$4 sm:$0xff]  }
 0x41a   : > { %14454 = vmatpush1.bf16.msra.mxu1 %v20557_v29  ;;  %13945 = vmatprep.subr.bf16.mxu0 %v20562_v47  ;;  %v20581_v29 = vld [vmem:[#allocation4 + $0x498] ss:$48 sps:$4 sm:$0xff]   ;;  %v20586_v47 = vld [vmem:[#allocation4 + $0x4f4] ss:$48 sps:$4 sm:$0xff]  }
 0x41b   : > { %14455 = vmatprep.subr.bf16.mxu1 %v20565_v0  ;;  %v20589_v0 = vld [vmem:[#allocation4 + $0x4fc] ss:$48 sps:$4 sm:$0xff]  }
 0x41d   : > { %13946 = vmatpush1.bf16.msra.mxu0 %v20560_v50  ;;  %v20584_v50 = vld [vmem:[#allocation4 + $0x4f0] ss:$48 sps:$4 sm:$0xff]  }
 0x41e   : > { %14456 = vmatpush1.bf16.msra.mxu1 %v20563_v51  ;;  %13947 = vmatprep.subr.bf16.mxu0 %v20568_v20  ;;  %v20587_v51 = vld [vmem:[#allocation4 + $0x4f8] ss:$48 sps:$4 sm:$0xff]   ;;  %v20592_v20 = vld [vmem:[#allocation4 + $0x554] ss:$48 sps:$4 sm:$0xff]  }
 0x41f   : > { %14457 = vmatprep.subr.bf16.mxu1 %v20571_v31  ;;  %v20595_v31 = vld [vmem:[#allocation4 + $0x55c] ss:$48 sps:$4 sm:$0xff]  }
 0x421   : > { %13948 = vmatpush1.bf16.msra.mxu0 %v20566_v33  ;;  %v20590_v33 = vld [vmem:[#allocation4 + $0x550] ss:$48 sps:$4 sm:$0xff]  }
 0x422   : > { %14458 = vmatpush1.bf16.msra.mxu1 %v20569_v45  ;;  %13949 = vmatprep.subr.bf16.mxu0 %v20574_v36  ;;  %v20593_v45 = vld [vmem:[#allocation4 + $0x558] ss:$48 sps:$4 sm:$0xff]   ;;  %v20598_v36 = vld [vmem:[#allocation4 + $0x5b4] ss:$48 sps:$4 sm:$0xff]  }
 0x423   : > { %14459 = vmatprep.subr.bf16.mxu1 %v20577_v59  ;;  %v20601_v59 = vld [vmem:[#allocation4 + $0x5bc] ss:$48 sps:$4 sm:$0xff]  }
 0x425   : > { %13950 = vmatpush1.bf16.msra.mxu0 %v20572_v14  ;;  %v20596_v14 = vld [vmem:[#allocation4 + $0x5b0] ss:$48 sps:$4 sm:$0xff]  }
 0x426   : > { %14460 = vmatpush1.bf16.msra.mxu1 %v20575_v60  ;;  %13951 = vmatprep.subr.bf16.mxu0 %v20580_v8  ;;  %v20599_v60 = vld [vmem:[#allocation4 + $0x5b8] ss:$48 sps:$4 sm:$0xff]   ;;  %v20604_v8 = vld [vmem:[#allocation4 + $0x614] ss:$48 sps:$4 sm:$0xff]  }
 0x427   : > { %14461 = vmatprep.subr.bf16.mxu1 %v20583_v23  ;;  %v20607_v23 = vld [vmem:[#allocation4 + $0x61c] ss:$48 sps:$4 sm:$0xff]  }
 0x429   : > { %13952 = vmatpush1.bf16.msra.mxu0 %v20578_v26  ;;  %v20602_v26 = vld [vmem:[#allocation4 + $0x610] ss:$48 sps:$4 sm:$0xff]  }
 0x42a   : > { %14462 = vmatpush1.bf16.msra.mxu1 %v20581_v29  ;;  %13953 = vmatprep.subr.bf16.mxu0 %v20586_v47  ;;  %v20605_v29 = vld [vmem:[#allocation4 + $0x618] ss:$48 sps:$4 sm:$0xff]   ;;  %v20610_v47 = vld [vmem:[#allocation4 + $0x674] ss:$48 sps:$4 sm:$0xff]  }
 0x42b   : > { %14463 = vmatprep.subr.bf16.mxu1 %v20589_v0  ;;  %v20613_v0 = vld [vmem:[#allocation4 + $0x67c] ss:$48 sps:$4 sm:$0xff]  }
 0x42d   : > { %13954 = vmatpush1.bf16.msra.mxu0 %v20584_v50  ;;  %v20608_v50 = vld [vmem:[#allocation4 + $0x670] ss:$48 sps:$4 sm:$0xff]  }
 0x42e   : > { %14464 = vmatpush1.bf16.msra.mxu1 %v20587_v51  ;;  %13955 = vmatprep.subr.bf16.mxu0 %v20592_v20  ;;  %v20611_v51 = vld [vmem:[#allocation4 + $0x678] ss:$48 sps:$4 sm:$0xff]   ;;  %v20616_v20 = vld [vmem:[#allocation4 + $0x6d4] ss:$48 sps:$4 sm:$0xff]  }
 0x42f   : > { %14465 = vmatprep.subr.bf16.mxu1 %v20595_v31  ;;  %v20619_v31 = vld [vmem:[#allocation4 + $0x6dc] ss:$48 sps:$4 sm:$0xff]  }
 0x431   : > { %13956 = vmatpush1.bf16.msra.mxu0 %v20590_v33  ;;  %v20614_v33 = vld [vmem:[#allocation4 + $0x6d0] ss:$48 sps:$4 sm:$0xff]  }
 0x432   : > { %14466 = vmatpush1.bf16.msra.mxu1 %v20593_v45  ;;  %13957 = vmatprep.subr.bf16.mxu0 %v20598_v36  ;;  %v20617_v45 = vld [vmem:[#allocation4 + $0x6d8] ss:$48 sps:$4 sm:$0xff]   ;;  %v20622_v36 = vld [vmem:[#allocation4 + $0x734] ss:$48 sps:$4 sm:$0xff]  }
 0x433   : > { %14467 = vmatprep.subr.bf16.mxu1 %v20601_v59  ;;  %v20625_v59 = vld [vmem:[#allocation4 + $0x73c] ss:$48 sps:$4 sm:$0xff]  }
 0x435   : > { %13958 = vmatpush1.bf16.msra.mxu0 %v20596_v14  ;;  %v20620_v14 = vld [vmem:[#allocation4 + $0x730] ss:$48 sps:$4 sm:$0xff]  }
 0x436   : > { %14468 = vmatpush1.bf16.msra.mxu1 %v20599_v60  ;;  %13978 = vmatprep.subr.bf16.mxu0 %v20604_v8  ;;  %v20623_v60 = vld [vmem:[#allocation4 + $0x738] ss:$48 sps:$4 sm:$0xff]   ;;  %v20628_v8 = vld [vmem:[#allocation4 + $0x794] ss:$48 sps:$4 sm:$0xff]  }
 0x437   : > { %14488 = vmatprep.subr.bf16.mxu1 %v20607_v23  ;;  %v20631_v23 = vld [vmem:[#allocation4 + $0x79c] ss:$48 sps:$4 sm:$0xff]  }
 0x438   : > { %13960 = vmatmul.mubr.bf16.vlgmr.msra.gmra.mrb[24].mxu0 %v23155_v5 }
 0x439   : > { %14470 = vmatmul.mubr.bf16.vlgmr.msra.gmra.mrb[24].mxu1 %v23155_v5  ;;  %13969 = vmatprep.mubr.bf16.mxu0 %v23179_v43 }
 0x43a   : > { %13979 = vmatpush1.bf16.msra.mxu0 %v20602_v26  ;;  %14479 = vmatprep.mubr.bf16.mxu1 %v23179_v43  ;;  %v20626_v26 = vld [vmem:[#allocation4 + $0x790] ss:$48 sps:$4 sm:$0xff]  }
 0x43b   : > { %14489 = vmatpush1.bf16.msra.mxu1 %v20605_v29  ;;  %13980 = vmatprep.subr.bf16.mxu0 %v20610_v47  ;;  %v20629_v29 = vld [vmem:[#allocation4 + $0x798] ss:$48 sps:$4 sm:$0xff]   ;;  %v20634_v47 = vld [vmem:[#allocation4 + $0x7f4] ss:$48 sps:$4 sm:$0xff]  }
 0x43c   : > { %14490 = vmatprep.subr.bf16.mxu1 %v20613_v0  ;;  %v20637_v0 = vld [vmem:[#allocation4 + $0x7fc] ss:$48 sps:$4 sm:$0xff]  }
 0x43e   : > { %13981 = vmatpush1.bf16.msra.mxu0 %v20608_v50  ;;  %v20632_v50 = vld [vmem:[#allocation4 + $0x7f0] ss:$48 sps:$4 sm:$0xff]  }
 0x43f   : > { %14491 = vmatpush1.bf16.msra.mxu1 %v20611_v51  ;;  %13982 = vmatprep.subr.bf16.mxu0 %v20616_v20  ;;  %v20635_v51 = vld [vmem:[#allocation4 + $0x7f8] ss:$48 sps:$4 sm:$0xff]   ;;  %v20640_v20 = vld [vmem:[#allocation4 + $0x854] ss:$48 sps:$4 sm:$0xff]  }
 0x440   : > { %13970 = vmatmul.mubr.bf16.gmra.mrb[28].mxu0 %v23175_v54  ;;  %14492 = vmatprep.subr.bf16.mxu1 %v20619_v31  ;;  %v20643_v31 = vld [vmem:[#allocation4 + $0x85c] ss:$48 sps:$4 sm:$0xff]  }
 0x441   : > { %14480 = vmatmul.mubr.bf16.gmra.mrb[28].mxu1 %v23175_v54  ;;  %14010 = vmatprep.mubr.bf16.mxu0 %v23161_v11 }
 0x442   : > { %13983 = vmatpush1.bf16.msra.mxu0 %v20614_v33  ;;  %14520 = vmatprep.mubr.bf16.mxu1 %v23161_v11  ;;  %v20638_v33 = vld [vmem:[#allocation4 + $0x850] ss:$48 sps:$4 sm:$0xff]  }
 0x443   : > { %14493 = vmatpush1.bf16.msra.mxu1 %v20617_v45  ;;  %13984 = vmatprep.subr.bf16.mxu0 %v20622_v36  ;;  %v20641_v45 = vld [vmem:[#allocation4 + $0x858] ss:$48 sps:$4 sm:$0xff]   ;;  %v20646_v36 = vld [vmem:[#allocation4 + $0x8b4] ss:$48 sps:$4 sm:$0xff]  }
 0x444   : > { %14494 = vmatprep.subr.bf16.mxu1 %v20625_v59  ;;  %v20649_v59 = vld [vmem:[#allocation4 + $0x8bc] ss:$48 sps:$4 sm:$0xff]  }
 0x446   : > { %13985 = vmatpush1.bf16.msra.mxu0 %v20620_v14  ;;  %v20644_v14 = vld [vmem:[#allocation4 + $0x8b0] ss:$48 sps:$4 sm:$0xff]  }
 0x447   : > { %14495 = vmatpush1.bf16.msra.mxu1 %v20623_v60  ;;  %13986 = vmatprep.subr.bf16.mxu0 %v20628_v8  ;;  %v20647_v60 = vld [vmem:[#allocation4 + $0x8b8] ss:$48 sps:$4 sm:$0xff]   ;;  %v20652_v8 = vld [vmem:[#allocation4 + $0x914] ss:$48 sps:$4 sm:$0xff]  }
 0x448   : > { %14496 = vmatprep.subr.bf16.mxu1 %v20631_v23  ;;  %v20655_v23 = vld [vmem:[#allocation4 + $0x91c] ss:$48 sps:$4 sm:$0xff]  }
 0x44a   : > { %13987 = vmatpush1.bf16.msra.mxu0 %v20626_v26  ;;  %v20650_v26 = vld [vmem:[#allocation4 + $0x910] ss:$48 sps:$4 sm:$0xff]  }
 0x44b   : > { %14497 = vmatpush1.bf16.msra.mxu1 %v20629_v29  ;;  %13988 = vmatprep.subr.bf16.mxu0 %v20634_v47  ;;  %v20653_v29 = vld [vmem:[#allocation4 + $0x918] ss:$48 sps:$4 sm:$0xff]   ;;  %v20658_v47 = vld [vmem:[#allocation4 + $0x974] ss:$48 sps:$4 sm:$0xff]  }
 0x44c   : > { %14498 = vmatprep.subr.bf16.mxu1 %v20637_v0  ;;  %v20661_v0 = vld [vmem:[#allocation4 + $0x97c] ss:$48 sps:$4 sm:$0xff]  }
 0x44e   : > { %13989 = vmatpush1.bf16.msra.mxu0 %v20632_v50  ;;  %v20656_v50 = vld [vmem:[#allocation4 + $0x970] ss:$48 sps:$4 sm:$0xff]  }
 0x44f   : > { %14499 = vmatpush1.bf16.msra.mxu1 %v20635_v51  ;;  %13990 = vmatprep.subr.bf16.mxu0 %v20640_v20  ;;  %v20659_v51 = vld [vmem:[#allocation4 + $0x978] ss:$48 sps:$4 sm:$0xff]   ;;  %v20664_v20 = vld [vmem:[#allocation4 + $0x9d4] ss:$48 sps:$4 sm:$0xff]  }
 0x450   : > { %14500 = vmatprep.subr.bf16.mxu1 %v20643_v31  ;;  %v20667_v31 = vld [vmem:[#allocation4 + $0x9dc] ss:$48 sps:$4 sm:$0xff]  }
 0x452   : > { %13991 = vmatpush1.bf16.msra.mxu0 %v20638_v33  ;;  %v20662_v33 = vld [vmem:[#allocation4 + $0x9d0] ss:$48 sps:$4 sm:$0xff]  }
 0x453   : > { %14501 = vmatpush1.bf16.msra.mxu1 %v20641_v45  ;;  %13992 = vmatprep.subr.bf16.mxu0 %v20646_v36  ;;  %v20665_v45 = vld [vmem:[#allocation4 + $0x9d8] ss:$48 sps:$4 sm:$0xff]   ;;  %v20670_v36 = vld [vmem:[#allocation4 + $0xa34] ss:$48 sps:$4 sm:$0xff]  }
 0x454   : > { %14502 = vmatprep.subr.bf16.mxu1 %v20649_v59  ;;  %v20673_v59 = vld [vmem:[#allocation4 + $0xa3c] ss:$48 sps:$4 sm:$0xff]  }
 0x456   : > { %13993 = vmatpush1.bf16.msra.mxu0 %v20644_v14  ;;  %v20668_v14 = vld [vmem:[#allocation4 + $0xa30] ss:$48 sps:$4 sm:$0xff]  }
 0x457   : > { %14503 = vmatpush1.bf16.msra.mxu1 %v20647_v60  ;;  %13994 = vmatprep.subr.bf16.mxu0 %v20652_v8  ;;  %v20671_v60 = vld [vmem:[#allocation4 + $0xa38] ss:$48 sps:$4 sm:$0xff]   ;;  %v20676_v8 = vld [vmem:[#allocation4 + $0xa94] ss:$48 sps:$4 sm:$0xff]  }
 0x458   : > { %14504 = vmatprep.subr.bf16.mxu1 %v20655_v23  ;;  %v20679_v23 = vld [vmem:[#allocation4 + $0xa9c] ss:$48 sps:$4 sm:$0xff]  }
 0x45a   : > { %13995 = vmatpush1.bf16.msra.mxu0 %v20650_v26  ;;  %v20674_v26 = vld [vmem:[#allocation4 + $0xa90] ss:$48 sps:$4 sm:$0xff]  }
 0x45b   : > { %14505 = vmatpush1.bf16.msra.mxu1 %v20653_v29  ;;  %13996 = vmatprep.subr.bf16.mxu0 %v20658_v47  ;;  %v20677_v29 = vld [vmem:[#allocation4 + $0xa98] ss:$48 sps:$4 sm:$0xff]   ;;  %v20682_v47 = vld [vmem:[#allocation4 + $0xaf4] ss:$48 sps:$4 sm:$0xff]  }
 0x45c   : > { %14506 = vmatprep.subr.bf16.mxu1 %v20661_v0  ;;  %v20685_v0 = vld [vmem:[#allocation4 + $0xafc] ss:$48 sps:$4 sm:$0xff]  }
 0x45e   : > { %13997 = vmatpush1.bf16.msra.mxu0 %v20656_v50  ;;  %v20680_v50 = vld [vmem:[#allocation4 + $0xaf0] ss:$48 sps:$4 sm:$0xff]  }
 0x45f   : > { %14507 = vmatpush1.bf16.msra.mxu1 %v20659_v51  ;;  %13998 = vmatprep.subr.bf16.mxu0 %v20664_v20  ;;  %v20683_v51 = vld [vmem:[#allocation4 + $0xaf8] ss:$48 sps:$4 sm:$0xff]   ;;  %v20688_v20 = vld [vmem:[#allocation4 + $0xb54] ss:$48 sps:$4 sm:$0xff]  }
 0x460   : > { %14508 = vmatprep.subr.bf16.mxu1 %v20667_v31  ;;  %v20691_v31 = vld [vmem:[#allocation4 + $0xb5c] ss:$48 sps:$4 sm:$0xff]  }
 0x462   : > { %13999 = vmatpush1.bf16.msra.mxu0 %v20662_v33  ;;  %v20686_v33 = vld [vmem:[#allocation4 + $0xb50] ss:$48 sps:$4 sm:$0xff]  }
 0x463   : > { %14509 = vmatpush1.bf16.msra.mxu1 %v20665_v45  ;;  %14000 = vmatprep.subr.bf16.mxu0 %v20670_v36  ;;  %v20689_v45 = vld [vmem:[#allocation4 + $0xb58] ss:$48 sps:$4 sm:$0xff]   ;;  %v20694_v36 = vld [vmem:[#allocation4 + $0xbb4] ss:$48 sps:$4 sm:$0xff]  }
 0x464   : > { %14510 = vmatprep.subr.bf16.mxu1 %v20673_v59  ;;  %v20697_v59 = vld [vmem:[#allocation4 + $0xbbc] ss:$48 sps:$4 sm:$0xff]  }
 0x466   : > { %14001 = vmatpush1.bf16.msra.mxu0 %v20668_v14  ;;  %v20692_v14 = vld [vmem:[#allocation4 + $0xbb0] ss:$48 sps:$4 sm:$0xff]  }
 0x467   : > { %14511 = vmatpush1.bf16.msra.mxu1 %v20671_v60  ;;  %14002 = vmatprep.subr.bf16.mxu0 %v20676_v8  ;;  %v20695_v60 = vld [vmem:[#allocation4 + $0xbb8] ss:$48 sps:$4 sm:$0xff]   ;;  %v20700_v8 = vld [vmem:[#allocation4 + $0xc14] ss:$48 sps:$4 sm:$0xff]  }
 0x468   : > { %14512 = vmatprep.subr.bf16.mxu1 %v20679_v23  ;;  %v20703_v23 = vld [vmem:[#allocation4 + $0xc1c] ss:$48 sps:$4 sm:$0xff]  }
 0x46a   : > { %14003 = vmatpush1.bf16.msra.mxu0 %v20674_v26  ;;  %v20698_v26 = vld [vmem:[#allocation4 + $0xc10] ss:$48 sps:$4 sm:$0xff]  }
 0x46b   : > { %14513 = vmatpush1.bf16.msra.mxu1 %v20677_v29  ;;  %14004 = vmatprep.subr.bf16.mxu0 %v20682_v47  ;;  %v20701_v29 = vld [vmem:[#allocation4 + $0xc18] ss:$48 sps:$4 sm:$0xff]   ;;  %v20706_v47 = vld [vmem:[#allocation4 + $0xc74] ss:$48 sps:$4 sm:$0xff]  }
 0x46c   : > { %14514 = vmatprep.subr.bf16.mxu1 %v20685_v0  ;;  %v20709_v0 = vld [vmem:[#allocation4 + $0xc7c] ss:$48 sps:$4 sm:$0xff]  }
 0x46e   : > { %14005 = vmatpush1.bf16.msra.mxu0 %v20680_v50  ;;  %v20704_v50 = vld [vmem:[#allocation4 + $0xc70] ss:$48 sps:$4 sm:$0xff]  }
 0x46f   : > { %14515 = vmatpush1.bf16.msra.mxu1 %v20683_v51  ;;  %14006 = vmatprep.subr.bf16.mxu0 %v20688_v20  ;;  %v20707_v51 = vld [vmem:[#allocation4 + $0xc78] ss:$48 sps:$4 sm:$0xff]   ;;  %v20712_v20 = vld [vmem:[#allocation4 + $0xcd4] ss:$48 sps:$4 sm:$0xff]  }
 0x470   : > { %14516 = vmatprep.subr.bf16.mxu1 %v20691_v31  ;;  %v20715_v31 = vld [vmem:[#allocation4 + $0xcdc] ss:$48 sps:$4 sm:$0xff]  }
 0x472   : > { %14007 = vmatpush1.bf16.msra.mxu0 %v20686_v33  ;;  %v20710_v33 = vld [vmem:[#allocation4 + $0xcd0] ss:$48 sps:$4 sm:$0xff]  }
 0x473   : > { %14517 = vmatpush1.bf16.msra.mxu1 %v20689_v45  ;;  %14008 = vmatprep.subr.bf16.mxu0 %v20694_v36  ;;  %v20713_v45 = vld [vmem:[#allocation4 + $0xcd8] ss:$48 sps:$4 sm:$0xff]   ;;  %v20718_v36 = vld [vmem:[#allocation4 + $0xd34] ss:$48 sps:$4 sm:$0xff]  }
 0x474   : > { %14518 = vmatprep.subr.bf16.mxu1 %v20697_v59  ;;  %v20721_v59 = vld [vmem:[#allocation4 + $0xd3c] ss:$48 sps:$4 sm:$0xff]  }
 0x476   : > { %14009 = vmatpush1.bf16.msra.mxu0 %v20692_v14  ;;  %v20716_v14 = vld [vmem:[#allocation4 + $0xd30] ss:$48 sps:$4 sm:$0xff]  }
 0x477   : > { %14519 = vmatpush1.bf16.msra.mxu1 %v20695_v60  ;;  %14029 = vmatprep.subr.bf16.mxu0 %v20700_v8  ;;  %v20719_v60 = vld [vmem:[#allocation4 + $0xd38] ss:$48 sps:$4 sm:$0xff]   ;;  %v20724_v8 = vld [vmem:[#allocation4 + $0xd94] ss:$48 sps:$4 sm:$0xff]  }
 0x478   : > { %14539 = vmatprep.subr.bf16.mxu1 %v20703_v23  ;;  %v20727_v23 = vld [vmem:[#allocation4 + $0xd9c] ss:$48 sps:$4 sm:$0xff]  }
 0x479   : > { %14011 = vmatmul.mubr.bf16.vlgmr.msra.gmra.mrb[24].mxu0 %v23157_v9 }
 0x47a   : > { %14521 = vmatmul.mubr.bf16.vlgmr.msra.gmra.mrb[24].mxu1 %v23157_v9  ;;  %14020 = vmatprep.mubr.bf16.mxu0 %v23181_v44 }
 0x47b   : > { %14030 = vmatpush1.bf16.msra.mxu0 %v20698_v26  ;;  %14530 = vmatprep.mubr.bf16.mxu1 %v23181_v44  ;;  %v20722_v26 = vld [vmem:[#allocation4 + $0xd90] ss:$48 sps:$4 sm:$0xff]  }
 0x47c   : > { %14540 = vmatpush1.bf16.msra.mxu1 %v20701_v29  ;;  %14031 = vmatprep.subr.bf16.mxu0 %v20706_v47  ;;  %v20725_v29 = vld [vmem:[#allocation4 + $0xd98] ss:$48 sps:$4 sm:$0xff]   ;;  %v20730_v47 = vld [vmem:[#allocation4 + $0xdf4] ss:$48 sps:$4 sm:$0xff]  }
 0x47d   : > { %14541 = vmatprep.subr.bf16.mxu1 %v20709_v0  ;;  %v20733_v0 = vld [vmem:[#allocation4 + $0xdfc] ss:$48 sps:$4 sm:$0xff]  }
 0x47f   : > { %14032 = vmatpush1.bf16.msra.mxu0 %v20704_v50  ;;  %v20728_v50 = vld [vmem:[#allocation4 + $0xdf0] ss:$48 sps:$4 sm:$0xff]  }
 0x480   : > { %14542 = vmatpush1.bf16.msra.mxu1 %v20707_v51  ;;  %14033 = vmatprep.subr.bf16.mxu0 %v20712_v20  ;;  %v20731_v51 = vld [vmem:[#allocation4 + $0xdf8] ss:$48 sps:$4 sm:$0xff]   ;;  %v20736_v20 = vld [vmem:[#allocation4 + $0xe54] ss:$48 sps:$4 sm:$0xff]  }
 0x481   : > { %14021 = vmatmul.mubr.bf16.gmra.mrb[28].mxu0 %v23177_v16  ;;  %14543 = vmatprep.subr.bf16.mxu1 %v20715_v31  ;;  %v20739_v31 = vld [vmem:[#allocation4 + $0xe5c] ss:$48 sps:$4 sm:$0xff]  }
 0x482   : > { %14531 = vmatmul.mubr.bf16.gmra.mrb[28].mxu1 %v23177_v16  ;;  %14061 = vmatprep.mubr.bf16.mxu0 %v23231_v17 }
 0x483   : > { %14034 = vmatpush1.bf16.msra.mxu0 %v20710_v33  ;;  %14571 = vmatprep.mubr.bf16.mxu1 %v23231_v17  ;;  %v20734_v33 = vld [vmem:[#allocation4 + $0xe50] ss:$48 sps:$4 sm:$0xff]  }
 0x484   : > { %14544 = vmatpush1.bf16.msra.mxu1 %v20713_v45  ;;  %14035 = vmatprep.subr.bf16.mxu0 %v20718_v36  ;;  %v20737_v45 = vld [vmem:[#allocation4 + $0xe58] ss:$48 sps:$4 sm:$0xff]   ;;  %v20742_v36 = vld [vmem:[#allocation4 + $0xeb4] ss:$48 sps:$4 sm:$0xff]  }
 0x485   : > { %14545 = vmatprep.subr.bf16.mxu1 %v20721_v59  ;;  %v20745_v59 = vld [vmem:[#allocation4 + $0xebc] ss:$48 sps:$4 sm:$0xff]  }
 0x487   : > { %14036 = vmatpush1.bf16.msra.mxu0 %v20716_v14  ;;  %v20740_v14 = vld [vmem:[#allocation4 + $0xeb0] ss:$48 sps:$4 sm:$0xff]  }
 0x488   : > { %14546 = vmatpush1.bf16.msra.mxu1 %v20719_v60  ;;  %14037 = vmatprep.subr.bf16.mxu0 %v20724_v8  ;;  %v20743_v60 = vld [vmem:[#allocation4 + $0xeb8] ss:$48 sps:$4 sm:$0xff]   ;;  %v20748_v8 = vld [vmem:[#allocation4 + $0xf14] ss:$48 sps:$4 sm:$0xff]  }
 0x489   : > { %14547 = vmatprep.subr.bf16.mxu1 %v20727_v23  ;;  %v20751_v23 = vld [vmem:[#allocation4 + $0xf1c] ss:$48 sps:$4 sm:$0xff]  }
 0x48b   : > { %14038 = vmatpush1.bf16.msra.mxu0 %v20722_v26  ;;  %v20746_v26 = vld [vmem:[#allocation4 + $0xf10] ss:$48 sps:$4 sm:$0xff]  }
 0x48c   : > { %14548 = vmatpush1.bf16.msra.mxu1 %v20725_v29  ;;  %14039 = vmatprep.subr.bf16.mxu0 %v20730_v47  ;;  %v20749_v29 = vld [vmem:[#allocation4 + $0xf18] ss:$48 sps:$4 sm:$0xff]   ;;  %v20754_v47 = vld [vmem:[#allocation4 + $0xf74] ss:$48 sps:$4 sm:$0xff]  }
 0x48d   : > { %14549 = vmatprep.subr.bf16.mxu1 %v20733_v0  ;;  %v20757_v0 = vld [vmem:[#allocation4 + $0xf7c] ss:$48 sps:$4 sm:$0xff]  }
 0x48f   : > { %14040 = vmatpush1.bf16.msra.mxu0 %v20728_v50  ;;  %v20752_v50 = vld [vmem:[#allocation4 + $0xf70] ss:$48 sps:$4 sm:$0xff]  }
 0x490   : > { %14550 = vmatpush1.bf16.msra.mxu1 %v20731_v51  ;;  %14041 = vmatprep.subr.bf16.mxu0 %v20736_v20  ;;  %v20755_v51 = vld [vmem:[#allocation4 + $0xf78] ss:$48 sps:$4 sm:$0xff]   ;;  %v20760_v20 = vld [vmem:[#allocation4 + $0xfd4] ss:$48 sps:$4 sm:$0xff]  }
 0x491   : > { %14551 = vmatprep.subr.bf16.mxu1 %v20739_v31  ;;  %v20763_v31 = vld [vmem:[#allocation4 + $0xfdc] ss:$48 sps:$4 sm:$0xff]  }
 0x493   : > { %14042 = vmatpush1.bf16.msra.mxu0 %v20734_v33  ;;  %v20758_v33 = vld [vmem:[#allocation4 + $0xfd0] ss:$48 sps:$4 sm:$0xff]  }
 0x494   : > { %14552 = vmatpush1.bf16.msra.mxu1 %v20737_v45  ;;  %14043 = vmatprep.subr.bf16.mxu0 %v20742_v36  ;;  %v20761_v45 = vld [vmem:[#allocation4 + $0xfd8] ss:$48 sps:$4 sm:$0xff]   ;;  %v20766_v36 = vld [vmem:[#allocation4 + $0x1034] ss:$48 sps:$4 sm:$0xff]  }
 0x495   : > { %14553 = vmatprep.subr.bf16.mxu1 %v20745_v59  ;;  %v20769_v59 = vld [vmem:[#allocation4 + $0x103c] ss:$48 sps:$4 sm:$0xff]  }
 0x497   : > { %14044 = vmatpush1.bf16.msra.mxu0 %v20740_v14  ;;  %v20764_v14 = vld [vmem:[#allocation4 + $0x1030] ss:$48 sps:$4 sm:$0xff]  }
 0x498   : > { %14554 = vmatpush1.bf16.msra.mxu1 %v20743_v60  ;;  %14045 = vmatprep.subr.bf16.mxu0 %v20748_v8  ;;  %v20767_v60 = vld [vmem:[#allocation4 + $0x1038] ss:$48 sps:$4 sm:$0xff]   ;;  %v20772_v8 = vld [vmem:[#allocation4 + $0x1094] ss:$48 sps:$4 sm:$0xff]  }
 0x499   : > { %14555 = vmatprep.subr.bf16.mxu1 %v20751_v23  ;;  %v20775_v23 = vld [vmem:[#allocation4 + $0x109c] ss:$48 sps:$4 sm:$0xff]  }
 0x49b   : > { %14046 = vmatpush1.bf16.msra.mxu0 %v20746_v26  ;;  %v20770_v26 = vld [vmem:[#allocation4 + $0x1090] ss:$48 sps:$4 sm:$0xff]  }
 0x49c   : > { %14556 = vmatpush1.bf16.msra.mxu1 %v20749_v29  ;;  %14047 = vmatprep.subr.bf16.mxu0 %v20754_v47  ;;  %v20773_v29 = vld [vmem:[#allocation4 + $0x1098] ss:$48 sps:$4 sm:$0xff]   ;;  %v20778_v47 = vld [vmem:[#allocation4 + $0x10f4] ss:$48 sps:$4 sm:$0xff]  }
 0x49d   : > { %14557 = vmatprep.subr.bf16.mxu1 %v20757_v0  ;;  %v20781_v0 = vld [vmem:[#allocation4 + $0x10fc] ss:$48 sps:$4 sm:$0xff]  }
 0x49f   : > { %14048 = vmatpush1.bf16.msra.mxu0 %v20752_v50  ;;  %v20776_v50 = vld [vmem:[#allocation4 + $0x10f0] ss:$48 sps:$4 sm:$0xff]  }
 0x4a0   : > { %14558 = vmatpush1.bf16.msra.mxu1 %v20755_v51  ;;  %14049 = vmatprep.subr.bf16.mxu0 %v20760_v20  ;;  %v20779_v51 = vld [vmem:[#allocation4 + $0x10f8] ss:$48 sps:$4 sm:$0xff]   ;;  %v20784_v20 = vld [vmem:[#allocation4 + $0x1154] ss:$48 sps:$4 sm:$0xff]  }
 0x4a1   : > { %14559 = vmatprep.subr.bf16.mxu1 %v20763_v31  ;;  %v20787_v31 = vld [vmem:[#allocation4 + $0x115c] ss:$48 sps:$4 sm:$0xff]  }
 0x4a3   : > { %14050 = vmatpush1.bf16.msra.mxu0 %v20758_v33  ;;  %v20782_v33 = vld [vmem:[#allocation4 + $0x1150] ss:$48 sps:$4 sm:$0xff]  }
 0x4a4   : > { %14560 = vmatpush1.bf16.msra.mxu1 %v20761_v45  ;;  %14051 = vmatprep.subr.bf16.mxu0 %v20766_v36  ;;  %v20785_v45 = vld [vmem:[#allocation4 + $0x1158] ss:$48 sps:$4 sm:$0xff]   ;;  %v20790_v36 = vld [vmem:[#allocation4 + $0x11b4] ss:$48 sps:$4 sm:$0xff]  }
 0x4a5   : > { %14561 = vmatprep.subr.bf16.mxu1 %v20769_v59  ;;  %v20793_v59 = vld [vmem:[#allocation4 + $0x11bc] ss:$48 sps:$4 sm:$0xff]  }
 0x4a7   : > { %14052 = vmatpush1.bf16.msra.mxu0 %v20764_v14  ;;  %v20788_v14 = vld [vmem:[#allocation4 + $0x11b0] ss:$48 sps:$4 sm:$0xff]  }
 0x4a8   : > { %14562 = vmatpush1.bf16.msra.mxu1 %v20767_v60  ;;  %14053 = vmatprep.subr.bf16.mxu0 %v20772_v8  ;;  %v20791_v60 = vld [vmem:[#allocation4 + $0x11b8] ss:$48 sps:$4 sm:$0xff]   ;;  %v20796_v8 = vld [vmem:[#allocation4 + $0x1214] ss:$48 sps:$4 sm:$0xff]  }
 0x4a9   : > { %14563 = vmatprep.subr.bf16.mxu1 %v20775_v23  ;;  %v20799_v23 = vld [vmem:[#allocation4 + $0x121c] ss:$48 sps:$4 sm:$0xff]  }
 0x4ab   : > { %14054 = vmatpush1.bf16.msra.mxu0 %v20770_v26  ;;  %v20794_v26 = vld [vmem:[#allocation4 + $0x1210] ss:$48 sps:$4 sm:$0xff]  }
 0x4ac   : > { %14564 = vmatpush1.bf16.msra.mxu1 %v20773_v29  ;;  %14055 = vmatprep.subr.bf16.mxu0 %v20778_v47  ;;  %v20797_v29 = vld [vmem:[#allocation4 + $0x1218] ss:$48 sps:$4 sm:$0xff]   ;;  %v20802_v47 = vld [vmem:[#allocation4 + $0x1274] ss:$48 sps:$4 sm:$0xff]  }
 0x4ad   : > { %14565 = vmatprep.subr.bf16.mxu1 %v20781_v0  ;;  %v20805_v0 = vld [vmem:[#allocation4 + $0x127c] ss:$48 sps:$4 sm:$0xff]  }
 0x4af   : > { %14056 = vmatpush1.bf16.msra.mxu0 %v20776_v50  ;;  %v20800_v50 = vld [vmem:[#allocation4 + $0x1270] ss:$48 sps:$4 sm:$0xff]  }
 0x4b0   : > { %14566 = vmatpush1.bf16.msra.mxu1 %v20779_v51  ;;  %14057 = vmatprep.subr.bf16.mxu0 %v20784_v20  ;;  %v20803_v51 = vld [vmem:[#allocation4 + $0x1278] ss:$48 sps:$4 sm:$0xff]   ;;  %v20808_v20 = vld [vmem:[#allocation4 + $0x12d4] ss:$48 sps:$4 sm:$0xff]  }
 0x4b1   : > { %14567 = vmatprep.subr.bf16.mxu1 %v20787_v31  ;;  %v20811_v31 = vld [vmem:[#allocation4 + $0x12dc] ss:$48 sps:$4 sm:$0xff]  }
 0x4b3   : > { %14058 = vmatpush1.bf16.msra.mxu0 %v20782_v33  ;;  %v20806_v33 = vld [vmem:[#allocation4 + $0x12d0] ss:$48 sps:$4 sm:$0xff]  }
 0x4b4   : > { %14568 = vmatpush1.bf16.msra.mxu1 %v20785_v45  ;;  %14059 = vmatprep.subr.bf16.mxu0 %v20790_v36  ;;  %v20809_v45 = vld [vmem:[#allocation4 + $0x12d8] ss:$48 sps:$4 sm:$0xff]   ;;  %v20814_v36 = vld [vmem:[#allocation4 + $0x1334] ss:$48 sps:$4 sm:$0xff]  }
 0x4b5   : > { %14569 = vmatprep.subr.bf16.mxu1 %v20793_v59  ;;  %v20817_v59 = vld [vmem:[#allocation4 + $0x133c] ss:$48 sps:$4 sm:$0xff]  }
 0x4b7   : > { %14060 = vmatpush1.bf16.msra.mxu0 %v20788_v14  ;;  %v20812_v14 = vld [vmem:[#allocation4 + $0x1330] ss:$48 sps:$4 sm:$0xff]  }
 0x4b8   : > { %14570 = vmatpush1.bf16.msra.mxu1 %v20791_v60  ;;  %14080 = vmatprep.subr.bf16.mxu0 %v20796_v8  ;;  %v3477_v60 = vld [vmem:[#allocation6] sm:$0xff]  ;;  %v20815_v8 = vld [vmem:[#allocation4 + $0x1338] ss:$48 sps:$4 sm:$0xff]  }
 0x4b9   : > { %14590 = vmatprep.subr.bf16.mxu1 %v20799_v23  ;;  %v20820_v23 = vld [vmem:[#allocation4 + $0x1394] ss:$48 sps:$4 sm:$0xff]  }
 0x4ba   : > { %14062 = vmatmul.mubr.bf16.vlgmr.msra.gmra.mrb[24].mxu0 %v23227_v7 }
 0x4bb   : > { %14572 = vmatmul.mubr.bf16.vlgmr.msra.gmra.mrb[24].mxu1 %v23227_v7  ;;  %14071 = vmatprep.mubr.bf16.mxu0 %v23241_v42 }
 0x4bc   : > { %14081 = vmatpush1.bf16.msra.mxu0 %v20794_v26  ;;  %14581 = vmatprep.mubr.bf16.mxu1 %v23241_v42  ;;  %v20823_v26 = vld [vmem:[#allocation4 + $0x139c] ss:$48 sps:$4 sm:$0xff]  }
 0x4bd   : > { %14591 = vmatpush1.bf16.msra.mxu1 %v20797_v29  ;;  %14082 = vmatprep.subr.bf16.mxu0 %v20802_v47  ;;  %v23497_v29 = vrot.slane %v3477_v60, %v23122_v2  ;;  %v20818_v47 = vld [vmem:[#allocation4 + $0x1390] ss:$48 sps:$4 sm:$0xff]  }
 0x4be   : > { %14592 = vmatprep.subr.bf16.mxu1 %v20805_v0  ;;  %v23500_v0 = vrot.slane %v3477_v60, %v23127_v38 }
 0x4bf   : > { %24001 = vst [vmem:[#allocation19_spill] sm:$0xff] %v23497_v29 }
 0x4c0   : > { %14083 = vmatpush1.bf16.msra.mxu0 %v20800_v50  ;;  %v23503_v50 = vrot.slane %v3477_v60, %v23130_v39 }
 0x4c1   : > { %14593 = vmatpush1.bf16.msra.mxu1 %v20803_v51  ;;  %14084 = vmatprep.subr.bf16.mxu0 %v20808_v20  ;;  %v20821_v51 = vld [vmem:[#allocation4 + $0x1398] ss:$48 sps:$4 sm:$0xff]   ;;  %v23506_v20 = vrot.slane %v3477_v60, %v23133_v40 }
 0x4c2   : > { %14072 = vmatmul.mubr.bf16.gmra.mrb[28].mxu0 %v23235_v56  ;;  %14594 = vmatprep.subr.bf16.mxu1 %v20811_v31  ;;  %24002 = vst [vmem:[#allocation20_spill] sm:$0xff] %v23503_v50  ;;  %v20826_v31 = vld [vmem:[#allocation4 + $0x13f4] ss:$48 sps:$4 sm:$0xff]   ;;  %v20827_v40 = vld [vmem:[#allocation4 + $0x13f8] ss:$48 sps:$4 sm:$0xff]  }
 0x4c3   : > { %14582 = vmatmul.mubr.bf16.gmra.mrb[28].mxu1 %v23235_v56  ;;  %14112 = vmatprep.mubr.bf16.mxu0 %v23279_v24 }
 0x4c4   : > { %14085 = vmatpush1.bf16.msra.mxu0 %v20806_v33  ;;  %14622 = vmatprep.mubr.bf16.mxu1 %v23279_v24 }
 0x4c5   : > { %14595 = vmatpush1.bf16.msra.mxu1 %v20809_v45  ;;  %14086 = vmatprep.subr.bf16.mxu0 %v20814_v36  ;;  %v20829_v45 = vld [vmem:[#allocation4 + $0x13fc] ss:$48 sps:$4 sm:$0xff]  }
 0x4c6   : > { %14596 = vmatprep.subr.bf16.mxu1 %v20817_v59 }
 0x4c8   : > { %14087 = vmatpush1.bf16.msra.mxu0 %v20812_v14 }
 0x4c9   : > { %14597 = vmatpush1.bf16.msra.mxu1 %v20815_v8  ;;  %14088 = vmatprep.subr.bf16.mxu0 %v20820_v23  ;;  %v20824_v8 = vld [vmem:[#allocation4 + $0x13f0] ss:$48 sps:$4 sm:$0xff]  }
 0x4ca   : > { %14598 = vmatprep.subr.bf16.mxu1 %v20823_v26  ;;  %v13400_v33 = vpop.f32.mrb[16].mxu0 }
 0x4cb   : > { %v18831_v36 = vadd.f32 %v13400_v33, %v23497_v29  ;;  %v13910_v59 = vpop.f32.mrb[16].mxu1  ;;  %v13402_v14 = vpop.f32.mrb[17].mxu0  ;;  %v20832_v33 = vld [vmem:[#allocation4 + $0x1454] ss:$48 sps:$4 sm:$0xff]  }
 0x4cc   : > { %14089 = vmatpush1.bf16.msra.mxu0 %v20818_v47  ;;  %v18837_v27 = vadd.f32 %v13910_v59, %v23500_v0  ;;  %v18832_v25 = vadd.f32 %v13402_v14, %v23503_v50  ;;  %v13912_v13 = vpop.f32.mrb[17].mxu1  ;;  %v13404_v23 = vpop.f32.mrb[18].mxu0  ;;  %v20835_v14 = vld [vmem:[#allocation4 + $0x145c] ss:$48 sps:$4 sm:$0xff]  }
 0x4cd   : > { %14599 = vmatpush1.bf16.msra.mxu1 %v20821_v51  ;;  %v18838_v60 = vadd.f32 %v13912_v13, %v23506_v20  ;;  %14090 = vmatprep.subr.bf16.mxu0 %v20826_v31  ;;  %v18833_v26 = vadd.f32 %v13404_v23, %v23497_v29  ;;  %v13914_v39 = vpop.f32.mrb[18].mxu1  ;;  %v13406_v38 = vpop.f32.mrb[19].mxu0  ;;  %v15967_v3 = vmax.f32 %v18831_v36, 0.0  ;;  %v20830_v23 = vld [vmem:[#allocation4 + $0x1450] ss:$48 sps:$4 sm:$0xff]  }
 0x4ce   : > { %14600 = vmatprep.subr.bf16.mxu1 %v20829_v45  ;;  %v18839_v47 = vadd.f32 %v13914_v39, %v23500_v0  ;;  %v18834_v59 = vadd.f32 %v13406_v38, %v23503_v50  ;;  %v13916_v2 = vpop.f32.mrb[19].mxu1  ;;  %v15969_v56 = vmax.f32 %v18837_v27, 0.0  ;;  %v15968_v13 = vmax.f32 %v18832_v25, 0.0  ;;  %v20833_v39 = vld [vmem:[#allocation4 + $0x1458] ss:$48 sps:$4 sm:$0xff]  }
 0x4cf   : > { %v15979_v24 = vmax.f32 %v18833_v26, 0.0  ;;  %v18840_v51 = vadd.f32 %v13916_v2, %v23506_v20  ;;  %v15970_v29 = vmax.f32 %v18838_v60, 0.0  ;;  %v20838_v38 = vld [vmem:[#allocation4 + $0x14b4] ss:$48 sps:$4 sm:$0xff]   ;;  %v20841_v25 = vld [vmem:[#allocation4 + $0x14bc] ss:$48 sps:$4 sm:$0xff]  }
 0x4d0   : > { %v15981_v31 = vmax.f32 %v18839_v47, 0.0  ;;  %14091 = vmatpush1.bf16.msra.mxu0 %v20824_v8  ;;  %v15980_v42 = vmax.f32 %v18834_v59, 0.0  ;;  %v20847_v59 = vld [vmem:[#allocation4 + $0x151c] ss:$48 sps:$4 sm:$0xff]  }
 0x4d1   : > { %v23516_v7 = vpack.c.bf16 %v15979_v24, %v15967_v3  ;;  %14601 = vmatpush1.bf16.msra.mxu1 %v20827_v40  ;;  %v15982_v45 = vmax.f32 %v18840_v51, 0.0  ;;  %14092 = vmatprep.subr.bf16.mxu0 %v20832_v33  ;;  %v20836_v40 = vld [vmem:[#allocation4 + $0x14b0] ss:$48 sps:$4 sm:$0xff]   ;;  %v20844_v33 = vld [vmem:[#allocation4 + $0x1514] ss:$48 sps:$4 sm:$0xff]  }
 0x4d2   : > { %v23518_v50 = vpack.c.bf16 %v15981_v31, %v15969_v56  ;;  %v23520_v36 = vpack.c.bf16 %v15980_v42, %v15968_v13  ;;  %14602 = vmatprep.subr.bf16.mxu1 %v20835_v14  ;;  %v23522_v2 = vpop.f32.mrb[20].mxu0  ;;  %v20839_v56 = vld [vmem:[#allocation4 + $0x14b8] ss:$48 sps:$4 sm:$0xff]   ;;  %v20850_v51 = vld [vmem:[#allocation4 + $0x1574] ss:$48 sps:$4 sm:$0xff]  }
 0x4d3   : > { %v23524_v27 = vpack.c.bf16 %v15982_v45, %v15970_v29  ;;  %v23526_v8 = vpop.f32.mrb[20].mxu1  ;;  %v23528_v60 = vpop.f32.mrb[21].mxu0  ;;  %v20842_v29 = vld [vmem:[#allocation4 + $0x1510] ss:$48 sps:$4 sm:$0xff]   ;;  %v20845_v14 = vld [vmem:[#allocation4 + $0x1518] ss:$48 sps:$4 sm:$0xff]  }
 0x4d4   : > { %24003 = vst [vmem:[#allocation21_spill] sm:$0xff] %v23518_v50  ;;  %14093 = vmatpush1.bf16.msra.mxu0 %v20830_v23  ;;  %v23530_v3 = vpop.f32.mrb[21].mxu1  ;;  %v13414_v24 = vpop.f32.mrb[22].mxu0  ;;  %v20853_v13 = vld [vmem:[#allocation4 + $0x157c] ss:$48 sps:$4 sm:$0xff]  }
 0x4d5   : > { %14603 = vmatpush1.bf16.msra.mxu1 %v20833_v39  ;;  %14094 = vmatprep.subr.bf16.mxu0 %v20838_v38  ;;  %v13924_v42 = vpop.f32.mrb[22].mxu1  ;;  %v13415_v26 = vpop.f32.mrb[23].mxu0  ;;  %v20848_v31 = vld [vmem:[#allocation4 + $0x1570] ss:$48 sps:$4 sm:$0xff]   ;;  %v20851_v23 = vld [vmem:[#allocation4 + $0x1578] ss:$48 sps:$4 sm:$0xff]  }
 0x4d6   : > { %14604 = vmatprep.subr.bf16.mxu1 %v20841_v25  ;;  %v13925_v47 = vpop.f32.mrb[23].mxu1  ;;  %v20856_v45 = vld [vmem:[#allocation4 + $0x15d4] ss:$48 sps:$4 sm:$0xff]   ;;  %v20859_v39 = vld [vmem:[#allocation4 + $0x15dc] ss:$48 sps:$4 sm:$0xff]  }
 0x4d7   : > { %v20854_v38 = vld [vmem:[#allocation4 + $0x15d0] ss:$48 sps:$4 sm:$0xff]   ;;  %v20857_v25 = vld [vmem:[#allocation4 + $0x15d8] ss:$48 sps:$4 sm:$0xff]   ;;  %v20865_v24 = vld [vmem:[#allocation4 + $0x163c] ss:$48 sps:$4 sm:$0xff]  }
 0x4d8   : > { %14095 = vmatpush1.bf16.msra.mxu0 %v20836_v40  ;;  %v20862_v40 = vld [vmem:[#allocation4 + $0x1634] ss:$48 sps:$4 sm:$0xff]   ;;  %v20863_v42 = vld [vmem:[#allocation4 + $0x1638] ss:$48 sps:$4 sm:$0xff]   ;;  %v20866_v47 = vld [vmem:[#allocation4 + $0x1690] ss:$48 sps:$4 sm:$0xff]  }
 0x4d9   : > { %14605 = vmatpush1.bf16.msra.mxu1 %v20839_v56  ;;  %14096 = vmatprep.subr.bf16.mxu0 %v20844_v33  ;;  %v20860_v56 = vld [vmem:[#allocation4 + $0x1630] ss:$48 sps:$4 sm:$0xff]   ;;  %v20868_v26 = vld [vmem:[#allocation4 + $0x1694] ss:$48 sps:$4 sm:$0xff]   ;;  %v20871_v33 = vld [vmem:[#allocation4 + $0x169c] ss:$48 sps:$4 sm:$0xff]  }
 0x4da   : > { %14606 = vmatprep.subr.bf16.mxu1 %v20847_v59  ;;  %v20869_v59 = vld [vmem:[#allocation4 + $0x1698] ss:$48 sps:$4 sm:$0xff]  }
 0x4dc   : > { %14097 = vmatpush1.bf16.msra.mxu0 %v20842_v29  ;;  %v20874_v29 = vld [vmem:[#allocation4 + $0x16f4] ss:$48 sps:$4 sm:$0xff]  }
 0x4dd   : > { %14607 = vmatpush1.bf16.msra.mxu1 %v20845_v14  ;;  %14098 = vmatprep.subr.bf16.mxu0 %v20850_v51  ;;  %v20877_v14 = vld [vmem:[#allocation4 + $0x16fc] ss:$48 sps:$4 sm:$0xff]   ;;  %v20872_v51 = vld [vmem:[#allocation4 + $0x16f0] ss:$48 sps:$4 sm:$0xff]  }
 0x4de   : > { %14608 = vmatprep.subr.bf16.mxu1 %v20853_v13  ;;  %v20875_v13 = vld [vmem:[#allocation4 + $0x16f8] ss:$48 sps:$4 sm:$0xff]  }
 0x4e0   : > { %14099 = vmatpush1.bf16.msra.mxu0 %v20848_v31  ;;  %v20880_v31 = vld [vmem:[#allocation4 + $0x1754] ss:$48 sps:$4 sm:$0xff]  }
 0x4e1   : > { %14609 = vmatpush1.bf16.msra.mxu1 %v20851_v23  ;;  %14100 = vmatprep.subr.bf16.mxu0 %v20856_v45  ;;  %v20883_v23 = vld [vmem:[#allocation4 + $0x175c] ss:$48 sps:$4 sm:$0xff]   ;;  %v20878_v45 = vld [vmem:[#allocation4 + $0x1750] ss:$48 sps:$4 sm:$0xff]  }
 0x4e2   : > { %14610 = vmatprep.subr.bf16.mxu1 %v20859_v39  ;;  %v20881_v39 = vld [vmem:[#allocation4 + $0x1758] ss:$48 sps:$4 sm:$0xff]  }
 0x4e4   : > { %14101 = vmatpush1.bf16.msra.mxu0 %v20854_v38  ;;  %v20886_v38 = vld [vmem:[#allocation4 + $0x17b4] ss:$48 sps:$4 sm:$0xff]  }
 0x4e5   : > { %14611 = vmatpush1.bf16.msra.mxu1 %v20857_v25  ;;  %14102 = vmatprep.subr.bf16.mxu0 %v20862_v40  ;;  %v20889_v25 = vld [vmem:[#allocation4 + $0x17bc] ss:$48 sps:$4 sm:$0xff]   ;;  %v20884_v40 = vld [vmem:[#allocation4 + $0x17b0] ss:$48 sps:$4 sm:$0xff]  }
 0x4e6   : > { %14612 = vmatprep.subr.bf16.mxu1 %v20865_v24  ;;  %v20887_v24 = vld [vmem:[#allocation4 + $0x17b8] ss:$48 sps:$4 sm:$0xff]  }
 0x4e8   : > { %14103 = vmatpush1.bf16.msra.mxu0 %v20860_v56  ;;  %v20892_v56 = vld [vmem:[#allocation4 + $0x1814] ss:$48 sps:$4 sm:$0xff]  }
 0x4e9   : > { %14613 = vmatpush1.bf16.msra.mxu1 %v20863_v42  ;;  %14104 = vmatprep.subr.bf16.mxu0 %v20868_v26  ;;  %v20895_v42 = vld [vmem:[#allocation4 + $0x181c] ss:$48 sps:$4 sm:$0xff]   ;;  %v20890_v26 = vld [vmem:[#allocation4 + $0x1810] ss:$48 sps:$4 sm:$0xff]  }
 0x4ea   : > { %14614 = vmatprep.subr.bf16.mxu1 %v20871_v33  ;;  %v20893_v33 = vld [vmem:[#allocation4 + $0x1818] ss:$48 sps:$4 sm:$0xff]  }
 0x4ec   : > { %14105 = vmatpush1.bf16.msra.mxu0 %v20866_v47  ;;  %v20898_v47 = vld [vmem:[#allocation4 + $0x1874] ss:$48 sps:$4 sm:$0xff]  }
 0x4ed   : > { %14615 = vmatpush1.bf16.msra.mxu1 %v20869_v59  ;;  %14106 = vmatprep.subr.bf16.mxu0 %v20874_v29  ;;  %v20901_v59 = vld [vmem:[#allocation4 + $0x187c] ss:$48 sps:$4 sm:$0xff]   ;;  %v20896_v29 = vld [vmem:[#allocation4 + $0x1870] ss:$48 sps:$4 sm:$0xff]  }
 0x4ee   : > { %14616 = vmatprep.subr.bf16.mxu1 %v20877_v14  ;;  %v20899_v14 = vld [vmem:[#allocation4 + $0x1878] ss:$48 sps:$4 sm:$0xff]  }
 0x4f0   : > { %14107 = vmatpush1.bf16.msra.mxu0 %v20872_v51  ;;  %v20904_v51 = vld [vmem:[#allocation4 + $0x18d4] ss:$48 sps:$4 sm:$0xff]  }
 0x4f1   : > { %14617 = vmatpush1.bf16.msra.mxu1 %v20875_v13  ;;  %14108 = vmatprep.subr.bf16.mxu0 %v20880_v31  ;;  %v20907_v13 = vld [vmem:[#allocation4 + $0x18dc] ss:$48 sps:$4 sm:$0xff]   ;;  %v20902_v31 = vld [vmem:[#allocation4 + $0x18d0] ss:$48 sps:$4 sm:$0xff]  }
 0x4f2   : > { %14618 = vmatprep.subr.bf16.mxu1 %v20883_v23  ;;  %v20905_v23 = vld [vmem:[#allocation4 + $0x18d8] ss:$48 sps:$4 sm:$0xff]  }
 0x4f4   : > { %14109 = vmatpush1.bf16.msra.mxu0 %v20878_v45  ;;  %v20910_v45 = vld [vmem:[#allocation4 + $0x1934] ss:$48 sps:$4 sm:$0xff]  }
 0x4f5   : > { %14619 = vmatpush1.bf16.msra.mxu1 %v20881_v39  ;;  %14110 = vmatprep.subr.bf16.mxu0 %v20886_v38  ;;  %v20913_v39 = vld [vmem:[#allocation4 + $0x193c] ss:$48 sps:$4 sm:$0xff]   ;;  %v20908_v38 = vld [vmem:[#allocation4 + $0x1930] ss:$48 sps:$4 sm:$0xff]  }
 0x4f6   : > { %14620 = vmatprep.subr.bf16.mxu1 %v20889_v25  ;;  %v20911_v25 = vld [vmem:[#allocation4 + $0x1938] ss:$48 sps:$4 sm:$0xff]  }
 0x4f8   : > { %14111 = vmatpush1.bf16.msra.mxu0 %v20884_v40  ;;  %v20916_v40 = vld [vmem:[#allocation4 + $0x1994] ss:$48 sps:$4 sm:$0xff]  }
 0x4f9   : > { %14621 = vmatpush1.bf16.msra.mxu1 %v20887_v24  ;;  %14131 = vmatprep.subr.bf16.mxu0 %v20892_v56  ;;  %v20919_v24 = vld [vmem:[#allocation4 + $0x199c] ss:$48 sps:$4 sm:$0xff]   ;;  %v20914_v56 = vld [vmem:[#allocation4 + $0x1990] ss:$48 sps:$4 sm:$0xff]  }
 0x4fa   : > { %14641 = vmatprep.subr.bf16.mxu1 %v20895_v42  ;;  %v20917_v42 = vld [vmem:[#allocation4 + $0x1998] ss:$48 sps:$4 sm:$0xff]  }
 0x4fb   : > { %14113 = vmatmul.mubr.bf16.vlgmr.msra.gmra.mrb[24].mxu0 %v23288_v55 }
 0x4fc   : > { %14623 = vmatmul.mubr.bf16.vlgmr.msra.gmra.mrb[24].mxu1 %v23288_v55  ;;  %14122 = vmatprep.mubr.bf16.mxu0 %v23294_v15 }
 0x4fd   : > { %14132 = vmatpush1.bf16.msra.mxu0 %v20890_v26  ;;  %14632 = vmatprep.mubr.bf16.mxu1 %v23294_v15  ;;  %v20922_v26 = vld [vmem:[#allocation4 + $0x19f4] ss:$48 sps:$4 sm:$0xff]  }
 0x4fe   : > { %14642 = vmatpush1.bf16.msra.mxu1 %v20893_v33  ;;  %14133 = vmatprep.subr.bf16.mxu0 %v20898_v47  ;;  %v20925_v33 = vld [vmem:[#allocation4 + $0x19fc] ss:$48 sps:$4 sm:$0xff]   ;;  %v20920_v47 = vld [vmem:[#allocation4 + $0x19f0] ss:$48 sps:$4 sm:$0xff]  }
 0x4ff   : > { %14643 = vmatprep.subr.bf16.mxu1 %v20901_v59  ;;  %v20923_v59 = vld [vmem:[#allocation4 + $0x19f8] ss:$48 sps:$4 sm:$0xff]  }
 0x501   : > { %14134 = vmatpush1.bf16.msra.mxu0 %v20896_v29  ;;  %v20928_v29 = vld [vmem:[#allocation4 + $0x1a54] ss:$48 sps:$4 sm:$0xff]  }
 0x502   : > { %14644 = vmatpush1.bf16.msra.mxu1 %v20899_v14  ;;  %14135 = vmatprep.subr.bf16.mxu0 %v20904_v51  ;;  %v20931_v14 = vld [vmem:[#allocation4 + $0x1a5c] ss:$48 sps:$4 sm:$0xff]   ;;  %v20926_v51 = vld [vmem:[#allocation4 + $0x1a50] ss:$48 sps:$4 sm:$0xff]  }
 0x503   : > { %14123 = vmatmul.mubr.bf16.gmra.mrb[28].mxu0 %v23306_v12  ;;  %14645 = vmatprep.subr.bf16.mxu1 %v20907_v13  ;;  %v20929_v13 = vld [vmem:[#allocation4 + $0x1a58] ss:$48 sps:$4 sm:$0xff]  }
 0x504   : > { %14633 = vmatmul.mubr.bf16.gmra.mrb[28].mxu1 %v23306_v12  ;;  %14163 = vmatprep.mubr.bf16.mxu0 %v23311_v21 }
 0x505   : > { %14136 = vmatpush1.bf16.msra.mxu0 %v20902_v31  ;;  %14673 = vmatprep.mubr.bf16.mxu1 %v23311_v21  ;;  %v20934_v31 = vld [vmem:[#allocation4 + $0x1ab4] ss:$48 sps:$4 sm:$0xff]  }
 0x506   : > { %14646 = vmatpush1.bf16.msra.mxu1 %v20905_v23  ;;  %14137 = vmatprep.subr.bf16.mxu0 %v20910_v45  ;;  %v20937_v23 = vld [vmem:[#allocation4 + $0x1abc] ss:$48 sps:$4 sm:$0xff]   ;;  %v20932_v45 = vld [vmem:[#allocation4 + $0x1ab0] ss:$48 sps:$4 sm:$0xff]  }
 0x507   : > { %14647 = vmatprep.subr.bf16.mxu1 %v20913_v39  ;;  %v20935_v39 = vld [vmem:[#allocation4 + $0x1ab8] ss:$48 sps:$4 sm:$0xff]  }
 0x509   : > { %14138 = vmatpush1.bf16.msra.mxu0 %v20908_v38  ;;  %v20940_v38 = vld [vmem:[#allocation4 + $0x1b14] ss:$48 sps:$4 sm:$0xff]  }
 0x50a   : > { %14648 = vmatpush1.bf16.msra.mxu1 %v20911_v25  ;;  %14139 = vmatprep.subr.bf16.mxu0 %v20916_v40  ;;  %v20943_v25 = vld [vmem:[#allocation4 + $0x1b1c] ss:$48 sps:$4 sm:$0xff]   ;;  %v20938_v40 = vld [vmem:[#allocation4 + $0x1b10] ss:$48 sps:$4 sm:$0xff]  }
 0x50b   : > { %14649 = vmatprep.subr.bf16.mxu1 %v20919_v24  ;;  %v20941_v24 = vld [vmem:[#allocation4 + $0x1b18] ss:$48 sps:$4 sm:$0xff]  }
 0x50d   : > { %14140 = vmatpush1.bf16.msra.mxu0 %v20914_v56  ;;  %v20946_v56 = vld [vmem:[#allocation4 + $0x1b74] ss:$48 sps:$4 sm:$0xff]  }
 0x50e   : > { %14650 = vmatpush1.bf16.msra.mxu1 %v20917_v42  ;;  %14141 = vmatprep.subr.bf16.mxu0 %v20922_v26  ;;  %v20949_v42 = vld [vmem:[#allocation4 + $0x1b7c] ss:$48 sps:$4 sm:$0xff]   ;;  %v20944_v26 = vld [vmem:[#allocation4 + $0x1b70] ss:$48 sps:$4 sm:$0xff]  }
 0x50f   : > { %14651 = vmatprep.subr.bf16.mxu1 %v20925_v33  ;;  %v20947_v33 = vld [vmem:[#allocation4 + $0x1b78] ss:$48 sps:$4 sm:$0xff]  }
 0x511   : > { %14142 = vmatpush1.bf16.msra.mxu0 %v20920_v47  ;;  %v20952_v47 = vld [vmem:[#allocation4 + $0x1bd4] ss:$48 sps:$4 sm:$0xff]  }
 0x512   : > { %14652 = vmatpush1.bf16.msra.mxu1 %v20923_v59  ;;  %14143 = vmatprep.subr.bf16.mxu0 %v20928_v29  ;;  %v20955_v59 = vld [vmem:[#allocation4 + $0x1bdc] ss:$48 sps:$4 sm:$0xff]   ;;  %v20950_v29 = vld [vmem:[#allocation4 + $0x1bd0] ss:$48 sps:$4 sm:$0xff]  }
 0x513   : > { %14653 = vmatprep.subr.bf16.mxu1 %v20931_v14  ;;  %v20953_v14 = vld [vmem:[#allocation4 + $0x1bd8] ss:$48 sps:$4 sm:$0xff]  }
 0x515   : > { %14144 = vmatpush1.bf16.msra.mxu0 %v20926_v51  ;;  %v20958_v51 = vld [vmem:[#allocation4 + $0x1c34] ss:$48 sps:$4 sm:$0xff]  }
 0x516   : > { %14654 = vmatpush1.bf16.msra.mxu1 %v20929_v13  ;;  %14145 = vmatprep.subr.bf16.mxu0 %v20934_v31  ;;  %v20961_v13 = vld [vmem:[#allocation4 + $0x1c3c] ss:$48 sps:$4 sm:$0xff]   ;;  %v20956_v31 = vld [vmem:[#allocation4 + $0x1c30] ss:$48 sps:$4 sm:$0xff]  }
 0x517   : > { %14655 = vmatprep.subr.bf16.mxu1 %v20937_v23  ;;  %v20959_v23 = vld [vmem:[#allocation4 + $0x1c38] ss:$48 sps:$4 sm:$0xff]  }
 0x519   : > { %14146 = vmatpush1.bf16.msra.mxu0 %v20932_v45  ;;  %v20964_v45 = vld [vmem:[#allocation4 + $0x1c94] ss:$48 sps:$4 sm:$0xff]  }
 0x51a   : > { %14656 = vmatpush1.bf16.msra.mxu1 %v20935_v39  ;;  %14147 = vmatprep.subr.bf16.mxu0 %v20940_v38  ;;  %v20967_v39 = vld [vmem:[#allocation4 + $0x1c9c] ss:$48 sps:$4 sm:$0xff]   ;;  %v20962_v38 = vld [vmem:[#allocation4 + $0x1c90] ss:$48 sps:$4 sm:$0xff]  }
 0x51b   : > { %14657 = vmatprep.subr.bf16.mxu1 %v20943_v25  ;;  %v20965_v25 = vld [vmem:[#allocation4 + $0x1c98] ss:$48 sps:$4 sm:$0xff]  }
 0x51d   : > { %14148 = vmatpush1.bf16.msra.mxu0 %v20938_v40  ;;  %v20970_v40 = vld [vmem:[#allocation4 + $0x1cf4] ss:$48 sps:$4 sm:$0xff]  }
 0x51e   : > { %14658 = vmatpush1.bf16.msra.mxu1 %v20941_v24  ;;  %14149 = vmatprep.subr.bf16.mxu0 %v20946_v56  ;;  %v20973_v24 = vld [vmem:[#allocation4 + $0x1cfc] ss:$48 sps:$4 sm:$0xff]   ;;  %v20968_v56 = vld [vmem:[#allocation4 + $0x1cf0] ss:$48 sps:$4 sm:$0xff]  }
 0x51f   : > { %14659 = vmatprep.subr.bf16.mxu1 %v20949_v42  ;;  %v20971_v42 = vld [vmem:[#allocation4 + $0x1cf8] ss:$48 sps:$4 sm:$0xff]  }
 0x521   : > { %14150 = vmatpush1.bf16.msra.mxu0 %v20944_v26  ;;  %v20976_v26 = vld [vmem:[#allocation4 + $0x1d54] ss:$48 sps:$4 sm:$0xff]  }
 0x522   : > { %14660 = vmatpush1.bf16.msra.mxu1 %v20947_v33  ;;  %14151 = vmatprep.subr.bf16.mxu0 %v20952_v47  ;;  %v20979_v33 = vld [vmem:[#allocation4 + $0x1d5c] ss:$48 sps:$4 sm:$0xff]   ;;  %v20974_v47 = vld [vmem:[#allocation4 + $0x1d50] ss:$48 sps:$4 sm:$0xff]  }
 0x523   : > { %14661 = vmatprep.subr.bf16.mxu1 %v20955_v59  ;;  %v20977_v59 = vld [vmem:[#allocation4 + $0x1d58] ss:$48 sps:$4 sm:$0xff]  }
 0x525   : > { %14152 = vmatpush1.bf16.msra.mxu0 %v20950_v29  ;;  %v20982_v29 = vld [vmem:[#allocation4 + $0x1db4] ss:$48 sps:$4 sm:$0xff]  }
 0x526   : > { %14662 = vmatpush1.bf16.msra.mxu1 %v20953_v14  ;;  %14153 = vmatprep.subr.bf16.mxu0 %v20958_v51  ;;  %v20985_v14 = vld [vmem:[#allocation4 + $0x1dbc] ss:$48 sps:$4 sm:$0xff]   ;;  %v20980_v51 = vld [vmem:[#allocation4 + $0x1db0] ss:$48 sps:$4 sm:$0xff]  }
 0x527   : > { %14663 = vmatprep.subr.bf16.mxu1 %v20961_v13  ;;  %v20983_v13 = vld [vmem:[#allocation4 + $0x1db8] ss:$48 sps:$4 sm:$0xff]  }
 0x529   : > { %14154 = vmatpush1.bf16.msra.mxu0 %v20956_v31  ;;  %v20988_v31 = vld [vmem:[#allocation4 + $0x1e14] ss:$48 sps:$4 sm:$0xff]  }
 0x52a   : > { %14664 = vmatpush1.bf16.msra.mxu1 %v20959_v23  ;;  %14155 = vmatprep.subr.bf16.mxu0 %v20964_v45  ;;  %v20991_v23 = vld [vmem:[#allocation4 + $0x1e1c] ss:$48 sps:$4 sm:$0xff]   ;;  %v20986_v45 = vld [vmem:[#allocation4 + $0x1e10] ss:$48 sps:$4 sm:$0xff]  }
 0x52b   : > { %14665 = vmatprep.subr.bf16.mxu1 %v20967_v39  ;;  %v20989_v39 = vld [vmem:[#allocation4 + $0x1e18] ss:$48 sps:$4 sm:$0xff]  }
 0x52d   : > { %14156 = vmatpush1.bf16.msra.mxu0 %v20962_v38  ;;  %v20994_v38 = vld [vmem:[#allocation4 + $0x1e74] ss:$48 sps:$4 sm:$0xff]  }
 0x52e   : > { %14666 = vmatpush1.bf16.msra.mxu1 %v20965_v25  ;;  %14157 = vmatprep.subr.bf16.mxu0 %v20970_v40  ;;  %v20997_v25 = vld [vmem:[#allocation4 + $0x1e7c] ss:$48 sps:$4 sm:$0xff]   ;;  %v20992_v40 = vld [vmem:[#allocation4 + $0x1e70] ss:$48 sps:$4 sm:$0xff]  }
 0x52f   : > { %14667 = vmatprep.subr.bf16.mxu1 %v20973_v24  ;;  %v20995_v24 = vld [vmem:[#allocation4 + $0x1e78] ss:$48 sps:$4 sm:$0xff]  }
 0x531   : > { %14158 = vmatpush1.bf16.msra.mxu0 %v20968_v56  ;;  %v21000_v56 = vld [vmem:[#allocation4 + $0x1ed4] ss:$48 sps:$4 sm:$0xff]  }
 0x532   : > { %14668 = vmatpush1.bf16.msra.mxu1 %v20971_v42  ;;  %14159 = vmatprep.subr.bf16.mxu0 %v20976_v26  ;;  %v21003_v42 = vld [vmem:[#allocation4 + $0x1edc] ss:$48 sps:$4 sm:$0xff]   ;;  %v20998_v26 = vld [vmem:[#allocation4 + $0x1ed0] ss:$48 sps:$4 sm:$0xff]  }
 0x533   : > { %14669 = vmatprep.subr.bf16.mxu1 %v20979_v33  ;;  %v21001_v33 = vld [vmem:[#allocation4 + $0x1ed8] ss:$48 sps:$4 sm:$0xff]  }
 0x535   : > { %14160 = vmatpush1.bf16.msra.mxu0 %v20974_v47  ;;  %v21006_v47 = vld [vmem:[#allocation4 + $0x1f34] ss:$48 sps:$4 sm:$0xff]  }
 0x536   : > { %14670 = vmatpush1.bf16.msra.mxu1 %v20977_v59  ;;  %14161 = vmatprep.subr.bf16.mxu0 %v20982_v29  ;;  %v21009_v59 = vld [vmem:[#allocation4 + $0x1f3c] ss:$48 sps:$4 sm:$0xff]   ;;  %v21004_v29 = vld [vmem:[#allocation4 + $0x1f30] ss:$48 sps:$4 sm:$0xff]  }
 0x537   : > { %14671 = vmatprep.subr.bf16.mxu1 %v20985_v14  ;;  %v21007_v14 = vld [vmem:[#allocation4 + $0x1f38] ss:$48 sps:$4 sm:$0xff]  }
 0x539   : > { %14162 = vmatpush1.bf16.msra.mxu0 %v20980_v51  ;;  %v21012_v51 = vld [vmem:[#allocation4 + $0x1f94] ss:$48 sps:$4 sm:$0xff]  }
 0x53a   : > { %14672 = vmatpush1.bf16.msra.mxu1 %v20983_v13  ;;  %14182 = vmatprep.subr.bf16.mxu0 %v20988_v31  ;;  %v21015_v13 = vld [vmem:[#allocation4 + $0x1f9c] ss:$48 sps:$4 sm:$0xff]   ;;  %v21010_v31 = vld [vmem:[#allocation4 + $0x1f90] ss:$48 sps:$4 sm:$0xff]  }
 0x53b   : > { %14692 = vmatprep.subr.bf16.mxu1 %v20991_v23  ;;  %v21013_v23 = vld [vmem:[#allocation4 + $0x1f98] ss:$48 sps:$4 sm:$0xff]  }
 0x53c   : > { %14164 = vmatmul.mubr.bf16.vlgmr.msra.gmra.mrb[24].mxu0 %v23322_v63 }
 0x53d   : > { %14674 = vmatmul.mubr.bf16.vlgmr.msra.gmra.mrb[24].mxu1 %v23322_v63  ;;  %14173 = vmatprep.mubr.bf16.mxu0 %v23326_v4 }
 0x53e   : > { %14183 = vmatpush1.bf16.msra.mxu0 %v20986_v45  ;;  %14683 = vmatprep.mubr.bf16.mxu1 %v23326_v4  ;;  %v21018_v45 = vld [vmem:[#allocation4 + $0x1ff4] ss:$48 sps:$4 sm:$0xff]  }
 0x53f   : > { %14693 = vmatpush1.bf16.msra.mxu1 %v20989_v39  ;;  %14184 = vmatprep.subr.bf16.mxu0 %v20994_v38  ;;  %v21021_v39 = vld [vmem:[#allocation4 + $0x1ffc] ss:$48 sps:$4 sm:$0xff]   ;;  %v21016_v38 = vld [vmem:[#allocation4 + $0x1ff0] ss:$48 sps:$4 sm:$0xff]  }
 0x540   : > { %14694 = vmatprep.subr.bf16.mxu1 %v20997_v25  ;;  %v21019_v25 = vld [vmem:[#allocation4 + $0x1ff8] ss:$48 sps:$4 sm:$0xff]  }
 0x542   : > { %14185 = vmatpush1.bf16.msra.mxu0 %v20992_v40  ;;  %v21024_v40 = vld [vmem:[#allocation4 + $0x2054] ss:$48 sps:$4 sm:$0xff]  }
 0x543   : > { %14695 = vmatpush1.bf16.msra.mxu1 %v20995_v24  ;;  %14186 = vmatprep.subr.bf16.mxu0 %v21000_v56  ;;  %v21027_v24 = vld [vmem:[#allocation4 + $0x205c] ss:$48 sps:$4 sm:$0xff]   ;;  %v21022_v56 = vld [vmem:[#allocation4 + $0x2050] ss:$48 sps:$4 sm:$0xff]  }
 0x544   : > { %14174 = vmatmul.mubr.bf16.gmra.mrb[28].mxu0 %v23338_v35  ;;  %14696 = vmatprep.subr.bf16.mxu1 %v21003_v42  ;;  %v21025_v42 = vld [vmem:[#allocation4 + $0x2058] ss:$48 sps:$4 sm:$0xff]  }
 0x545   : > { %14684 = vmatmul.mubr.bf16.gmra.mrb[28].mxu1 %v23338_v35  ;;  %14214 = vmatprep.mubr.bf16.mxu0 %v23343_v19 }
 0x546   : > { %14187 = vmatpush1.bf16.msra.mxu0 %v20998_v26  ;;  %14724 = vmatprep.mubr.bf16.mxu1 %v23343_v19  ;;  %v21030_v26 = vld [vmem:[#allocation4 + $0x20b4] ss:$48 sps:$4 sm:$0xff]  }
 0x547   : > { %14697 = vmatpush1.bf16.msra.mxu1 %v21001_v33  ;;  %14188 = vmatprep.subr.bf16.mxu0 %v21006_v47  ;;  %v21033_v33 = vld [vmem:[#allocation4 + $0x20bc] ss:$48 sps:$4 sm:$0xff]   ;;  %v21028_v47 = vld [vmem:[#allocation4 + $0x20b0] ss:$48 sps:$4 sm:$0xff]  }
 0x548   : > { %14698 = vmatprep.subr.bf16.mxu1 %v21009_v59  ;;  %v21031_v59 = vld [vmem:[#allocation4 + $0x20b8] ss:$48 sps:$4 sm:$0xff]  }
 0x54a   : > { %14189 = vmatpush1.bf16.msra.mxu0 %v21004_v29  ;;  %v21036_v29 = vld [vmem:[#allocation4 + $0x2114] ss:$48 sps:$4 sm:$0xff]  }
 0x54b   : > { %14699 = vmatpush1.bf16.msra.mxu1 %v21007_v14  ;;  %14190 = vmatprep.subr.bf16.mxu0 %v21012_v51  ;;  %v21039_v14 = vld [vmem:[#allocation4 + $0x211c] ss:$48 sps:$4 sm:$0xff]   ;;  %v21034_v51 = vld [vmem:[#allocation4 + $0x2110] ss:$48 sps:$4 sm:$0xff]  }
 0x54c   : > { %14700 = vmatprep.subr.bf16.mxu1 %v21015_v13  ;;  %v21037_v13 = vld [vmem:[#allocation4 + $0x2118] ss:$48 sps:$4 sm:$0xff]  }
 0x54e   : > { %14191 = vmatpush1.bf16.msra.mxu0 %v21010_v31  ;;  %v21042_v31 = vld [vmem:[#allocation4 + $0x2174] ss:$48 sps:$4 sm:$0xff]  }
 0x54f   : > { %14701 = vmatpush1.bf16.msra.mxu1 %v21013_v23  ;;  %14192 = vmatprep.subr.bf16.mxu0 %v21018_v45  ;;  %v21045_v23 = vld [vmem:[#allocation4 + $0x217c] ss:$48 sps:$4 sm:$0xff]   ;;  %v21040_v45 = vld [vmem:[#allocation4 + $0x2170] ss:$48 sps:$4 sm:$0xff]  }
 0x550   : > { %14702 = vmatprep.subr.bf16.mxu1 %v21021_v39  ;;  %v21043_v39 = vld [vmem:[#allocation4 + $0x2178] ss:$48 sps:$4 sm:$0xff]  }
 0x552   : > { %14193 = vmatpush1.bf16.msra.mxu0 %v21016_v38  ;;  %v21048_v38 = vld [vmem:[#allocation4 + $0x21d4] ss:$48 sps:$4 sm:$0xff]  }
 0x553   : > { %14703 = vmatpush1.bf16.msra.mxu1 %v21019_v25  ;;  %14194 = vmatprep.subr.bf16.mxu0 %v21024_v40  ;;  %v21051_v25 = vld [vmem:[#allocation4 + $0x21dc] ss:$48 sps:$4 sm:$0xff]   ;;  %v21046_v40 = vld [vmem:[#allocation4 + $0x21d0] ss:$48 sps:$4 sm:$0xff]  }
 0x554   : > { %14704 = vmatprep.subr.bf16.mxu1 %v21027_v24  ;;  %v21049_v24 = vld [vmem:[#allocation4 + $0x21d8] ss:$48 sps:$4 sm:$0xff]  }
 0x556   : > { %14195 = vmatpush1.bf16.msra.mxu0 %v21022_v56  ;;  %v21054_v56 = vld [vmem:[#allocation4 + $0x2234] ss:$48 sps:$4 sm:$0xff]  }
 0x557   : > { %14705 = vmatpush1.bf16.msra.mxu1 %v21025_v42  ;;  %14196 = vmatprep.subr.bf16.mxu0 %v21030_v26  ;;  %v21057_v42 = vld [vmem:[#allocation4 + $0x223c] ss:$48 sps:$4 sm:$0xff]   ;;  %v21052_v26 = vld [vmem:[#allocation4 + $0x2230] ss:$48 sps:$4 sm:$0xff]  }
 0x558   : > { %14706 = vmatprep.subr.bf16.mxu1 %v21033_v33  ;;  %v21055_v33 = vld [vmem:[#allocation4 + $0x2238] ss:$48 sps:$4 sm:$0xff]  }
 0x55a   : > { %14197 = vmatpush1.bf16.msra.mxu0 %v21028_v47  ;;  %v21060_v47 = vld [vmem:[#allocation4 + $0x2294] ss:$48 sps:$4 sm:$0xff]  }
 0x55b   : > { %14707 = vmatpush1.bf16.msra.mxu1 %v21031_v59  ;;  %14198 = vmatprep.subr.bf16.mxu0 %v21036_v29  ;;  %v21063_v59 = vld [vmem:[#allocation4 + $0x229c] ss:$48 sps:$4 sm:$0xff]   ;;  %v21058_v29 = vld [vmem:[#allocation4 + $0x2290] ss:$48 sps:$4 sm:$0xff]  }
 0x55c   : > { %14708 = vmatprep.subr.bf16.mxu1 %v21039_v14  ;;  %v21061_v14 = vld [vmem:[#allocation4 + $0x2298] ss:$48 sps:$4 sm:$0xff]  }
 0x55e   : > { %14199 = vmatpush1.bf16.msra.mxu0 %v21034_v51  ;;  %v21066_v51 = vld [vmem:[#allocation4 + $0x22f4] ss:$48 sps:$4 sm:$0xff]  }
 0x55f   : > { %14709 = vmatpush1.bf16.msra.mxu1 %v21037_v13  ;;  %14200 = vmatprep.subr.bf16.mxu0 %v21042_v31  ;;  %v21069_v13 = vld [vmem:[#allocation4 + $0x22fc] ss:$48 sps:$4 sm:$0xff]   ;;  %v21064_v31 = vld [vmem:[#allocation4 + $0x22f0] ss:$48 sps:$4 sm:$0xff]  }
 0x560   : > { %14710 = vmatprep.subr.bf16.mxu1 %v21045_v23  ;;  %v21067_v23 = vld [vmem:[#allocation4 + $0x22f8] ss:$48 sps:$4 sm:$0xff]  }
 0x562   : > { %14201 = vmatpush1.bf16.msra.mxu0 %v21040_v45  ;;  %v21072_v45 = vld [vmem:[#allocation4 + $0x2354] ss:$48 sps:$4 sm:$0xff]  }
 0x563   : > { %14711 = vmatpush1.bf16.msra.mxu1 %v21043_v39  ;;  %14202 = vmatprep.subr.bf16.mxu0 %v21048_v38  ;;  %v21075_v39 = vld [vmem:[#allocation4 + $0x235c] ss:$48 sps:$4 sm:$0xff]   ;;  %v21070_v38 = vld [vmem:[#allocation4 + $0x2350] ss:$48 sps:$4 sm:$0xff]  }
 0x564   : > { %14712 = vmatprep.subr.bf16.mxu1 %v21051_v25  ;;  %v21073_v25 = vld [vmem:[#allocation4 + $0x2358] ss:$48 sps:$4 sm:$0xff]  }
 0x566   : > { %14203 = vmatpush1.bf16.msra.mxu0 %v21046_v40  ;;  %v21078_v40 = vld [vmem:[#allocation4 + $0x23b4] ss:$48 sps:$4 sm:$0xff]  }
 0x567   : > { %14713 = vmatpush1.bf16.msra.mxu1 %v21049_v24  ;;  %14204 = vmatprep.subr.bf16.mxu0 %v21054_v56  ;;  %v21081_v24 = vld [vmem:[#allocation4 + $0x23bc] ss:$48 sps:$4 sm:$0xff]   ;;  %v21076_v56 = vld [vmem:[#allocation4 + $0x23b0] ss:$48 sps:$4 sm:$0xff]  }
 0x568   : > { %14714 = vmatprep.subr.bf16.mxu1 %v21057_v42  ;;  %v21079_v42 = vld [vmem:[#allocation4 + $0x23b8] ss:$48 sps:$4 sm:$0xff]  }
 0x56a   : > { %14205 = vmatpush1.bf16.msra.mxu0 %v21052_v26  ;;  %v21084_v26 = vld [vmem:[#allocation4 + $0x2414] ss:$48 sps:$4 sm:$0xff]  }
 0x56b   : > { %14715 = vmatpush1.bf16.msra.mxu1 %v21055_v33  ;;  %14206 = vmatprep.subr.bf16.mxu0 %v21060_v47  ;;  %v21087_v33 = vld [vmem:[#allocation4 + $0x241c] ss:$48 sps:$4 sm:$0xff]   ;;  %v21082_v47 = vld [vmem:[#allocation4 + $0x2410] ss:$48 sps:$4 sm:$0xff]  }
 0x56c   : > { %14716 = vmatprep.subr.bf16.mxu1 %v21063_v59  ;;  %v21085_v59 = vld [vmem:[#allocation4 + $0x2418] ss:$48 sps:$4 sm:$0xff]  }
 0x56e   : > { %14207 = vmatpush1.bf16.msra.mxu0 %v21058_v29  ;;  %v21090_v29 = vld [vmem:[#allocation4 + $0x2474] ss:$48 sps:$4 sm:$0xff]  }
 0x56f   : > { %14717 = vmatpush1.bf16.msra.mxu1 %v21061_v14  ;;  %14208 = vmatprep.subr.bf16.mxu0 %v21066_v51  ;;  %v21093_v14 = vld [vmem:[#allocation4 + $0x247c] ss:$48 sps:$4 sm:$0xff]   ;;  %v21088_v51 = vld [vmem:[#allocation4 + $0x2470] ss:$48 sps:$4 sm:$0xff]  }
 0x570   : > { %14718 = vmatprep.subr.bf16.mxu1 %v21069_v13  ;;  %v21091_v13 = vld [vmem:[#allocation4 + $0x2478] ss:$48 sps:$4 sm:$0xff]  }
 0x572   : > { %14209 = vmatpush1.bf16.msra.mxu0 %v21064_v31  ;;  %v21096_v31 = vld [vmem:[#allocation4 + $0x24d4] ss:$48 sps:$4 sm:$0xff]  }
 0x573   : > { %14719 = vmatpush1.bf16.msra.mxu1 %v21067_v23  ;;  %14210 = vmatprep.subr.bf16.mxu0 %v21072_v45  ;;  %v21099_v23 = vld [vmem:[#allocation4 + $0x24dc] ss:$48 sps:$4 sm:$0xff]   ;;  %v21094_v45 = vld [vmem:[#allocation4 + $0x24d0] ss:$48 sps:$4 sm:$0xff]  }
 0x574   : > { %14720 = vmatprep.subr.bf16.mxu1 %v21075_v39  ;;  %v21097_v39 = vld [vmem:[#allocation4 + $0x24d8] ss:$48 sps:$4 sm:$0xff]  }
 0x576   : > { %14211 = vmatpush1.bf16.msra.mxu0 %v21070_v38  ;;  %v21102_v38 = vld [vmem:[#allocation4 + $0x2534] ss:$48 sps:$4 sm:$0xff]  }
 0x577   : > { %14721 = vmatpush1.bf16.msra.mxu1 %v21073_v25  ;;  %14212 = vmatprep.subr.bf16.mxu0 %v21078_v40  ;;  %v21105_v25 = vld [vmem:[#allocation4 + $0x253c] ss:$48 sps:$4 sm:$0xff]   ;;  %v21100_v40 = vld [vmem:[#allocation4 + $0x2530] ss:$48 sps:$4 sm:$0xff]  }
 0x578   : > { %14722 = vmatprep.subr.bf16.mxu1 %v21081_v24  ;;  %v21103_v24 = vld [vmem:[#allocation4 + $0x2538] ss:$48 sps:$4 sm:$0xff]  }
 0x57a   : > { %14213 = vmatpush1.bf16.msra.mxu0 %v21076_v56  ;;  %v21108_v56 = vld [vmem:[#allocation4 + $0x2594] ss:$48 sps:$4 sm:$0xff]  }
 0x57b   : > { %14723 = vmatpush1.bf16.msra.mxu1 %v21079_v42  ;;  %14233 = vmatprep.subr.bf16.mxu0 %v21084_v26  ;;  %v21111_v42 = vld [vmem:[#allocation4 + $0x259c] ss:$48 sps:$4 sm:$0xff]   ;;  %v21106_v26 = vld [vmem:[#allocation4 + $0x2590] ss:$48 sps:$4 sm:$0xff]  }
 0x57c   : > { %14743 = vmatprep.subr.bf16.mxu1 %v21087_v33  ;;  %v21109_v33 = vld [vmem:[#allocation4 + $0x2598] ss:$48 sps:$4 sm:$0xff]  }
 0x57d   : > { %14215 = vmatmul.mubr.bf16.vlgmr.msra.gmra.mrb[24].mxu0 %v23354_v48 }
 0x57e   : > { %14725 = vmatmul.mubr.bf16.vlgmr.msra.gmra.mrb[24].mxu1 %v23354_v48  ;;  %14224 = vmatprep.mubr.bf16.mxu0 %v23358_v49 }
 0x57f   : > { %14234 = vmatpush1.bf16.msra.mxu0 %v21082_v47  ;;  %14734 = vmatprep.mubr.bf16.mxu1 %v23358_v49  ;;  %v21114_v47 = vld [vmem:[#allocation4 + $0x25f4] ss:$48 sps:$4 sm:$0xff]  }
 0x580   : > { %14744 = vmatpush1.bf16.msra.mxu1 %v21085_v59  ;;  %14235 = vmatprep.subr.bf16.mxu0 %v21090_v29  ;;  %v21117_v59 = vld [vmem:[#allocation4 + $0x25fc] ss:$48 sps:$4 sm:$0xff]   ;;  %v21112_v29 = vld [vmem:[#allocation4 + $0x25f0] ss:$48 sps:$4 sm:$0xff]  }
 0x581   : > { %14745 = vmatprep.subr.bf16.mxu1 %v21093_v14  ;;  %v21115_v14 = vld [vmem:[#allocation4 + $0x25f8] ss:$48 sps:$4 sm:$0xff]  }
 0x583   : > { %14236 = vmatpush1.bf16.msra.mxu0 %v21088_v51  ;;  %v21120_v51 = vld [vmem:[#allocation4 + $0x2654] ss:$48 sps:$4 sm:$0xff]  }
 0x584   : > { %14746 = vmatpush1.bf16.msra.mxu1 %v21091_v13  ;;  %14237 = vmatprep.subr.bf16.mxu0 %v21096_v31  ;;  %v21123_v13 = vld [vmem:[#allocation4 + $0x265c] ss:$48 sps:$4 sm:$0xff]   ;;  %v21118_v31 = vld [vmem:[#allocation4 + $0x2650] ss:$48 sps:$4 sm:$0xff]  }
 0x585   : > { %14225 = vmatmul.mubr.bf16.gmra.mrb[28].mxu0 %v23370_v37  ;;  %14747 = vmatprep.subr.bf16.mxu1 %v21099_v23  ;;  %v21121_v23 = vld [vmem:[#allocation4 + $0x2658] ss:$48 sps:$4 sm:$0xff]  }
 0x586   : > { %14735 = vmatmul.mubr.bf16.gmra.mrb[28].mxu1 %v23370_v37  ;;  %14265 = vmatprep.mubr.bf16.mxu0 %v23375_v58 }
 0x587   : > { %14238 = vmatpush1.bf16.msra.mxu0 %v21094_v45  ;;  %14775 = vmatprep.mubr.bf16.mxu1 %v23375_v58  ;;  %v21126_v45 = vld [vmem:[#allocation4 + $0x26b4] ss:$48 sps:$4 sm:$0xff]  }
 0x588   : > { %14748 = vmatpush1.bf16.msra.mxu1 %v21097_v39  ;;  %14239 = vmatprep.subr.bf16.mxu0 %v21102_v38  ;;  %v21129_v39 = vld [vmem:[#allocation4 + $0x26bc] ss:$48 sps:$4 sm:$0xff]   ;;  %v21124_v38 = vld [vmem:[#allocation4 + $0x26b0] ss:$48 sps:$4 sm:$0xff]  }
 0x589   : > { %14749 = vmatprep.subr.bf16.mxu1 %v21105_v25  ;;  %v21127_v25 = vld [vmem:[#allocation4 + $0x26b8] ss:$48 sps:$4 sm:$0xff]  }
 0x58b   : > { %14240 = vmatpush1.bf16.msra.mxu0 %v21100_v40  ;;  %v21132_v40 = vld [vmem:[#allocation4 + $0x2714] ss:$48 sps:$4 sm:$0xff]  }
 0x58c   : > { %14750 = vmatpush1.bf16.msra.mxu1 %v21103_v24  ;;  %14241 = vmatprep.subr.bf16.mxu0 %v21108_v56  ;;  %v21135_v24 = vld [vmem:[#allocation4 + $0x271c] ss:$48 sps:$4 sm:$0xff]   ;;  %v21130_v56 = vld [vmem:[#allocation4 + $0x2710] ss:$48 sps:$4 sm:$0xff]  }
 0x58d   : > { %14751 = vmatprep.subr.bf16.mxu1 %v21111_v42  ;;  %v21133_v42 = vld [vmem:[#allocation4 + $0x2718] ss:$48 sps:$4 sm:$0xff]  }
 0x58f   : > { %14242 = vmatpush1.bf16.msra.mxu0 %v21106_v26  ;;  %v21138_v26 = vld [vmem:[#allocation4 + $0x2774] ss:$48 sps:$4 sm:$0xff]  }
 0x590   : > { %14752 = vmatpush1.bf16.msra.mxu1 %v21109_v33  ;;  %14243 = vmatprep.subr.bf16.mxu0 %v21114_v47  ;;  %v21141_v33 = vld [vmem:[#allocation4 + $0x277c] ss:$48 sps:$4 sm:$0xff]   ;;  %v21136_v47 = vld [vmem:[#allocation4 + $0x2770] ss:$48 sps:$4 sm:$0xff]  }
 0x591   : > { %14753 = vmatprep.subr.bf16.mxu1 %v21117_v59  ;;  %v21139_v59 = vld [vmem:[#allocation4 + $0x2778] ss:$48 sps:$4 sm:$0xff]  }
 0x593   : > { %14244 = vmatpush1.bf16.msra.mxu0 %v21112_v29  ;;  %v21144_v29 = vld [vmem:[#allocation4 + $0x27d4] ss:$48 sps:$4 sm:$0xff]  }
 0x594   : > { %14754 = vmatpush1.bf16.msra.mxu1 %v21115_v14  ;;  %14245 = vmatprep.subr.bf16.mxu0 %v21120_v51  ;;  %v21147_v14 = vld [vmem:[#allocation4 + $0x27dc] ss:$48 sps:$4 sm:$0xff]   ;;  %v21142_v51 = vld [vmem:[#allocation4 + $0x27d0] ss:$48 sps:$4 sm:$0xff]  }
 0x595   : > { %14755 = vmatprep.subr.bf16.mxu1 %v21123_v13  ;;  %v21145_v13 = vld [vmem:[#allocation4 + $0x27d8] ss:$48 sps:$4 sm:$0xff]  }
 0x597   : > { %14246 = vmatpush1.bf16.msra.mxu0 %v21118_v31  ;;  %v21150_v31 = vld [vmem:[#allocation4 + $0x2834] ss:$48 sps:$4 sm:$0xff]  }
 0x598   : > { %14756 = vmatpush1.bf16.msra.mxu1 %v21121_v23  ;;  %14247 = vmatprep.subr.bf16.mxu0 %v21126_v45  ;;  %v21153_v23 = vld [vmem:[#allocation4 + $0x283c] ss:$48 sps:$4 sm:$0xff]   ;;  %v21148_v45 = vld [vmem:[#allocation4 + $0x2830] ss:$48 sps:$4 sm:$0xff]  }
 0x599   : > { %14757 = vmatprep.subr.bf16.mxu1 %v21129_v39  ;;  %v21151_v39 = vld [vmem:[#allocation4 + $0x2838] ss:$48 sps:$4 sm:$0xff]  }
 0x59b   : > { %14248 = vmatpush1.bf16.msra.mxu0 %v21124_v38  ;;  %v21156_v38 = vld [vmem:[#allocation4 + $0x2894] ss:$48 sps:$4 sm:$0xff]  }
 0x59c   : > { %14758 = vmatpush1.bf16.msra.mxu1 %v21127_v25  ;;  %14249 = vmatprep.subr.bf16.mxu0 %v21132_v40  ;;  %v21159_v25 = vld [vmem:[#allocation4 + $0x289c] ss:$48 sps:$4 sm:$0xff]   ;;  %v21154_v40 = vld [vmem:[#allocation4 + $0x2890] ss:$48 sps:$4 sm:$0xff]  }
 0x59d   : > { %14759 = vmatprep.subr.bf16.mxu1 %v21135_v24  ;;  %v21157_v24 = vld [vmem:[#allocation4 + $0x2898] ss:$48 sps:$4 sm:$0xff]  }
 0x59f   : > { %14250 = vmatpush1.bf16.msra.mxu0 %v21130_v56  ;;  %v21162_v56 = vld [vmem:[#allocation4 + $0x28f4] ss:$48 sps:$4 sm:$0xff]  }
 0x5a0   : > { %14760 = vmatpush1.bf16.msra.mxu1 %v21133_v42  ;;  %14251 = vmatprep.subr.bf16.mxu0 %v21138_v26  ;;  %v21165_v42 = vld [vmem:[#allocation4 + $0x28fc] ss:$48 sps:$4 sm:$0xff]   ;;  %v21160_v26 = vld [vmem:[#allocation4 + $0x28f0] ss:$48 sps:$4 sm:$0xff]  }
 0x5a1   : > { %14761 = vmatprep.subr.bf16.mxu1 %v21141_v33  ;;  %v21163_v33 = vld [vmem:[#allocation4 + $0x28f8] ss:$48 sps:$4 sm:$0xff]  }
 0x5a3   : > { %14252 = vmatpush1.bf16.msra.mxu0 %v21136_v47  ;;  %v21168_v47 = vld [vmem:[#allocation4 + $0x2954] ss:$48 sps:$4 sm:$0xff]  }
 0x5a4   : > { %14762 = vmatpush1.bf16.msra.mxu1 %v21139_v59  ;;  %14253 = vmatprep.subr.bf16.mxu0 %v21144_v29  ;;  %v21171_v59 = vld [vmem:[#allocation4 + $0x295c] ss:$48 sps:$4 sm:$0xff]   ;;  %v21166_v29 = vld [vmem:[#allocation4 + $0x2950] ss:$48 sps:$4 sm:$0xff]  }
 0x5a5   : > { %14763 = vmatprep.subr.bf16.mxu1 %v21147_v14  ;;  %v21169_v14 = vld [vmem:[#allocation4 + $0x2958] ss:$48 sps:$4 sm:$0xff]  }
 0x5a7   : > { %14254 = vmatpush1.bf16.msra.mxu0 %v21142_v51  ;;  %v21174_v51 = vld [vmem:[#allocation4 + $0x29b4] ss:$48 sps:$4 sm:$0xff]  }
 0x5a8   : > { %14764 = vmatpush1.bf16.msra.mxu1 %v21145_v13  ;;  %14255 = vmatprep.subr.bf16.mxu0 %v21150_v31  ;;  %v21177_v13 = vld [vmem:[#allocation4 + $0x29bc] ss:$48 sps:$4 sm:$0xff]   ;;  %v21172_v31 = vld [vmem:[#allocation4 + $0x29b0] ss:$48 sps:$4 sm:$0xff]  }
 0x5a9   : > { %14765 = vmatprep.subr.bf16.mxu1 %v21153_v23  ;;  %v21175_v23 = vld [vmem:[#allocation4 + $0x29b8] ss:$48 sps:$4 sm:$0xff]  }
 0x5ab   : > { %14256 = vmatpush1.bf16.msra.mxu0 %v21148_v45  ;;  %v21180_v45 = vld [vmem:[#allocation4 + $0x2a14] ss:$48 sps:$4 sm:$0xff]  }
 0x5ac   : > { %14766 = vmatpush1.bf16.msra.mxu1 %v21151_v39  ;;  %14257 = vmatprep.subr.bf16.mxu0 %v21156_v38  ;;  %v21183_v39 = vld [vmem:[#allocation4 + $0x2a1c] ss:$48 sps:$4 sm:$0xff]   ;;  %v21178_v38 = vld [vmem:[#allocation4 + $0x2a10] ss:$48 sps:$4 sm:$0xff]  }
 0x5ad   : > { %14767 = vmatprep.subr.bf16.mxu1 %v21159_v25  ;;  %v21181_v25 = vld [vmem:[#allocation4 + $0x2a18] ss:$48 sps:$4 sm:$0xff]  }
 0x5af   : > { %14258 = vmatpush1.bf16.msra.mxu0 %v21154_v40  ;;  %v21186_v40 = vld [vmem:[#allocation4 + $0x2a74] ss:$48 sps:$4 sm:$0xff]  }
 0x5b0   : > { %14768 = vmatpush1.bf16.msra.mxu1 %v21157_v24  ;;  %14259 = vmatprep.subr.bf16.mxu0 %v21162_v56  ;;  %v21189_v24 = vld [vmem:[#allocation4 + $0x2a7c] ss:$48 sps:$4 sm:$0xff]   ;;  %v21184_v56 = vld [vmem:[#allocation4 + $0x2a70] ss:$48 sps:$4 sm:$0xff]  }
 0x5b1   : > { %14769 = vmatprep.subr.bf16.mxu1 %v21165_v42  ;;  %v21187_v42 = vld [vmem:[#allocation4 + $0x2a78] ss:$48 sps:$4 sm:$0xff]  }
 0x5b3   : > { %14260 = vmatpush1.bf16.msra.mxu0 %v21160_v26  ;;  %v21192_v26 = vld [vmem:[#allocation4 + $0x2ad4] ss:$48 sps:$4 sm:$0xff]  }
 0x5b4   : > { %14770 = vmatpush1.bf16.msra.mxu1 %v21163_v33  ;;  %14261 = vmatprep.subr.bf16.mxu0 %v21168_v47  ;;  %v21195_v33 = vld [vmem:[#allocation4 + $0x2adc] ss:$48 sps:$4 sm:$0xff]   ;;  %v21190_v47 = vld [vmem:[#allocation4 + $0x2ad0] ss:$48 sps:$4 sm:$0xff]  }
 0x5b5   : > { %14771 = vmatprep.subr.bf16.mxu1 %v21171_v59  ;;  %v21193_v59 = vld [vmem:[#allocation4 + $0x2ad8] ss:$48 sps:$4 sm:$0xff]  }
 0x5b7   : > { %14262 = vmatpush1.bf16.msra.mxu0 %v21166_v29  ;;  %v21198_v29 = vld [vmem:[#allocation4 + $0x2b34] ss:$48 sps:$4 sm:$0xff]  }
 0x5b8   : > { %14772 = vmatpush1.bf16.msra.mxu1 %v21169_v14  ;;  %14263 = vmatprep.subr.bf16.mxu0 %v21174_v51  ;;  %v21201_v14 = vld [vmem:[#allocation4 + $0x2b3c] ss:$48 sps:$4 sm:$0xff]   ;;  %v21196_v51 = vld [vmem:[#allocation4 + $0x2b30] ss:$48 sps:$4 sm:$0xff]  }
 0x5b9   : > { %14773 = vmatprep.subr.bf16.mxu1 %v21177_v13  ;;  %v21199_v13 = vld [vmem:[#allocation4 + $0x2b38] ss:$48 sps:$4 sm:$0xff]  }
 0x5bb   : > { %14264 = vmatpush1.bf16.msra.mxu0 %v21172_v31  ;;  %v21204_v31 = vld [vmem:[#allocation4 + $0x2b94] ss:$48 sps:$4 sm:$0xff]  }
 0x5bc   : > { %14774 = vmatpush1.bf16.msra.mxu1 %v21175_v23  ;;  %14284 = vmatprep.subr.bf16.mxu0 %v21180_v45  ;;  %v21207_v23 = vld [vmem:[#allocation4 + $0x2b9c] ss:$48 sps:$4 sm:$0xff]   ;;  %v21202_v45 = vld [vmem:[#allocation4 + $0x2b90] ss:$48 sps:$4 sm:$0xff]  }
 0x5bd   : > { %14794 = vmatprep.subr.bf16.mxu1 %v21183_v39  ;;  %v21205_v39 = vld [vmem:[#allocation4 + $0x2b98] ss:$48 sps:$4 sm:$0xff]  }
 0x5be   : > { %14266 = vmatmul.mubr.bf16.vlgmr.msra.gmra.mrb[24].mxu0 %v23382_v28 }
 0x5bf   : > { %14776 = vmatmul.mubr.bf16.vlgmr.msra.gmra.mrb[24].mxu1 %v23382_v28  ;;  %14275 = vmatprep.mubr.bf16.mxu0 %v23365_v62 }
 0x5c0   : > { %14285 = vmatpush1.bf16.msra.mxu0 %v21178_v38  ;;  %14785 = vmatprep.mubr.bf16.mxu1 %v23365_v62  ;;  %v21210_v38 = vld [vmem:[#allocation4 + $0x2bf4] ss:$48 sps:$4 sm:$0xff]  }
 0x5c1   : > { %14795 = vmatpush1.bf16.msra.mxu1 %v21181_v25  ;;  %14286 = vmatprep.subr.bf16.mxu0 %v21186_v40  ;;  %v21213_v25 = vld [vmem:[#allocation4 + $0x2bfc] ss:$48 sps:$4 sm:$0xff]   ;;  %v21208_v40 = vld [vmem:[#allocation4 + $0x2bf0] ss:$48 sps:$4 sm:$0xff]  }
 0x5c2   : > { %14796 = vmatprep.subr.bf16.mxu1 %v21189_v24  ;;  %v21211_v24 = vld [vmem:[#allocation4 + $0x2bf8] ss:$48 sps:$4 sm:$0xff]  }
 0x5c4   : > { %14287 = vmatpush1.bf16.msra.mxu0 %v21184_v56  ;;  %v21216_v56 = vld [vmem:[#allocation4 + $0x2c54] ss:$48 sps:$4 sm:$0xff]  }
 0x5c5   : > { %14797 = vmatpush1.bf16.msra.mxu1 %v21187_v42  ;;  %14288 = vmatprep.subr.bf16.mxu0 %v21192_v26  ;;  %v21219_v42 = vld [vmem:[#allocation4 + $0x2c5c] ss:$48 sps:$4 sm:$0xff]   ;;  %v21214_v26 = vld [vmem:[#allocation4 + $0x2c50] ss:$48 sps:$4 sm:$0xff]  }
 0x5c6   : > { %14276 = vmatmul.mubr.bf16.gmra.mrb[28].mxu0 %v23394_v41  ;;  %14798 = vmatprep.subr.bf16.mxu1 %v21195_v33  ;;  %v21217_v33 = vld [vmem:[#allocation4 + $0x2c58] ss:$48 sps:$4 sm:$0xff]  }
 0x5c7   : > { %14786 = vmatmul.mubr.bf16.gmra.mrb[28].mxu1 %v23394_v41  ;;  %14316 = vmatprep.mubr.bf16.mxu0 %v23399_v52 }
 0x5c8   : > { %14289 = vmatpush1.bf16.msra.mxu0 %v21190_v47  ;;  %14826 = vmatprep.mubr.bf16.mxu1 %v23399_v52  ;;  %v21222_v47 = vld [vmem:[#allocation4 + $0x2cb4] ss:$48 sps:$4 sm:$0xff]  }
 0x5c9   : > { %14799 = vmatpush1.bf16.msra.mxu1 %v21193_v59  ;;  %14290 = vmatprep.subr.bf16.mxu0 %v21198_v29  ;;  %v21225_v59 = vld [vmem:[#allocation4 + $0x2cbc] ss:$48 sps:$4 sm:$0xff]   ;;  %v21220_v29 = vld [vmem:[#allocation4 + $0x2cb0] ss:$48 sps:$4 sm:$0xff]  }
 0x5ca   : > { %14800 = vmatprep.subr.bf16.mxu1 %v21201_v14  ;;  %v21223_v14 = vld [vmem:[#allocation4 + $0x2cb8] ss:$48 sps:$4 sm:$0xff]  }
 0x5cc   : > { %14291 = vmatpush1.bf16.msra.mxu0 %v21196_v51  ;;  %v21228_v51 = vld [vmem:[#allocation4 + $0x2d14] ss:$48 sps:$4 sm:$0xff]  }
 0x5cd   : > { %14801 = vmatpush1.bf16.msra.mxu1 %v21199_v13  ;;  %14292 = vmatprep.subr.bf16.mxu0 %v21204_v31  ;;  %v21231_v13 = vld [vmem:[#allocation4 + $0x2d1c] ss:$48 sps:$4 sm:$0xff]   ;;  %v21226_v31 = vld [vmem:[#allocation4 + $0x2d10] ss:$48 sps:$4 sm:$0xff]  }
 0x5ce   : > { %14802 = vmatprep.subr.bf16.mxu1 %v21207_v23  ;;  %v21229_v23 = vld [vmem:[#allocation4 + $0x2d18] ss:$48 sps:$4 sm:$0xff]  }
 0x5d0   : > { %14293 = vmatpush1.bf16.msra.mxu0 %v21202_v45  ;;  %v21234_v45 = vld [vmem:[#allocation4 + $0x2d74] ss:$48 sps:$4 sm:$0xff]  }
 0x5d1   : > { %14803 = vmatpush1.bf16.msra.mxu1 %v21205_v39  ;;  %14294 = vmatprep.subr.bf16.mxu0 %v21210_v38  ;;  %v21237_v39 = vld [vmem:[#allocation4 + $0x2d7c] ss:$48 sps:$4 sm:$0xff]   ;;  %v21232_v38 = vld [vmem:[#allocation4 + $0x2d70] ss:$48 sps:$4 sm:$0xff]  }
 0x5d2   : > { %14804 = vmatprep.subr.bf16.mxu1 %v21213_v25  ;;  %v21235_v25 = vld [vmem:[#allocation4 + $0x2d78] ss:$48 sps:$4 sm:$0xff]  }
 0x5d4   : > { %14295 = vmatpush1.bf16.msra.mxu0 %v21208_v40  ;;  %v21240_v40 = vld [vmem:[#allocation4 + $0x2dd4] ss:$48 sps:$4 sm:$0xff]  }
 0x5d5   : > { %14805 = vmatpush1.bf16.msra.mxu1 %v21211_v24  ;;  %14296 = vmatprep.subr.bf16.mxu0 %v21216_v56  ;;  %v21243_v24 = vld [vmem:[#allocation4 + $0x2ddc] ss:$48 sps:$4 sm:$0xff]   ;;  %v21238_v56 = vld [vmem:[#allocation4 + $0x2dd0] ss:$48 sps:$4 sm:$0xff]  }
 0x5d6   : > { %14806 = vmatprep.subr.bf16.mxu1 %v21219_v42  ;;  %v21241_v42 = vld [vmem:[#allocation4 + $0x2dd8] ss:$48 sps:$4 sm:$0xff]  }
 0x5d8   : > { %14297 = vmatpush1.bf16.msra.mxu0 %v21214_v26  ;;  %v21246_v26 = vld [vmem:[#allocation4 + $0x2e34] ss:$48 sps:$4 sm:$0xff]  }
 0x5d9   : > { %14807 = vmatpush1.bf16.msra.mxu1 %v21217_v33  ;;  %14298 = vmatprep.subr.bf16.mxu0 %v21222_v47  ;;  %v21249_v33 = vld [vmem:[#allocation4 + $0x2e3c] ss:$48 sps:$4 sm:$0xff]   ;;  %v21244_v47 = vld [vmem:[#allocation4 + $0x2e30] ss:$48 sps:$4 sm:$0xff]  }
 0x5da   : > { %14808 = vmatprep.subr.bf16.mxu1 %v21225_v59  ;;  %v21247_v59 = vld [vmem:[#allocation4 + $0x2e38] ss:$48 sps:$4 sm:$0xff]  }
 0x5dc   : > { %14299 = vmatpush1.bf16.msra.mxu0 %v21220_v29  ;;  %v21252_v29 = vld [vmem:[#allocation4 + $0x2e94] ss:$48 sps:$4 sm:$0xff]  }
 0x5dd   : > { %14809 = vmatpush1.bf16.msra.mxu1 %v21223_v14  ;;  %14300 = vmatprep.subr.bf16.mxu0 %v21228_v51  ;;  %v21255_v14 = vld [vmem:[#allocation4 + $0x2e9c] ss:$48 sps:$4 sm:$0xff]   ;;  %v21250_v51 = vld [vmem:[#allocation4 + $0x2e90] ss:$48 sps:$4 sm:$0xff]  }
 0x5de   : > { %14810 = vmatprep.subr.bf16.mxu1 %v21231_v13  ;;  %v21253_v13 = vld [vmem:[#allocation4 + $0x2e98] ss:$48 sps:$4 sm:$0xff]  }
 0x5e0   : > { %14301 = vmatpush1.bf16.msra.mxu0 %v21226_v31  ;;  %v21258_v31 = vld [vmem:[#allocation4 + $0x2ef4] ss:$48 sps:$4 sm:$0xff]  }
 0x5e1   : > { %14811 = vmatpush1.bf16.msra.mxu1 %v21229_v23  ;;  %14302 = vmatprep.subr.bf16.mxu0 %v21234_v45  ;;  %v21261_v23 = vld [vmem:[#allocation4 + $0x2efc] ss:$48 sps:$4 sm:$0xff]   ;;  %v21256_v45 = vld [vmem:[#allocation4 + $0x2ef0] ss:$48 sps:$4 sm:$0xff]  }
 0x5e2   : > { %14812 = vmatprep.subr.bf16.mxu1 %v21237_v39  ;;  %v21259_v39 = vld [vmem:[#allocation4 + $0x2ef8] ss:$48 sps:$4 sm:$0xff]  }
 0x5e4   : > { %14303 = vmatpush1.bf16.msra.mxu0 %v21232_v38  ;;  %v21264_v38 = vld [vmem:[#allocation4 + $0x2f54] ss:$48 sps:$4 sm:$0xff]  }
 0x5e5   : > { %14813 = vmatpush1.bf16.msra.mxu1 %v21235_v25  ;;  %14304 = vmatprep.subr.bf16.mxu0 %v21240_v40  ;;  %v21267_v25 = vld [vmem:[#allocation4 + $0x2f5c] ss:$48 sps:$4 sm:$0xff]   ;;  %v21262_v40 = vld [vmem:[#allocation4 + $0x2f50] ss:$48 sps:$4 sm:$0xff]  }
 0x5e6   : > { %14814 = vmatprep.subr.bf16.mxu1 %v21243_v24  ;;  %v21265_v24 = vld [vmem:[#allocation4 + $0x2f58] ss:$48 sps:$4 sm:$0xff]  }
 0x5e8   : > { %14305 = vmatpush1.bf16.msra.mxu0 %v21238_v56  ;;  %v21270_v56 = vld [vmem:[#allocation4 + $0x2fb4] ss:$48 sps:$4 sm:$0xff]  }
 0x5e9   : > { %14815 = vmatpush1.bf16.msra.mxu1 %v21241_v42  ;;  %14306 = vmatprep.subr.bf16.mxu0 %v21246_v26  ;;  %v21273_v42 = vld [vmem:[#allocation4 + $0x2fbc] ss:$48 sps:$4 sm:$0xff]   ;;  %v21268_v26 = vld [vmem:[#allocation4 + $0x2fb0] ss:$48 sps:$4 sm:$0xff]  }
 0x5ea   : > { %14816 = vmatprep.subr.bf16.mxu1 %v21249_v33  ;;  %v21271_v33 = vld [vmem:[#allocation4 + $0x2fb8] ss:$48 sps:$4 sm:$0xff]  }
 0x5ec   : > { %14307 = vmatpush1.bf16.msra.mxu0 %v21244_v47  ;;  %v21276_v47 = vld [vmem:[#allocation4 + $0x3014] ss:$48 sps:$4 sm:$0xff]  }
 0x5ed   : > { %14817 = vmatpush1.bf16.msra.mxu1 %v21247_v59  ;;  %14308 = vmatprep.subr.bf16.mxu0 %v21252_v29  ;;  %v21279_v59 = vld [vmem:[#allocation4 + $0x301c] ss:$48 sps:$4 sm:$0xff]   ;;  %v21274_v29 = vld [vmem:[#allocation4 + $0x3010] ss:$48 sps:$4 sm:$0xff]  }
 0x5ee   : > { %14818 = vmatprep.subr.bf16.mxu1 %v21255_v14  ;;  %v21277_v14 = vld [vmem:[#allocation4 + $0x3018] ss:$48 sps:$4 sm:$0xff]  }
 0x5f0   : > { %14309 = vmatpush1.bf16.msra.mxu0 %v21250_v51  ;;  %v21282_v51 = vld [vmem:[#allocation4 + $0x3074] ss:$48 sps:$4 sm:$0xff]  }
 0x5f1   : > { %14819 = vmatpush1.bf16.msra.mxu1 %v21253_v13  ;;  %14310 = vmatprep.subr.bf16.mxu0 %v21258_v31  ;;  %v21285_v13 = vld [vmem:[#allocation4 + $0x307c] ss:$48 sps:$4 sm:$0xff]   ;;  %v21280_v31 = vld [vmem:[#allocation4 + $0x3070] ss:$48 sps:$4 sm:$0xff]  }
 0x5f2   : > { %14820 = vmatprep.subr.bf16.mxu1 %v21261_v23  ;;  %v21283_v23 = vld [vmem:[#allocation4 + $0x3078] ss:$48 sps:$4 sm:$0xff]  }
 0x5f4   : > { %14311 = vmatpush1.bf16.msra.mxu0 %v21256_v45  ;;  %v21288_v45 = vld [vmem:[#allocation4 + $0x30d4] ss:$48 sps:$4 sm:$0xff]  }
 0x5f5   : > { %14821 = vmatpush1.bf16.msra.mxu1 %v21259_v39  ;;  %14312 = vmatprep.subr.bf16.mxu0 %v21264_v38  ;;  %v21291_v39 = vld [vmem:[#allocation4 + $0x30dc] ss:$48 sps:$4 sm:$0xff]   ;;  %v21286_v38 = vld [vmem:[#allocation4 + $0x30d0] ss:$48 sps:$4 sm:$0xff]  }
 0x5f6   : > { %14822 = vmatprep.subr.bf16.mxu1 %v21267_v25  ;;  %v21289_v25 = vld [vmem:[#allocation4 + $0x30d8] ss:$48 sps:$4 sm:$0xff]  }
 0x5f8   : > { %14313 = vmatpush1.bf16.msra.mxu0 %v21262_v40  ;;  %v21294_v40 = vld [vmem:[#allocation4 + $0x3134] ss:$48 sps:$4 sm:$0xff]  }
 0x5f9   : > { %14823 = vmatpush1.bf16.msra.mxu1 %v21265_v24  ;;  %14314 = vmatprep.subr.bf16.mxu0 %v21270_v56  ;;  %v21297_v24 = vld [vmem:[#allocation4 + $0x313c] ss:$48 sps:$4 sm:$0xff]   ;;  %v21292_v56 = vld [vmem:[#allocation4 + $0x3130] ss:$48 sps:$4 sm:$0xff]  }
 0x5fa   : > { %14824 = vmatprep.subr.bf16.mxu1 %v21273_v42  ;;  %v21295_v42 = vld [vmem:[#allocation4 + $0x3138] ss:$48 sps:$4 sm:$0xff]  }
 0x5fc   : > { %14315 = vmatpush1.bf16.msra.mxu0 %v21268_v26  ;;  %v21300_v26 = vld [vmem:[#allocation4 + $0x3194] ss:$48 sps:$4 sm:$0xff]  }
 0x5fd   : > { %14825 = vmatpush1.bf16.msra.mxu1 %v21271_v33  ;;  %14335 = vmatprep.subr.bf16.mxu0 %v21276_v47  ;;  %v21303_v33 = vld [vmem:[#allocation4 + $0x319c] ss:$48 sps:$4 sm:$0xff]   ;;  %v21298_v47 = vld [vmem:[#allocation4 + $0x3190] ss:$48 sps:$4 sm:$0xff]  }
 0x5fe   : > { %14845 = vmatprep.subr.bf16.mxu1 %v21279_v59  ;;  %v21301_v59 = vld [vmem:[#allocation4 + $0x3198] ss:$48 sps:$4 sm:$0xff]  }
 0x5ff   : > { %14317 = vmatmul.mubr.bf16.vlgmr.msra.gmra.mrb[24].mxu0 %v23410_v57 }
 0x600   : > { %14827 = vmatmul.mubr.bf16.vlgmr.msra.gmra.mrb[24].mxu1 %v23410_v57  ;;  %14326 = vmatprep.mubr.bf16.mxu0 %v23389_v61 }
 0x601   : > { %14336 = vmatpush1.bf16.msra.mxu0 %v21274_v29  ;;  %14836 = vmatprep.mubr.bf16.mxu1 %v23389_v61  ;;  %v21306_v29 = vld [vmem:[#allocation4 + $0x31f4] ss:$48 sps:$4 sm:$0xff]  }
 0x602   : > { %14846 = vmatpush1.bf16.msra.mxu1 %v21277_v14  ;;  %14337 = vmatprep.subr.bf16.mxu0 %v21282_v51  ;;  %v21309_v14 = vld [vmem:[#allocation4 + $0x31fc] ss:$48 sps:$4 sm:$0xff]   ;;  %v21304_v51 = vld [vmem:[#allocation4 + $0x31f0] ss:$48 sps:$4 sm:$0xff]  }
 0x603   : > { %14847 = vmatprep.subr.bf16.mxu1 %v21285_v13  ;;  %v21307_v13 = vld [vmem:[#allocation4 + $0x31f8] ss:$48 sps:$4 sm:$0xff]  }
 0x605   : > { %14338 = vmatpush1.bf16.msra.mxu0 %v21280_v31  ;;  %v21312_v31 = vld [vmem:[#allocation4 + $0x3254] ss:$48 sps:$4 sm:$0xff]  }
 0x606   : > { %14848 = vmatpush1.bf16.msra.mxu1 %v21283_v23  ;;  %14339 = vmatprep.subr.bf16.mxu0 %v21288_v45  ;;  %v21315_v23 = vld [vmem:[#allocation4 + $0x325c] ss:$48 sps:$4 sm:$0xff]   ;;  %v21310_v45 = vld [vmem:[#allocation4 + $0x3250] ss:$48 sps:$4 sm:$0xff]  }
 0x607   : > { %14327 = vmatmul.mubr.bf16.gmra.mrb[28].mxu0 %v23405_v6  ;;  %14849 = vmatprep.subr.bf16.mxu1 %v21291_v39  ;;  %v21313_v39 = vld [vmem:[#allocation4 + $0x3258] ss:$48 sps:$4 sm:$0xff]  }
 0x608   : > { %14837 = vmatmul.mubr.bf16.gmra.mrb[28].mxu1 %v23405_v6  ;;  %14367 = vmatprep.mubr.bf16.mxu0 %v23423_v18 }
 0x609   : > { %14340 = vmatpush1.bf16.msra.mxu0 %v21286_v38  ;;  %14877 = vmatprep.mubr.bf16.mxu1 %v23423_v18  ;;  %v21318_v38 = vld [vmem:[#allocation4 + $0x32b4] ss:$48 sps:$4 sm:$0xff]  }
 0x60a   : > { %14850 = vmatpush1.bf16.msra.mxu1 %v21289_v25  ;;  %14341 = vmatprep.subr.bf16.mxu0 %v21294_v40  ;;  %v21321_v25 = vld [vmem:[#allocation4 + $0x32bc] ss:$48 sps:$4 sm:$0xff]   ;;  %v21316_v40 = vld [vmem:[#allocation4 + $0x32b0] ss:$48 sps:$4 sm:$0xff]  }
 0x60b   : > { %14851 = vmatprep.subr.bf16.mxu1 %v21297_v24  ;;  %v21319_v24 = vld [vmem:[#allocation4 + $0x32b8] ss:$48 sps:$4 sm:$0xff]  }
 0x60d   : > { %14342 = vmatpush1.bf16.msra.mxu0 %v21292_v56  ;;  %v21324_v56 = vld [vmem:[#allocation4 + $0x3314] ss:$48 sps:$4 sm:$0xff]  }
 0x60e   : > { %14852 = vmatpush1.bf16.msra.mxu1 %v21295_v42  ;;  %14343 = vmatprep.subr.bf16.mxu0 %v21300_v26  ;;  %v21327_v42 = vld [vmem:[#allocation4 + $0x331c] ss:$48 sps:$4 sm:$0xff]   ;;  %v21322_v26 = vld [vmem:[#allocation4 + $0x3310] ss:$48 sps:$4 sm:$0xff]  }
 0x60f   : > { %14853 = vmatprep.subr.bf16.mxu1 %v21303_v33  ;;  %v21325_v33 = vld [vmem:[#allocation4 + $0x3318] ss:$48 sps:$4 sm:$0xff]  }
 0x611   : > { %14344 = vmatpush1.bf16.msra.mxu0 %v21298_v47  ;;  %v21330_v47 = vld [vmem:[#allocation4 + $0x3374] ss:$48 sps:$4 sm:$0xff]  }
 0x612   : > { %14854 = vmatpush1.bf16.msra.mxu1 %v21301_v59  ;;  %14345 = vmatprep.subr.bf16.mxu0 %v21306_v29  ;;  %v21333_v59 = vld [vmem:[#allocation4 + $0x337c] ss:$48 sps:$4 sm:$0xff]   ;;  %v21328_v29 = vld [vmem:[#allocation4 + $0x3370] ss:$48 sps:$4 sm:$0xff]  }
 0x613   : > { %14855 = vmatprep.subr.bf16.mxu1 %v21309_v14  ;;  %v21331_v14 = vld [vmem:[#allocation4 + $0x3378] ss:$48 sps:$4 sm:$0xff]  }
 0x615   : > { %14346 = vmatpush1.bf16.msra.mxu0 %v21304_v51  ;;  %v21336_v51 = vld [vmem:[#allocation4 + $0x33d4] ss:$48 sps:$4 sm:$0xff]  }
 0x616   : > { %14856 = vmatpush1.bf16.msra.mxu1 %v21307_v13  ;;  %14347 = vmatprep.subr.bf16.mxu0 %v21312_v31  ;;  %v21339_v13 = vld [vmem:[#allocation4 + $0x33dc] ss:$48 sps:$4 sm:$0xff]   ;;  %v21334_v31 = vld [vmem:[#allocation4 + $0x33d0] ss:$48 sps:$4 sm:$0xff]  }
 0x617   : > { %14857 = vmatprep.subr.bf16.mxu1 %v21315_v23  ;;  %v21337_v23 = vld [vmem:[#allocation4 + $0x33d8] ss:$48 sps:$4 sm:$0xff]  }
 0x619   : > { %14348 = vmatpush1.bf16.msra.mxu0 %v21310_v45  ;;  %v21342_v45 = vld [vmem:[#allocation4 + $0x3434] ss:$48 sps:$4 sm:$0xff]  }
 0x61a   : > { %14858 = vmatpush1.bf16.msra.mxu1 %v21313_v39  ;;  %14349 = vmatprep.subr.bf16.mxu0 %v21318_v38  ;;  %v21345_v39 = vld [vmem:[#allocation4 + $0x343c] ss:$48 sps:$4 sm:$0xff]   ;;  %v21340_v38 = vld [vmem:[#allocation4 + $0x3430] ss:$48 sps:$4 sm:$0xff]  }
 0x61b   : > { %14859 = vmatprep.subr.bf16.mxu1 %v21321_v25  ;;  %v21343_v25 = vld [vmem:[#allocation4 + $0x3438] ss:$48 sps:$4 sm:$0xff]  }
 0x61d   : > { %14350 = vmatpush1.bf16.msra.mxu0 %v21316_v40  ;;  %v21348_v40 = vld [vmem:[#allocation4 + $0x3494] ss:$48 sps:$4 sm:$0xff]  }
 0x61e   : > { %14860 = vmatpush1.bf16.msra.mxu1 %v21319_v24  ;;  %14351 = vmatprep.subr.bf16.mxu0 %v21324_v56  ;;  %v21351_v24 = vld [vmem:[#allocation4 + $0x349c] ss:$48 sps:$4 sm:$0xff]   ;;  %v21346_v56 = vld [vmem:[#allocation4 + $0x3490] ss:$48 sps:$4 sm:$0xff]  }
 0x61f   : > { %14861 = vmatprep.subr.bf16.mxu1 %v21327_v42  ;;  %v21349_v42 = vld [vmem:[#allocation4 + $0x3498] ss:$48 sps:$4 sm:$0xff]  }
 0x621   : > { %14352 = vmatpush1.bf16.msra.mxu0 %v21322_v26  ;;  %v21354_v26 = vld [vmem:[#allocation4 + $0x34f4] ss:$48 sps:$4 sm:$0xff]  }
 0x622   : > { %14862 = vmatpush1.bf16.msra.mxu1 %v21325_v33  ;;  %14353 = vmatprep.subr.bf16.mxu0 %v21330_v47  ;;  %v21357_v33 = vld [vmem:[#allocation4 + $0x34fc] ss:$48 sps:$4 sm:$0xff]   ;;  %v21352_v47 = vld [vmem:[#allocation4 + $0x34f0] ss:$48 sps:$4 sm:$0xff]  }
 0x623   : > { %14863 = vmatprep.subr.bf16.mxu1 %v21333_v59  ;;  %v21355_v59 = vld [vmem:[#allocation4 + $0x34f8] ss:$48 sps:$4 sm:$0xff]  }
 0x625   : > { %14354 = vmatpush1.bf16.msra.mxu0 %v21328_v29  ;;  %v21360_v29 = vld [vmem:[#allocation4 + $0x3554] ss:$48 sps:$4 sm:$0xff]  }
 0x626   : > { %14864 = vmatpush1.bf16.msra.mxu1 %v21331_v14  ;;  %14355 = vmatprep.subr.bf16.mxu0 %v21336_v51  ;;  %v21363_v14 = vld [vmem:[#allocation4 + $0x355c] ss:$48 sps:$4 sm:$0xff]   ;;  %v21358_v51 = vld [vmem:[#allocation4 + $0x3550] ss:$48 sps:$4 sm:$0xff]  }
 0x627   : > { %14865 = vmatprep.subr.bf16.mxu1 %v21339_v13  ;;  %v21361_v13 = vld [vmem:[#allocation4 + $0x3558] ss:$48 sps:$4 sm:$0xff]  }
 0x629   : > { %14356 = vmatpush1.bf16.msra.mxu0 %v21334_v31  ;;  %v21366_v31 = vld [vmem:[#allocation4 + $0x35b4] ss:$48 sps:$4 sm:$0xff]  }
 0x62a   : > { %14866 = vmatpush1.bf16.msra.mxu1 %v21337_v23  ;;  %14357 = vmatprep.subr.bf16.mxu0 %v21342_v45  ;;  %v21369_v23 = vld [vmem:[#allocation4 + $0x35bc] ss:$48 sps:$4 sm:$0xff]   ;;  %v21364_v45 = vld [vmem:[#allocation4 + $0x35b0] ss:$48 sps:$4 sm:$0xff]  }
 0x62b   : > { %14867 = vmatprep.subr.bf16.mxu1 %v21345_v39  ;;  %v21367_v39 = vld [vmem:[#allocation4 + $0x35b8] ss:$48 sps:$4 sm:$0xff]  }
 0x62d   : > { %14358 = vmatpush1.bf16.msra.mxu0 %v21340_v38  ;;  %v21372_v38 = vld [vmem:[#allocation4 + $0x3614] ss:$48 sps:$4 sm:$0xff]  }
 0x62e   : > { %14868 = vmatpush1.bf16.msra.mxu1 %v21343_v25  ;;  %14359 = vmatprep.subr.bf16.mxu0 %v21348_v40  ;;  %v21375_v25 = vld [vmem:[#allocation4 + $0x361c] ss:$48 sps:$4 sm:$0xff]   ;;  %v21370_v40 = vld [vmem:[#allocation4 + $0x3610] ss:$48 sps:$4 sm:$0xff]  }
 0x62f   : > { %14869 = vmatprep.subr.bf16.mxu1 %v21351_v24  ;;  %v21373_v24 = vld [vmem:[#allocation4 + $0x3618] ss:$48 sps:$4 sm:$0xff]  }
 0x631   : > { %14360 = vmatpush1.bf16.msra.mxu0 %v21346_v56  ;;  %v21378_v56 = vld [vmem:[#allocation4 + $0x3674] ss:$48 sps:$4 sm:$0xff]  }
 0x632   : > { %14870 = vmatpush1.bf16.msra.mxu1 %v21349_v42  ;;  %14361 = vmatprep.subr.bf16.mxu0 %v21354_v26  ;;  %v21381_v42 = vld [vmem:[#allocation4 + $0x367c] ss:$48 sps:$4 sm:$0xff]   ;;  %v21376_v26 = vld [vmem:[#allocation4 + $0x3670] ss:$48 sps:$4 sm:$0xff]  }
 0x633   : > { %14871 = vmatprep.subr.bf16.mxu1 %v21357_v33  ;;  %v21379_v33 = vld [vmem:[#allocation4 + $0x3678] ss:$48 sps:$4 sm:$0xff]  }
 0x635   : > { %14362 = vmatpush1.bf16.msra.mxu0 %v21352_v47  ;;  %v21384_v47 = vld [vmem:[#allocation4 + $0x36d4] ss:$48 sps:$4 sm:$0xff]  }
 0x636   : > { %14872 = vmatpush1.bf16.msra.mxu1 %v21355_v59  ;;  %14363 = vmatprep.subr.bf16.mxu0 %v21360_v29  ;;  %v21387_v59 = vld [vmem:[#allocation4 + $0x36dc] ss:$48 sps:$4 sm:$0xff]   ;;  %v21382_v29 = vld [vmem:[#allocation4 + $0x36d0] ss:$48 sps:$4 sm:$0xff]  }
 0x637   : > { %14873 = vmatprep.subr.bf16.mxu1 %v21363_v14  ;;  %v21385_v14 = vld [vmem:[#allocation4 + $0x36d8] ss:$48 sps:$4 sm:$0xff]  }
 0x639   : > { %14364 = vmatpush1.bf16.msra.mxu0 %v21358_v51  ;;  %v21390_v51 = vld [vmem:[#allocation4 + $0x3734] ss:$48 sps:$4 sm:$0xff]  }
 0x63a   : > { %14874 = vmatpush1.bf16.msra.mxu1 %v21361_v13  ;;  %14365 = vmatprep.subr.bf16.mxu0 %v21366_v31  ;;  %v21393_v13 = vld [vmem:[#allocation4 + $0x373c] ss:$48 sps:$4 sm:$0xff]   ;;  %v21388_v31 = vld [vmem:[#allocation4 + $0x3730] ss:$48 sps:$4 sm:$0xff]  }
 0x63b   : > { %14875 = vmatprep.subr.bf16.mxu1 %v21369_v23  ;;  %v21391_v23 = vld [vmem:[#allocation4 + $0x3738] ss:$48 sps:$4 sm:$0xff]  }
 0x63d   : > { %14366 = vmatpush1.bf16.msra.mxu0 %v21364_v45  ;;  %v21396_v45 = vld [vmem:[#allocation4 + $0x3794] ss:$48 sps:$4 sm:$0xff]  }
 0x63e   : > { %14876 = vmatpush1.bf16.msra.mxu1 %v21367_v39  ;;  %14386 = vmatprep.subr.bf16.mxu0 %v21372_v38  ;;  %v21399_v39 = vld [vmem:[#allocation4 + $0x379c] ss:$48 sps:$4 sm:$0xff]   ;;  %v21394_v38 = vld [vmem:[#allocation4 + $0x3790] ss:$48 sps:$4 sm:$0xff]  }
 0x63f   : > { %14896 = vmatprep.subr.bf16.mxu1 %v21375_v25  ;;  %v21397_v25 = vld [vmem:[#allocation4 + $0x3798] ss:$48 sps:$4 sm:$0xff]  }
 0x640   : > { %14368 = vmatmul.mubr.bf16.vlgmr.msra.gmra.mrb[24].mxu0 %v23434_v22 }
 0x641   : > { %14878 = vmatmul.mubr.bf16.vlgmr.msra.gmra.mrb[24].mxu1 %v23434_v22  ;;  %14377 = vmatprep.mubr.bf16.mxu0 %v23417_v1 }
 0x642   : > { %14387 = vmatpush1.bf16.msra.mxu0 %v21370_v40  ;;  %14887 = vmatprep.mubr.bf16.mxu1 %v23417_v1  ;;  %v21402_v40 = vld [vmem:[#allocation4 + $0x37f4] ss:$48 sps:$4 sm:$0xff]  }
 0x643   : > { %14897 = vmatpush1.bf16.msra.mxu1 %v21373_v24  ;;  %14388 = vmatprep.subr.bf16.mxu0 %v21378_v56  ;;  %v21405_v24 = vld [vmem:[#allocation4 + $0x37fc] ss:$48 sps:$4 sm:$0xff]   ;;  %v21400_v56 = vld [vmem:[#allocation4 + $0x37f0] ss:$48 sps:$4 sm:$0xff]  }
 0x644   : > { %14898 = vmatprep.subr.bf16.mxu1 %v21381_v42  ;;  %v21403_v42 = vld [vmem:[#allocation4 + $0x37f8] ss:$48 sps:$4 sm:$0xff]  }
 0x646   : > { %14389 = vmatpush1.bf16.msra.mxu0 %v21376_v26  ;;  %v21408_v26 = vld [vmem:[#allocation4 + $0x3854] ss:$48 sps:$4 sm:$0xff]  }
 0x647   : > { %14899 = vmatpush1.bf16.msra.mxu1 %v21379_v33  ;;  %14390 = vmatprep.subr.bf16.mxu0 %v21384_v47  ;;  %v21411_v33 = vld [vmem:[#allocation4 + $0x385c] ss:$48 sps:$4 sm:$0xff]   ;;  %v21406_v47 = vld [vmem:[#allocation4 + $0x3850] ss:$48 sps:$4 sm:$0xff]  }
 0x648   : > { %14378 = vmatmul.mubr.bf16.gmra.mrb[28].mxu0 %v23429_v30  ;;  %14900 = vmatprep.subr.bf16.mxu1 %v21387_v59  ;;  %v21409_v59 = vld [vmem:[#allocation4 + $0x3858] ss:$48 sps:$4 sm:$0xff]  }
 0x649   : > { %14888 = vmatmul.mubr.bf16.gmra.mrb[28].mxu1 %v23429_v30  ;;  %18780 = vmatprep.mubr.msk.bf16.mxu0 %vm1525_vm13, %v23447_v53 }
 0x64a   : > { %14391 = vmatpush1.bf16.msra.mxu0 %v21382_v29  ;;  %18782 = vmatprep.mubr.msk.bf16.mxu1 %vm1525_vm13, %v23447_v53  ;;  %v21414_v29 = vld [vmem:[#allocation4 + $0x38b4] ss:$48 sps:$4 sm:$0xff]  }
 0x64b   : > { %14901 = vmatpush1.bf16.msra.mxu1 %v21385_v14  ;;  %14392 = vmatprep.subr.bf16.mxu0 %v21390_v51  ;;  %v21417_v14 = vld [vmem:[#allocation4 + $0x38bc] ss:$48 sps:$4 sm:$0xff]   ;;  %v21412_v51 = vld [vmem:[#allocation4 + $0x38b0] ss:$48 sps:$4 sm:$0xff]  }
 0x64c   : > { %14902 = vmatprep.subr.bf16.mxu1 %v21393_v13  ;;  %v21415_v13 = vld [vmem:[#allocation4 + $0x38b8] ss:$48 sps:$4 sm:$0xff]  }
 0x64e   : > { %14393 = vmatpush1.bf16.msra.mxu0 %v21388_v31  ;;  %v21420_v31 = vld [vmem:[#allocation4 + $0x3914] ss:$48 sps:$4 sm:$0xff]  }
 0x64f   : > { %14903 = vmatpush1.bf16.msra.mxu1 %v21391_v23  ;;  %14394 = vmatprep.subr.bf16.mxu0 %v21396_v45  ;;  %v21423_v23 = vld [vmem:[#allocation4 + $0x391c] ss:$48 sps:$4 sm:$0xff]   ;;  %v21418_v45 = vld [vmem:[#allocation4 + $0x3910] ss:$48 sps:$4 sm:$0xff]  }
 0x650   : > { %14904 = vmatprep.subr.bf16.mxu1 %v21399_v39  ;;  %v21421_v39 = vld [vmem:[#allocation4 + $0x3918] ss:$48 sps:$4 sm:$0xff]  }
 0x652   : > { %14395 = vmatpush1.bf16.msra.mxu0 %v21394_v38  ;;  %v21426_v38 = vld [vmem:[#allocation4 + $0x3974] ss:$48 sps:$4 sm:$0xff]  }
 0x653   : > { %14905 = vmatpush1.bf16.msra.mxu1 %v21397_v25  ;;  %14396 = vmatprep.subr.bf16.mxu0 %v21402_v40  ;;  %v21429_v25 = vld [vmem:[#allocation4 + $0x397c] ss:$48 sps:$4 sm:$0xff]   ;;  %v21424_v40 = vld [vmem:[#allocation4 + $0x3970] ss:$48 sps:$4 sm:$0xff]  }
 0x654   : > { %14906 = vmatprep.subr.bf16.mxu1 %v21405_v24  ;;  %v21427_v24 = vld [vmem:[#allocation4 + $0x3978] ss:$48 sps:$4 sm:$0xff]  }
 0x656   : > { %14397 = vmatpush1.bf16.msra.mxu0 %v21400_v56  ;;  %v21432_v56 = vld [vmem:[#allocation4 + $0x39d4] ss:$48 sps:$4 sm:$0xff]  }
 0x657   : > { %14907 = vmatpush1.bf16.msra.mxu1 %v21403_v42  ;;  %14398 = vmatprep.subr.bf16.mxu0 %v21408_v26  ;;  %v21435_v42 = vld [vmem:[#allocation4 + $0x39dc] ss:$48 sps:$4 sm:$0xff]   ;;  %v21430_v26 = vld [vmem:[#allocation4 + $0x39d0] ss:$48 sps:$4 sm:$0xff]  }
 0x658   : > { %14908 = vmatprep.subr.bf16.mxu1 %v21411_v33  ;;  %v21433_v33 = vld [vmem:[#allocation4 + $0x39d8] ss:$48 sps:$4 sm:$0xff]  }
 0x65a   : > { %14399 = vmatpush1.bf16.msra.mxu0 %v21406_v47  ;;  %v21438_v47 = vld [vmem:[#allocation4 + $0x3a34] ss:$48 sps:$4 sm:$0xff]  }
 0x65b   : > { %14909 = vmatpush1.bf16.msra.mxu1 %v21409_v59  ;;  %14400 = vmatprep.subr.bf16.mxu0 %v21414_v29  ;;  %v21441_v59 = vld [vmem:[#allocation4 + $0x3a3c] ss:$48 sps:$4 sm:$0xff]   ;;  %v21436_v29 = vld [vmem:[#allocation4 + $0x3a30] ss:$48 sps:$4 sm:$0xff]  }
 0x65c   : > { %14910 = vmatprep.subr.bf16.mxu1 %v21417_v14  ;;  %v21439_v14 = vld [vmem:[#allocation4 + $0x3a38] ss:$48 sps:$4 sm:$0xff]  }
 0x65e   : > { %14401 = vmatpush1.bf16.msra.mxu0 %v21412_v51  ;;  %v21444_v51 = vld [vmem:[#allocation4 + $0x24] ss:$48 sps:$4 sm:$0xff]  }
 0x65f   : > { %14911 = vmatpush1.bf16.msra.mxu1 %v21415_v13  ;;  %14402 = vmatprep.subr.bf16.mxu0 %v21420_v31  ;;  %v21447_v13 = vld [vmem:[#allocation4 + $0x2c] ss:$48 sps:$4 sm:$0xff]   ;;  %v21442_v31 = vld [vmem:[#allocation4 + $0x20] ss:$48 sps:$4 sm:$0xff]  }
 0x660   : > { %14912 = vmatprep.subr.bf16.mxu1 %v21423_v23  ;;  %v21445_v23 = vld [vmem:[#allocation4 + $0x28] ss:$48 sps:$4 sm:$0xff]  }
 0x662   : > { %14403 = vmatpush1.bf16.msra.mxu0 %v21418_v45  ;;  %v21450_v45 = vld [vmem:[#allocation4 + $0x84] ss:$48 sps:$4 sm:$0xff]  }
 0x663   : > { %14913 = vmatpush1.bf16.msra.mxu1 %v21421_v39  ;;  %14404 = vmatprep.subr.bf16.mxu0 %v21426_v38  ;;  %v21453_v39 = vld [vmem:[#allocation4 + $0x8c] ss:$48 sps:$4 sm:$0xff]   ;;  %v21448_v38 = vld [vmem:[#allocation4 + $0x80] ss:$48 sps:$4 sm:$0xff]  }
 0x664   : > { %14914 = vmatprep.subr.bf16.mxu1 %v21429_v25  ;;  %v21451_v25 = vld [vmem:[#allocation4 + $0x88] ss:$48 sps:$4 sm:$0xff]  }
 0x666   : > { %14405 = vmatpush1.bf16.msra.mxu0 %v21424_v40  ;;  %v21456_v40 = vld [vmem:[#allocation4 + $0xe4] ss:$48 sps:$4 sm:$0xff]  }
 0x667   : > { %14915 = vmatpush1.bf16.msra.mxu1 %v21427_v24  ;;  %14406 = vmatprep.subr.bf16.mxu0 %v21432_v56  ;;  %v21459_v24 = vld [vmem:[#allocation4 + $0xec] ss:$48 sps:$4 sm:$0xff]   ;;  %v21454_v56 = vld [vmem:[#allocation4 + $0xe0] ss:$48 sps:$4 sm:$0xff]  }
 0x668   : > { %14916 = vmatprep.subr.bf16.mxu1 %v21435_v42  ;;  %v21457_v42 = vld [vmem:[#allocation4 + $0xe8] ss:$48 sps:$4 sm:$0xff]  }
 0x66a   : > { %14407 = vmatpush1.bf16.msra.mxu0 %v21430_v26  ;;  %v21462_v26 = vld [vmem:[#allocation4 + $0x144] ss:$48 sps:$4 sm:$0xff]  }
 0x66b   : > { %14917 = vmatpush1.bf16.msra.mxu1 %v21433_v33  ;;  %14408 = vmatprep.subr.bf16.mxu0 %v21438_v47  ;;  %v21465_v33 = vld [vmem:[#allocation4 + $0x14c] ss:$48 sps:$4 sm:$0xff]   ;;  %v21460_v47 = vld [vmem:[#allocation4 + $0x140] ss:$48 sps:$4 sm:$0xff]  }
 0x66c   : > { %14918 = vmatprep.subr.bf16.mxu1 %v21441_v59  ;;  %v21463_v59 = vld [vmem:[#allocation4 + $0x148] ss:$48 sps:$4 sm:$0xff]  }
 0x66e   : > { %14409 = vmatpush1.bf16.msra.mxu0 %v21436_v29  ;;  %v21468_v29 = vld [vmem:[#allocation4 + $0x1a4] ss:$48 sps:$4 sm:$0xff]  }
 0x66f   : > { %14919 = vmatpush1.bf16.msra.mxu1 %v21439_v14  ;;  %14947 = vmatprep.subr.bf16.mxu0 %v21444_v51  ;;  %v21471_v14 = vld [vmem:[#allocation4 + $0x1ac] ss:$48 sps:$4 sm:$0xff]   ;;  %v21466_v51 = vld [vmem:[#allocation4 + $0x1a0] ss:$48 sps:$4 sm:$0xff]  }
 0x670   : > { %15457 = vmatprep.subr.bf16.mxu1 %v21447_v13  ;;  %v21469_v13 = vld [vmem:[#allocation4 + $0x1a8] ss:$48 sps:$4 sm:$0xff]  }
 0x671   : > { %14419 = vmatmul.mubr.bf16.vlgmr.msra.gmra.mrb[24].mxu0 %v23460_v34 }
 0x672   : > { %14929 = vmatmul.mubr.bf16.vlgmr.msra.gmra.mrb[24].mxu1 %v23460_v34  ;;  %18781 = vmatprep.mubr.msk.bf16.mxu0 %vm1525_vm13, %v23441_v46 }
 0x673   : > { %18783 = vmatprep.mubr.msk.bf16.mxu1 %vm1525_vm13, %v23441_v46  ;;  %14948 = vmatpush1.bf16.msra.mxu0 %v21442_v31  ;;  %v21474_v31 = vld [vmem:[#allocation4 + $0x204] ss:$48 sps:$4 sm:$0xff]  }
 0x674   : > { %15458 = vmatpush1.bf16.msra.mxu1 %v21445_v23  ;;  %14949 = vmatprep.subr.bf16.mxu0 %v21450_v45  ;;  %v21477_v23 = vld [vmem:[#allocation4 + $0x20c] ss:$48 sps:$4 sm:$0xff]   ;;  %v21472_v45 = vld [vmem:[#allocation4 + $0x200] ss:$48 sps:$4 sm:$0xff]  }
 0x675   : > { %15459 = vmatprep.subr.bf16.mxu1 %v21453_v39  ;;  %v21480_v39 = vld [vmem:[#allocation4 + $0x264] ss:$48 sps:$4 sm:$0xff]  }
 0x677   : > { %14950 = vmatpush1.bf16.msra.mxu0 %v21448_v38  ;;  %v21483_v38 = vld [vmem:[#allocation4 + $0x26c] ss:$48 sps:$4 sm:$0xff]  }
 0x678   : > { %15460 = vmatpush1.bf16.msra.mxu1 %v21451_v25  ;;  %14951 = vmatprep.subr.bf16.mxu0 %v21456_v40  ;;  %v21478_v25 = vld [vmem:[#allocation4 + $0x260] ss:$48 sps:$4 sm:$0xff]   ;;  %v21481_v40 = vld [vmem:[#allocation4 + $0x268] ss:$48 sps:$4 sm:$0xff]  }
 0x679   : > { %14429 = vmatmul.mubr.bf16.gmra.mrb[28].mxu0 %v23455_v32  ;;  %15461 = vmatprep.subr.bf16.mxu1 %v21459_v24  ;;  %v21486_v24 = vld [vmem:[#allocation4 + $0x2c4] ss:$48 sps:$4 sm:$0xff]  }
 0x67a   : > { %14939 = vmatmul.mubr.bf16.gmra.mrb[28].mxu1 %v23455_v32  ;;  %14979 = vmatprep.mubr.bf16.mxu0 %v23159_v10 }
 0x67b   : > { %14952 = vmatpush1.bf16.msra.mxu0 %v21454_v56  ;;  %15489 = vmatprep.mubr.bf16.mxu1 %v23159_v10  ;;  %v21475_v10 = vld [vmem:[#allocation4 + $0x208] ss:$48 sps:$4 sm:$0xff]   ;;  %v21489_v56 = vld [vmem:[#allocation4 + $0x2cc] ss:$48 sps:$4 sm:$0xff]  }
 0x67c   : > { %15462 = vmatpush1.bf16.msra.mxu1 %v21457_v42  ;;  %14953 = vmatprep.subr.bf16.mxu0 %v21462_v26  ;;  %v21484_v42 = vld [vmem:[#allocation4 + $0x2c0] ss:$48 sps:$4 sm:$0xff]   ;;  %v21487_v26 = vld [vmem:[#allocation4 + $0x2c8] ss:$48 sps:$4 sm:$0xff]  }
 0x67d   : > { %15463 = vmatprep.subr.bf16.mxu1 %v21465_v33  ;;  %v21492_v33 = vld [vmem:[#allocation4 + $0x324] ss:$48 sps:$4 sm:$0xff]  }
 0x67f   : > { %14954 = vmatpush1.bf16.msra.mxu0 %v21460_v47  ;;  %v21495_v47 = vld [vmem:[#allocation4 + $0x32c] ss:$48 sps:$4 sm:$0xff]  }
 0x680   : > { %15464 = vmatpush1.bf16.msra.mxu1 %v21463_v59  ;;  %14955 = vmatprep.subr.bf16.mxu0 %v21468_v29  ;;  %v21490_v59 = vld [vmem:[#allocation4 + $0x320] ss:$48 sps:$4 sm:$0xff]   ;;  %v21493_v29 = vld [vmem:[#allocation4 + $0x328] ss:$48 sps:$4 sm:$0xff]  }
 0x681   : > { %15465 = vmatprep.subr.bf16.mxu1 %v21471_v14  ;;  %v21498_v14 = vld [vmem:[#allocation4 + $0x384] ss:$48 sps:$4 sm:$0xff]  }
 0x683   : > { %14956 = vmatpush1.bf16.msra.mxu0 %v21466_v51  ;;  %v21501_v51 = vld [vmem:[#allocation4 + $0x38c] ss:$48 sps:$4 sm:$0xff]  }
 0x684   : > { %15466 = vmatpush1.bf16.msra.mxu1 %v21469_v13  ;;  %14957 = vmatprep.subr.bf16.mxu0 %v21474_v31  ;;  %v21496_v13 = vld [vmem:[#allocation4 + $0x380] ss:$48 sps:$4 sm:$0xff]   ;;  %v21499_v31 = vld [vmem:[#allocation4 + $0x388] ss:$48 sps:$4 sm:$0xff]  }
 0x685   : > { %15467 = vmatprep.subr.bf16.mxu1 %v21477_v23  ;;  %v21504_v23 = vld [vmem:[#allocation4 + $0x3e4] ss:$48 sps:$4 sm:$0xff]  }
 0x687   : > { %14958 = vmatpush1.bf16.msra.mxu0 %v21472_v45  ;;  %v21507_v45 = vld [vmem:[#allocation4 + $0x3ec] ss:$48 sps:$4 sm:$0xff]  }
 0x688   : > { %15468 = vmatpush1.bf16.msra.mxu1 %v21475_v10  ;;  %14959 = vmatprep.subr.bf16.mxu0 %v21480_v39  ;;  %v21502_v10 = vld [vmem:[#allocation4 + $0x3e0] ss:$48 sps:$4 sm:$0xff]   ;;  %v21505_v39 = vld [vmem:[#allocation4 + $0x3e8] ss:$48 sps:$4 sm:$0xff]  }
 0x689   : > { %15469 = vmatprep.subr.bf16.mxu1 %v21483_v38  ;;  %v21510_v38 = vld [vmem:[#allocation4 + $0x444] ss:$48 sps:$4 sm:$0xff]  }
 0x68b   : > { %14960 = vmatpush1.bf16.msra.mxu0 %v21478_v25  ;;  %v21513_v25 = vld [vmem:[#allocation4 + $0x44c] ss:$48 sps:$4 sm:$0xff]  }
 0x68c   : > { %15470 = vmatpush1.bf16.msra.mxu1 %v21481_v40  ;;  %14961 = vmatprep.subr.bf16.mxu0 %v21486_v24  ;;  %v21508_v40 = vld [vmem:[#allocation4 + $0x440] ss:$48 sps:$4 sm:$0xff]   ;;  %v21511_v24 = vld [vmem:[#allocation4 + $0x448] ss:$48 sps:$4 sm:$0xff]  }
 0x68d   : > { %15471 = vmatprep.subr.bf16.mxu1 %v21489_v56  ;;  %v21516_v56 = vld [vmem:[#allocation4 + $0x4a4] ss:$48 sps:$4 sm:$0xff]  }
 0x68f   : > { %14962 = vmatpush1.bf16.msra.mxu0 %v21484_v42  ;;  %v21519_v42 = vld [vmem:[#allocation4 + $0x4ac] ss:$48 sps:$4 sm:$0xff]  }
 0x690   : > { %15472 = vmatpush1.bf16.msra.mxu1 %v21487_v26  ;;  %14963 = vmatprep.subr.bf16.mxu0 %v21492_v33  ;;  %v21514_v26 = vld [vmem:[#allocation4 + $0x4a0] ss:$48 sps:$4 sm:$0xff]   ;;  %v21517_v33 = vld [vmem:[#allocation4 + $0x4a8] ss:$48 sps:$4 sm:$0xff]  }
 0x691   : > { %15473 = vmatprep.subr.bf16.mxu1 %v21495_v47  ;;  %v21522_v47 = vld [vmem:[#allocation4 + $0x504] ss:$48 sps:$4 sm:$0xff]  }
 0x693   : > { %14964 = vmatpush1.bf16.msra.mxu0 %v21490_v59  ;;  %v21525_v59 = vld [vmem:[#allocation4 + $0x50c] ss:$48 sps:$4 sm:$0xff]  }
 0x694   : > { %15474 = vmatpush1.bf16.msra.mxu1 %v21493_v29  ;;  %14965 = vmatprep.subr.bf16.mxu0 %v21498_v14  ;;  %v21520_v29 = vld [vmem:[#allocation4 + $0x500] ss:$48 sps:$4 sm:$0xff]   ;;  %v21523_v14 = vld [vmem:[#allocation4 + $0x508] ss:$48 sps:$4 sm:$0xff]  }
 0x695   : > { %15475 = vmatprep.subr.bf16.mxu1 %v21501_v51  ;;  %v21528_v51 = vld [vmem:[#allocation4 + $0x564] ss:$48 sps:$4 sm:$0xff]  }
 0x697   : > { %14966 = vmatpush1.bf16.msra.mxu0 %v21496_v13  ;;  %v21531_v13 = vld [vmem:[#allocation4 + $0x56c] ss:$48 sps:$4 sm:$0xff]  }
 0x698   : > { %15476 = vmatpush1.bf16.msra.mxu1 %v21499_v31  ;;  %14967 = vmatprep.subr.bf16.mxu0 %v21504_v23  ;;  %v21526_v31 = vld [vmem:[#allocation4 + $0x560] ss:$48 sps:$4 sm:$0xff]   ;;  %v21529_v23 = vld [vmem:[#allocation4 + $0x568] ss:$48 sps:$4 sm:$0xff]  }
 0x699   : > { %15477 = vmatprep.subr.bf16.mxu1 %v21507_v45  ;;  %v21534_v45 = vld [vmem:[#allocation4 + $0x5c4] ss:$48 sps:$4 sm:$0xff]  }
 0x69b   : > { %14968 = vmatpush1.bf16.msra.mxu0 %v21502_v10  ;;  %v21537_v10 = vld [vmem:[#allocation4 + $0x5cc] ss:$48 sps:$4 sm:$0xff]  }
 0x69c   : > { %15478 = vmatpush1.bf16.msra.mxu1 %v21505_v39  ;;  %14969 = vmatprep.subr.bf16.mxu0 %v21510_v38  ;;  %v21532_v39 = vld [vmem:[#allocation4 + $0x5c0] ss:$48 sps:$4 sm:$0xff]   ;;  %v21535_v38 = vld [vmem:[#allocation4 + $0x5c8] ss:$48 sps:$4 sm:$0xff]  }
 0x69d   : > { %15479 = vmatprep.subr.bf16.mxu1 %v21513_v25  ;;  %v21540_v25 = vld [vmem:[#allocation4 + $0x624] ss:$48 sps:$4 sm:$0xff]  }
 0x69f   : > { %14970 = vmatpush1.bf16.msra.mxu0 %v21508_v40  ;;  %v21543_v40 = vld [vmem:[#allocation4 + $0x62c] ss:$48 sps:$4 sm:$0xff]  }
 0x6a0   : > { %15480 = vmatpush1.bf16.msra.mxu1 %v21511_v24  ;;  %14971 = vmatprep.subr.bf16.mxu0 %v21516_v56  ;;  %v21538_v24 = vld [vmem:[#allocation4 + $0x620] ss:$48 sps:$4 sm:$0xff]   ;;  %v21541_v56 = vld [vmem:[#allocation4 + $0x628] ss:$48 sps:$4 sm:$0xff]  }
 0x6a1   : > { %15481 = vmatprep.subr.bf16.mxu1 %v21519_v42  ;;  %v21546_v42 = vld [vmem:[#allocation4 + $0x684] ss:$48 sps:$4 sm:$0xff]  }
 0x6a3   : > { %14972 = vmatpush1.bf16.msra.mxu0 %v21514_v26  ;;  %v21549_v26 = vld [vmem:[#allocation4 + $0x68c] ss:$48 sps:$4 sm:$0xff]  }
 0x6a4   : > { %15482 = vmatpush1.bf16.msra.mxu1 %v21517_v33  ;;  %14973 = vmatprep.subr.bf16.mxu0 %v21522_v47  ;;  %v21544_v33 = vld [vmem:[#allocation4 + $0x680] ss:$48 sps:$4 sm:$0xff]   ;;  %v21547_v47 = vld [vmem:[#allocation4 + $0x688] ss:$48 sps:$4 sm:$0xff]  }
 0x6a5   : > { %15483 = vmatprep.subr.bf16.mxu1 %v21525_v59  ;;  %v21552_v59 = vld [vmem:[#allocation4 + $0x6e4] ss:$48 sps:$4 sm:$0xff]  }
 0x6a7   : > { %14974 = vmatpush1.bf16.msra.mxu0 %v21520_v29  ;;  %v21555_v29 = vld [vmem:[#allocation4 + $0x6ec] ss:$48 sps:$4 sm:$0xff]  }
 0x6a8   : > { %15484 = vmatpush1.bf16.msra.mxu1 %v21523_v14  ;;  %14975 = vmatprep.subr.bf16.mxu0 %v21528_v51  ;;  %v21550_v14 = vld [vmem:[#allocation4 + $0x6e0] ss:$48 sps:$4 sm:$0xff]   ;;  %v21553_v51 = vld [vmem:[#allocation4 + $0x6e8] ss:$48 sps:$4 sm:$0xff]  }
 0x6a9   : > { %15485 = vmatprep.subr.bf16.mxu1 %v21531_v13  ;;  %v21558_v13 = vld [vmem:[#allocation4 + $0x744] ss:$48 sps:$4 sm:$0xff]  }
 0x6ab   : > { %14976 = vmatpush1.bf16.msra.mxu0 %v21526_v31  ;;  %v21559_v31 = vld [vmem:[#allocation4 + $0x748] ss:$48 sps:$4 sm:$0xff]  }
 0x6ac   : > { %15486 = vmatpush1.bf16.msra.mxu1 %v21529_v23  ;;  %14977 = vmatprep.subr.bf16.mxu0 %v21534_v45  ;;  %v21564_v23 = vld [vmem:[#allocation4 + $0x7a4] ss:$48 sps:$4 sm:$0xff]   ;;  %v21567_v45 = vld [vmem:[#allocation4 + $0x7ac] ss:$48 sps:$4 sm:$0xff]  }
 0x6ad   : > { %15487 = vmatprep.subr.bf16.mxu1 %v21537_v10  ;;  %v21562_v10 = vld [vmem:[#allocation4 + $0x7a0] ss:$48 sps:$4 sm:$0xff]  }
 0x6af   : > { %14978 = vmatpush1.bf16.msra.mxu0 %v21532_v39  ;;  %v21565_v39 = vld [vmem:[#allocation4 + $0x7a8] ss:$48 sps:$4 sm:$0xff]  }
 0x6b0   : > { %15488 = vmatpush1.bf16.msra.mxu1 %v21535_v38  ;;  %14998 = vmatprep.subr.bf16.mxu0 %v21540_v25  ;;  %v21570_v38 = vld [vmem:[#allocation4 + $0x804] ss:$48 sps:$4 sm:$0xff]   ;;  %v21568_v25 = vld [vmem:[#allocation4 + $0x800] ss:$48 sps:$4 sm:$0xff]  }
 0x6b1   : > { %15508 = vmatprep.subr.bf16.mxu1 %v21543_v40  ;;  %v21576_v40 = vld [vmem:[#allocation4 + $0x864] ss:$48 sps:$4 sm:$0xff]  }
 0x6b2   : > { %14980 = vmatmul.mubr.bf16.vlgmr.msra.gmra.mrb[32].mxu0 %v23155_v5 }
 0x6b3   : > { %15490 = vmatmul.mubr.bf16.vlgmr.msra.gmra.mrb[32].mxu1 %v23155_v5  ;;  %14989 = vmatprep.mubr.bf16.mxu0 %v23179_v43  ;;  %v21561_v5 = vld [vmem:[#allocation4 + $0x74c] ss:$48 sps:$4 sm:$0xff]  }
 0x6b4   : > { %14999 = vmatpush1.bf16.msra.mxu0 %v21538_v24  ;;  %15499 = vmatprep.mubr.bf16.mxu1 %v23179_v43  ;;  %v21556_v43 = vld [vmem:[#allocation4 + $0x740] ss:$48 sps:$4 sm:$0xff]   ;;  %v21579_v24 = vld [vmem:[#allocation4 + $0x86c] ss:$48 sps:$4 sm:$0xff]  }
 0x6b5   : > { %15509 = vmatpush1.bf16.msra.mxu1 %v21541_v56  ;;  %15000 = vmatprep.subr.bf16.mxu0 %v21546_v42  ;;  %v21574_v56 = vld [vmem:[#allocation4 + $0x860] ss:$48 sps:$4 sm:$0xff]   ;;  %v21577_v42 = vld [vmem:[#allocation4 + $0x868] ss:$48 sps:$4 sm:$0xff]  }
 0x6b6   : > { %15510 = vmatprep.subr.bf16.mxu1 %v21549_v26  ;;  %v21582_v26 = vld [vmem:[#allocation4 + $0x8c4] ss:$48 sps:$4 sm:$0xff]  }
 0x6b8   : > { %15001 = vmatpush1.bf16.msra.mxu0 %v21544_v33  ;;  %v21585_v33 = vld [vmem:[#allocation4 + $0x8cc] ss:$48 sps:$4 sm:$0xff]  }
 0x6b9   : > { %15511 = vmatpush1.bf16.msra.mxu1 %v21547_v47  ;;  %15002 = vmatprep.subr.bf16.mxu0 %v21552_v59  ;;  %v21580_v47 = vld [vmem:[#allocation4 + $0x8c0] ss:$48 sps:$4 sm:$0xff]   ;;  %v21583_v59 = vld [vmem:[#allocation4 + $0x8c8] ss:$48 sps:$4 sm:$0xff]  }
 0x6ba   : > { %14990 = vmatmul.mubr.bf16.gmra.mrb[36].mxu0 %v23175_v54  ;;  %15512 = vmatprep.subr.bf16.mxu1 %v21555_v29  ;;  %v21588_v29 = vld [vmem:[#allocation4 + $0x924] ss:$48 sps:$4 sm:$0xff]  }
 0x6bb   : > { %15500 = vmatmul.mubr.bf16.gmra.mrb[36].mxu1 %v23175_v54  ;;  %15030 = vmatprep.mubr.bf16.mxu0 %v23161_v11  ;;  %v21573_v54 = vld [vmem:[#allocation4 + $0x80c] ss:$48 sps:$4 sm:$0xff]  }
 0x6bc   : > { %15003 = vmatpush1.bf16.msra.mxu0 %v21550_v14  ;;  %15540 = vmatprep.mubr.bf16.mxu1 %v23161_v11  ;;  %v21571_v11 = vld [vmem:[#allocation4 + $0x808] ss:$48 sps:$4 sm:$0xff]   ;;  %v21591_v14 = vld [vmem:[#allocation4 + $0x92c] ss:$48 sps:$4 sm:$0xff]  }
 0x6bd   : > { %15513 = vmatpush1.bf16.msra.mxu1 %v21553_v51  ;;  %15004 = vmatprep.subr.bf16.mxu0 %v21558_v13  ;;  %v21586_v51 = vld [vmem:[#allocation4 + $0x920] ss:$48 sps:$4 sm:$0xff]   ;;  %v21589_v13 = vld [vmem:[#allocation4 + $0x928] ss:$48 sps:$4 sm:$0xff]  }
 0x6be   : > { %15514 = vmatprep.subr.bf16.mxu1 %v21561_v5  ;;  %v21594_v5 = vld [vmem:[#allocation4 + $0x984] ss:$48 sps:$4 sm:$0xff]  }
 0x6c0   : > { %15005 = vmatpush1.bf16.msra.mxu0 %v21556_v43  ;;  %v21597_v43 = vld [vmem:[#allocation4 + $0x98c] ss:$48 sps:$4 sm:$0xff]  }
 0x6c1   : > { %15515 = vmatpush1.bf16.msra.mxu1 %v21559_v31  ;;  %15006 = vmatprep.subr.bf16.mxu0 %v21564_v23  ;;  %v21592_v31 = vld [vmem:[#allocation4 + $0x980] ss:$48 sps:$4 sm:$0xff]   ;;  %v21595_v23 = vld [vmem:[#allocation4 + $0x988] ss:$48 sps:$4 sm:$0xff]  }
 0x6c2   : > { %15516 = vmatprep.subr.bf16.mxu1 %v21567_v45  ;;  %v21600_v45 = vld [vmem:[#allocation4 + $0x9e4] ss:$48 sps:$4 sm:$0xff]  }
 0x6c4   : > { %15007 = vmatpush1.bf16.msra.mxu0 %v21562_v10  ;;  %v21603_v10 = vld [vmem:[#allocation4 + $0x9ec] ss:$48 sps:$4 sm:$0xff]  }
 0x6c5   : > { %15517 = vmatpush1.bf16.msra.mxu1 %v21565_v39  ;;  %15008 = vmatprep.subr.bf16.mxu0 %v21570_v38  ;;  %v21598_v39 = vld [vmem:[#allocation4 + $0x9e0] ss:$48 sps:$4 sm:$0xff]   ;;  %v21601_v38 = vld [vmem:[#allocation4 + $0x9e8] ss:$48 sps:$4 sm:$0xff]  }
 0x6c6   : > { %15518 = vmatprep.subr.bf16.mxu1 %v21573_v54  ;;  %v21606_v54 = vld [vmem:[#allocation4 + $0xa44] ss:$48 sps:$4 sm:$0xff]  }
 0x6c8   : > { %15009 = vmatpush1.bf16.msra.mxu0 %v21568_v25  ;;  %v21609_v25 = vld [vmem:[#allocation4 + $0xa4c] ss:$48 sps:$4 sm:$0xff]  }
 0x6c9   : > { %15519 = vmatpush1.bf16.msra.mxu1 %v21571_v11  ;;  %15010 = vmatprep.subr.bf16.mxu0 %v21576_v40  ;;  %v21604_v11 = vld [vmem:[#allocation4 + $0xa40] ss:$48 sps:$4 sm:$0xff]   ;;  %v21607_v40 = vld [vmem:[#allocation4 + $0xa48] ss:$48 sps:$4 sm:$0xff]  }
 0x6ca   : > { %15520 = vmatprep.subr.bf16.mxu1 %v21579_v24  ;;  %v21612_v24 = vld [vmem:[#allocation4 + $0xaa4] ss:$48 sps:$4 sm:$0xff]  }
 0x6cc   : > { %15011 = vmatpush1.bf16.msra.mxu0 %v21574_v56  ;;  %v21615_v56 = vld [vmem:[#allocation4 + $0xaac] ss:$48 sps:$4 sm:$0xff]  }
 0x6cd   : > { %15521 = vmatpush1.bf16.msra.mxu1 %v21577_v42  ;;  %15012 = vmatprep.subr.bf16.mxu0 %v21582_v26  ;;  %v21610_v42 = vld [vmem:[#allocation4 + $0xaa0] ss:$48 sps:$4 sm:$0xff]   ;;  %v21613_v26 = vld [vmem:[#allocation4 + $0xaa8] ss:$48 sps:$4 sm:$0xff]  }
 0x6ce   : > { %15522 = vmatprep.subr.bf16.mxu1 %v21585_v33  ;;  %v21618_v33 = vld [vmem:[#allocation4 + $0xb04] ss:$48 sps:$4 sm:$0xff]  }
 0x6d0   : > { %15013 = vmatpush1.bf16.msra.mxu0 %v21580_v47  ;;  %v21621_v47 = vld [vmem:[#allocation4 + $0xb0c] ss:$48 sps:$4 sm:$0xff]  }
 0x6d1   : > { %15523 = vmatpush1.bf16.msra.mxu1 %v21583_v59  ;;  %15014 = vmatprep.subr.bf16.mxu0 %v21588_v29  ;;  %v21616_v59 = vld [vmem:[#allocation4 + $0xb00] ss:$48 sps:$4 sm:$0xff]   ;;  %v21619_v29 = vld [vmem:[#allocation4 + $0xb08] ss:$48 sps:$4 sm:$0xff]  }
 0x6d2   : > { %15524 = vmatprep.subr.bf16.mxu1 %v21591_v14  ;;  %v21624_v14 = vld [vmem:[#allocation4 + $0xb64] ss:$48 sps:$4 sm:$0xff]  }
 0x6d4   : > { %15015 = vmatpush1.bf16.msra.mxu0 %v21586_v51  ;;  %v21627_v51 = vld [vmem:[#allocation4 + $0xb6c] ss:$48 sps:$4 sm:$0xff]  }
 0x6d5   : > { %15525 = vmatpush1.bf16.msra.mxu1 %v21589_v13  ;;  %15016 = vmatprep.subr.bf16.mxu0 %v21594_v5  ;;  %v21622_v13 = vld [vmem:[#allocation4 + $0xb60] ss:$48 sps:$4 sm:$0xff]   ;;  %v21625_v5 = vld [vmem:[#allocation4 + $0xb68] ss:$48 sps:$4 sm:$0xff]  }
 0x6d6   : > { %15526 = vmatprep.subr.bf16.mxu1 %v21597_v43  ;;  %v21630_v43 = vld [vmem:[#allocation4 + $0xbc4] ss:$48 sps:$4 sm:$0xff]  }
 0x6d8   : > { %15017 = vmatpush1.bf16.msra.mxu0 %v21592_v31  ;;  %v21633_v31 = vld [vmem:[#allocation4 + $0xbcc] ss:$48 sps:$4 sm:$0xff]  }
 0x6d9   : > { %15527 = vmatpush1.bf16.msra.mxu1 %v21595_v23  ;;  %15018 = vmatprep.subr.bf16.mxu0 %v21600_v45  ;;  %v21628_v23 = vld [vmem:[#allocation4 + $0xbc0] ss:$48 sps:$4 sm:$0xff]   ;;  %v21631_v45 = vld [vmem:[#allocation4 + $0xbc8] ss:$48 sps:$4 sm:$0xff]  }
 0x6da   : > { %15528 = vmatprep.subr.bf16.mxu1 %v21603_v10  ;;  %v21636_v10 = vld [vmem:[#allocation4 + $0xc24] ss:$48 sps:$4 sm:$0xff]  }
 0x6dc   : > { %15019 = vmatpush1.bf16.msra.mxu0 %v21598_v39  ;;  %v21639_v39 = vld [vmem:[#allocation4 + $0xc2c] ss:$48 sps:$4 sm:$0xff]  }
 0x6dd   : > { %15529 = vmatpush1.bf16.msra.mxu1 %v21601_v38  ;;  %15020 = vmatprep.subr.bf16.mxu0 %v21606_v54  ;;  %v21634_v38 = vld [vmem:[#allocation4 + $0xc20] ss:$48 sps:$4 sm:$0xff]   ;;  %v21637_v54 = vld [vmem:[#allocation4 + $0xc28] ss:$48 sps:$4 sm:$0xff]  }
 0x6de   : > { %15530 = vmatprep.subr.bf16.mxu1 %v21609_v25  ;;  %v21642_v25 = vld [vmem:[#allocation4 + $0xc84] ss:$48 sps:$4 sm:$0xff]  }
 0x6e0   : > { %15021 = vmatpush1.bf16.msra.mxu0 %v21604_v11  ;;  %v21645_v11 = vld [vmem:[#allocation4 + $0xc8c] ss:$48 sps:$4 sm:$0xff]  }
 0x6e1   : > { %15531 = vmatpush1.bf16.msra.mxu1 %v21607_v40  ;;  %15022 = vmatprep.subr.bf16.mxu0 %v21612_v24  ;;  %v21640_v40 = vld [vmem:[#allocation4 + $0xc80] ss:$48 sps:$4 sm:$0xff]   ;;  %v21643_v24 = vld [vmem:[#allocation4 + $0xc88] ss:$48 sps:$4 sm:$0xff]  }
 0x6e2   : > { %15532 = vmatprep.subr.bf16.mxu1 %v21615_v56  ;;  %v21648_v56 = vld [vmem:[#allocation4 + $0xce4] ss:$48 sps:$4 sm:$0xff]  }
 0x6e4   : > { %15023 = vmatpush1.bf16.msra.mxu0 %v21610_v42  ;;  %v21651_v42 = vld [vmem:[#allocation4 + $0xcec] ss:$48 sps:$4 sm:$0xff]  }
 0x6e5   : > { %15533 = vmatpush1.bf16.msra.mxu1 %v21613_v26  ;;  %15024 = vmatprep.subr.bf16.mxu0 %v21618_v33  ;;  %v21646_v26 = vld [vmem:[#allocation4 + $0xce0] ss:$48 sps:$4 sm:$0xff]   ;;  %v21649_v33 = vld [vmem:[#allocation4 + $0xce8] ss:$48 sps:$4 sm:$0xff]  }
 0x6e6   : > { %15534 = vmatprep.subr.bf16.mxu1 %v21621_v47  ;;  %v21654_v47 = vld [vmem:[#allocation4 + $0xd44] ss:$48 sps:$4 sm:$0xff]  }
 0x6e8   : > { %15025 = vmatpush1.bf16.msra.mxu0 %v21616_v59  ;;  %v21655_v59 = vld [vmem:[#allocation4 + $0xd48] ss:$48 sps:$4 sm:$0xff]  }
 0x6e9   : > { %15535 = vmatpush1.bf16.msra.mxu1 %v21619_v29  ;;  %15026 = vmatprep.subr.bf16.mxu0 %v21624_v14  ;;  %v21660_v29 = vld [vmem:[#allocation4 + $0xda4] ss:$48 sps:$4 sm:$0xff]   ;;  %v21663_v14 = vld [vmem:[#allocation4 + $0xdac] ss:$48 sps:$4 sm:$0xff]  }
 0x6ea   : > { %15536 = vmatprep.subr.bf16.mxu1 %v21627_v51  ;;  %v21658_v51 = vld [vmem:[#allocation4 + $0xda0] ss:$48 sps:$4 sm:$0xff]  }
 0x6ec   : > { %15027 = vmatpush1.bf16.msra.mxu0 %v21622_v13  ;;  %v21661_v13 = vld [vmem:[#allocation4 + $0xda8] ss:$48 sps:$4 sm:$0xff]  }
 0x6ed   : > { %15537 = vmatpush1.bf16.msra.mxu1 %v21625_v5  ;;  %15028 = vmatprep.subr.bf16.mxu0 %v21630_v43  ;;  %v21666_v5 = vld [vmem:[#allocation4 + $0xe04] ss:$48 sps:$4 sm:$0xff]   ;;  %v21664_v43 = vld [vmem:[#allocation4 + $0xe00] ss:$48 sps:$4 sm:$0xff]  }
 0x6ee   : > { %15538 = vmatprep.subr.bf16.mxu1 %v21633_v31  ;;  %v21672_v31 = vld [vmem:[#allocation4 + $0xe64] ss:$48 sps:$4 sm:$0xff]  }
 0x6f0   : > { %15029 = vmatpush1.bf16.msra.mxu0 %v21628_v23  ;;  %v21675_v23 = vld [vmem:[#allocation4 + $0xe6c] ss:$48 sps:$4 sm:$0xff]  }
 0x6f1   : > { %15539 = vmatpush1.bf16.msra.mxu1 %v21631_v45  ;;  %15049 = vmatprep.subr.bf16.mxu0 %v21636_v10  ;;  %v21670_v45 = vld [vmem:[#allocation4 + $0xe60] ss:$48 sps:$4 sm:$0xff]   ;;  %v21673_v10 = vld [vmem:[#allocation4 + $0xe68] ss:$48 sps:$4 sm:$0xff]  }
 0x6f2   : > { %15559 = vmatprep.subr.bf16.mxu1 %v21639_v39  ;;  %v21678_v39 = vld [vmem:[#allocation4 + $0xec4] ss:$48 sps:$4 sm:$0xff]  }
 0x6f3   : > { %15031 = vmatmul.mubr.bf16.vlgmr.msra.gmra.mrb[32].mxu0 %v23157_v9 }
 0x6f4   : > { %15541 = vmatmul.mubr.bf16.vlgmr.msra.gmra.mrb[32].mxu1 %v23157_v9  ;;  %15040 = vmatprep.mubr.bf16.mxu0 %v23181_v44  ;;  %v21657_v9 = vld [vmem:[#allocation4 + $0xd4c] ss:$48 sps:$4 sm:$0xff]  }
 0x6f5   : > { %15050 = vmatpush1.bf16.msra.mxu0 %v21634_v38  ;;  %15550 = vmatprep.mubr.bf16.mxu1 %v23181_v44  ;;  %v21652_v44 = vld [vmem:[#allocation4 + $0xd40] ss:$48 sps:$4 sm:$0xff]   ;;  %v21681_v38 = vld [vmem:[#allocation4 + $0xecc] ss:$48 sps:$4 sm:$0xff]  }
 0x6f6   : > { %15560 = vmatpush1.bf16.msra.mxu1 %v21637_v54  ;;  %15051 = vmatprep.subr.bf16.mxu0 %v21642_v25  ;;  %v21676_v54 = vld [vmem:[#allocation4 + $0xec0] ss:$48 sps:$4 sm:$0xff]   ;;  %v21679_v25 = vld [vmem:[#allocation4 + $0xec8] ss:$48 sps:$4 sm:$0xff]  }
 0x6f7   : > { %15561 = vmatprep.subr.bf16.mxu1 %v21645_v11  ;;  %v21684_v11 = vld [vmem:[#allocation4 + $0xf24] ss:$48 sps:$4 sm:$0xff]  }
 0x6f9   : > { %15052 = vmatpush1.bf16.msra.mxu0 %v21640_v40  ;;  %v21687_v40 = vld [vmem:[#allocation4 + $0xf2c] ss:$48 sps:$4 sm:$0xff]  }
 0x6fa   : > { %15562 = vmatpush1.bf16.msra.mxu1 %v21643_v24  ;;  %15053 = vmatprep.subr.bf16.mxu0 %v21648_v56  ;;  %v21682_v24 = vld [vmem:[#allocation4 + $0xf20] ss:$48 sps:$4 sm:$0xff]   ;;  %v21685_v56 = vld [vmem:[#allocation4 + $0xf28] ss:$48 sps:$4 sm:$0xff]  }
 0x6fb   : > { %15041 = vmatmul.mubr.bf16.gmra.mrb[36].mxu0 %v23177_v16  ;;  %15563 = vmatprep.subr.bf16.mxu1 %v21651_v42  ;;  %v21690_v42 = vld [vmem:[#allocation4 + $0xf84] ss:$48 sps:$4 sm:$0xff]  }
 0x6fc   : > { %15551 = vmatmul.mubr.bf16.gmra.mrb[36].mxu1 %v23177_v16  ;;  %15081 = vmatprep.mubr.bf16.mxu0 %v23231_v17  ;;  %v21669_v16 = vld [vmem:[#allocation4 + $0xe0c] ss:$48 sps:$4 sm:$0xff]  }
 0x6fd   : > { %15054 = vmatpush1.bf16.msra.mxu0 %v21646_v26  ;;  %15591 = vmatprep.mubr.bf16.mxu1 %v23231_v17  ;;  %v21667_v17 = vld [vmem:[#allocation4 + $0xe08] ss:$48 sps:$4 sm:$0xff]   ;;  %v21693_v26 = vld [vmem:[#allocation4 + $0xf8c] ss:$48 sps:$4 sm:$0xff]  }
 0x6fe   : > { %15564 = vmatpush1.bf16.msra.mxu1 %v21649_v33  ;;  %15055 = vmatprep.subr.bf16.mxu0 %v21654_v47  ;;  %v21688_v33 = vld [vmem:[#allocation4 + $0xf80] ss:$48 sps:$4 sm:$0xff]   ;;  %v21691_v47 = vld [vmem:[#allocation4 + $0xf88] ss:$48 sps:$4 sm:$0xff]  }
 0x6ff   : > { %15565 = vmatprep.subr.bf16.mxu1 %v21657_v9  ;;  %v21696_v9 = vld [vmem:[#allocation4 + $0xfe4] ss:$48 sps:$4 sm:$0xff]  }
 0x701   : > { %15056 = vmatpush1.bf16.msra.mxu0 %v21652_v44  ;;  %v21699_v44 = vld [vmem:[#allocation4 + $0xfec] ss:$48 sps:$4 sm:$0xff]  }
 0x702   : > { %15566 = vmatpush1.bf16.msra.mxu1 %v21655_v59  ;;  %15057 = vmatprep.subr.bf16.mxu0 %v21660_v29  ;;  %v21694_v59 = vld [vmem:[#allocation4 + $0xfe0] ss:$48 sps:$4 sm:$0xff]   ;;  %v21697_v29 = vld [vmem:[#allocation4 + $0xfe8] ss:$48 sps:$4 sm:$0xff]  }
 0x703   : > { %15567 = vmatprep.subr.bf16.mxu1 %v21663_v14  ;;  %v21702_v14 = vld [vmem:[#allocation4 + $0x1044] ss:$48 sps:$4 sm:$0xff]  }
 0x705   : > { %15058 = vmatpush1.bf16.msra.mxu0 %v21658_v51  ;;  %v21705_v51 = vld [vmem:[#allocation4 + $0x104c] ss:$48 sps:$4 sm:$0xff]  }
 0x706   : > { %15568 = vmatpush1.bf16.msra.mxu1 %v21661_v13  ;;  %15059 = vmatprep.subr.bf16.mxu0 %v21666_v5  ;;  %v21700_v13 = vld [vmem:[#allocation4 + $0x1040] ss:$48 sps:$4 sm:$0xff]   ;;  %v21703_v5 = vld [vmem:[#allocation4 + $0x1048] ss:$48 sps:$4 sm:$0xff]  }
 0x707   : > { %15569 = vmatprep.subr.bf16.mxu1 %v21669_v16  ;;  %v21708_v16 = vld [vmem:[#allocation4 + $0x10a4] ss:$48 sps:$4 sm:$0xff]  }
 0x709   : > { %15060 = vmatpush1.bf16.msra.mxu0 %v21664_v43  ;;  %v21711_v43 = vld [vmem:[#allocation4 + $0x10ac] ss:$48 sps:$4 sm:$0xff]  }
 0x70a   : > { %15570 = vmatpush1.bf16.msra.mxu1 %v21667_v17  ;;  %15061 = vmatprep.subr.bf16.mxu0 %v21672_v31  ;;  %v21706_v17 = vld [vmem:[#allocation4 + $0x10a0] ss:$48 sps:$4 sm:$0xff]   ;;  %v21709_v31 = vld [vmem:[#allocation4 + $0x10a8] ss:$48 sps:$4 sm:$0xff]  }
 0x70b   : > { %15571 = vmatprep.subr.bf16.mxu1 %v21675_v23  ;;  %v21714_v23 = vld [vmem:[#allocation4 + $0x1104] ss:$48 sps:$4 sm:$0xff]  }
 0x70d   : > { %15062 = vmatpush1.bf16.msra.mxu0 %v21670_v45  ;;  %v21717_v45 = vld [vmem:[#allocation4 + $0x110c] ss:$48 sps:$4 sm:$0xff]  }
 0x70e   : > { %15572 = vmatpush1.bf16.msra.mxu1 %v21673_v10  ;;  %15063 = vmatprep.subr.bf16.mxu0 %v21678_v39  ;;  %v21712_v10 = vld [vmem:[#allocation4 + $0x1100] ss:$48 sps:$4 sm:$0xff]   ;;  %v21715_v39 = vld [vmem:[#allocation4 + $0x1108] ss:$48 sps:$4 sm:$0xff]  }
 0x70f   : > { %15573 = vmatprep.subr.bf16.mxu1 %v21681_v38  ;;  %v21720_v38 = vld [vmem:[#allocation4 + $0x1164] ss:$48 sps:$4 sm:$0xff]  }
 0x711   : > { %15064 = vmatpush1.bf16.msra.mxu0 %v21676_v54  ;;  %v21723_v54 = vld [vmem:[#allocation4 + $0x116c] ss:$48 sps:$4 sm:$0xff]  }
 0x712   : > { %15574 = vmatpush1.bf16.msra.mxu1 %v21679_v25  ;;  %15065 = vmatprep.subr.bf16.mxu0 %v21684_v11  ;;  %v21718_v25 = vld [vmem:[#allocation4 + $0x1160] ss:$48 sps:$4 sm:$0xff]   ;;  %v21721_v11 = vld [vmem:[#allocation4 + $0x1168] ss:$48 sps:$4 sm:$0xff]  }
 0x713   : > { %15575 = vmatprep.subr.bf16.mxu1 %v21687_v40  ;;  %v21726_v40 = vld [vmem:[#allocation4 + $0x11c4] ss:$48 sps:$4 sm:$0xff]  }
 0x715   : > { %15066 = vmatpush1.bf16.msra.mxu0 %v21682_v24  ;;  %v21729_v24 = vld [vmem:[#allocation4 + $0x11cc] ss:$48 sps:$4 sm:$0xff]  }
 0x716   : > { %15576 = vmatpush1.bf16.msra.mxu1 %v21685_v56  ;;  %15067 = vmatprep.subr.bf16.mxu0 %v21690_v42  ;;  %v21724_v56 = vld [vmem:[#allocation4 + $0x11c0] ss:$48 sps:$4 sm:$0xff]   ;;  %v21727_v42 = vld [vmem:[#allocation4 + $0x11c8] ss:$48 sps:$4 sm:$0xff]  }
 0x717   : > { %15577 = vmatprep.subr.bf16.mxu1 %v21693_v26  ;;  %v21732_v26 = vld [vmem:[#allocation4 + $0x1224] ss:$48 sps:$4 sm:$0xff]  }
 0x719   : > { %15068 = vmatpush1.bf16.msra.mxu0 %v21688_v33  ;;  %v21735_v33 = vld [vmem:[#allocation4 + $0x122c] ss:$48 sps:$4 sm:$0xff]  }
 0x71a   : > { %15578 = vmatpush1.bf16.msra.mxu1 %v21691_v47  ;;  %15069 = vmatprep.subr.bf16.mxu0 %v21696_v9  ;;  %v21730_v47 = vld [vmem:[#allocation4 + $0x1220] ss:$48 sps:$4 sm:$0xff]   ;;  %v21733_v9 = vld [vmem:[#allocation4 + $0x1228] ss:$48 sps:$4 sm:$0xff]  }
 0x71b   : > { %15579 = vmatprep.subr.bf16.mxu1 %v21699_v44  ;;  %v21738_v44 = vld [vmem:[#allocation4 + $0x1284] ss:$48 sps:$4 sm:$0xff]  }
 0x71d   : > { %15070 = vmatpush1.bf16.msra.mxu0 %v21694_v59  ;;  %v24004_v59 = vld [vmem:[#allocation14_spill] sm:$0xff] }
 0x71e   : > { %15580 = vmatpush1.bf16.msra.mxu1 %v21697_v29  ;;  %15071 = vmatprep.subr.bf16.mxu0 %v21702_v14  ;;  %v21741_v29 = vld [vmem:[#allocation4 + $0x128c] ss:$48 sps:$4 sm:$0xff]   ;;  %v24005_v14 = vld [vmem:[#allocation16_spill] sm:$0xff] }
 0x71f   : > { %15581 = vmatprep.subr.bf16.mxu1 %v21705_v51  ;;  %v21736_v51 = vld [vmem:[#allocation4 + $0x1280] ss:$48 sps:$4 sm:$0xff]  }
 0x721   : > { %15072 = vmatpush1.bf16.msra.mxu0 %v21700_v13  ;;  %v21739_v13 = vld [vmem:[#allocation4 + $0x1288] ss:$48 sps:$4 sm:$0xff]  }
 0x722   : > { %15582 = vmatpush1.bf16.msra.mxu1 %v21703_v5  ;;  %15073 = vmatprep.subr.bf16.mxu0 %v21708_v16  ;;  %v21744_v5 = vld [vmem:[#allocation4 + $0x12e4] ss:$48 sps:$4 sm:$0xff]   ;;  %v21747_v16 = vld [vmem:[#allocation4 + $0x12ec] ss:$48 sps:$4 sm:$0xff]  }
 0x723   : > { %15583 = vmatprep.subr.bf16.mxu1 %v21711_v43  ;;  %v21742_v43 = vld [vmem:[#allocation4 + $0x12e0] ss:$48 sps:$4 sm:$0xff]  }
 0x725   : > { %15074 = vmatpush1.bf16.msra.mxu0 %v21706_v17  ;;  %v21745_v17 = vld [vmem:[#allocation4 + $0x12e8] ss:$48 sps:$4 sm:$0xff]  }
 0x726   : > { %15584 = vmatpush1.bf16.msra.mxu1 %v21709_v31  ;;  %15075 = vmatprep.subr.bf16.mxu0 %v21714_v23  ;;  %v21750_v31 = vld [vmem:[#allocation4 + $0x1344] ss:$48 sps:$4 sm:$0xff]   ;;  %v24006_v23 = vld [vmem:[#allocation15_spill] sm:$0xff] }
 0x727   : > { %15585 = vmatprep.subr.bf16.mxu1 %v21717_v45  ;;  %v21753_v45 = vld [vmem:[#allocation4 + $0x134c] ss:$48 sps:$4 sm:$0xff]  }
 0x729   : > { %15076 = vmatpush1.bf16.msra.mxu0 %v21712_v10  ;;  %v24007_v10 = vld [vmem:[#allocation17_spill] sm:$0xff] }
 0x72a   : > { %15586 = vmatpush1.bf16.msra.mxu1 %v21715_v39  ;;  %15077 = vmatprep.subr.bf16.mxu0 %v21720_v38  ;;  %v21748_v39 = vld [vmem:[#allocation4 + $0x1340] ss:$48 sps:$4 sm:$0xff]   ;;  %v21751_v38 = vld [vmem:[#allocation4 + $0x1348] ss:$48 sps:$4 sm:$0xff]  }
 0x72b   : > { %15587 = vmatprep.subr.bf16.mxu1 %v21723_v54  ;;  %v21756_v54 = vld [vmem:[#allocation4 + $0x13a4] ss:$48 sps:$4 sm:$0xff]  }
 0x72d   : > { %15078 = vmatpush1.bf16.msra.mxu0 %v21718_v25  ;;  %v24008_v25 = vld [vmem:[#allocation9_spill] sm:$0xff] }
 0x72e   : > { %15588 = vmatpush1.bf16.msra.mxu1 %v21721_v11  ;;  %15079 = vmatprep.subr.bf16.mxu0 %v21726_v40  ;;  %v3511_v11 = vsub.s32 7, %v24008_v25  ;;  %v21759_v40 = vld [vmem:[#allocation4 + $0x13ac] ss:$48 sps:$4 sm:$0xff]  }
 0x72f   : > { %15589 = vmatprep.subr.bf16.mxu1 %v21729_v24  ;;  %v22378_v24 = vld [vmem:[#allocation6] sm:$0xff] }
 0x731   : > { %15080 = vmatpush1.bf16.msra.mxu0 %v21724_v56  ;;  %v24009_v56 = vsub.s32 4, %v24008_v25 }
 0x732   : > { %15590 = vmatpush1.bf16.msra.mxu1 %v21727_v42  ;;  %15100 = vmatprep.subr.bf16.mxu0 %v21732_v26  ;;  %v21754_v26 = vld [vmem:[#allocation4 + $0x13a0] ss:$48 sps:$4 sm:$0xff]  }
 0x733   : > { %15610 = vmatprep.subr.bf16.mxu1 %v21735_v33  ;;  %v23619_v42 = vrot.slane %v22378_v24, %v24009_v56  ;;  %v24011_v33 = vsub.s32 6, %v24008_v25 }
 0x734   : > { %15082 = vmatmul.mubr.bf16.vlgmr.msra.gmra.mrb[32].mxu0 %v24004_v59 }
 0x735   : > { %15592 = vmatmul.mubr.bf16.vlgmr.msra.gmra.mrb[32].mxu1 %v24004_v59  ;;  %15091 = vmatprep.mubr.bf16.mxu0 %v24005_v14  ;;  %24010 = vst [vmem:[#allocation14_spill] sm:$0xff] %v23619_v42  ;;  %v21757_v59 = vld [vmem:[#allocation4 + $0x13a8] ss:$48 sps:$4 sm:$0xff]  }
 0x736   : > { %15101 = vmatpush1.bf16.msra.mxu0 %v21730_v47  ;;  %15601 = vmatprep.mubr.bf16.mxu1 %v24005_v14  ;;  %v23623_v47 = vrot.slane %v22378_v24, %v24011_v33  ;;  %v21762_v14 = vld [vmem:[#allocation4 + $0x1404] ss:$48 sps:$4 sm:$0xff]  }
 0x737   : > { %15611 = vmatpush1.bf16.msra.mxu1 %v21733_v9  ;;  %15102 = vmatprep.subr.bf16.mxu0 %v21738_v44  ;;  %v24013_v9 = vsub.s32 5, %v24008_v25 }
 0x738   : > { %15612 = vmatprep.subr.bf16.mxu1 %v21741_v29  ;;  %24012 = vst [vmem:[#allocation16_spill] sm:$0xff] %v23623_v47  ;;  %v23629_v29 = vrot.slane %v22378_v24, %v3511_v11 }
 0x739   : > { %v23627_v44 = vrot.slane %v22378_v24, %v24013_v9  ;;  %v21768_v24 = vld [vmem:[#allocation4 + $0x1464] ss:$48 sps:$4 sm:$0xff]   ;;  %v21771_v9 = vld [vmem:[#allocation4 + $0x146c] ss:$48 sps:$4 sm:$0xff]  }
 0x73a   : > { %15103 = vmatpush1.bf16.msra.mxu0 %v21736_v51 }
 0x73b   : > { %15613 = vmatpush1.bf16.msra.mxu1 %v21739_v13  ;;  %15104 = vmatprep.subr.bf16.mxu0 %v21744_v5  ;;  %v21765_v13 = vld [vmem:[#allocation4 + $0x140c] ss:$48 sps:$4 sm:$0xff]  }
 0x73c   : > { %15092 = vmatmul.mubr.bf16.gmra.mrb[36].mxu0 %v24006_v23  ;;  %15614 = vmatprep.subr.bf16.mxu1 %v21747_v16 }
 0x73d   : > { %15602 = vmatmul.mubr.bf16.gmra.mrb[36].mxu1 %v24006_v23  ;;  %15132 = vmatprep.mubr.bf16.mxu0 %v24007_v10 }
 0x73e   : > { %15105 = vmatpush1.bf16.msra.mxu0 %v21742_v43  ;;  %15642 = vmatprep.mubr.bf16.mxu1 %v24007_v10 }
 0x73f   : > { %15615 = vmatpush1.bf16.msra.mxu1 %v21745_v17  ;;  %15106 = vmatprep.subr.bf16.mxu0 %v21750_v31 }
 0x740   : > { %15616 = vmatprep.subr.bf16.mxu1 %v21753_v45  ;;  %v21760_v45 = vld [vmem:[#allocation4 + $0x1400] ss:$48 sps:$4 sm:$0xff]  }
 0x742   : > { %15107 = vmatpush1.bf16.msra.mxu0 %v21748_v39 }
 0x743   : > { %15617 = vmatpush1.bf16.msra.mxu1 %v21751_v38  ;;  %15108 = vmatprep.subr.bf16.mxu0 %v21756_v54  ;;  %v21763_v38 = vld [vmem:[#allocation4 + $0x1408] ss:$48 sps:$4 sm:$0xff]  }
 0x744   : > { %15618 = vmatprep.subr.bf16.mxu1 %v21759_v40  ;;  %v14420_v51 = vpop.f32.mrb[24].mxu0 }
 0x745   : > { %v18843_v5 = vadd.f32 %v14420_v51, %v23619_v42  ;;  %v14930_v16 = vpop.f32.mrb[24].mxu1  ;;  %v14422_v43 = vpop.f32.mrb[25].mxu0 }
 0x746   : > { %15109 = vmatpush1.bf16.msra.mxu0 %v21754_v26  ;;  %v18849_v17 = vadd.f32 %v14930_v16, %v23623_v47  ;;  %v18844_v31 = vadd.f32 %v14422_v43, %v23627_v44  ;;  %v14932_v23 = vpop.f32.mrb[25].mxu1  ;;  %v14424_v10 = vpop.f32.mrb[26].mxu0 }
 0x747   : > { %15619 = vmatpush1.bf16.msra.mxu1 %v21757_v59  ;;  %v18850_v39 = vadd.f32 %v14932_v23, %v23629_v29  ;;  %15110 = vmatprep.subr.bf16.mxu0 %v21762_v14  ;;  %v18845_v54 = vadd.f32 %v14424_v10, %v23619_v42  ;;  %v14934_v11 = vpop.f32.mrb[26].mxu1  ;;  %v14426_v40 = vpop.f32.mrb[27].mxu0  ;;  %v15971_v51 = vmax.f32 %v18843_v5, 0.0  ;;  %v21766_v10 = vld [vmem:[#allocation4 + $0x1460] ss:$48 sps:$4 sm:$0xff]  }
 0x748   : > { %15620 = vmatprep.subr.bf16.mxu1 %v21765_v13  ;;  %v18851_v56 = vadd.f32 %v14934_v11, %v23623_v47  ;;  %v18846_v26 = vadd.f32 %v14426_v40, %v23627_v44  ;;  %v14936_v33 = vpop.f32.mrb[27].mxu1  ;;  %v15973_v43 = vmax.f32 %v18849_v17, 0.0  ;;  %v15972_v23 = vmax.f32 %v18844_v31, 0.0  ;;  %v21769_v11 = vld [vmem:[#allocation4 + $0x1468] ss:$48 sps:$4 sm:$0xff]  }
 0x749   : > { %v15983_v16 = vmax.f32 %v18845_v54, 0.0  ;;  %v18852_v59 = vadd.f32 %v14936_v33, %v23629_v29  ;;  %v15974_v42 = vmax.f32 %v18850_v39, 0.0  ;;  %v21774_v40 = vld [vmem:[#allocation4 + $0x14c4] ss:$48 sps:$4 sm:$0xff]   ;;  %v21777_v17 = vld [vmem:[#allocation4 + $0x14cc] ss:$48 sps:$4 sm:$0xff]  }
 0x74a   : > { %v15985_v14 = vmax.f32 %v18851_v56, 0.0  ;;  %15111 = vmatpush1.bf16.msra.mxu0 %v21760_v45  ;;  %v15984_v32 = vmax.f32 %v18846_v26, 0.0  ;;  %v21775_v26 = vld [vmem:[#allocation4 + $0x14c8] ss:$48 sps:$4 sm:$0xff]  }
 0x74b   : > { %v23639_v50 = vpack.c.bf16 %v15983_v16, %v15971_v51  ;;  %15621 = vmatpush1.bf16.msra.mxu1 %v21763_v38  ;;  %v15986_v13 = vmax.f32 %v18852_v59, 0.0  ;;  %15112 = vmatprep.subr.bf16.mxu0 %v21768_v24  ;;  %v21772_v24 = vld [vmem:[#allocation4 + $0x14c0] ss:$48 sps:$4 sm:$0xff]   ;;  %v21783_v16 = vld [vmem:[#allocation4 + $0x152c] ss:$48 sps:$4 sm:$0xff]  }
 0x74c   : > { %v23641_v47 = vpack.c.bf16 %v15985_v14, %v15973_v43  ;;  %v23643_v5 = vpack.c.bf16 %v15984_v32, %v15972_v23  ;;  %15622 = vmatprep.subr.bf16.mxu1 %v21771_v9  ;;  %v23645_v54 = vpop.f32.mrb[28].mxu0  ;;  %v21780_v9 = vld [vmem:[#allocation4 + $0x1524] ss:$48 sps:$4 sm:$0xff]   ;;  %v21781_v59 = vld [vmem:[#allocation4 + $0x1528] ss:$48 sps:$4 sm:$0xff]  }
 0x74d   : > { %v23647_v31 = vpack.c.bf16 %v15986_v13, %v15974_v42  ;;  %v23649_v45 = vpop.f32.mrb[28].mxu1  ;;  %v23651_v39 = vpop.f32.mrb[29].mxu0  ;;  %v21778_v42 = vld [vmem:[#allocation4 + $0x1520] ss:$48 sps:$4 sm:$0xff]   ;;  %v21786_v43 = vld [vmem:[#allocation4 + $0x1584] ss:$48 sps:$4 sm:$0xff]  }
 0x74e   : > { %15113 = vmatpush1.bf16.msra.mxu0 %v21766_v10  ;;  %v23653_v38 = vpop.f32.mrb[29].mxu1  ;;  %v14434_v56 = vpop.f32.mrb[30].mxu0  ;;  %v21789_v23 = vld [vmem:[#allocation4 + $0x158c] ss:$48 sps:$4 sm:$0xff]   ;;  %v21784_v14 = vld [vmem:[#allocation4 + $0x1580] ss:$48 sps:$4 sm:$0xff]  }
 0x74f   : > { %15623 = vmatpush1.bf16.msra.mxu1 %v21769_v11  ;;  %15114 = vmatprep.subr.bf16.mxu0 %v21774_v40  ;;  %v14944_v32 = vpop.f32.mrb[30].mxu1  ;;  %v14435_v33 = vpop.f32.mrb[31].mxu0  ;;  %v21787_v10 = vld [vmem:[#allocation4 + $0x1588] ss:$48 sps:$4 sm:$0xff]   ;;  %v21792_v13 = vld [vmem:[#allocation4 + $0x15e4] ss:$48 sps:$4 sm:$0xff]  }
 0x750   : > { %15624 = vmatprep.subr.bf16.mxu1 %v21777_v17  ;;  %v14945_v51 = vpop.f32.mrb[31].mxu1  ;;  %v21795_v11 = vld [vmem:[#allocation4 + $0x15ec] ss:$48 sps:$4 sm:$0xff]   ;;  %v21790_v40 = vld [vmem:[#allocation4 + $0x15e0] ss:$48 sps:$4 sm:$0xff]  }
 0x751   : > { %v21793_v17 = vld [vmem:[#allocation4 + $0x15e8] ss:$48 sps:$4 sm:$0xff]   ;;  %v21801_v56 = vld [vmem:[#allocation4 + $0x164c] ss:$48 sps:$4 sm:$0xff]   ;;  %v21804_v33 = vld [vmem:[#allocation4 + $0x16a4] ss:$48 sps:$4 sm:$0xff]  }
 0x752   : > { %15115 = vmatpush1.bf16.msra.mxu0 %v21772_v24  ;;  %v21798_v24 = vld [vmem:[#allocation4 + $0x1644] ss:$48 sps:$4 sm:$0xff]   ;;  %v21799_v32 = vld [vmem:[#allocation4 + $0x1648] ss:$48 sps:$4 sm:$0xff]   ;;  %v21802_v51 = vld [vmem:[#allocation4 + $0x16a0] ss:$48 sps:$4 sm:$0xff]  }
 0x753   : > { %15625 = vmatpush1.bf16.msra.mxu1 %v21775_v26  ;;  %15116 = vmatprep.subr.bf16.mxu0 %v21780_v9  ;;  %v21796_v26 = vld [vmem:[#allocation4 + $0x1640] ss:$48 sps:$4 sm:$0xff]   ;;  %v21807_v9 = vld [vmem:[#allocation4 + $0x16ac] ss:$48 sps:$4 sm:$0xff]  }
 0x754   : > { %15626 = vmatprep.subr.bf16.mxu1 %v21783_v16  ;;  %v21805_v16 = vld [vmem:[#allocation4 + $0x16a8] ss:$48 sps:$4 sm:$0xff]  }
 0x756   : > { %15117 = vmatpush1.bf16.msra.mxu0 %v21778_v42  ;;  %v21810_v42 = vld [vmem:[#allocation4 + $0x1704] ss:$48 sps:$4 sm:$0xff]  }
 0x757   : > { %15627 = vmatpush1.bf16.msra.mxu1 %v21781_v59  ;;  %15118 = vmatprep.subr.bf16.mxu0 %v21786_v43  ;;  %v21813_v59 = vld [vmem:[#allocation4 + $0x170c] ss:$48 sps:$4 sm:$0xff]   ;;  %v21808_v43 = vld [vmem:[#allocation4 + $0x1700] ss:$48 sps:$4 sm:$0xff]  }
 0x758   : > { %15628 = vmatprep.subr.bf16.mxu1 %v21789_v23  ;;  %v21811_v23 = vld [vmem:[#allocation4 + $0x1708] ss:$48 sps:$4 sm:$0xff]  }
 0x75a   : > { %15119 = vmatpush1.bf16.msra.mxu0 %v21784_v14  ;;  %v21816_v14 = vld [vmem:[#allocation4 + $0x1764] ss:$48 sps:$4 sm:$0xff]  }
 0x75b   : > { %15629 = vmatpush1.bf16.msra.mxu1 %v21787_v10  ;;  %15120 = vmatprep.subr.bf16.mxu0 %v21792_v13  ;;  %v21819_v10 = vld [vmem:[#allocation4 + $0x176c] ss:$48 sps:$4 sm:$0xff]   ;;  %v21814_v13 = vld [vmem:[#allocation4 + $0x1760] ss:$48 sps:$4 sm:$0xff]  }
 0x75c   : > { %15630 = vmatprep.subr.bf16.mxu1 %v21795_v11  ;;  %v21817_v11 = vld [vmem:[#allocation4 + $0x1768] ss:$48 sps:$4 sm:$0xff]  }
 0x75e   : > { %15121 = vmatpush1.bf16.msra.mxu0 %v21790_v40  ;;  %v21822_v40 = vld [vmem:[#allocation4 + $0x17c4] ss:$48 sps:$4 sm:$0xff]  }
 0x75f   : > { %15631 = vmatpush1.bf16.msra.mxu1 %v21793_v17  ;;  %15122 = vmatprep.subr.bf16.mxu0 %v21798_v24  ;;  %v21825_v17 = vld [vmem:[#allocation4 + $0x17cc] ss:$48 sps:$4 sm:$0xff]   ;;  %v21820_v24 = vld [vmem:[#allocation4 + $0x17c0] ss:$48 sps:$4 sm:$0xff]  }
 0x760   : > { %15632 = vmatprep.subr.bf16.mxu1 %v21801_v56  ;;  %v21823_v56 = vld [vmem:[#allocation4 + $0x17c8] ss:$48 sps:$4 sm:$0xff]  }
 0x762   : > { %15123 = vmatpush1.bf16.msra.mxu0 %v21796_v26  ;;  %v21828_v26 = vld [vmem:[#allocation4 + $0x1824] ss:$48 sps:$4 sm:$0xff]  }
 0x763   : > { %15633 = vmatpush1.bf16.msra.mxu1 %v21799_v32  ;;  %15124 = vmatprep.subr.bf16.mxu0 %v21804_v33  ;;  %v21831_v32 = vld [vmem:[#allocation4 + $0x182c] ss:$48 sps:$4 sm:$0xff]   ;;  %v21826_v33 = vld [vmem:[#allocation4 + $0x1820] ss:$48 sps:$4 sm:$0xff]  }
 0x764   : > { %15634 = vmatprep.subr.bf16.mxu1 %v21807_v9  ;;  %v21829_v9 = vld [vmem:[#allocation4 + $0x1828] ss:$48 sps:$4 sm:$0xff]  }
 0x766   : > { %15125 = vmatpush1.bf16.msra.mxu0 %v21802_v51  ;;  %v21834_v51 = vld [vmem:[#allocation4 + $0x1884] ss:$48 sps:$4 sm:$0xff]  }
 0x767   : > { %15635 = vmatpush1.bf16.msra.mxu1 %v21805_v16  ;;  %15126 = vmatprep.subr.bf16.mxu0 %v21810_v42  ;;  %v21837_v16 = vld [vmem:[#allocation4 + $0x188c] ss:$48 sps:$4 sm:$0xff]   ;;  %v21832_v42 = vld [vmem:[#allocation4 + $0x1880] ss:$48 sps:$4 sm:$0xff]  }
 0x768   : > { %15636 = vmatprep.subr.bf16.mxu1 %v21813_v59  ;;  %v21835_v59 = vld [vmem:[#allocation4 + $0x1888] ss:$48 sps:$4 sm:$0xff]  }
 0x76a   : > { %15127 = vmatpush1.bf16.msra.mxu0 %v21808_v43  ;;  %v21840_v43 = vld [vmem:[#allocation4 + $0x18e4] ss:$48 sps:$4 sm:$0xff]  }
 0x76b   : > { %15637 = vmatpush1.bf16.msra.mxu1 %v21811_v23  ;;  %15128 = vmatprep.subr.bf16.mxu0 %v21816_v14  ;;  %v21843_v23 = vld [vmem:[#allocation4 + $0x18ec] ss:$48 sps:$4 sm:$0xff]   ;;  %v21838_v14 = vld [vmem:[#allocation4 + $0x18e0] ss:$48 sps:$4 sm:$0xff]  }
 0x76c   : > { %15638 = vmatprep.subr.bf16.mxu1 %v21819_v10  ;;  %v21841_v10 = vld [vmem:[#allocation4 + $0x18e8] ss:$48 sps:$4 sm:$0xff]  }
 0x76e   : > { %15129 = vmatpush1.bf16.msra.mxu0 %v21814_v13  ;;  %v21846_v13 = vld [vmem:[#allocation4 + $0x1944] ss:$48 sps:$4 sm:$0xff]  }
 0x76f   : > { %15639 = vmatpush1.bf16.msra.mxu1 %v21817_v11  ;;  %15130 = vmatprep.subr.bf16.mxu0 %v21822_v40  ;;  %v21847_v11 = vld [vmem:[#allocation4 + $0x1948] ss:$48 sps:$4 sm:$0xff]   ;;  %v21852_v40 = vld [vmem:[#allocation4 + $0x19a4] ss:$48 sps:$4 sm:$0xff]  }
 0x770   : > { %15640 = vmatprep.subr.bf16.mxu1 %v21825_v17  ;;  %v21855_v17 = vld [vmem:[#allocation4 + $0x19ac] ss:$48 sps:$4 sm:$0xff]  }
 0x772   : > { %15131 = vmatpush1.bf16.msra.mxu0 %v21820_v24  ;;  %v21850_v24 = vld [vmem:[#allocation4 + $0x19a0] ss:$48 sps:$4 sm:$0xff]  }
 0x773   : > { %15641 = vmatpush1.bf16.msra.mxu1 %v21823_v56  ;;  %15151 = vmatprep.subr.bf16.mxu0 %v21828_v26  ;;  %v21853_v56 = vld [vmem:[#allocation4 + $0x19a8] ss:$48 sps:$4 sm:$0xff]   ;;  %v21858_v26 = vld [vmem:[#allocation4 + $0x1a04] ss:$48 sps:$4 sm:$0xff]  }
 0x774   : > { %15661 = vmatprep.subr.bf16.mxu1 %v21831_v32  ;;  %v21856_v32 = vld [vmem:[#allocation4 + $0x1a00] ss:$48 sps:$4 sm:$0xff]  }
 0x775   : > { %15133 = vmatmul.mubr.bf16.vlgmr.msra.gmra.mrb[32].mxu0 %v23288_v55 }
 0x776   : > { %15643 = vmatmul.mubr.bf16.vlgmr.msra.gmra.mrb[32].mxu1 %v23288_v55  ;;  %15142 = vmatprep.mubr.bf16.mxu0 %v23294_v15  ;;  %v21849_v55 = vld [vmem:[#allocation4 + $0x194c] ss:$48 sps:$4 sm:$0xff]  }
 0x777   : > { %15152 = vmatpush1.bf16.msra.mxu0 %v21826_v33  ;;  %15652 = vmatprep.mubr.bf16.mxu1 %v23294_v15  ;;  %v21844_v15 = vld [vmem:[#allocation4 + $0x1940] ss:$48 sps:$4 sm:$0xff]   ;;  %v21864_v33 = vld [vmem:[#allocation4 + $0x1a64] ss:$48 sps:$4 sm:$0xff]  }
 0x778   : > { %15662 = vmatpush1.bf16.msra.mxu1 %v21829_v9  ;;  %15153 = vmatprep.subr.bf16.mxu0 %v21834_v51  ;;  %v21867_v9 = vld [vmem:[#allocation4 + $0x1a6c] ss:$48 sps:$4 sm:$0xff]   ;;  %v21862_v51 = vld [vmem:[#allocation4 + $0x1a60] ss:$48 sps:$4 sm:$0xff]  }
 0x779   : > { %15663 = vmatprep.subr.bf16.mxu1 %v21837_v16  ;;  %v21865_v16 = vld [vmem:[#allocation4 + $0x1a68] ss:$48 sps:$4 sm:$0xff]  }
 0x77b   : > { %15154 = vmatpush1.bf16.msra.mxu0 %v21832_v42  ;;  %v21870_v42 = vld [vmem:[#allocation4 + $0x1ac4] ss:$48 sps:$4 sm:$0xff]  }
 0x77c   : > { %15664 = vmatpush1.bf16.msra.mxu1 %v21835_v59  ;;  %15155 = vmatprep.subr.bf16.mxu0 %v21840_v43  ;;  %v21873_v59 = vld [vmem:[#allocation4 + $0x1acc] ss:$48 sps:$4 sm:$0xff]   ;;  %v21868_v43 = vld [vmem:[#allocation4 + $0x1ac0] ss:$48 sps:$4 sm:$0xff]  }
 0x77d   : > { %15143 = vmatmul.mubr.bf16.gmra.mrb[36].mxu0 %v23306_v12  ;;  %15665 = vmatprep.subr.bf16.mxu1 %v21843_v23  ;;  %v21871_v23 = vld [vmem:[#allocation4 + $0x1ac8] ss:$48 sps:$4 sm:$0xff]  }
 0x77e   : > { %15653 = vmatmul.mubr.bf16.gmra.mrb[36].mxu1 %v23306_v12  ;;  %15183 = vmatprep.mubr.bf16.mxu0 %v23311_v21  ;;  %v21861_v12 = vld [vmem:[#allocation4 + $0x1a0c] ss:$48 sps:$4 sm:$0xff]  }
 0x77f   : > { %15156 = vmatpush1.bf16.msra.mxu0 %v21838_v14  ;;  %15693 = vmatprep.mubr.bf16.mxu1 %v23311_v21  ;;  %v21859_v21 = vld [vmem:[#allocation4 + $0x1a08] ss:$48 sps:$4 sm:$0xff]   ;;  %v21876_v14 = vld [vmem:[#allocation4 + $0x1b24] ss:$48 sps:$4 sm:$0xff]  }
 0x780   : > { %15666 = vmatpush1.bf16.msra.mxu1 %v21841_v10  ;;  %15157 = vmatprep.subr.bf16.mxu0 %v21846_v13  ;;  %v21879_v10 = vld [vmem:[#allocation4 + $0x1b2c] ss:$48 sps:$4 sm:$0xff]   ;;  %v21874_v13 = vld [vmem:[#allocation4 + $0x1b20] ss:$48 sps:$4 sm:$0xff]  }
 0x781   : > { %15667 = vmatprep.subr.bf16.mxu1 %v21849_v55  ;;  %v21877_v55 = vld [vmem:[#allocation4 + $0x1b28] ss:$48 sps:$4 sm:$0xff]  }
 0x783   : > { %15158 = vmatpush1.bf16.msra.mxu0 %v21844_v15  ;;  %v21882_v15 = vld [vmem:[#allocation4 + $0x1b84] ss:$48 sps:$4 sm:$0xff]  }
 0x784   : > { %15668 = vmatpush1.bf16.msra.mxu1 %v21847_v11  ;;  %15159 = vmatprep.subr.bf16.mxu0 %v21852_v40  ;;  %v21885_v11 = vld [vmem:[#allocation4 + $0x1b8c] ss:$48 sps:$4 sm:$0xff]   ;;  %v21880_v40 = vld [vmem:[#allocation4 + $0x1b80] ss:$48 sps:$4 sm:$0xff]  }
 0x785   : > { %15669 = vmatprep.subr.bf16.mxu1 %v21855_v17  ;;  %v21883_v17 = vld [vmem:[#allocation4 + $0x1b88] ss:$48 sps:$4 sm:$0xff]  }
 0x787   : > { %15160 = vmatpush1.bf16.msra.mxu0 %v21850_v24  ;;  %v21888_v24 = vld [vmem:[#allocation4 + $0x1be4] ss:$48 sps:$4 sm:$0xff]  }
 0x788   : > { %15670 = vmatpush1.bf16.msra.mxu1 %v21853_v56  ;;  %15161 = vmatprep.subr.bf16.mxu0 %v21858_v26  ;;  %v21891_v56 = vld [vmem:[#allocation4 + $0x1bec] ss:$48 sps:$4 sm:$0xff]   ;;  %v21886_v26 = vld [vmem:[#allocation4 + $0x1be0] ss:$48 sps:$4 sm:$0xff]  }
 0x789   : > { %15671 = vmatprep.subr.bf16.mxu1 %v21861_v12  ;;  %v21889_v12 = vld [vmem:[#allocation4 + $0x1be8] ss:$48 sps:$4 sm:$0xff]  }
 0x78b   : > { %15162 = vmatpush1.bf16.msra.mxu0 %v21856_v32  ;;  %v21894_v32 = vld [vmem:[#allocation4 + $0x1c44] ss:$48 sps:$4 sm:$0xff]  }
 0x78c   : > { %15672 = vmatpush1.bf16.msra.mxu1 %v21859_v21  ;;  %15163 = vmatprep.subr.bf16.mxu0 %v21864_v33  ;;  %v21897_v21 = vld [vmem:[#allocation4 + $0x1c4c] ss:$48 sps:$4 sm:$0xff]   ;;  %v21892_v33 = vld [vmem:[#allocation4 + $0x1c40] ss:$48 sps:$4 sm:$0xff]  }
 0x78d   : > { %15673 = vmatprep.subr.bf16.mxu1 %v21867_v9  ;;  %v21895_v9 = vld [vmem:[#allocation4 + $0x1c48] ss:$48 sps:$4 sm:$0xff]  }
 0x78f   : > { %15164 = vmatpush1.bf16.msra.mxu0 %v21862_v51  ;;  %v21900_v51 = vld [vmem:[#allocation4 + $0x1ca4] ss:$48 sps:$4 sm:$0xff]  }
 0x790   : > { %15674 = vmatpush1.bf16.msra.mxu1 %v21865_v16  ;;  %15165 = vmatprep.subr.bf16.mxu0 %v21870_v42  ;;  %v21903_v16 = vld [vmem:[#allocation4 + $0x1cac] ss:$48 sps:$4 sm:$0xff]   ;;  %v21898_v42 = vld [vmem:[#allocation4 + $0x1ca0] ss:$48 sps:$4 sm:$0xff]  }
 0x791   : > { %15675 = vmatprep.subr.bf16.mxu1 %v21873_v59  ;;  %v21901_v59 = vld [vmem:[#allocation4 + $0x1ca8] ss:$48 sps:$4 sm:$0xff]  }
 0x793   : > { %15166 = vmatpush1.bf16.msra.mxu0 %v21868_v43  ;;  %v21906_v43 = vld [vmem:[#allocation4 + $0x1d04] ss:$48 sps:$4 sm:$0xff]  }
 0x794   : > { %15676 = vmatpush1.bf16.msra.mxu1 %v21871_v23  ;;  %15167 = vmatprep.subr.bf16.mxu0 %v21876_v14  ;;  %v21909_v23 = vld [vmem:[#allocation4 + $0x1d0c] ss:$48 sps:$4 sm:$0xff]   ;;  %v21904_v14 = vld [vmem:[#allocation4 + $0x1d00] ss:$48 sps:$4 sm:$0xff]  }
 0x795   : > { %15677 = vmatprep.subr.bf16.mxu1 %v21879_v10  ;;  %v21907_v10 = vld [vmem:[#allocation4 + $0x1d08] ss:$48 sps:$4 sm:$0xff]  }
 0x797   : > { %15168 = vmatpush1.bf16.msra.mxu0 %v21874_v13  ;;  %v21912_v13 = vld [vmem:[#allocation4 + $0x1d64] ss:$48 sps:$4 sm:$0xff]  }
 0x798   : > { %15678 = vmatpush1.bf16.msra.mxu1 %v21877_v55  ;;  %15169 = vmatprep.subr.bf16.mxu0 %v21882_v15  ;;  %v21915_v55 = vld [vmem:[#allocation4 + $0x1d6c] ss:$48 sps:$4 sm:$0xff]   ;;  %v21910_v15 = vld [vmem:[#allocation4 + $0x1d60] ss:$48 sps:$4 sm:$0xff]  }
 0x799   : > { %15679 = vmatprep.subr.bf16.mxu1 %v21885_v11  ;;  %v21913_v11 = vld [vmem:[#allocation4 + $0x1d68] ss:$48 sps:$4 sm:$0xff]  }
 0x79b   : > { %15170 = vmatpush1.bf16.msra.mxu0 %v21880_v40  ;;  %v21918_v40 = vld [vmem:[#allocation4 + $0x1dc4] ss:$48 sps:$4 sm:$0xff]  }
 0x79c   : > { %15680 = vmatpush1.bf16.msra.mxu1 %v21883_v17  ;;  %15171 = vmatprep.subr.bf16.mxu0 %v21888_v24  ;;  %v21921_v17 = vld [vmem:[#allocation4 + $0x1dcc] ss:$48 sps:$4 sm:$0xff]   ;;  %v21916_v24 = vld [vmem:[#allocation4 + $0x1dc0] ss:$48 sps:$4 sm:$0xff]  }
 0x79d   : > { %15681 = vmatprep.subr.bf16.mxu1 %v21891_v56  ;;  %v21919_v56 = vld [vmem:[#allocation4 + $0x1dc8] ss:$48 sps:$4 sm:$0xff]  }
 0x79f   : > { %15172 = vmatpush1.bf16.msra.mxu0 %v21886_v26  ;;  %v21924_v26 = vld [vmem:[#allocation4 + $0x1e24] ss:$48 sps:$4 sm:$0xff]  }
 0x7a0   : > { %15682 = vmatpush1.bf16.msra.mxu1 %v21889_v12  ;;  %15173 = vmatprep.subr.bf16.mxu0 %v21894_v32  ;;  %v21927_v12 = vld [vmem:[#allocation4 + $0x1e2c] ss:$48 sps:$4 sm:$0xff]   ;;  %v21922_v32 = vld [vmem:[#allocation4 + $0x1e20] ss:$48 sps:$4 sm:$0xff]  }
 0x7a1   : > { %15683 = vmatprep.subr.bf16.mxu1 %v21897_v21  ;;  %v21925_v21 = vld [vmem:[#allocation4 + $0x1e28] ss:$48 sps:$4 sm:$0xff]  }
 0x7a3   : > { %15174 = vmatpush1.bf16.msra.mxu0 %v21892_v33  ;;  %v21930_v33 = vld [vmem:[#allocation4 + $0x1e84] ss:$48 sps:$4 sm:$0xff]  }
 0x7a4   : > { %15684 = vmatpush1.bf16.msra.mxu1 %v21895_v9  ;;  %15175 = vmatprep.subr.bf16.mxu0 %v21900_v51  ;;  %v21933_v9 = vld [vmem:[#allocation4 + $0x1e8c] ss:$48 sps:$4 sm:$0xff]   ;;  %v21928_v51 = vld [vmem:[#allocation4 + $0x1e80] ss:$48 sps:$4 sm:$0xff]  }
 0x7a5   : > { %15685 = vmatprep.subr.bf16.mxu1 %v21903_v16  ;;  %v21931_v16 = vld [vmem:[#allocation4 + $0x1e88] ss:$48 sps:$4 sm:$0xff]  }
 0x7a7   : > { %15176 = vmatpush1.bf16.msra.mxu0 %v21898_v42  ;;  %v21936_v42 = vld [vmem:[#allocation4 + $0x1ee4] ss:$48 sps:$4 sm:$0xff]  }
 0x7a8   : > { %15686 = vmatpush1.bf16.msra.mxu1 %v21901_v59  ;;  %15177 = vmatprep.subr.bf16.mxu0 %v21906_v43  ;;  %v21939_v59 = vld [vmem:[#allocation4 + $0x1eec] ss:$48 sps:$4 sm:$0xff]   ;;  %v21934_v43 = vld [vmem:[#allocation4 + $0x1ee0] ss:$48 sps:$4 sm:$0xff]  }
 0x7a9   : > { %15687 = vmatprep.subr.bf16.mxu1 %v21909_v23  ;;  %v21937_v23 = vld [vmem:[#allocation4 + $0x1ee8] ss:$48 sps:$4 sm:$0xff]  }
 0x7ab   : > { %15178 = vmatpush1.bf16.msra.mxu0 %v21904_v14  ;;  %v21942_v14 = vld [vmem:[#allocation4 + $0x1f44] ss:$48 sps:$4 sm:$0xff]  }
 0x7ac   : > { %15688 = vmatpush1.bf16.msra.mxu1 %v21907_v10  ;;  %15179 = vmatprep.subr.bf16.mxu0 %v21912_v13  ;;  %v21943_v10 = vld [vmem:[#allocation4 + $0x1f48] ss:$48 sps:$4 sm:$0xff]   ;;  %v21948_v13 = vld [vmem:[#allocation4 + $0x1fa4] ss:$48 sps:$4 sm:$0xff]  }
 0x7ad   : > { %15689 = vmatprep.subr.bf16.mxu1 %v21915_v55  ;;  %v21951_v55 = vld [vmem:[#allocation4 + $0x1fac] ss:$48 sps:$4 sm:$0xff]  }
 0x7af   : > { %15180 = vmatpush1.bf16.msra.mxu0 %v21910_v15  ;;  %v21946_v15 = vld [vmem:[#allocation4 + $0x1fa0] ss:$48 sps:$4 sm:$0xff]  }
 0x7b0   : > { %15690 = vmatpush1.bf16.msra.mxu1 %v21913_v11  ;;  %15181 = vmatprep.subr.bf16.mxu0 %v21918_v40  ;;  %v21949_v11 = vld [vmem:[#allocation4 + $0x1fa8] ss:$48 sps:$4 sm:$0xff]   ;;  %v21954_v40 = vld [vmem:[#allocation4 + $0x2004] ss:$48 sps:$4 sm:$0xff]  }
 0x7b1   : > { %15691 = vmatprep.subr.bf16.mxu1 %v21921_v17  ;;  %v21952_v17 = vld [vmem:[#allocation4 + $0x2000] ss:$48 sps:$4 sm:$0xff]  }
 0x7b3   : > { %15182 = vmatpush1.bf16.msra.mxu0 %v21916_v24  ;;  %v21960_v24 = vld [vmem:[#allocation4 + $0x2064] ss:$48 sps:$4 sm:$0xff]  }
 0x7b4   : > { %15692 = vmatpush1.bf16.msra.mxu1 %v21919_v56  ;;  %15202 = vmatprep.subr.bf16.mxu0 %v21924_v26  ;;  %v21963_v56 = vld [vmem:[#allocation4 + $0x206c] ss:$48 sps:$4 sm:$0xff]   ;;  %v21958_v26 = vld [vmem:[#allocation4 + $0x2060] ss:$48 sps:$4 sm:$0xff]  }
 0x7b5   : > { %15712 = vmatprep.subr.bf16.mxu1 %v21927_v12  ;;  %v21961_v12 = vld [vmem:[#allocation4 + $0x2068] ss:$48 sps:$4 sm:$0xff]  }
 0x7b6   : > { %15184 = vmatmul.mubr.bf16.vlgmr.msra.gmra.mrb[32].mxu0 %v23322_v63 }
 0x7b7   : > { %15694 = vmatmul.mubr.bf16.vlgmr.msra.gmra.mrb[32].mxu1 %v23322_v63  ;;  %15193 = vmatprep.mubr.bf16.mxu0 %v23326_v4  ;;  %v21945_v63 = vld [vmem:[#allocation4 + $0x1f4c] ss:$48 sps:$4 sm:$0xff]  }
 0x7b8   : > { %15203 = vmatpush1.bf16.msra.mxu0 %v21922_v32  ;;  %15703 = vmatprep.mubr.bf16.mxu1 %v23326_v4  ;;  %v21940_v4 = vld [vmem:[#allocation4 + $0x1f40] ss:$48 sps:$4 sm:$0xff]   ;;  %v21966_v32 = vld [vmem:[#allocation4 + $0x20c4] ss:$48 sps:$4 sm:$0xff]  }
 0x7b9   : > { %15713 = vmatpush1.bf16.msra.mxu1 %v21925_v21  ;;  %15204 = vmatprep.subr.bf16.mxu0 %v21930_v33  ;;  %v21969_v21 = vld [vmem:[#allocation4 + $0x20cc] ss:$48 sps:$4 sm:$0xff]   ;;  %v21964_v33 = vld [vmem:[#allocation4 + $0x20c0] ss:$48 sps:$4 sm:$0xff]  }
 0x7ba   : > { %15714 = vmatprep.subr.bf16.mxu1 %v21933_v9  ;;  %v21967_v9 = vld [vmem:[#allocation4 + $0x20c8] ss:$48 sps:$4 sm:$0xff]  }
 0x7bc   : > { %15205 = vmatpush1.bf16.msra.mxu0 %v21928_v51  ;;  %v21972_v51 = vld [vmem:[#allocation4 + $0x2124] ss:$48 sps:$4 sm:$0xff]  }
 0x7bd   : > { %15715 = vmatpush1.bf16.msra.mxu1 %v21931_v16  ;;  %15206 = vmatprep.subr.bf16.mxu0 %v21936_v42  ;;  %v21975_v16 = vld [vmem:[#allocation4 + $0x212c] ss:$48 sps:$4 sm:$0xff]   ;;  %v21970_v42 = vld [vmem:[#allocation4 + $0x2120] ss:$48 sps:$4 sm:$0xff]  }
 0x7be   : > { %15194 = vmatmul.mubr.bf16.gmra.mrb[36].mxu0 %v23338_v35  ;;  %15716 = vmatprep.subr.bf16.mxu1 %v21939_v59  ;;  %v21973_v59 = vld [vmem:[#allocation4 + $0x2128] ss:$48 sps:$4 sm:$0xff]  }
 0x7bf   : > { %15704 = vmatmul.mubr.bf16.gmra.mrb[36].mxu1 %v23338_v35  ;;  %15234 = vmatprep.mubr.bf16.mxu0 %v23343_v19  ;;  %v21957_v35 = vld [vmem:[#allocation4 + $0x200c] ss:$48 sps:$4 sm:$0xff]  }
 0x7c0   : > { %15207 = vmatpush1.bf16.msra.mxu0 %v21934_v43  ;;  %15744 = vmatprep.mubr.bf16.mxu1 %v23343_v19  ;;  %v21955_v19 = vld [vmem:[#allocation4 + $0x2008] ss:$48 sps:$4 sm:$0xff]   ;;  %v21978_v43 = vld [vmem:[#allocation4 + $0x2184] ss:$48 sps:$4 sm:$0xff]  }
 0x7c1   : > { %15717 = vmatpush1.bf16.msra.mxu1 %v21937_v23  ;;  %15208 = vmatprep.subr.bf16.mxu0 %v21942_v14  ;;  %v21981_v23 = vld [vmem:[#allocation4 + $0x218c] ss:$48 sps:$4 sm:$0xff]   ;;  %v21976_v14 = vld [vmem:[#allocation4 + $0x2180] ss:$48 sps:$4 sm:$0xff]  }
 0x7c2   : > { %15718 = vmatprep.subr.bf16.mxu1 %v21945_v63  ;;  %v21979_v63 = vld [vmem:[#allocation4 + $0x2188] ss:$48 sps:$4 sm:$0xff]  }
 0x7c4   : > { %15209 = vmatpush1.bf16.msra.mxu0 %v21940_v4  ;;  %v21984_v4 = vld [vmem:[#allocation4 + $0x21e4] ss:$48 sps:$4 sm:$0xff]  }
 0x7c5   : > { %15719 = vmatpush1.bf16.msra.mxu1 %v21943_v10  ;;  %15210 = vmatprep.subr.bf16.mxu0 %v21948_v13  ;;  %v21987_v10 = vld [vmem:[#allocation4 + $0x21ec] ss:$48 sps:$4 sm:$0xff]   ;;  %v21982_v13 = vld [vmem:[#allocation4 + $0x21e0] ss:$48 sps:$4 sm:$0xff]  }
 0x7c6   : > { %15720 = vmatprep.subr.bf16.mxu1 %v21951_v55  ;;  %v21985_v55 = vld [vmem:[#allocation4 + $0x21e8] ss:$48 sps:$4 sm:$0xff]  }
 0x7c8   : > { %15211 = vmatpush1.bf16.msra.mxu0 %v21946_v15  ;;  %v21990_v15 = vld [vmem:[#allocation4 + $0x2244] ss:$48 sps:$4 sm:$0xff]  }
 0x7c9   : > { %15721 = vmatpush1.bf16.msra.mxu1 %v21949_v11  ;;  %15212 = vmatprep.subr.bf16.mxu0 %v21954_v40  ;;  %v21993_v11 = vld [vmem:[#allocation4 + $0x224c] ss:$48 sps:$4 sm:$0xff]   ;;  %v21988_v40 = vld [vmem:[#allocation4 + $0x2240] ss:$48 sps:$4 sm:$0xff]  }
 0x7ca   : > { %15722 = vmatprep.subr.bf16.mxu1 %v21957_v35  ;;  %v21991_v35 = vld [vmem:[#allocation4 + $0x2248] ss:$48 sps:$4 sm:$0xff]  }
 0x7cc   : > { %15213 = vmatpush1.bf16.msra.mxu0 %v21952_v17  ;;  %v21996_v17 = vld [vmem:[#allocation4 + $0x22a4] ss:$48 sps:$4 sm:$0xff]  }
 0x7cd   : > { %15723 = vmatpush1.bf16.msra.mxu1 %v21955_v19  ;;  %15214 = vmatprep.subr.bf16.mxu0 %v21960_v24  ;;  %v21999_v19 = vld [vmem:[#allocation4 + $0x22ac] ss:$48 sps:$4 sm:$0xff]   ;;  %v21994_v24 = vld [vmem:[#allocation4 + $0x22a0] ss:$48 sps:$4 sm:$0xff]  }
 0x7ce   : > { %15724 = vmatprep.subr.bf16.mxu1 %v21963_v56  ;;  %v21997_v56 = vld [vmem:[#allocation4 + $0x22a8] ss:$48 sps:$4 sm:$0xff]  }
 0x7d0   : > { %15215 = vmatpush1.bf16.msra.mxu0 %v21958_v26  ;;  %v22002_v26 = vld [vmem:[#allocation4 + $0x2304] ss:$48 sps:$4 sm:$0xff]  }
 0x7d1   : > { %15725 = vmatpush1.bf16.msra.mxu1 %v21961_v12  ;;  %15216 = vmatprep.subr.bf16.mxu0 %v21966_v32  ;;  %v22005_v12 = vld [vmem:[#allocation4 + $0x230c] ss:$48 sps:$4 sm:$0xff]   ;;  %v22000_v32 = vld [vmem:[#allocation4 + $0x2300] ss:$48 sps:$4 sm:$0xff]  }
 0x7d2   : > { %15726 = vmatprep.subr.bf16.mxu1 %v21969_v21  ;;  %v22003_v21 = vld [vmem:[#allocation4 + $0x2308] ss:$48 sps:$4 sm:$0xff]  }
 0x7d4   : > { %15217 = vmatpush1.bf16.msra.mxu0 %v21964_v33  ;;  %v22008_v33 = vld [vmem:[#allocation4 + $0x2364] ss:$48 sps:$4 sm:$0xff]  }
 0x7d5   : > { %15727 = vmatpush1.bf16.msra.mxu1 %v21967_v9  ;;  %15218 = vmatprep.subr.bf16.mxu0 %v21972_v51  ;;  %v22011_v9 = vld [vmem:[#allocation4 + $0x236c] ss:$48 sps:$4 sm:$0xff]   ;;  %v22006_v51 = vld [vmem:[#allocation4 + $0x2360] ss:$48 sps:$4 sm:$0xff]  }
 0x7d6   : > { %15728 = vmatprep.subr.bf16.mxu1 %v21975_v16  ;;  %v22009_v16 = vld [vmem:[#allocation4 + $0x2368] ss:$48 sps:$4 sm:$0xff]  }
 0x7d8   : > { %15219 = vmatpush1.bf16.msra.mxu0 %v21970_v42  ;;  %v22014_v42 = vld [vmem:[#allocation4 + $0x23c4] ss:$48 sps:$4 sm:$0xff]  }
 0x7d9   : > { %15729 = vmatpush1.bf16.msra.mxu1 %v21973_v59  ;;  %15220 = vmatprep.subr.bf16.mxu0 %v21978_v43  ;;  %v22017_v59 = vld [vmem:[#allocation4 + $0x23cc] ss:$48 sps:$4 sm:$0xff]   ;;  %v22012_v43 = vld [vmem:[#allocation4 + $0x23c0] ss:$48 sps:$4 sm:$0xff]  }
 0x7da   : > { %15730 = vmatprep.subr.bf16.mxu1 %v21981_v23  ;;  %v22015_v23 = vld [vmem:[#allocation4 + $0x23c8] ss:$48 sps:$4 sm:$0xff]  }
 0x7dc   : > { %15221 = vmatpush1.bf16.msra.mxu0 %v21976_v14  ;;  %v22020_v14 = vld [vmem:[#allocation4 + $0x2424] ss:$48 sps:$4 sm:$0xff]  }
 0x7dd   : > { %15731 = vmatpush1.bf16.msra.mxu1 %v21979_v63  ;;  %15222 = vmatprep.subr.bf16.mxu0 %v21984_v4  ;;  %v22023_v63 = vld [vmem:[#allocation4 + $0x242c] ss:$48 sps:$4 sm:$0xff]   ;;  %v22018_v4 = vld [vmem:[#allocation4 + $0x2420] ss:$48 sps:$4 sm:$0xff]  }
 0x7de   : > { %15732 = vmatprep.subr.bf16.mxu1 %v21987_v10  ;;  %v22021_v10 = vld [vmem:[#allocation4 + $0x2428] ss:$48 sps:$4 sm:$0xff]  }
 0x7e0   : > { %15223 = vmatpush1.bf16.msra.mxu0 %v21982_v13  ;;  %v22026_v13 = vld [vmem:[#allocation4 + $0x2484] ss:$48 sps:$4 sm:$0xff]  }
 0x7e1   : > { %15733 = vmatpush1.bf16.msra.mxu1 %v21985_v55  ;;  %15224 = vmatprep.subr.bf16.mxu0 %v21990_v15  ;;  %v22029_v55 = vld [vmem:[#allocation4 + $0x248c] ss:$48 sps:$4 sm:$0xff]   ;;  %v22024_v15 = vld [vmem:[#allocation4 + $0x2480] ss:$48 sps:$4 sm:$0xff]  }
 0x7e2   : > { %15734 = vmatprep.subr.bf16.mxu1 %v21993_v11  ;;  %v22027_v11 = vld [vmem:[#allocation4 + $0x2488] ss:$48 sps:$4 sm:$0xff]  }
 0x7e4   : > { %15225 = vmatpush1.bf16.msra.mxu0 %v21988_v40  ;;  %v22032_v40 = vld [vmem:[#allocation4 + $0x24e4] ss:$48 sps:$4 sm:$0xff]  }
 0x7e5   : > { %15735 = vmatpush1.bf16.msra.mxu1 %v21991_v35  ;;  %15226 = vmatprep.subr.bf16.mxu0 %v21996_v17  ;;  %v22035_v35 = vld [vmem:[#allocation4 + $0x24ec] ss:$48 sps:$4 sm:$0xff]   ;;  %v22030_v17 = vld [vmem:[#allocation4 + $0x24e0] ss:$48 sps:$4 sm:$0xff]  }
 0x7e6   : > { %15736 = vmatprep.subr.bf16.mxu1 %v21999_v19  ;;  %v22033_v19 = vld [vmem:[#allocation4 + $0x24e8] ss:$48 sps:$4 sm:$0xff]  }
 0x7e8   : > { %15227 = vmatpush1.bf16.msra.mxu0 %v21994_v24  ;;  %v22038_v24 = vld [vmem:[#allocation4 + $0x2544] ss:$48 sps:$4 sm:$0xff]  }
 0x7e9   : > { %15737 = vmatpush1.bf16.msra.mxu1 %v21997_v56  ;;  %15228 = vmatprep.subr.bf16.mxu0 %v22002_v26  ;;  %v22039_v56 = vld [vmem:[#allocation4 + $0x2548] ss:$48 sps:$4 sm:$0xff]   ;;  %v22044_v26 = vld [vmem:[#allocation4 + $0x25a4] ss:$48 sps:$4 sm:$0xff]  }
 0x7ea   : > { %15738 = vmatprep.subr.bf16.mxu1 %v22005_v12  ;;  %v22047_v12 = vld [vmem:[#allocation4 + $0x25ac] ss:$48 sps:$4 sm:$0xff]  }
 0x7ec   : > { %15229 = vmatpush1.bf16.msra.mxu0 %v22000_v32  ;;  %v22042_v32 = vld [vmem:[#allocation4 + $0x25a0] ss:$48 sps:$4 sm:$0xff]  }
 0x7ed   : > { %15739 = vmatpush1.bf16.msra.mxu1 %v22003_v21  ;;  %15230 = vmatprep.subr.bf16.mxu0 %v22008_v33  ;;  %v22045_v21 = vld [vmem:[#allocation4 + $0x25a8] ss:$48 sps:$4 sm:$0xff]   ;;  %v22050_v33 = vld [vmem:[#allocation4 + $0x2604] ss:$48 sps:$4 sm:$0xff]  }
 0x7ee   : > { %15740 = vmatprep.subr.bf16.mxu1 %v22011_v9  ;;  %v22048_v9 = vld [vmem:[#allocation4 + $0x2600] ss:$48 sps:$4 sm:$0xff]  }
 0x7f0   : > { %15231 = vmatpush1.bf16.msra.mxu0 %v22006_v51  ;;  %v22056_v51 = vld [vmem:[#allocation4 + $0x2664] ss:$48 sps:$4 sm:$0xff]  }
 0x7f1   : > { %15741 = vmatpush1.bf16.msra.mxu1 %v22009_v16  ;;  %15232 = vmatprep.subr.bf16.mxu0 %v22014_v42  ;;  %v22059_v16 = vld [vmem:[#allocation4 + $0x266c] ss:$48 sps:$4 sm:$0xff]   ;;  %v22054_v42 = vld [vmem:[#allocation4 + $0x2660] ss:$48 sps:$4 sm:$0xff]  }
 0x7f2   : > { %15742 = vmatprep.subr.bf16.mxu1 %v22017_v59  ;;  %v22057_v59 = vld [vmem:[#allocation4 + $0x2668] ss:$48 sps:$4 sm:$0xff]  }
 0x7f4   : > { %15233 = vmatpush1.bf16.msra.mxu0 %v22012_v43  ;;  %v22062_v43 = vld [vmem:[#allocation4 + $0x26c4] ss:$48 sps:$4 sm:$0xff]  }
 0x7f5   : > { %15743 = vmatpush1.bf16.msra.mxu1 %v22015_v23  ;;  %15253 = vmatprep.subr.bf16.mxu0 %v22020_v14  ;;  %v22065_v23 = vld [vmem:[#allocation4 + $0x26cc] ss:$48 sps:$4 sm:$0xff]   ;;  %v22060_v14 = vld [vmem:[#allocation4 + $0x26c0] ss:$48 sps:$4 sm:$0xff]  }
 0x7f6   : > { %15763 = vmatprep.subr.bf16.mxu1 %v22023_v63  ;;  %v22063_v63 = vld [vmem:[#allocation4 + $0x26c8] ss:$48 sps:$4 sm:$0xff]  }
 0x7f7   : > { %15235 = vmatmul.mubr.bf16.vlgmr.msra.gmra.mrb[32].mxu0 %v23354_v48 }
 0x7f8   : > { %15745 = vmatmul.mubr.bf16.vlgmr.msra.gmra.mrb[32].mxu1 %v23354_v48  ;;  %15244 = vmatprep.mubr.bf16.mxu0 %v23358_v49  ;;  %v22041_v48 = vld [vmem:[#allocation4 + $0x254c] ss:$48 sps:$4 sm:$0xff]  }
 0x7f9   : > { %15254 = vmatpush1.bf16.msra.mxu0 %v22018_v4  ;;  %15754 = vmatprep.mubr.bf16.mxu1 %v23358_v49  ;;  %v22036_v49 = vld [vmem:[#allocation4 + $0x2540] ss:$48 sps:$4 sm:$0xff]   ;;  %v22068_v4 = vld [vmem:[#allocation4 + $0x2724] ss:$48 sps:$4 sm:$0xff]  }
 0x7fa   : > { %15764 = vmatpush1.bf16.msra.mxu1 %v22021_v10  ;;  %15255 = vmatprep.subr.bf16.mxu0 %v22026_v13  ;;  %v22071_v10 = vld [vmem:[#allocation4 + $0x272c] ss:$48 sps:$4 sm:$0xff]   ;;  %v22066_v13 = vld [vmem:[#allocation4 + $0x2720] ss:$48 sps:$4 sm:$0xff]  }
 0x7fb   : > { %15765 = vmatprep.subr.bf16.mxu1 %v22029_v55  ;;  %v22069_v55 = vld [vmem:[#allocation4 + $0x2728] ss:$48 sps:$4 sm:$0xff]  }
 0x7fd   : > { %15256 = vmatpush1.bf16.msra.mxu0 %v22024_v15  ;;  %v22074_v15 = vld [vmem:[#allocation4 + $0x2784] ss:$48 sps:$4 sm:$0xff]  }
 0x7fe   : > { %15766 = vmatpush1.bf16.msra.mxu1 %v22027_v11  ;;  %15257 = vmatprep.subr.bf16.mxu0 %v22032_v40  ;;  %v22077_v11 = vld [vmem:[#allocation4 + $0x278c] ss:$48 sps:$4 sm:$0xff]   ;;  %v22072_v40 = vld [vmem:[#allocation4 + $0x2780] ss:$48 sps:$4 sm:$0xff]  }
 0x7ff   : > { %15245 = vmatmul.mubr.bf16.gmra.mrb[36].mxu0 %v23370_v37  ;;  %15767 = vmatprep.subr.bf16.mxu1 %v22035_v35  ;;  %v22075_v35 = vld [vmem:[#allocation4 + $0x2788] ss:$48 sps:$4 sm:$0xff]  }
 0x800   : > { %15755 = vmatmul.mubr.bf16.gmra.mrb[36].mxu1 %v23370_v37  ;;  %15285 = vmatprep.mubr.bf16.mxu0 %v23375_v58  ;;  %v22053_v37 = vld [vmem:[#allocation4 + $0x260c] ss:$48 sps:$4 sm:$0xff]  }
 0x801   : > { %15258 = vmatpush1.bf16.msra.mxu0 %v22030_v17  ;;  %15795 = vmatprep.mubr.bf16.mxu1 %v23375_v58  ;;  %v22051_v58 = vld [vmem:[#allocation4 + $0x2608] ss:$48 sps:$4 sm:$0xff]   ;;  %v22080_v17 = vld [vmem:[#allocation4 + $0x27e4] ss:$48 sps:$4 sm:$0xff]  }
 0x802   : > { %15768 = vmatpush1.bf16.msra.mxu1 %v22033_v19  ;;  %15259 = vmatprep.subr.bf16.mxu0 %v22038_v24  ;;  %v22083_v19 = vld [vmem:[#allocation4 + $0x27ec] ss:$48 sps:$4 sm:$0xff]   ;;  %v22078_v24 = vld [vmem:[#allocation4 + $0x27e0] ss:$48 sps:$4 sm:$0xff]  }
 0x803   : > { %15769 = vmatprep.subr.bf16.mxu1 %v22041_v48  ;;  %v22081_v48 = vld [vmem:[#allocation4 + $0x27e8] ss:$48 sps:$4 sm:$0xff]  }
 0x805   : > { %15260 = vmatpush1.bf16.msra.mxu0 %v22036_v49  ;;  %v22086_v49 = vld [vmem:[#allocation4 + $0x2844] ss:$48 sps:$4 sm:$0xff]  }
 0x806   : > { %15770 = vmatpush1.bf16.msra.mxu1 %v22039_v56  ;;  %15261 = vmatprep.subr.bf16.mxu0 %v22044_v26  ;;  %v22089_v56 = vld [vmem:[#allocation4 + $0x284c] ss:$48 sps:$4 sm:$0xff]   ;;  %v22084_v26 = vld [vmem:[#allocation4 + $0x2840] ss:$48 sps:$4 sm:$0xff]  }
 0x807   : > { %15771 = vmatprep.subr.bf16.mxu1 %v22047_v12  ;;  %v22087_v12 = vld [vmem:[#allocation4 + $0x2848] ss:$48 sps:$4 sm:$0xff]  }
 0x809   : > { %15262 = vmatpush1.bf16.msra.mxu0 %v22042_v32  ;;  %v22092_v32 = vld [vmem:[#allocation4 + $0x28a4] ss:$48 sps:$4 sm:$0xff]  }
 0x80a   : > { %15772 = vmatpush1.bf16.msra.mxu1 %v22045_v21  ;;  %15263 = vmatprep.subr.bf16.mxu0 %v22050_v33  ;;  %v22095_v21 = vld [vmem:[#allocation4 + $0x28ac] ss:$48 sps:$4 sm:$0xff]   ;;  %v22090_v33 = vld [vmem:[#allocation4 + $0x28a0] ss:$48 sps:$4 sm:$0xff]  }
 0x80b   : > { %15773 = vmatprep.subr.bf16.mxu1 %v22053_v37  ;;  %v22093_v37 = vld [vmem:[#allocation4 + $0x28a8] ss:$48 sps:$4 sm:$0xff]  }
 0x80d   : > { %15264 = vmatpush1.bf16.msra.mxu0 %v22048_v9  ;;  %v22098_v9 = vld [vmem:[#allocation4 + $0x2904] ss:$48 sps:$4 sm:$0xff]  }
 0x80e   : > { %15774 = vmatpush1.bf16.msra.mxu1 %v22051_v58  ;;  %15265 = vmatprep.subr.bf16.mxu0 %v22056_v51  ;;  %v22101_v58 = vld [vmem:[#allocation4 + $0x290c] ss:$48 sps:$4 sm:$0xff]   ;;  %v22096_v51 = vld [vmem:[#allocation4 + $0x2900] ss:$48 sps:$4 sm:$0xff]  }
 0x80f   : > { %15775 = vmatprep.subr.bf16.mxu1 %v22059_v16  ;;  %v22099_v16 = vld [vmem:[#allocation4 + $0x2908] ss:$48 sps:$4 sm:$0xff]  }
 0x811   : > { %15266 = vmatpush1.bf16.msra.mxu0 %v22054_v42  ;;  %v22104_v42 = vld [vmem:[#allocation4 + $0x2964] ss:$48 sps:$4 sm:$0xff]  }
 0x812   : > { %15776 = vmatpush1.bf16.msra.mxu1 %v22057_v59  ;;  %15267 = vmatprep.subr.bf16.mxu0 %v22062_v43  ;;  %v22107_v59 = vld [vmem:[#allocation4 + $0x296c] ss:$48 sps:$4 sm:$0xff]   ;;  %v22102_v43 = vld [vmem:[#allocation4 + $0x2960] ss:$48 sps:$4 sm:$0xff]  }
 0x813   : > { %15777 = vmatprep.subr.bf16.mxu1 %v22065_v23  ;;  %v22105_v23 = vld [vmem:[#allocation4 + $0x2968] ss:$48 sps:$4 sm:$0xff]  }
 0x815   : > { %15268 = vmatpush1.bf16.msra.mxu0 %v22060_v14  ;;  %v22110_v14 = vld [vmem:[#allocation4 + $0x29c4] ss:$48 sps:$4 sm:$0xff]  }
 0x816   : > { %15778 = vmatpush1.bf16.msra.mxu1 %v22063_v63  ;;  %15269 = vmatprep.subr.bf16.mxu0 %v22068_v4  ;;  %v22113_v63 = vld [vmem:[#allocation4 + $0x29cc] ss:$48 sps:$4 sm:$0xff]   ;;  %v22108_v4 = vld [vmem:[#allocation4 + $0x29c0] ss:$48 sps:$4 sm:$0xff]  }
 0x817   : > { %15779 = vmatprep.subr.bf16.mxu1 %v22071_v10  ;;  %v22111_v10 = vld [vmem:[#allocation4 + $0x29c8] ss:$48 sps:$4 sm:$0xff]  }
 0x819   : > { %15270 = vmatpush1.bf16.msra.mxu0 %v22066_v13  ;;  %v22116_v13 = vld [vmem:[#allocation4 + $0x2a24] ss:$48 sps:$4 sm:$0xff]  }
 0x81a   : > { %15780 = vmatpush1.bf16.msra.mxu1 %v22069_v55  ;;  %15271 = vmatprep.subr.bf16.mxu0 %v22074_v15  ;;  %v22119_v55 = vld [vmem:[#allocation4 + $0x2a2c] ss:$48 sps:$4 sm:$0xff]   ;;  %v22114_v15 = vld [vmem:[#allocation4 + $0x2a20] ss:$48 sps:$4 sm:$0xff]  }
 0x81b   : > { %15781 = vmatprep.subr.bf16.mxu1 %v22077_v11  ;;  %v22117_v11 = vld [vmem:[#allocation4 + $0x2a28] ss:$48 sps:$4 sm:$0xff]  }
 0x81d   : > { %15272 = vmatpush1.bf16.msra.mxu0 %v22072_v40  ;;  %v22122_v40 = vld [vmem:[#allocation4 + $0x2a84] ss:$48 sps:$4 sm:$0xff]  }
 0x81e   : > { %15782 = vmatpush1.bf16.msra.mxu1 %v22075_v35  ;;  %15273 = vmatprep.subr.bf16.mxu0 %v22080_v17  ;;  %v22125_v35 = vld [vmem:[#allocation4 + $0x2a8c] ss:$48 sps:$4 sm:$0xff]   ;;  %v22120_v17 = vld [vmem:[#allocation4 + $0x2a80] ss:$48 sps:$4 sm:$0xff]  }
 0x81f   : > { %15783 = vmatprep.subr.bf16.mxu1 %v22083_v19  ;;  %v22123_v19 = vld [vmem:[#allocation4 + $0x2a88] ss:$48 sps:$4 sm:$0xff]  }
 0x821   : > { %15274 = vmatpush1.bf16.msra.mxu0 %v22078_v24  ;;  %v22128_v24 = vld [vmem:[#allocation4 + $0x2ae4] ss:$48 sps:$4 sm:$0xff]  }
 0x822   : > { %15784 = vmatpush1.bf16.msra.mxu1 %v22081_v48  ;;  %15275 = vmatprep.subr.bf16.mxu0 %v22086_v49  ;;  %v22131_v48 = vld [vmem:[#allocation4 + $0x2aec] ss:$48 sps:$4 sm:$0xff]   ;;  %v22126_v49 = vld [vmem:[#allocation4 + $0x2ae0] ss:$48 sps:$4 sm:$0xff]  }
 0x823   : > { %15785 = vmatprep.subr.bf16.mxu1 %v22089_v56  ;;  %v22129_v56 = vld [vmem:[#allocation4 + $0x2ae8] ss:$48 sps:$4 sm:$0xff]  }
 0x825   : > { %15276 = vmatpush1.bf16.msra.mxu0 %v22084_v26  ;;  %v22134_v26 = vld [vmem:[#allocation4 + $0x2b44] ss:$48 sps:$4 sm:$0xff]  }
 0x826   : > { %15786 = vmatpush1.bf16.msra.mxu1 %v22087_v12  ;;  %15277 = vmatprep.subr.bf16.mxu0 %v22092_v32  ;;  %v22135_v12 = vld [vmem:[#allocation4 + $0x2b48] ss:$48 sps:$4 sm:$0xff]   ;;  %v22140_v32 = vld [vmem:[#allocation4 + $0x2ba4] ss:$48 sps:$4 sm:$0xff]  }
 0x827   : > { %15787 = vmatprep.subr.bf16.mxu1 %v22095_v21  ;;  %v22143_v21 = vld [vmem:[#allocation4 + $0x2bac] ss:$48 sps:$4 sm:$0xff]  }
 0x829   : > { %15278 = vmatpush1.bf16.msra.mxu0 %v22090_v33  ;;  %v22138_v33 = vld [vmem:[#allocation4 + $0x2ba0] ss:$48 sps:$4 sm:$0xff]  }
 0x82a   : > { %15788 = vmatpush1.bf16.msra.mxu1 %v22093_v37  ;;  %15279 = vmatprep.subr.bf16.mxu0 %v22098_v9  ;;  %v22141_v37 = vld [vmem:[#allocation4 + $0x2ba8] ss:$48 sps:$4 sm:$0xff]   ;;  %v22146_v9 = vld [vmem:[#allocation4 + $0x2c04] ss:$48 sps:$4 sm:$0xff]  }
 0x82b   : > { %15789 = vmatprep.subr.bf16.mxu1 %v22101_v58  ;;  %v22144_v58 = vld [vmem:[#allocation4 + $0x2c00] ss:$48 sps:$4 sm:$0xff]  }
 0x82d   : > { %15280 = vmatpush1.bf16.msra.mxu0 %v22096_v51  ;;  %v22152_v51 = vld [vmem:[#allocation4 + $0x2c64] ss:$48 sps:$4 sm:$0xff]  }
 0x82e   : > { %15790 = vmatpush1.bf16.msra.mxu1 %v22099_v16  ;;  %15281 = vmatprep.subr.bf16.mxu0 %v22104_v42  ;;  %v22155_v16 = vld [vmem:[#allocation4 + $0x2c6c] ss:$48 sps:$4 sm:$0xff]   ;;  %v22150_v42 = vld [vmem:[#allocation4 + $0x2c60] ss:$48 sps:$4 sm:$0xff]  }
 0x82f   : > { %15791 = vmatprep.subr.bf16.mxu1 %v22107_v59  ;;  %v22153_v59 = vld [vmem:[#allocation4 + $0x2c68] ss:$48 sps:$4 sm:$0xff]  }
 0x831   : > { %15282 = vmatpush1.bf16.msra.mxu0 %v22102_v43  ;;  %v22158_v43 = vld [vmem:[#allocation4 + $0x2cc4] ss:$48 sps:$4 sm:$0xff]  }
 0x832   : > { %15792 = vmatpush1.bf16.msra.mxu1 %v22105_v23  ;;  %15283 = vmatprep.subr.bf16.mxu0 %v22110_v14  ;;  %v22161_v23 = vld [vmem:[#allocation4 + $0x2ccc] ss:$48 sps:$4 sm:$0xff]   ;;  %v22156_v14 = vld [vmem:[#allocation4 + $0x2cc0] ss:$48 sps:$4 sm:$0xff]  }
 0x833   : > { %15793 = vmatprep.subr.bf16.mxu1 %v22113_v63  ;;  %v22159_v63 = vld [vmem:[#allocation4 + $0x2cc8] ss:$48 sps:$4 sm:$0xff]  }
 0x835   : > { %15284 = vmatpush1.bf16.msra.mxu0 %v22108_v4  ;;  %v22164_v4 = vld [vmem:[#allocation4 + $0x2d24] ss:$48 sps:$4 sm:$0xff]  }
 0x836   : > { %15794 = vmatpush1.bf16.msra.mxu1 %v22111_v10  ;;  %15304 = vmatprep.subr.bf16.mxu0 %v22116_v13  ;;  %v22167_v10 = vld [vmem:[#allocation4 + $0x2d2c] ss:$48 sps:$4 sm:$0xff]   ;;  %v22162_v13 = vld [vmem:[#allocation4 + $0x2d20] ss:$48 sps:$4 sm:$0xff]  }
 0x837   : > { %15814 = vmatprep.subr.bf16.mxu1 %v22119_v55  ;;  %v22165_v55 = vld [vmem:[#allocation4 + $0x2d28] ss:$48 sps:$4 sm:$0xff]  }
 0x838   : > { %15286 = vmatmul.mubr.bf16.vlgmr.msra.gmra.mrb[32].mxu0 %v23382_v28 }
 0x839   : > { %15796 = vmatmul.mubr.bf16.vlgmr.msra.gmra.mrb[32].mxu1 %v23382_v28  ;;  %15295 = vmatprep.mubr.bf16.mxu0 %v23365_v62  ;;  %v22137_v28 = vld [vmem:[#allocation4 + $0x2b4c] ss:$48 sps:$4 sm:$0xff]  }
 0x83a   : > { %15305 = vmatpush1.bf16.msra.mxu0 %v22114_v15  ;;  %15805 = vmatprep.mubr.bf16.mxu1 %v23365_v62  ;;  %v22132_v62 = vld [vmem:[#allocation4 + $0x2b40] ss:$48 sps:$4 sm:$0xff]   ;;  %v22170_v15 = vld [vmem:[#allocation4 + $0x2d84] ss:$48 sps:$4 sm:$0xff]  }
 0x83b   : > { %15815 = vmatpush1.bf16.msra.mxu1 %v22117_v11  ;;  %15306 = vmatprep.subr.bf16.mxu0 %v22122_v40  ;;  %v22173_v11 = vld [vmem:[#allocation4 + $0x2d8c] ss:$48 sps:$4 sm:$0xff]   ;;  %v22168_v40 = vld [vmem:[#allocation4 + $0x2d80] ss:$48 sps:$4 sm:$0xff]  }
 0x83c   : > { %15816 = vmatprep.subr.bf16.mxu1 %v22125_v35  ;;  %v22171_v35 = vld [vmem:[#allocation4 + $0x2d88] ss:$48 sps:$4 sm:$0xff]  }
 0x83e   : > { %15307 = vmatpush1.bf16.msra.mxu0 %v22120_v17  ;;  %v22176_v17 = vld [vmem:[#allocation4 + $0x2de4] ss:$48 sps:$4 sm:$0xff]  }
 0x83f   : > { %15817 = vmatpush1.bf16.msra.mxu1 %v22123_v19  ;;  %15308 = vmatprep.subr.bf16.mxu0 %v22128_v24  ;;  %v22179_v19 = vld [vmem:[#allocation4 + $0x2dec] ss:$48 sps:$4 sm:$0xff]   ;;  %v22174_v24 = vld [vmem:[#allocation4 + $0x2de0] ss:$48 sps:$4 sm:$0xff]  }
 0x840   : > { %15296 = vmatmul.mubr.bf16.gmra.mrb[36].mxu0 %v23394_v41  ;;  %15818 = vmatprep.subr.bf16.mxu1 %v22131_v48  ;;  %v22177_v48 = vld [vmem:[#allocation4 + $0x2de8] ss:$48 sps:$4 sm:$0xff]  }
 0x841   : > { %15806 = vmatmul.mubr.bf16.gmra.mrb[36].mxu1 %v23394_v41  ;;  %15336 = vmatprep.mubr.bf16.mxu0 %v23399_v52  ;;  %v22149_v41 = vld [vmem:[#allocation4 + $0x2c0c] ss:$48 sps:$4 sm:$0xff]  }
 0x842   : > { %15309 = vmatpush1.bf16.msra.mxu0 %v22126_v49  ;;  %15846 = vmatprep.mubr.bf16.mxu1 %v23399_v52  ;;  %v22147_v52 = vld [vmem:[#allocation4 + $0x2c08] ss:$48 sps:$4 sm:$0xff]   ;;  %v22182_v49 = vld [vmem:[#allocation4 + $0x2e44] ss:$48 sps:$4 sm:$0xff]  }
 0x843   : > { %15819 = vmatpush1.bf16.msra.mxu1 %v22129_v56  ;;  %15310 = vmatprep.subr.bf16.mxu0 %v22134_v26  ;;  %v22185_v56 = vld [vmem:[#allocation4 + $0x2e4c] ss:$48 sps:$4 sm:$0xff]   ;;  %v22180_v26 = vld [vmem:[#allocation4 + $0x2e40] ss:$48 sps:$4 sm:$0xff]  }
 0x844   : > { %15820 = vmatprep.subr.bf16.mxu1 %v22137_v28  ;;  %v22183_v28 = vld [vmem:[#allocation4 + $0x2e48] ss:$48 sps:$4 sm:$0xff]  }
 0x846   : > { %15311 = vmatpush1.bf16.msra.mxu0 %v22132_v62  ;;  %v22188_v62 = vld [vmem:[#allocation4 + $0x2ea4] ss:$48 sps:$4 sm:$0xff]  }
 0x847   : > { %15821 = vmatpush1.bf16.msra.mxu1 %v22135_v12  ;;  %15312 = vmatprep.subr.bf16.mxu0 %v22140_v32  ;;  %v22191_v12 = vld [vmem:[#allocation4 + $0x2eac] ss:$48 sps:$4 sm:$0xff]   ;;  %v22186_v32 = vld [vmem:[#allocation4 + $0x2ea0] ss:$48 sps:$4 sm:$0xff]  }
 0x848   : > { %15822 = vmatprep.subr.bf16.mxu1 %v22143_v21  ;;  %v22189_v21 = vld [vmem:[#allocation4 + $0x2ea8] ss:$48 sps:$4 sm:$0xff]  }
 0x84a   : > { %15313 = vmatpush1.bf16.msra.mxu0 %v22138_v33  ;;  %v22194_v33 = vld [vmem:[#allocation4 + $0x2f04] ss:$48 sps:$4 sm:$0xff]  }
 0x84b   : > { %15823 = vmatpush1.bf16.msra.mxu1 %v22141_v37  ;;  %15314 = vmatprep.subr.bf16.mxu0 %v22146_v9  ;;  %v22197_v37 = vld [vmem:[#allocation4 + $0x2f0c] ss:$48 sps:$4 sm:$0xff]   ;;  %v22192_v9 = vld [vmem:[#allocation4 + $0x2f00] ss:$48 sps:$4 sm:$0xff]  }
 0x84c   : > { %15824 = vmatprep.subr.bf16.mxu1 %v22149_v41  ;;  %v22195_v41 = vld [vmem:[#allocation4 + $0x2f08] ss:$48 sps:$4 sm:$0xff]  }
 0x84e   : > { %15315 = vmatpush1.bf16.msra.mxu0 %v22144_v58  ;;  %v22200_v58 = vld [vmem:[#allocation4 + $0x2f64] ss:$48 sps:$4 sm:$0xff]  }
 0x84f   : > { %15825 = vmatpush1.bf16.msra.mxu1 %v22147_v52  ;;  %15316 = vmatprep.subr.bf16.mxu0 %v22152_v51  ;;  %v22203_v52 = vld [vmem:[#allocation4 + $0x2f6c] ss:$48 sps:$4 sm:$0xff]   ;;  %v22198_v51 = vld [vmem:[#allocation4 + $0x2f60] ss:$48 sps:$4 sm:$0xff]  }
 0x850   : > { %15826 = vmatprep.subr.bf16.mxu1 %v22155_v16  ;;  %v22201_v16 = vld [vmem:[#allocation4 + $0x2f68] ss:$48 sps:$4 sm:$0xff]  }
 0x852   : > { %15317 = vmatpush1.bf16.msra.mxu0 %v22150_v42  ;;  %v22206_v42 = vld [vmem:[#allocation4 + $0x2fc4] ss:$48 sps:$4 sm:$0xff]  }
 0x853   : > { %15827 = vmatpush1.bf16.msra.mxu1 %v22153_v59  ;;  %15318 = vmatprep.subr.bf16.mxu0 %v22158_v43  ;;  %v22209_v59 = vld [vmem:[#allocation4 + $0x2fcc] ss:$48 sps:$4 sm:$0xff]   ;;  %v22204_v43 = vld [vmem:[#allocation4 + $0x2fc0] ss:$48 sps:$4 sm:$0xff]  }
 0x854   : > { %15828 = vmatprep.subr.bf16.mxu1 %v22161_v23  ;;  %v22207_v23 = vld [vmem:[#allocation4 + $0x2fc8] ss:$48 sps:$4 sm:$0xff]  }
 0x856   : > { %15319 = vmatpush1.bf16.msra.mxu0 %v22156_v14  ;;  %v22212_v14 = vld [vmem:[#allocation4 + $0x3024] ss:$48 sps:$4 sm:$0xff]  }
 0x857   : > { %15829 = vmatpush1.bf16.msra.mxu1 %v22159_v63  ;;  %15320 = vmatprep.subr.bf16.mxu0 %v22164_v4  ;;  %v22215_v63 = vld [vmem:[#allocation4 + $0x302c] ss:$48 sps:$4 sm:$0xff]   ;;  %v22210_v4 = vld [vmem:[#allocation4 + $0x3020] ss:$48 sps:$4 sm:$0xff]  }
 0x858   : > { %15830 = vmatprep.subr.bf16.mxu1 %v22167_v10  ;;  %v22213_v10 = vld [vmem:[#allocation4 + $0x3028] ss:$48 sps:$4 sm:$0xff]  }
 0x85a   : > { %15321 = vmatpush1.bf16.msra.mxu0 %v22162_v13  ;;  %v22218_v13 = vld [vmem:[#allocation4 + $0x3084] ss:$48 sps:$4 sm:$0xff]  }
 0x85b   : > { %15831 = vmatpush1.bf16.msra.mxu1 %v22165_v55  ;;  %15322 = vmatprep.subr.bf16.mxu0 %v22170_v15  ;;  %v22221_v55 = vld [vmem:[#allocation4 + $0x308c] ss:$48 sps:$4 sm:$0xff]   ;;  %v22216_v15 = vld [vmem:[#allocation4 + $0x3080] ss:$48 sps:$4 sm:$0xff]  }
 0x85c   : > { %15832 = vmatprep.subr.bf16.mxu1 %v22173_v11  ;;  %v22219_v11 = vld [vmem:[#allocation4 + $0x3088] ss:$48 sps:$4 sm:$0xff]  }
 0x85e   : > { %15323 = vmatpush1.bf16.msra.mxu0 %v22168_v40  ;;  %v22224_v40 = vld [vmem:[#allocation4 + $0x30e4] ss:$48 sps:$4 sm:$0xff]  }
 0x85f   : > { %15833 = vmatpush1.bf16.msra.mxu1 %v22171_v35  ;;  %15324 = vmatprep.subr.bf16.mxu0 %v22176_v17  ;;  %v22227_v35 = vld [vmem:[#allocation4 + $0x30ec] ss:$48 sps:$4 sm:$0xff]   ;;  %v22222_v17 = vld [vmem:[#allocation4 + $0x30e0] ss:$48 sps:$4 sm:$0xff]  }
 0x860   : > { %15834 = vmatprep.subr.bf16.mxu1 %v22179_v19  ;;  %v22225_v19 = vld [vmem:[#allocation4 + $0x30e8] ss:$48 sps:$4 sm:$0xff]  }
 0x862   : > { %15325 = vmatpush1.bf16.msra.mxu0 %v22174_v24  ;;  %v22230_v24 = vld [vmem:[#allocation4 + $0x3144] ss:$48 sps:$4 sm:$0xff]  }
 0x863   : > { %15835 = vmatpush1.bf16.msra.mxu1 %v22177_v48  ;;  %15326 = vmatprep.subr.bf16.mxu0 %v22182_v49  ;;  %v22231_v48 = vld [vmem:[#allocation4 + $0x3148] ss:$48 sps:$4 sm:$0xff]   ;;  %v22236_v49 = vld [vmem:[#allocation4 + $0x31a4] ss:$48 sps:$4 sm:$0xff]  }
 0x864   : > { %15836 = vmatprep.subr.bf16.mxu1 %v22185_v56  ;;  %v22239_v56 = vld [vmem:[#allocation4 + $0x31ac] ss:$48 sps:$4 sm:$0xff]  }
 0x866   : > { %15327 = vmatpush1.bf16.msra.mxu0 %v22180_v26  ;;  %v22234_v26 = vld [vmem:[#allocation4 + $0x31a0] ss:$48 sps:$4 sm:$0xff]  }
 0x867   : > { %15837 = vmatpush1.bf16.msra.mxu1 %v22183_v28  ;;  %15328 = vmatprep.subr.bf16.mxu0 %v22188_v62  ;;  %v22237_v28 = vld [vmem:[#allocation4 + $0x31a8] ss:$48 sps:$4 sm:$0xff]   ;;  %v22242_v62 = vld [vmem:[#allocation4 + $0x3204] ss:$48 sps:$4 sm:$0xff]  }
 0x868   : > { %15838 = vmatprep.subr.bf16.mxu1 %v22191_v12  ;;  %v22240_v12 = vld [vmem:[#allocation4 + $0x3200] ss:$48 sps:$4 sm:$0xff]  }
 0x86a   : > { %15329 = vmatpush1.bf16.msra.mxu0 %v22186_v32  ;;  %v22248_v32 = vld [vmem:[#allocation4 + $0x3264] ss:$48 sps:$4 sm:$0xff]  }
 0x86b   : > { %15839 = vmatpush1.bf16.msra.mxu1 %v22189_v21  ;;  %15330 = vmatprep.subr.bf16.mxu0 %v22194_v33  ;;  %v22251_v21 = vld [vmem:[#allocation4 + $0x326c] ss:$48 sps:$4 sm:$0xff]   ;;  %v22246_v33 = vld [vmem:[#allocation4 + $0x3260] ss:$48 sps:$4 sm:$0xff]  }
 0x86c   : > { %15840 = vmatprep.subr.bf16.mxu1 %v22197_v37  ;;  %v22249_v37 = vld [vmem:[#allocation4 + $0x3268] ss:$48 sps:$4 sm:$0xff]  }
 0x86e   : > { %15331 = vmatpush1.bf16.msra.mxu0 %v22192_v9  ;;  %v22254_v9 = vld [vmem:[#allocation4 + $0x32c4] ss:$48 sps:$4 sm:$0xff]  }
 0x86f   : > { %15841 = vmatpush1.bf16.msra.mxu1 %v22195_v41  ;;  %15332 = vmatprep.subr.bf16.mxu0 %v22200_v58  ;;  %v22257_v41 = vld [vmem:[#allocation4 + $0x32cc] ss:$48 sps:$4 sm:$0xff]   ;;  %v22252_v58 = vld [vmem:[#allocation4 + $0x32c0] ss:$48 sps:$4 sm:$0xff]  }
 0x870   : > { %15842 = vmatprep.subr.bf16.mxu1 %v22203_v52  ;;  %v22255_v52 = vld [vmem:[#allocation4 + $0x32c8] ss:$48 sps:$4 sm:$0xff]  }
 0x872   : > { %15333 = vmatpush1.bf16.msra.mxu0 %v22198_v51  ;;  %v22260_v51 = vld [vmem:[#allocation4 + $0x3324] ss:$48 sps:$4 sm:$0xff]  }
 0x873   : > { %15843 = vmatpush1.bf16.msra.mxu1 %v22201_v16  ;;  %15334 = vmatprep.subr.bf16.mxu0 %v22206_v42  ;;  %v22263_v16 = vld [vmem:[#allocation4 + $0x332c] ss:$48 sps:$4 sm:$0xff]   ;;  %v22258_v42 = vld [vmem:[#allocation4 + $0x3320] ss:$48 sps:$4 sm:$0xff]  }
 0x874   : > { %15844 = vmatprep.subr.bf16.mxu1 %v22209_v59  ;;  %v22261_v59 = vld [vmem:[#allocation4 + $0x3328] ss:$48 sps:$4 sm:$0xff]  }
 0x876   : > { %15335 = vmatpush1.bf16.msra.mxu0 %v22204_v43  ;;  %v22266_v43 = vld [vmem:[#allocation4 + $0x3384] ss:$48 sps:$4 sm:$0xff]  }
 0x877   : > { %15845 = vmatpush1.bf16.msra.mxu1 %v22207_v23  ;;  %15355 = vmatprep.subr.bf16.mxu0 %v22212_v14  ;;  %v22269_v23 = vld [vmem:[#allocation4 + $0x338c] ss:$48 sps:$4 sm:$0xff]   ;;  %v22264_v14 = vld [vmem:[#allocation4 + $0x3380] ss:$48 sps:$4 sm:$0xff]  }
 0x878   : > { %15865 = vmatprep.subr.bf16.mxu1 %v22215_v63  ;;  %v22267_v63 = vld [vmem:[#allocation4 + $0x3388] ss:$48 sps:$4 sm:$0xff]  }
 0x879   : > { %15337 = vmatmul.mubr.bf16.vlgmr.msra.gmra.mrb[32].mxu0 %v23410_v57 }
 0x87a   : > { %15847 = vmatmul.mubr.bf16.vlgmr.msra.gmra.mrb[32].mxu1 %v23410_v57  ;;  %15346 = vmatprep.mubr.bf16.mxu0 %v23389_v61  ;;  %v22233_v57 = vld [vmem:[#allocation4 + $0x314c] ss:$48 sps:$4 sm:$0xff]  }
 0x87b   : > { %15356 = vmatpush1.bf16.msra.mxu0 %v22210_v4  ;;  %15856 = vmatprep.mubr.bf16.mxu1 %v23389_v61  ;;  %v22228_v61 = vld [vmem:[#allocation4 + $0x3140] ss:$48 sps:$4 sm:$0xff]   ;;  %v22272_v4 = vld [vmem:[#allocation4 + $0x33e4] ss:$48 sps:$4 sm:$0xff]  }
 0x87c   : > { %15866 = vmatpush1.bf16.msra.mxu1 %v22213_v10  ;;  %15357 = vmatprep.subr.bf16.mxu0 %v22218_v13  ;;  %v22275_v10 = vld [vmem:[#allocation4 + $0x33ec] ss:$48 sps:$4 sm:$0xff]   ;;  %v22270_v13 = vld [vmem:[#allocation4 + $0x33e0] ss:$48 sps:$4 sm:$0xff]  }
 0x87d   : > { %15867 = vmatprep.subr.bf16.mxu1 %v22221_v55  ;;  %v22273_v55 = vld [vmem:[#allocation4 + $0x33e8] ss:$48 sps:$4 sm:$0xff]  }
 0x87f   : > { %15358 = vmatpush1.bf16.msra.mxu0 %v22216_v15  ;;  %v22278_v15 = vld [vmem:[#allocation4 + $0x3444] ss:$48 sps:$4 sm:$0xff]  }
 0x880   : > { %15868 = vmatpush1.bf16.msra.mxu1 %v22219_v11  ;;  %15359 = vmatprep.subr.bf16.mxu0 %v22224_v40  ;;  %v22281_v11 = vld [vmem:[#allocation4 + $0x344c] ss:$48 sps:$4 sm:$0xff]   ;;  %v22276_v40 = vld [vmem:[#allocation4 + $0x3440] ss:$48 sps:$4 sm:$0xff]  }
 0x881   : > { %15347 = vmatmul.mubr.bf16.gmra.mrb[36].mxu0 %v23405_v6  ;;  %15869 = vmatprep.subr.bf16.mxu1 %v22227_v35  ;;  %v22279_v35 = vld [vmem:[#allocation4 + $0x3448] ss:$48 sps:$4 sm:$0xff]  }
 0x882   : > { %15857 = vmatmul.mubr.bf16.gmra.mrb[36].mxu1 %v23405_v6  ;;  %15387 = vmatprep.mubr.bf16.mxu0 %v23423_v18  ;;  %v22245_v6 = vld [vmem:[#allocation4 + $0x320c] ss:$48 sps:$4 sm:$0xff]  }
 0x883   : > { %15360 = vmatpush1.bf16.msra.mxu0 %v22222_v17  ;;  %15897 = vmatprep.mubr.bf16.mxu1 %v23423_v18  ;;  %v22243_v18 = vld [vmem:[#allocation4 + $0x3208] ss:$48 sps:$4 sm:$0xff]   ;;  %v22284_v17 = vld [vmem:[#allocation4 + $0x34a4] ss:$48 sps:$4 sm:$0xff]  }
 0x884   : > { %15870 = vmatpush1.bf16.msra.mxu1 %v22225_v19  ;;  %15361 = vmatprep.subr.bf16.mxu0 %v22230_v24  ;;  %v22287_v19 = vld [vmem:[#allocation4 + $0x34ac] ss:$48 sps:$4 sm:$0xff]   ;;  %v22282_v24 = vld [vmem:[#allocation4 + $0x34a0] ss:$48 sps:$4 sm:$0xff]  }
 0x885   : > { %15871 = vmatprep.subr.bf16.mxu1 %v22233_v57  ;;  %v22285_v57 = vld [vmem:[#allocation4 + $0x34a8] ss:$48 sps:$4 sm:$0xff]  }
 0x887   : > { %15362 = vmatpush1.bf16.msra.mxu0 %v22228_v61  ;;  %v22290_v61 = vld [vmem:[#allocation4 + $0x3504] ss:$48 sps:$4 sm:$0xff]  }
 0x888   : > { %15872 = vmatpush1.bf16.msra.mxu1 %v22231_v48  ;;  %15363 = vmatprep.subr.bf16.mxu0 %v22236_v49  ;;  %v22293_v48 = vld [vmem:[#allocation4 + $0x350c] ss:$48 sps:$4 sm:$0xff]   ;;  %v22288_v49 = vld [vmem:[#allocation4 + $0x3500] ss:$48 sps:$4 sm:$0xff]  }
 0x889   : > { %15873 = vmatprep.subr.bf16.mxu1 %v22239_v56  ;;  %v22291_v56 = vld [vmem:[#allocation4 + $0x3508] ss:$48 sps:$4 sm:$0xff]  }
 0x88b   : > { %15364 = vmatpush1.bf16.msra.mxu0 %v22234_v26  ;;  %v22296_v26 = vld [vmem:[#allocation4 + $0x3564] ss:$48 sps:$4 sm:$0xff]  }
 0x88c   : > { %15874 = vmatpush1.bf16.msra.mxu1 %v22237_v28  ;;  %15365 = vmatprep.subr.bf16.mxu0 %v22242_v62  ;;  %v22299_v28 = vld [vmem:[#allocation4 + $0x356c] ss:$48 sps:$4 sm:$0xff]   ;;  %v22294_v62 = vld [vmem:[#allocation4 + $0x3560] ss:$48 sps:$4 sm:$0xff]  }
 0x88d   : > { %15875 = vmatprep.subr.bf16.mxu1 %v22245_v6  ;;  %v22297_v6 = vld [vmem:[#allocation4 + $0x3568] ss:$48 sps:$4 sm:$0xff]  }
 0x88f   : > { %15366 = vmatpush1.bf16.msra.mxu0 %v22240_v12  ;;  %v22302_v12 = vld [vmem:[#allocation4 + $0x35c4] ss:$48 sps:$4 sm:$0xff]  }
 0x890   : > { %15876 = vmatpush1.bf16.msra.mxu1 %v22243_v18  ;;  %15367 = vmatprep.subr.bf16.mxu0 %v22248_v32  ;;  %v22305_v18 = vld [vmem:[#allocation4 + $0x35cc] ss:$48 sps:$4 sm:$0xff]   ;;  %v22300_v32 = vld [vmem:[#allocation4 + $0x35c0] ss:$48 sps:$4 sm:$0xff]  }
 0x891   : > { %15877 = vmatprep.subr.bf16.mxu1 %v22251_v21  ;;  %v22303_v21 = vld [vmem:[#allocation4 + $0x35c8] ss:$48 sps:$4 sm:$0xff]  }
 0x893   : > { %15368 = vmatpush1.bf16.msra.mxu0 %v22246_v33  ;;  %v22308_v33 = vld [vmem:[#allocation4 + $0x3624] ss:$48 sps:$4 sm:$0xff]  }
 0x894   : > { %15878 = vmatpush1.bf16.msra.mxu1 %v22249_v37  ;;  %15369 = vmatprep.subr.bf16.mxu0 %v22254_v9  ;;  %v22311_v37 = vld [vmem:[#allocation4 + $0x362c] ss:$48 sps:$4 sm:$0xff]   ;;  %v22306_v9 = vld [vmem:[#allocation4 + $0x3620] ss:$48 sps:$4 sm:$0xff]  }
 0x895   : > { %15879 = vmatprep.subr.bf16.mxu1 %v22257_v41  ;;  %v22309_v41 = vld [vmem:[#allocation4 + $0x3628] ss:$48 sps:$4 sm:$0xff]  }
 0x897   : > { %15370 = vmatpush1.bf16.msra.mxu0 %v22252_v58  ;;  %v22314_v58 = vld [vmem:[#allocation4 + $0x3684] ss:$48 sps:$4 sm:$0xff]  }
 0x898   : > { %15880 = vmatpush1.bf16.msra.mxu1 %v22255_v52  ;;  %15371 = vmatprep.subr.bf16.mxu0 %v22260_v51  ;;  %v22317_v52 = vld [vmem:[#allocation4 + $0x368c] ss:$48 sps:$4 sm:$0xff]   ;;  %v22312_v51 = vld [vmem:[#allocation4 + $0x3680] ss:$48 sps:$4 sm:$0xff]  }
 0x899   : > { %15881 = vmatprep.subr.bf16.mxu1 %v22263_v16  ;;  %v22315_v16 = vld [vmem:[#allocation4 + $0x3688] ss:$48 sps:$4 sm:$0xff]  }
 0x89b   : > { %15372 = vmatpush1.bf16.msra.mxu0 %v22258_v42  ;;  %v22320_v42 = vld [vmem:[#allocation4 + $0x36e4] ss:$48 sps:$4 sm:$0xff]  }
 0x89c   : > { %15882 = vmatpush1.bf16.msra.mxu1 %v22261_v59  ;;  %15373 = vmatprep.subr.bf16.mxu0 %v22266_v43  ;;  %v22323_v59 = vld [vmem:[#allocation4 + $0x36ec] ss:$48 sps:$4 sm:$0xff]   ;;  %v22318_v43 = vld [vmem:[#allocation4 + $0x36e0] ss:$48 sps:$4 sm:$0xff]  }
 0x89d   : > { %15883 = vmatprep.subr.bf16.mxu1 %v22269_v23  ;;  %v22321_v23 = vld [vmem:[#allocation4 + $0x36e8] ss:$48 sps:$4 sm:$0xff]  }
 0x89f   : > { %15374 = vmatpush1.bf16.msra.mxu0 %v22264_v14  ;;  %v22326_v14 = vld [vmem:[#allocation4 + $0x3744] ss:$48 sps:$4 sm:$0xff]  }
 0x8a0   : > { %15884 = vmatpush1.bf16.msra.mxu1 %v22267_v63  ;;  %15375 = vmatprep.subr.bf16.mxu0 %v22272_v4  ;;  %v22327_v63 = vld [vmem:[#allocation4 + $0x3748] ss:$48 sps:$4 sm:$0xff]   ;;  %v22332_v4 = vld [vmem:[#allocation4 + $0x37a4] ss:$48 sps:$4 sm:$0xff]  }
 0x8a1   : > { %15885 = vmatprep.subr.bf16.mxu1 %v22275_v10  ;;  %v22335_v10 = vld [vmem:[#allocation4 + $0x37ac] ss:$48 sps:$4 sm:$0xff]  }
 0x8a3   : > { %15376 = vmatpush1.bf16.msra.mxu0 %v22270_v13  ;;  %v22330_v13 = vld [vmem:[#allocation4 + $0x37a0] ss:$48 sps:$4 sm:$0xff]  }
 0x8a4   : > { %15886 = vmatpush1.bf16.msra.mxu1 %v22273_v55  ;;  %15377 = vmatprep.subr.bf16.mxu0 %v22278_v15  ;;  %v22333_v55 = vld [vmem:[#allocation4 + $0x37a8] ss:$48 sps:$4 sm:$0xff]   ;;  %v22341_v15 = vld [vmem:[#allocation4 + $0x380c] ss:$48 sps:$4 sm:$0xff]  }
 0x8a5   : > { %15887 = vmatprep.subr.bf16.mxu1 %v22281_v11  ;;  %v22336_v11 = vld [vmem:[#allocation4 + $0x3800] ss:$48 sps:$4 sm:$0xff]  }
 0x8a7   : > { %15378 = vmatpush1.bf16.msra.mxu0 %v22276_v40  ;;  %v22344_v40 = vld [vmem:[#allocation4 + $0x3864] ss:$48 sps:$4 sm:$0xff]  }
 0x8a8   : > { %15888 = vmatpush1.bf16.msra.mxu1 %v22279_v35  ;;  %15379 = vmatprep.subr.bf16.mxu0 %v22284_v17  ;;  %v22347_v35 = vld [vmem:[#allocation4 + $0x386c] ss:$48 sps:$4 sm:$0xff]   ;;  %v22342_v17 = vld [vmem:[#allocation4 + $0x3860] ss:$48 sps:$4 sm:$0xff]  }
 0x8a9   : > { %15889 = vmatprep.subr.bf16.mxu1 %v22287_v19  ;;  %v22345_v19 = vld [vmem:[#allocation4 + $0x3868] ss:$48 sps:$4 sm:$0xff]  }
 0x8ab   : > { %15380 = vmatpush1.bf16.msra.mxu0 %v22282_v24  ;;  %v22350_v24 = vld [vmem:[#allocation4 + $0x38c4] ss:$48 sps:$4 sm:$0xff]  }
 0x8ac   : > { %15890 = vmatpush1.bf16.msra.mxu1 %v22285_v57  ;;  %15381 = vmatprep.subr.bf16.mxu0 %v22290_v61  ;;  %v22353_v57 = vld [vmem:[#allocation4 + $0x38cc] ss:$48 sps:$4 sm:$0xff]   ;;  %v22348_v61 = vld [vmem:[#allocation4 + $0x38c0] ss:$48 sps:$4 sm:$0xff]  }
 0x8ad   : > { %15891 = vmatprep.subr.bf16.mxu1 %v22293_v48  ;;  %v22351_v48 = vld [vmem:[#allocation4 + $0x38c8] ss:$48 sps:$4 sm:$0xff]  }
 0x8af   : > { %15382 = vmatpush1.bf16.msra.mxu0 %v22288_v49  ;;  %v22356_v49 = vld [vmem:[#allocation4 + $0x3924] ss:$48 sps:$4 sm:$0xff]  }
 0x8b0   : > { %15892 = vmatpush1.bf16.msra.mxu1 %v22291_v56  ;;  %15383 = vmatprep.subr.bf16.mxu0 %v22296_v26  ;;  %v22359_v56 = vld [vmem:[#allocation4 + $0x392c] ss:$48 sps:$4 sm:$0xff]   ;;  %v22354_v26 = vld [vmem:[#allocation4 + $0x3920] ss:$48 sps:$4 sm:$0xff]  }
 0x8b1   : > { %15893 = vmatprep.subr.bf16.mxu1 %v22299_v28  ;;  %v22357_v28 = vld [vmem:[#allocation4 + $0x3928] ss:$48 sps:$4 sm:$0xff]  }
 0x8b3   : > { %15384 = vmatpush1.bf16.msra.mxu0 %v22294_v62  ;;  %v22362_v62 = vld [vmem:[#allocation4 + $0x3984] ss:$48 sps:$4 sm:$0xff]  }
 0x8b4   : > { %15894 = vmatpush1.bf16.msra.mxu1 %v22297_v6  ;;  %15385 = vmatprep.subr.bf16.mxu0 %v22302_v12  ;;  %v22365_v6 = vld [vmem:[#allocation4 + $0x398c] ss:$48 sps:$4 sm:$0xff]   ;;  %v22360_v12 = vld [vmem:[#allocation4 + $0x3980] ss:$48 sps:$4 sm:$0xff]  }
 0x8b5   : > { %15895 = vmatprep.subr.bf16.mxu1 %v22305_v18  ;;  %v22363_v18 = vld [vmem:[#allocation4 + $0x3988] ss:$48 sps:$4 sm:$0xff]  }
 0x8b7   : > { %15386 = vmatpush1.bf16.msra.mxu0 %v22300_v32  ;;  %v22368_v32 = vld [vmem:[#allocation4 + $0x39e4] ss:$48 sps:$4 sm:$0xff]  }
 0x8b8   : > { %15896 = vmatpush1.bf16.msra.mxu1 %v22303_v21  ;;  %15406 = vmatprep.subr.bf16.mxu0 %v22308_v33  ;;  %v22371_v21 = vld [vmem:[#allocation4 + $0x39ec] ss:$48 sps:$4 sm:$0xff]   ;;  %v22366_v33 = vld [vmem:[#allocation4 + $0x39e0] ss:$48 sps:$4 sm:$0xff]  }
 0x8b9   : > { %15916 = vmatprep.subr.bf16.mxu1 %v22311_v37  ;;  %v22369_v37 = vld [vmem:[#allocation4 + $0x39e8] ss:$48 sps:$4 sm:$0xff]  }
 0x8ba   : > { %15388 = vmatmul.mubr.bf16.vlgmr.msra.gmra.mrb[32].mxu0 %v23434_v22 }
 0x8bb   : > { %15898 = vmatmul.mubr.bf16.vlgmr.msra.gmra.mrb[32].mxu1 %v23434_v22  ;;  %15397 = vmatprep.mubr.bf16.mxu0 %v23417_v1  ;;  %v22329_v22 = vld [vmem:[#allocation4 + $0x374c] ss:$48 sps:$4 sm:$0xff]  }
 0x8bc   : > { %15407 = vmatpush1.bf16.msra.mxu0 %v22306_v9  ;;  %15907 = vmatprep.mubr.bf16.mxu1 %v23417_v1  ;;  %v22324_v1 = vld [vmem:[#allocation4 + $0x3740] ss:$48 sps:$4 sm:$0xff]   ;;  %v22374_v9 = vld [vmem:[#allocation4 + $0x3a44] ss:$48 sps:$4 sm:$0xff]  }
 0x8bd   : > { %15917 = vmatpush1.bf16.msra.mxu1 %v22309_v41  ;;  %15408 = vmatprep.subr.bf16.mxu0 %v22314_v58  ;;  %v22377_v41 = vld [vmem:[#allocation4 + $0x3a4c] ss:$48 sps:$4 sm:$0xff]  }
 0x8be   : > { %15918 = vmatprep.subr.bf16.mxu1 %v22317_v52  ;;  %v24014_v58 = vld [vmem:[#allocation19_spill] sm:$0xff] }
 0x8bf   : > { %v18835_v52 = vadd.f32 %v23522_v2, %v24014_v58 }
 0x8c0   : > { %15409 = vmatpush1.bf16.msra.mxu0 %v22312_v51  ;;  %v18841_v51 = vadd.f32 %v23526_v8, %v23500_v0  ;;  %v23715_v0 = vadd.s32 8, %v24008_v25 }
 0x8c1   : > { %15919 = vmatpush1.bf16.msra.mxu1 %v22315_v16  ;;  %15410 = vmatprep.subr.bf16.mxu0 %v22320_v42  ;;  %v24015_v16 = vld [vmem:[#allocation20_spill] sm:$0xff] }
 0x8c2   : > { %15398 = vmatmul.mubr.bf16.gmra.mrb[36].mxu0 %v23429_v30  ;;  %15920 = vmatprep.subr.bf16.mxu1 %v22323_v59  ;;  %v18836_v42 = vadd.f32 %v23528_v60, %v24015_v16  ;;  %v22372_v59 = vld [vmem:[#allocation4 + $0x3a40] ss:$48 sps:$4 sm:$0xff]  }
 0x8c3   : > { %15908 = vmatmul.mubr.bf16.gmra.mrb[36].mxu1 %v23429_v30  ;;  %18784 = vmatprep.mubr.msk.bf16.mxu0 %vm1525_vm13, %v23447_v53  ;;  %v22338_v30 = vld [vmem:[#allocation4 + $0x3804] ss:$48 sps:$4 sm:$0xff]  }
 0x8c4   : > { %15411 = vmatpush1.bf16.msra.mxu0 %v22318_v43  ;;  %18786 = vmatprep.mubr.msk.bf16.mxu1 %vm1525_vm13, %v23447_v53  ;;  %v22339_v53 = vld [vmem:[#allocation4 + $0x3808] ss:$48 sps:$4 sm:$0xff]   ;;  %v18842_v43 = vadd.f32 %v23530_v3, %v23506_v20 }
 0x8c5   : > { %15921 = vmatpush1.bf16.msra.mxu1 %v22321_v23  ;;  %15412 = vmatprep.subr.bf16.mxu0 %v22326_v14  ;;  %v22375_v23 = vld [vmem:[#allocation4 + $0x3a48] ss:$48 sps:$4 sm:$0xff]   ;;  %v15991_v14 = vmax.f32 %v18835_v52, 0.0 }
 0x8c6   : > { %15922 = vmatprep.subr.bf16.mxu1 %v22329_v22  ;;  %v15993_v22 = vmax.f32 %v18841_v51, 0.0  ;;  %v15994_v2 = vmax.f32 %v18842_v43, 0.0 }
 0x8c7   : > { %v16015_v20 = vpack.c.bf16 %v15991_v14, %v15991_v14 }
 0x8c8   : > { %15413 = vmatpush1.bf16.msra.mxu0 %v22324_v1  ;;  %v15992_v1 = vmax.f32 %v18836_v42, 0.0  ;;  %v16017_v8 = vpack.c.bf16 %v15993_v22, %v15993_v22  ;;  %v23724_v3 = vpack.c.bf16 %v15994_v2, %v15994_v2 }
 0x8c9   : > { %15923 = vmatpush1.bf16.msra.mxu1 %v22327_v63  ;;  %15414 = vmatprep.subr.bf16.mxu0 %v22332_v4  ;;  %v24016_v63 = vlaneseq }
 0x8ca   : > { %15924 = vmatprep.subr.bf16.mxu1 %v22335_v10  ;;  %v23719_v60 = vpack.c.bf16 %v15992_v1, %v15992_v1  ;;  %v16032_v10 = vmul.u32 2, %v24008_v25 }
 0x8cb   : > { %v23730_v4 = vand.u32 127, %v24016_v63 }
 0x8cc   : > { %15415 = vmatpush1.bf16.msra.mxu0 %v22330_v13  ;;  %v16033_v13 = vmul.u32 2, %v23715_v0 }
 0x8cd   : > { %15925 = vmatpush1.bf16.msra.mxu1 %v22333_v55  ;;  %15416 = vmatprep.subr.bf16.mxu0 %v22338_v30  ;;  %v24017_v55 = vld [vmem:[#allocation21_spill] sm:$0xff]  ;;  %vm16034_vm15 = vcmp.eq.s32.totalorder %v23730_v4, %v16032_v10  ;;  %v24018_v30 = vld [vmem:[#allocation14_spill] sm:$0xff] }
 0x8ce   : > { %15926 = vmatprep.subr.bf16.mxu1 %v22341_v15  ;;  %vm16035_vm0 = vcmp.eq.s32.totalorder %v23730_v4, %v16033_v13  ;;  %v18847_v15 = vadd.f32 %v23645_v54, %v24018_v30 }
 0x8d0   : > { %15417 = vmatpush1.bf16.msra.mxu0 %v22336_v11  ;;  %v18848_v11 = vadd.f32 %v23651_v39, %v23627_v44  ;;  %v15995_v44 = vmax.f32 %v18847_v15, 0.0 }
 0x8d1   : > { %15927 = vmatpush1.bf16.msra.mxu1 %v22339_v53  ;;  %15418 = vmatprep.subr.bf16.mxu0 %v22344_v40  ;;  %v24019_v53 = vld [vmem:[#allocation18_spill] sm:$0xff]  ;;  %v24020_v40 = vld [vmem:[#allocation16_spill] sm:$0xff] }
 0x8d2   : > { %15928 = vmatprep.subr.bf16.mxu1 %v22347_v35  ;;  %v18853_v35 = vadd.f32 %v23649_v45, %v24020_v40  ;;  %v15996_v39 = vmax.f32 %v18848_v11, 0.0 }
 0x8d4   : > { %15419 = vmatpush1.bf16.msra.mxu0 %v22342_v17  ;;  %v18854_v17 = vadd.f32 %v23653_v38, %v23629_v29  ;;  %v23771_v29 = vpack.c.bf16 %v15996_v39, %v15996_v39 }
 0x8d5   : > { %15929 = vmatpush1.bf16.msra.mxu1 %v22345_v19  ;;  %15420 = vmatprep.subr.bf16.mxu0 %v22350_v24  ;;  %v24021_v19 = vmov 0   ;;  %v22492_v24 = vmov 0.0  }
 0x8d6   : > { %15930 = vmatprep.subr.bf16.mxu1 %v22353_v57  ;;  %v18788_v54 = vsel %vm16034_vm15, 1.0, %v22492_v24  ;;  %v18789_v57 = vsel %vm16035_vm0, 1.0, %v22492_v24  ;;  %v15998_v45 = vmax.f32 %v18854_v17, 0.0 }
 0x8d8   : > { %15421 = vmatpush1.bf16.msra.mxu0 %v22348_v61  ;;  %v23769_v61 = vpack.c.bf16 %v18789_v57, %v18788_v54 }
 0x8d9   : > { %15931 = vmatpush1.bf16.msra.mxu1 %v22351_v48  ;;  %15422 = vmatprep.subr.bf16.mxu0 %v22356_v49  ;;  %v15997_v48 = vmax.f32 %v18853_v35, 0.0  ;;  %v16019_v49 = vpack.c.bf16 %v15995_v44, %v15995_v44 }
 0x8da   : > { %15932 = vmatprep.subr.bf16.mxu1 %v22359_v56  ;;  %v23775_v56 = vpack.c.bf16 %v15998_v45, %v15998_v45 }
 0x8db   : > { %v16021_v38 = vpack.c.bf16 %v15997_v48, %v15997_v48 }
 0x8dc   : > { %15423 = vmatpush1.bf16.msra.mxu0 %v22354_v26  ;;  %v23787_v26 = vsel %vm16054_vm14, %v16019_v49, 0 }
 0x8dd   : > { %15933 = vmatpush1.bf16.msra.mxu1 %v22357_v28  ;;  %15424 = vmatprep.subr.bf16.mxu0 %v22362_v62  ;;  %v23792_v28 = vsel %vm16054_vm14, %v16021_v38, 0  ;;  %v3478_v62 = vld [vmem:[#allocation6 + $0x8] sm:$0xf] }
 0x8de   : > { %15934 = vmatprep.subr.bf16.mxu1 %v22365_v6  ;;  %v24022_v6 = vld [vmem:[#allocation10_spill] sm:$0xff] }
 0x8e0   : > { %15425 = vmatpush1.bf16.msra.mxu0 %v22360_v12  ;;  %v3516_v12 = vrot.slane %v3478_v62, %v24022_v6 }
 0x8e1   : > { %15935 = vmatpush1.bf16.msra.mxu1 %v22363_v18  ;;  %15426 = vmatprep.subr.bf16.mxu0 %v22368_v32  ;;  %v24023_v18 = vld [vmem:[#allocation11_spill] sm:$0xff] }
 0x8e2   : > { %15936 = vmatprep.subr.bf16.mxu1 %v22371_v21  ;;  %v3524_v32 = vrot.slane %v3478_v62, %v24023_v18  ;;  %v24024_v21 = vld [vmem:[#allocation12_spill] sm:$0xff] }
 0x8e4   : > { %15427 = vmatpush1.bf16.msra.mxu0 %v22366_v33  ;;  %v3520_v33 = vrot.slane %v3478_v62, %v24024_v21 }
 0x8e5   : > { %15937 = vmatpush1.bf16.msra.mxu1 %v22369_v37  ;;  %15428 = vmatprep.subr.bf16.mxu0 %v22374_v9  ;;  %v24025_v37 = vld [vmem:[#allocation13_spill] sm:$0xff] }
 0x8e6   : > { %15938 = vmatprep.subr.bf16.mxu1 %v22377_v41  ;;  %v3528_v9 = vrot.slane %v3478_v62, %v24025_v37 }
 0x8e8   : > { %15429 = vmatpush1.bf16.msra.mxu0 %v22372_v59 }
 0x8e9   : > { %15939 = vmatpush1.bf16.msra.mxu1 %v22375_v23  ;;  %16091 = vmatprep.subr.bf16.mxu0 %v23520_v36 }
 0x8ea   : > { %16134 = vmatprep.subr.bf16.mxu1 %v23524_v27 }
 0x8eb   : > { %15439 = vmatmul.mubr.bf16.vlgmr.msra.gmra.mrb[32].mxu0 %v23460_v34 }
 0x8ec   : > { %15949 = vmatmul.mubr.bf16.vlgmr.msra.gmra.mrb[32].mxu1 %v23460_v34  ;;  %18785 = vmatprep.mubr.msk.bf16.mxu0 %vm1525_vm13, %v23441_v46  ;;  %v23740_v34 = vsel %vm16054_vm14, %v16015_v20, 0 }
 0x8ed   : > { %18787 = vmatprep.mubr.msk.bf16.mxu1 %vm1525_vm13, %v23441_v46  ;;  %16092 = vmatpush1.bf16.msra.mxu0 %v23516_v7  ;;  %v23744_v46 = vsel %vm16054_vm14, %v16017_v8, 0 }
 0x8ee   : > { %16135 = vmatpush1.bf16.msra.mxu1 %v24017_v55  ;;  %18792 = vmatprep.subr.msk.bf16.mxu0 %vm16054_vm14, %v23719_v60 }
 0x8ef   : > { %18794 = vmatprep.subr.msk.bf16.mxu1 %vm16054_vm14, %v23724_v3 }
 0x8f1   : > { %16094 = vmatpush1.bf16.msra.mxu0 %v23740_v34 }
 0x8f2   : > { %16137 = vmatpush1.bf16.msra.mxu1 %v23744_v46  ;;  %16177 = vmatprep.subr.bf16.mxu0 %v23643_v5 }
 0x8f3   : > { %16220 = vmatprep.subr.bf16.mxu1 %v23647_v31  ;;  %15449 = vmatmul.mubr.bf16.gmra.mrb[36].mxu0 %v24019_v53 }
 0x8f4   : > { %15959 = vmatmul.mubr.bf16.gmra.mrb[36].mxu1 %v24019_v53  ;;  %16123 = vmatprep.mubr.bf16.mxu0 %v24021_v19 }
 0x8f5   : > { %16166 = vmatprep.mubr.bf16.mxu1 %v24021_v19 }
 0x8fb   : > { %18793 = vmatmul.mubr.msk.bf16.vlgmr.msra.gmra.mrb[40].mxu0 %vm16050_vm1, %v23769_v61 }
 0x8fc   : > { %18795 = vmatmul.mubr.msk.bf16.vlgmr.msra.gmra.mrb[40].mxu1 %vm16050_vm1, %v23769_v61  ;;  %16178 = vmatpush1.bf16.msra.mxu0 %v23639_v50 }
 0x8fd   : > { %16221 = vmatpush1.bf16.msra.mxu1 %v23641_v47  ;;  %18796 = vmatprep.subr.msk.bf16.mxu0 %vm16054_vm14, %v23771_v29 }
 0x8fe   : > { %18798 = vmatprep.subr.msk.bf16.mxu1 %vm16054_vm14, %v23775_v56  ;;  %16209 = vmatprep.mubr.bf16.mxu0 %v24021_v19 }
 0x8ff   : > { %16252 = vmatprep.mubr.bf16.mxu1 %v24021_v19 }
 0x900   : > { %16180 = vmatpush1.bf16.msra.mxu0 %v23787_v26 }
 0x901   : > { %16223 = vmatpush1.bf16.msra.mxu1 %v23792_v28 }
 0x903   : > { %18797 = vmatmul.mubr.msk.bf16.vlgmr.msra.gmra.mrb[44].mxu0 %vm16050_vm1, %v23769_v61 }
 0x904   : > { %18799 = vmatmul.mubr.msk.bf16.vlgmr.msra.gmra.mrb[44].mxu1 %vm16050_vm1, %v23769_v61  ;;  %16295 = vmatprep.mubr.bf16.mxu0 %v24021_v19 }
 0x905   : > { %16338 = vmatprep.mubr.bf16.mxu1 %v24021_v19 }
 0x9be   : > { %v15440_v41 = vpop.f32.mrb[32].mxu0 }
 0x9bf   : > { %v18855_v58 = vadd.f32 %v15440_v41, %v3516_v12  ;;  %v15950_v52 = vpop.f32.mrb[32].mxu1  ;;  %v15442_v51 = vpop.f32.mrb[33].mxu0 }
 0x9c0   : > { %v18861_v16 = vadd.f32 %v15950_v52, %v3524_v32  ;;  %v18856_v42 = vadd.f32 %v15442_v51, %v3520_v33  ;;  %v15952_v59 = vpop.f32.mrb[33].mxu1  ;;  %v15444_v43 = vpop.f32.mrb[34].mxu0 }
 0x9c1   : > { %v18862_v23 = vadd.f32 %v15952_v59, %v3528_v9  ;;  %v18857_v14 = vadd.f32 %v15444_v43, %v3516_v12  ;;  %v15954_v22 = vpop.f32.mrb[34].mxu1  ;;  %v15446_v1 = vpop.f32.mrb[35].mxu0  ;;  %v15975_v63 = vmax.f32 %v18855_v58, 0.0 }
 0x9c2   : > { %v18863_v2 = vadd.f32 %v15954_v22, %v3524_v32  ;;  %v18858_v20 = vadd.f32 %v15446_v1, %v3520_v33  ;;  %v15956_v8 = vpop.f32.mrb[35].mxu1  ;;  %v15977_v11 = vmax.f32 %v18861_v16, 0.0  ;;  %v15976_v53 = vmax.f32 %v18856_v42, 0.0 }
 0x9c3   : > { %v15987_v30 = vmax.f32 %v18857_v14, 0.0  ;;  %v18864_v15 = vadd.f32 %v15956_v8, %v3528_v9  ;;  %v15978_v17 = vmax.f32 %v18862_v23, 0.0  ;;  %v16041_v23 = vadd.s32 1, %v16032_v10 }
 0x9c4   : > { %v15989_v40 = vmax.f32 %v18863_v2, 0.0  ;;  %v15988_v35 = vmax.f32 %v18858_v20, 0.0 }
 0x9c5   : > { %v23805_v54 = vpack.c.bf16 %v15987_v30, %v15975_v63  ;;  %v15990_v57 = vmax.f32 %v18864_v15, 0.0  ;;  %vm16043_vm2 = vcmp.eq.s32.totalorder %v23730_v4, %v16041_v23 }
 0x9c6   : > { %v23807_v44 = vpack.c.bf16 %v15989_v40, %v15977_v11  ;;  %v23809_v39 = vpack.c.bf16 %v15988_v35, %v15976_v53  ;;  %v15450_v48 = vpop.f32.mrb[36].mxu0 }
 0x9c7   : > { %v23811_v45 = vpack.c.bf16 %v15990_v57, %v15978_v17  ;;  %v18859_v49 = vadd.f32 %v15450_v48, %v3516_v12  ;;  %v15960_v38 = vpop.f32.mrb[36].mxu1  ;;  %v15452_v62 = vpop.f32.mrb[37].mxu0 }
 0x9c8   : > { %v18865_v6 = vadd.f32 %v15960_v38, %v3524_v32  ;;  %v18860_v18 = vadd.f32 %v15452_v62, %v3520_v33  ;;  %v15962_v21 = vpop.f32.mrb[37].mxu1  ;;  %v15454_v37 = vpop.f32.mrb[38].mxu0  ;;  %16263 = vmatprep.subr.bf16.mxu0 %v23809_v39 }
 0x9c9   : > { %v15999_v41 = vmax.f32 %v18859_v49, 0.0  ;;  %v18866_v58 = vadd.f32 %v15962_v21, %v3528_v9  ;;  %v15964_v52 = vpop.f32.mrb[38].mxu1  ;;  %16306 = vmatprep.subr.bf16.mxu1 %v23811_v45  ;;  %v15455_v51 = vpop.f32.mrb[39].mxu0  ;;  %16264 = vmatpush1.bf16.msra.mxu0 %v23805_v54  ;;  %v16042_v9 = vadd.s32 1, %v16033_v13 }
 0x9ca   : > { %v16001_v16 = vmax.f32 %v18865_v6, 0.0  ;;  %v16000_v42 = vmax.f32 %v18860_v18, 0.0  ;;  %v15965_v59 = vpop.f32.mrb[39].mxu1  ;;  %16307 = vmatpush1.bf16.msra.mxu1 %v23807_v44 }
 0x9cb   : > { %v16023_v12 = vpack.c.bf16 %v15999_v41, %v15999_v41  ;;  %v16002_v32 = vmax.f32 %v18866_v58, 0.0  ;;  %vm16044_vm3 = vcmp.eq.s32.totalorder %v23730_v4, %v16042_v9 }
 0x9cc   : > { %v16025_v33 = vpack.c.bf16 %v16001_v16, %v16001_v16  ;;  %v16024_v43 = vpack.c.bf16 %v16000_v42, %v16000_v42  ;;  %v18791_v4 = vsel %vm16044_vm3, 1.0, %v22492_v24 }
 0x9cd   : > { %v16026_v14 = vpack.c.bf16 %v16002_v32, %v16002_v32  ;;  %v16080_v22 = vsel %vm16054_vm14, %v16023_v12, 0 }
 0x9ce   : > { %18800 = vmatprep.subr.msk.bf16.mxu0 %vm16054_vm14, %v16024_v43  ;;  %v16086_v1 = vsel %vm16054_vm14, %v16025_v33, 0  ;;  %v23824_v2 = vpop.f32.mrb[40].mxu0 }
 0x9cf   : > { %18802 = vmatprep.subr.msk.bf16.mxu1 %vm16054_vm14, %v16026_v14  ;;  %16266 = vmatpush1.bf16.msra.mxu0 %v16080_v22  ;;  %v23827_v20 = vpop.f32.mrb[40].mxu1  ;;  %v23829_v8 = vpop.f32.mrb[41].mxu0 }
 0x9d0   : > { %16309 = vmatpush1.bf16.msra.mxu1 %v16086_v1  ;;  %16352 = vmatprep.subr.bf16.mxu0 %v23520_v36  ;;  %v23834_v25 = vpop.f32.mrb[41].mxu1  ;;  %v23836_v0 = vpop.f32.mrb[42].mxu0  ;;  %v18790_v36 = vsel %vm16043_vm2, 1.0, %v22492_v24 }
 0x9d1   : > { %16395 = vmatprep.subr.bf16.mxu1 %v23524_v27  ;;  %v23839_v10 = vpop.f32.mrb[42].mxu1  ;;  %v23841_v13 = vpop.f32.mrb[43].mxu0  ;;  %v16049_v27 = vpack.c.bf16 %v18791_v4, %v18790_v36 }
 0x9d2   : > { %18801 = vmatmul.mubr.msk.bf16.vlgmr.msra.gmra.mrb[48].mxu0 %vm16050_vm1, %v23769_v61  ;;  %v23845_v63 = vpop.f32.mrb[43].mxu1 }
 0x9d3   : > { %18803 = vmatmul.mubr.msk.bf16.vlgmr.msra.gmra.mrb[48].mxu1 %vm16050_vm1, %v23769_v61  ;;  %16353 = vmatpush1.bf16.msra.mxu0 %v23516_v7 }
 0x9d4   : > { %16396 = vmatpush1.bf16.msra.mxu1 %v24017_v55  ;;  %18804 = vmatprep.subr.msk.bf16.mxu0 %vm16054_vm14, %v23719_v60 }
 0x9d5   : > { %18806 = vmatprep.subr.msk.bf16.mxu1 %vm16054_vm14, %v23724_v3  ;;  %16384 = vmatprep.mubr.bf16.mxu0 %v24021_v19 }
 0x9d6   : > { %16427 = vmatprep.mubr.bf16.mxu1 %v24021_v19  ;;  %v23859_v61 = vpop.f32.mrb[44].mxu0 }
 0x9d7   : > { %16355 = vmatpush1.bf16.msra.mxu0 %v23740_v34  ;;  %v23862_v7 = vpop.f32.mrb[44].mxu1  ;;  %v23864_v24 = vpop.f32.mrb[45].mxu0 }
 0x9d8   : > { %16398 = vmatpush1.bf16.msra.mxu1 %v23744_v46  ;;  %16438 = vmatprep.subr.bf16.mxu0 %v23643_v5  ;;  %v23868_v60 = vpop.f32.mrb[45].mxu1  ;;  %v23870_v3 = vpop.f32.mrb[46].mxu0 }
 0x9d9   : > { %16481 = vmatprep.subr.bf16.mxu1 %v23647_v31  ;;  %v23873_v55 = vpop.f32.mrb[46].mxu1  ;;  %v23875_v30 = vpop.f32.mrb[47].mxu0 }
 0x9da   : > { %18805 = vmatmul.mubr.msk.bf16.vlgmr.msra.gmra.mrb[52].mxu0 %vm16050_vm1, %v16049_v27  ;;  %v23878_v34 = vpop.f32.mrb[47].mxu1 }
 0x9db   : > { %18807 = vmatmul.mubr.msk.bf16.vlgmr.msra.gmra.mrb[52].mxu1 %vm16050_vm1, %v16049_v27  ;;  %16439 = vmatpush1.bf16.msra.mxu0 %v23639_v50 }
 0x9dc   : > { %16482 = vmatpush1.bf16.msra.mxu1 %v23641_v47  ;;  %18808 = vmatprep.subr.msk.bf16.mxu0 %vm16054_vm14, %v23771_v29 }
 0x9dd   : > { %18810 = vmatprep.subr.msk.bf16.mxu1 %vm16054_vm14, %v23775_v56  ;;  %16470 = vmatprep.mubr.bf16.mxu0 %v24021_v19 }
 0x9de   : > { %16513 = vmatprep.mubr.bf16.mxu1 %v24021_v19 }
 0x9df   : > { %16441 = vmatpush1.bf16.msra.mxu0 %v23787_v26 }
 0x9e0   : > { %16484 = vmatpush1.bf16.msra.mxu1 %v23792_v28  ;;  %16524 = vmatprep.subr.bf16.mxu0 %v23809_v39 }
 0x9e1   : > { %16567 = vmatprep.subr.bf16.mxu1 %v23811_v45 }
 0x9e2   : > { %18809 = vmatmul.mubr.msk.bf16.vlgmr.msra.gmra.mrb[56].mxu0 %vm16050_vm1, %v16049_v27 }
 0x9e3   : > { %18811 = vmatmul.mubr.msk.bf16.vlgmr.msra.gmra.mrb[56].mxu1 %vm16050_vm1, %v16049_v27  ;;  %16525 = vmatpush1.bf16.msra.mxu0 %v23805_v54 }
 0x9e4   : > { %16568 = vmatpush1.bf16.msra.mxu1 %v23807_v44  ;;  %18812 = vmatprep.subr.msk.bf16.mxu0 %vm16054_vm14, %v16024_v43 }
 0x9e5   : > { %18814 = vmatprep.subr.msk.bf16.mxu1 %vm16054_vm14, %v16026_v14  ;;  %16556 = vmatprep.mubr.bf16.mxu0 %v24021_v19 }
 0x9e6   : > { %16599 = vmatprep.mubr.bf16.mxu1 %v24021_v19 }
 0x9e7   : > { %16527 = vmatpush1.bf16.msra.mxu0 %v16080_v22 }
 0x9e8   : > { %16570 = vmatpush1.bf16.msra.mxu1 %v16086_v1 }
 0x9ea   : > { %18813 = vmatmul.mubr.msk.bf16.vlgmr.msra.gmra.mrb[60].mxu0 %vm16050_vm1, %v16049_v27 }
 0x9eb   : > { %18815 = vmatmul.mubr.msk.bf16.vlgmr.msra.gmra.mrb[60].mxu1 %vm16050_vm1, %v16049_v27 }
 0xaa5   : > { %v16297_v50 = vpop.f32.mrb[48].mxu0 }
 0xaa6   : > { %v23903_v47 = vpop.f32.mrb[48].mxu1  ;;  %v23905_v5 = vpop.f32.mrb[49].mxu0 }
 0xaa7   : > { %v23907_v31 = vpop.f32.mrb[49].mxu1  ;;  %v23909_v46 = vpop.f32.mrb[50].mxu0 }
 0xaa8   : > { %v23911_v29 = vpop.f32.mrb[50].mxu1  ;;  %v23913_v56 = vpop.f32.mrb[51].mxu0 }
 0xaa9   : > { %v23915_v19 = vpop.f32.mrb[51].mxu1 }
 0xaad   : > { %v16386_v26 = vpop.f32.mrb[52].mxu0 }
 0xaae   : > { %v16610_v28 = vmax.f32 %v23824_v2, %v16386_v26  ;;  %v16429_v15 = vpop.f32.mrb[52].mxu1  ;;  %v16388_v11 = vpop.f32.mrb[53].mxu0 }
 0xaaf   : > { %v16612_v53 = vmax.f32 %v23827_v20, %v16429_v15  ;;  %v16611_v40 = vmax.f32 %v23829_v8, %v16388_v11  ;;  %v16431_v35 = vpop.f32.mrb[53].mxu1  ;;  %v16390_v17 = vpop.f32.mrb[54].mxu0 }
 0xab0   : > { %v16613_v54 = vmax.f32 %v23834_v25, %v16431_v35  ;;  %v16622_v57 = vmax.f32 %v23836_v0, %v16390_v17  ;;  %v16433_v44 = vpop.f32.mrb[54].mxu1  ;;  %v16392_v39 = vpop.f32.mrb[55].mxu0 }
 0xab1   : > { %v16624_v48 = vmax.f32 %v23839_v10, %v16433_v44  ;;  %v16623_v45 = vmax.f32 %v23841_v13, %v16392_v39  ;;  %v16435_v49 = vpop.f32.mrb[55].mxu1 }
 0xab2   : > { %v16625_v38 = vmax.f32 %v23845_v63, %v16435_v49 }
 0xab5   : > { %v16472_v62 = vpop.f32.mrb[56].mxu0 }
 0xab6   : > { %v16614_v6 = vmax.f32 %v23859_v61, %v16472_v62  ;;  %v16515_v18 = vpop.f32.mrb[56].mxu1  ;;  %v16474_v21 = vpop.f32.mrb[57].mxu0 }
 0xab7   : > { %v16616_v37 = vmax.f32 %v23862_v7, %v16515_v18  ;;  %v16615_v41 = vmax.f32 %v23864_v24, %v16474_v21  ;;  %v16517_v58 = vpop.f32.mrb[57].mxu1  ;;  %v16476_v52 = vpop.f32.mrb[58].mxu0 }
 0xab8   : > { %v16617_v51 = vmax.f32 %v23868_v60, %v16517_v58  ;;  %v16626_v16 = vmax.f32 %v23870_v3, %v16476_v52  ;;  %v16519_v42 = vpop.f32.mrb[58].mxu1  ;;  %v16478_v59 = vpop.f32.mrb[59].mxu0 }
 0xab9   : > { %v16634_v12 = vmax.f32 %v16610_v28, %v16616_v37  ;;  %v16628_v32 = vmax.f32 %v23873_v55, %v16519_v42  ;;  %v16627_v33 = vmax.f32 %v23875_v30, %v16478_v59  ;;  %v16521_v43 = vpop.f32.mrb[59].mxu1 }
 0xaba   : > { %v16635_v23 = vmax.f32 %v16611_v40, %v16617_v51  ;;  %v16629_v9 = vmax.f32 %v23878_v34, %v16521_v43 }
 0xabb   : > { %v16640_v14 = vmax.f32 %v16622_v57, %v16628_v32 }
 0xabc   : > { %v18825_v22 = vpack.c.bf16 %v16635_v23, %v16634_v12  ;;  %v16641_v1 = vmax.f32 %v16623_v45, %v16629_v9 }
 0xabd   : > { %v16558_v2 = vpop.f32.mrb[60].mxu0 }
 0xabe   : > { %16682 = vst [vmem:[%s23937_s22] sm:$0xff] %v18825_v22  ;;  %v18828_v20 = vpack.c.bf16 %v16641_v1, %v16640_v14  ;;  %v16618_v8 = vmax.f32 %v16297_v50, %v16558_v2  ;;  %v16601_v25 = vpop.f32.mrb[60].mxu1  ;;  %v16560_v0 = vpop.f32.mrb[61].mxu0 }
 0xabf   : > { %v16620_v10 = vmax.f32 %v23903_v47, %v16601_v25  ;;  %v16619_v13 = vmax.f32 %v23905_v5, %v16560_v0  ;;  %v16603_v63 = vpop.f32.mrb[61].mxu1  ;;  %v16562_v36 = vpop.f32.mrb[62].mxu0 }
 0xac0   : > { %16685 = vst [vmem:[%s23937_s22 + $0x18] sm:$0x33] %v18828_v20  ;;  %v16636_v4 = vmax.f32 %v16612_v53, %v16618_v8  ;;  %v16621_v27 = vmax.f32 %v23907_v31, %v16603_v63  ;;  %v16630_v61 = vmax.f32 %v23909_v46, %v16562_v36  ;;  %v16605_v7 = vpop.f32.mrb[62].mxu1  ;;  %v16564_v24 = vpop.f32.mrb[63].mxu0 }
 0xac1   : > { %v16638_v60 = vmax.f32 %v16614_v6, %v16620_v10  ;;  %v16637_v3 = vmax.f32 %v16613_v54, %v16619_v13  ;;  %v16632_v55 = vmax.f32 %v23911_v29, %v16605_v7  ;;  %v16631_v30 = vmax.f32 %v23913_v56, %v16564_v24  ;;  %v16607_v34 = vpop.f32.mrb[63].mxu1 }
 0xac2   : > { %v16639_v50 = vmax.f32 %v16615_v41, %v16621_v27  ;;  %v16642_v47 = vmax.f32 %v16624_v48, %v16630_v61  ;;  %v16633_v5 = vmax.f32 %v23915_v19, %v16607_v34 }
 0xac3   : > { %v18826_v31 = vpack.c.bf16 %v16637_v3, %v16636_v4  ;;  %v16644_v26 = vmax.f32 %v16626_v16, %v16632_v55  ;;  %v16643_v46 = vmax.f32 %v16625_v38, %v16631_v30 }
 0xac4   : > { %v18827_v28 = vpack.c.bf16 %v16639_v50, %v16638_v60  ;;  %v16645_v15 = vmax.f32 %v16627_v33, %v16633_v5 }
 0xac5   : > { %16683 = vst [vmem:[%s23937_s22 + $0x8] sm:$0xff] %v18826_v31  ;;  %v18829_v11 = vpack.c.bf16 %v16643_v46, %v16642_v47 }
 0xac6   : > { %16684 = vst [vmem:[%s23937_s22 + $0x10] sm:$0xff] %v18827_v28  ;;  %v18830_v53 = vpack.c.bf16 %v16645_v15, %v16644_v26 }
 0xac7   : > { %16686 = vst [vmem:[%s23937_s22 + $0x20] sm:$0x33] %v18829_v11 }
 0xac8   : > { %16687 = vst [vmem:[%s23937_s22 + $0x28] sm:$0x33] %v18830_v53 }
 0xac9 PF: > { %s17_s18 = sadd.s32 1, %s22477_s18  }
 0xaca   : > { %p14_p2 = scmp.ge.s32.totalorder %s17_s18, 4  }
 0xacc   :  { %16 = sbr.rel (!%p14_p2) target bundleno = 2 (0x2), region = 83 }
 0xad3   :  { %16709 = vsyncpa [#allocation3], 1 }
 0xad4   :  { %16711 = vsyncpa [#allocation3 + $0x1], 1 }
 0xad5   :  { %16712 = vsyncpa [#allocation5], 1 }

</bundles_post_ra>
